<compile_context>
chip_gen: v5e
topology: v5e:2x2
jax: 0.10.0
libtpu: 0.0.40
codegen_flags: <defaults>
</compile_context>

<pallas_src>
import functools

import jax
import jax.numpy as jnp
from jax import lax
from jax.experimental import pallas as pl
from jax.experimental.pallas import tpu as pltpu

LEAKY_SLOPE = 0.01                     # nn.LeakyReLU() default
BN_EPS = 1e-5                          # nn.BatchNorm2d default
# One conservative limit that is safe on v7x (64 MiB physical) and leaves large
# headroom on v5e/v6e (128 MiB).
# TODO(synk): per-generation tile tables (v6e could use ~96 MiB and larger tiles).
VMEM_LIMIT_BYTES = 48 * 1024 * 1024
CONV_STEP_VMEM_BUDGET = 20 * 1024 * 1024   # per-grid-step working set, conv pass
MAX_TILE_M = 512                       # rows per block (multiple of 8/16 sublanes)
MAX_TILE_N = 1024                      # keep full output-channel dim in one block
MAX_TILE_K = 512                       # reduction block (multiple of 128 lanes)
MAX_CONV_TILE_ROWS = 2048              # cap on tile_h * W2 for the conv matmul


def _round_up(x, m):
    return ((x + m - 1) // m) * m


def _pick_tile(dim_pad, cap):
    # dim_pad is a multiple of 128; largest 128-multiple tile <= cap dividing it.
    for t in (1024, 512, 384, 256, 128):
        if t <= cap and dim_pad % t == 0:
            return t
    return 128


def _pad2d(a, rows, cols):
    return jnp.pad(a, ((0, rows - a.shape[0]), (0, cols - a.shape[1])))


# ----------------------------- Pallas kernels -----------------------------

def _matmul_bias_kernel(x_ref, w_ref, b_ref, o_ref, acc_ref):
    """o = x @ w + b. bf16 MXU operands, fp32 accumulation, K-tiled."""
    k = pl.program_id(2)

    @pl.when(k == 0)
    def _():
        acc_ref[...] = jnp.zeros_like(acc_ref)

    acc_ref[...] += jnp.dot(x_ref[...], w_ref[...],
                            preferred_element_type=jnp.float32)

    @pl.when(k == pl.num_programs(2) - 1)
    def _():
        o_ref[...] = (acc_ref[...] + b_ref[...]).astype(o_ref.dtype)


def _conv3x3_stats_kernel(halo_ref, w_ref, z_ref, stats_ref, *, tile_h, w2):
    """3x3 conv (pad=1) on one (batch, row-block, channel-block) tile.

    halo_ref : (3, (tile_h+2)*W2, C) bf16 — dx-pre-shifted copies of the
               row-halo'd, row-flattened input slab (dx = 0,1,2).
    w_ref    : (9, C, tile_n) bf16, tap order t = dy*3 + dx.
    z_ref    : (tile_h*W2, tile_n) bf16 output (conv bias omitted: BN cancels it).
    stats_ref: (8, tile_n) fp32 — row0 = per-channel sum, row1 = sum of squares
               for THIS block only (partials reduced in XLA => all grid axes
               stay "parallel", good for v7x megacore).
    """
    acc = jnp.zeros(z_ref.shape, jnp.float32)
    for dy in range(3):
        for dx in range(3):
            # dy handled by an aligned static row slice of the flattened slab,
            # dx by selecting the pre-shifted copy.  No reshapes, no unaligned ops.
            lhs = halo_ref[dx, dy * w2:(dy + tile_h) * w2, :]
            acc = acc + jnp.dot(lhs, w_ref[dy * 3 + dx],
                                preferred_element_type=jnp.float32)

    z_ref[...] = acc.astype(z_ref.dtype)          # bf16 z: halves HBM traffic

    s = jnp.sum(acc, axis=0, keepdims=True)       # (1, tile_n) fp32
    ss = jnp.sum(acc * acc, axis=0, keepdims=True)
    row = lax.broadcasted_iota(jnp.int32, stats_ref.shape, 0)
    stats_ref[...] = jnp.where(row == 0, s, jnp.where(row == 1, ss, 0.0))


def _bn_lrelu_kernel(z_ref, scale_ref, shift_ref, o_ref):
    """y = z * scale + shift ; LeakyReLU(0.01). Elementwise, fp32 math."""
    y = z_ref[...].astype(jnp.float32) * scale_ref[...] + shift_ref[...]
    o_ref[...] = jnp.where(y >= 0.0, y, LEAKY_SLOPE * y).astype(o_ref.dtype)


# --------------------------- pallas_call wrappers --------------------------

def _tiled_matmul_bias(x, w, b, out_dtype):
    """[M,K] @ [K,N] + b[N] with M/N/K tiling and bf16 MXU operands."""
    M, K = x.shape
    N = w.shape[1]
    tile_m = min(MAX_TILE_M, _round_up(M, 16))
    m_pad = _round_up(M, tile_m)
    k_pad = _round_up(K, 128)
    n_pad = _round_up(N, 128)
    tile_k = _pick_tile(k_pad, MAX_TILE_K)
    tile_n = _pick_tile(n_pad, min(MAX_TILE_N, 256))

    xp = _pad2d(x, m_pad, k_pad).astype(jnp.bfloat16)
    wp = _pad2d(w, k_pad, n_pad).astype(jnp.bfloat16)
    bp = _pad2d(b.reshape(1, N).astype(jnp.float32), 1, n_pad)

    grid = (m_pad // tile_m, n_pad // tile_n, k_pad // tile_k)
    out = pl.pallas_call(
        _matmul_bias_kernel,
        grid=grid,
        in_specs=[
            pl.BlockSpec((tile_m, tile_k), lambda i, j, k: (i, k)),
            pl.BlockSpec((tile_k, tile_n), lambda i, j, k: (k, j)),
            pl.BlockSpec((1, tile_n), lambda i, j, k: (0, j)),
        ],
        out_specs=pl.BlockSpec((tile_m, tile_n), lambda i, j, k: (i, j)),
        out_shape=jax.ShapeDtypeStruct((m_pad, n_pad), out_dtype),
        scratch_shapes=[pltpu.VMEM((tile_m, tile_n), jnp.float32)],
        compiler_params=pltpu.CompilerParams(
            dimension_semantics=("parallel", "parallel", "arbitrary"),
            vmem_limit_bytes=VMEM_LIMIT_BYTES),
    )(xp, wp, bp)
    return out[:M, :N]


def _pick_conv_tile_h(H2, W2, C, tile_n):
    """Largest row-tile dividing H2 whose per-step working set fits the budget."""
    best = None
    for th in range(1, H2 + 1):
        if H2 % th:
            continue
        m_tile = th * W2
        if m_tile % 8 or m_tile > MAX_CONV_TILE_ROWS:
            continue
        slab = 3 * (th + 2) * W2 * C * 2          # bf16 halo slab
        wts = 9 * C * tile_n * 2                  # bf16 weights
        zout = m_tile * tile_n * 2                # bf16 z block
        stats = 8 * tile_n * 4
        acc = m_tile * tile_n * 4                 # fp32 accumulator value
        if 2 * (slab + wts + zout + stats) + acc <= CONV_STEP_VMEM_BUDGET:
            best = th
    if best is None:
        best = H2
    return best


def _build_halo3(f_nhwc, tile_h):
    """(N,H2,W2,C) -> (N, nb, 3, (tile_h+2)*W2, C):  per row-block, three
    dx-shifted (zero-boundary) copies of the row-halo'd slab, rows flattened
    so the conv kernel only needs aligned static slices.  ~3.2x the map in HBM
    (vs 9x + per-channel-block re-reads for im2col patches)."""
    N, H2, W2, C = f_nhwc.shape
    nb = H2 // tile_h
    fp = jnp.pad(f_nhwc, ((0, 0), (1, 1), (1, 1), (0, 0)))      # (N, H2+2, W2+2, C)
    sh = jnp.stack([fp[:, :, dx:dx + W2, :] for dx in range(3)], axis=1)
    # sh: (N, 3, H2+2, W2, C); overlapping row blocks of tile_h+2 padded rows.
    blocks = [sh[:, :, i * tile_h:i * tile_h + tile_h + 2, :, :] for i in range(nb)]
    hal = jnp.stack(blocks, axis=1)              # (N, nb, 3, tile_h+2, W2, C)
    return hal.reshape(N, nb, 3, (tile_h + 2) * W2, C)


def _conv3x3_bn_lrelu(f_nhwc, w_oihw, gamma, beta, out_dtype):
    """Conv2d(3x3, pad=1) + BatchNorm2d(batch stats) + LeakyReLU as two tiled
    Pallas passes.  Pass 1: halo-slab conv matmul + per-block partial stats.
    Pass 2: elementwise normalize + LeakyReLU."""
    N, H2, W2, C = f_nhwc.shape
    Co = w_oihw.shape[0]
    M = N * H2 * W2
    n_pad = _round_up(Co, 128)
    tile_n = _pick_tile(n_pad, MAX_TILE_N)       # full Co in one block when <= 1024
    tile_h = _pick_conv_tile_h(H2, W2, C, tile_n)
    nb = H2 // tile_h
    m_tile = tile_h * W2
    assert m_tile % 8 == 0, (tile_h, W2)
    flat_rows = (tile_h + 2) * W2

    halo = _build_halo3(f_nhwc.astype(jnp.bfloat16), tile_h)
    # PyTorch Conv2d weight [Co, Cin, 3, 3] -> (9, Cin, Co), tap order (dy, dx).
    w9 = jnp.transpose(w_oihw, (2, 3, 1, 0)).reshape(9, C, Co)
    w9 = jnp.pad(w9, ((0, 0), (0, 0), (0, n_pad - Co))).astype(jnp.bfloat16)

    # ---- Pass 1: conv matmul + per-(batch,row-block) partial stats ----------
    grid1 = (N, nb, n_pad // tile_n)             # all axes fully parallel
    kern = functools.partial(_conv3x3_stats_kernel, tile_h=tile_h, w2=W2)
    z, stats = pl.pallas_call(
        kern,
        grid=grid1,
        in_specs=[
            pl.BlockSpec((None, None, 3, flat_rows, C),
                         lambda n, i, j: (n, i, 0, 0, 0)),
            pl.BlockSpec((9, C, tile_n), lambda n, i, j: (0, 0, j)),
        ],
        out_specs=[
            pl.BlockSpec((m_tile, tile_n), lambda n, i, j, nb=nb: (n * nb + i, j)),
            pl.BlockSpec((8, tile_n), lambda n, i, j, nb=nb: (n * nb + i, j)),
        ],
        out_shape=[
            jax.ShapeDtypeStruct((M, n_pad), jnp.bfloat16),           # bf16 z
            jax.ShapeDtypeStruct((N * nb * 8, n_pad), jnp.float32),   # partial stats
        ],
        compiler_params=pltpu.CompilerParams(
            dimension_semantics=("parallel", "parallel", "parallel"),
            vmem_limit_bytes=VMEM_LIMIT_BYTES),
    )(halo, w9)

    # Tiny XLA reduction of the per-block partials -> batch statistics.
    stats = stats.reshape(N * nb, 8, n_pad)
    mean = jnp.sum(stats[:, 0, :], axis=0) / M
    var = jnp.maximum(jnp.sum(stats[:, 1, :], axis=0) / M - mean * mean, 0.0)
    gp = jnp.pad(gamma.astype(jnp.float32), (0, n_pad - Co))
    bp = jnp.pad(beta.astype(jnp.float32), (0, n_pad - Co))
    rstd = lax.rsqrt(var + BN_EPS)
    scale = (gp * rstd).reshape(1, n_pad)
    shift = (bp - mean * gp * rstd).reshape(1, n_pad)

    # ---- Pass 2: elementwise normalize + LeakyReLU (memory-bound) -----------
    # Channel blocks outermost so the (1, tile_n) scale/shift stay VMEM-resident.
    grid2 = (n_pad // tile_n, N * nb)
    out = pl.pallas_call(
        _bn_lrelu_kernel,
        grid=grid2,
        in_specs=[
            pl.BlockSpec((m_tile, tile_n), lambda j, r: (r, j)),
            pl.BlockSpec((1, tile_n), lambda j, r: (0, j)),
            pl.BlockSpec((1, tile_n), lambda j, r: (0, j)),
        ],
        out_specs=pl.BlockSpec((m_tile, tile_n), lambda j, r: (r, j)),
        out_shape=jax.ShapeDtypeStruct((M, n_pad), out_dtype),
        compiler_params=pltpu.CompilerParams(
            dimension_semantics=("parallel", "parallel"),
            vmem_limit_bytes=VMEM_LIMIT_BYTES),
    )(z, scale, shift)

    return out[:, :Co].reshape(N, H2, W2, Co)


# ------------------------------ forward pass -------------------------------

def upsample_bn_forward(params, x_nchw, concat_nchw):
    N, Ci, H, W = x_nchw.shape
    _, Cs, H2, W2 = concat_nchw.shape
    assert H2 == 2 * H and W2 == 2 * W

    # --- ConvTranspose2d(Ci, Ci, 2, stride=2): one tiled bf16 matmul ---
    x_flat = jnp.transpose(x_nchw, (0, 2, 3, 1)).reshape(N * H * W, Ci)
    # PyTorch ConvTranspose2d weight [Cin, Cout, kH, kW] -> [Ci, (a, b, co)]
    wt_mat = jnp.transpose(params["ct_w"], (0, 2, 3, 1)).reshape(Ci, 4 * Ci)
    bt_vec = jnp.tile(params["ct_b"], 4)
    y = _tiled_matmul_bias(x_flat, wt_mat, bt_vec, out_dtype=jnp.bfloat16)
    # TODO(synk): fold the 2x2 interleave + channel concat directly into conv1's
    # halo gather (manual DMA / data-dependent index_map) to drop these XLA
    # layout round trips entirely.
    up = (y.reshape(N, H, W, 2, 2, Ci)
            .transpose(0, 1, 3, 2, 4, 5)
            .reshape(N, 2 * H, 2 * W, Ci))

    # --- torch.cat([up_x, concat_with], dim=1) (channel-last here) ---
    cw = jnp.transpose(concat_nchw, (0, 2, 3, 1)).astype(jnp.bfloat16)
    f = jnp.concatenate([up, cw], axis=-1)                  # [N, 2H, 2W, Ci+Cs]

    # --- conv1/bn1/lrelu then conv2/bn2/lrelu (two tiled passes each) ---
    h1 = _conv3x3_bn_lrelu(f, params["c1_w"], params["bn1_g"], params["bn1_b"],
                           out_dtype=jnp.bfloat16)
    h2 = _conv3x3_bn_lrelu(h1, params["c2_w"], params["bn2_g"], params["bn2_b"],
                           out_dtype=jnp.float32)
    return jnp.transpose(h2, (0, 3, 1, 2))                  # back to NCHW


# -------------------------- parameters (synthetic) --------------------------

def init_params(key, skip_input, output_features, input_features):
    ks = jax.random.split(key, 10)
    return {
        # ConvTranspose2d(input_features, input_features, 2, stride=2)
        "ct_w": 0.2 * jax.random.normal(ks[0], (input_features, input_features, 2, 2), jnp.float32),
        "ct_b": 0.1 * jax.random.normal(ks[1], (input_features,), jnp.float32),
        # Conv2d(skip_input, output_features, 3, padding=1)  (bias cancelled by BN)
        "c1_w": 0.2 * jax.random.normal(ks[2], (output_features, skip_input, 3, 3), jnp.float32),
        "c1_b": 0.1 * jax.random.normal(ks[3], (output_features,), jnp.float32),
        "bn1_g": 1.0 + 0.1 * jax.random.normal(ks[4], (output_features,), jnp.float32),
        "bn1_b": 0.1 * jax.random.normal(ks[5], (output_features,), jnp.float32),
        # Conv2d(output_features, output_features, 3, padding=1)
        "c2_w": 0.2 * jax.random.normal(ks[6], (output_features, output_features, 3, 3), jnp.float32),
        "c2_b": 0.1 * jax.random.normal(ks[7], (output_features,), jnp.float32),
        "bn2_g": 1.0 + 0.1 * jax.random.normal(ks[8], (output_features,), jnp.float32),
        "bn2_b": 0.1 * jax.random.normal(ks[9], (output_features,), jnp.float32),
    }


# ------------------------- pure-JAX reference check -------------------------

def reference_forward(params, x, cw):
    N, Ci, H, W = x.shape
    up = jnp.einsum("ncij,cdab->ndiajb", x, params["ct_w"]).reshape(N, Ci, 2 * H, 2 * W)
    up = up + params["ct_b"][None, :, None, None]
    f = jnp.concatenate([up, cw], axis=1)

    def conv_bn_lrelu(h, w, b, g, beta):
        z = lax.conv_general_dilated(
            h, w, (1, 1), ((1, 1), (1, 1)),
            dimension_numbers=("NCHW", "OIHW", "NCHW"),
            precision=lax.Precision.HIGHEST,
        ) + b[None, :, None, None]
        mu = jnp.mean(z, axis=(0, 2, 3), keepdims=True)
        var = jnp.mean((z - mu) ** 2, axis=(0, 2, 3), keepdims=True)
        zn = (z - mu) / jnp.sqrt(var + BN_EPS)
        zn = zn * g[None, :, None, None] + beta[None, :, None, None]
        return jnp.where(zn >= 0, zn, LEAKY_SLOPE * zn)

    h1 = conv_bn_lrelu(f, params["c1_w"], params["c1_b"], params["bn1_g"], params["bn1_b"])
    h2 = conv_bn_lrelu(h1, params["c2_w"], params["c2_b"], params["bn2_g"], params["bn2_b"])
    return h2


if __name__ == "__main__":
    key = jax.random.PRNGKey(0)
    k_x, k_c, k_p = jax.random.split(key, 3)

    # Small shapes consistent with the module (x: [2, 4, 16, 16]).
    N, input_features, H, W = 2, 4, 16, 16
    Cs = 4
    skip_input = input_features + Cs        # channels after concat = 8
    output_features = 8

    x = jax.random.normal(k_x, (N, input_features, H, W), jnp.float32)
    concat_with = jax.random.normal(k_c, (N, Cs, 2 * H, 2 * W), jnp.float32)
    params = init_params(k_p, skip_input, output_features, input_features)

    fwd = jax.jit(upsample_bn_forward)
    out = jax.block_until_ready(fwd(params, x, concat_with))
    ref = jax.block_until_ready(reference_forward(params, x, concat_with))

    assert out.shape == (N, output_features, 2 * H, 2 * W), out.shape
    err = jnp.abs(out - ref)
    max_err = float(jnp.max(err))
    mean_err = float(jnp.mean(err))
    # bf16 MXU operands + bf16 intermediate z (fp32 accumulation/stats) =>
    # looser tolerance than an all-fp32 pipeline.
    assert max_err < 2.5e-1 and mean_err < 4e-2, (max_err, mean_err)
    print("KERNEL_OK")
</pallas_src>

<mosaic_0001>
module attributes {stable_mosaic.version = 11 : i64} {
  func.func @_matmul_bias_kernel(%arg0: i32, %arg1: i32, %arg2: i32, %arg3: memref<512x128xbf16, #tpu.memory_space<vmem>>, %arg4: memref<128x128xbf16, #tpu.memory_space<vmem>>, %arg5: memref<1x128xf32, #tpu.memory_space<vmem>>, %arg6: memref<512x128xbf16, #tpu.memory_space<vmem>>, %arg7: memref<512x128xf32, #tpu.memory_space<vmem>>) attributes {dimension_semantics = [#tpu.dimension_semantics<parallel>, #tpu.dimension_semantics<parallel>, #tpu.dimension_semantics<arbitrary>], iteration_bounds = array<i64: 1, 1, 1>, scalar_prefetch = 0 : i64, scratch_operands = 1 : i64, tpu.core_type = #tpu.core_type<tc>, window_params = [{transform_indices = @transform_0, window_bounds = array<i64: 512, 128>}, {transform_indices = @transform_1, window_bounds = array<i64: 128, 128>}, {transform_indices = @transform_2, window_bounds = array<i64: 1, 128>}, {transform_indices = @transform_3, window_bounds = array<i64: 512, 128>}]} {
    %c0_i32 = arith.constant 0 : i32
    %0 = arith.cmpi eq, %arg2, %c0_i32 : i32
    %1 = arith.extui %0 : i1 to i32
    %c0_i32_0 = arith.constant 0 : i32
    %2 = arith.cmpi ne, %1, %c0_i32_0 : i32
    scf.if %2 {
      %cst_10 = arith.constant 0.000000e+00 : f32
      %12 = vector.broadcast %cst_10 : f32 to vector<512x128xf32>
      %c0_11 = arith.constant 0 : index
      %c0_12 = arith.constant 0 : index
      %13 = vector.load %arg7[%c0_11, %c0_12] : memref<512x128xf32, #tpu.memory_space<vmem>>, vector<512x128xf32>
      tpu.vector_store %arg7[%c0_11, %c0_12], %12 {strides = array<i32>} : memref<512x128xf32, #tpu.memory_space<vmem>>, vector<512x128xf32>,
    } else {
    }
    %c0 = arith.constant 0 : index
    %c0_1 = arith.constant 0 : index
    %3 = vector.load %arg7[%c0, %c0_1] : memref<512x128xf32, #tpu.memory_space<vmem>>, vector<512x128xf32>
    %c0_2 = arith.constant 0 : index
    %c0_3 = arith.constant 0 : index
    %4 = vector.load %arg3[%c0_2, %c0_3] : memref<512x128xbf16, #tpu.memory_space<vmem>>, vector<512x128xbf16>
    %c0_4 = arith.constant 0 : index
    %c0_5 = arith.constant 0 : index
    %5 = vector.load %arg4[%c0_4, %c0_5] : memref<128x128xbf16, #tpu.memory_space<vmem>>, vector<128x128xbf16>
    %cst = arith.constant dense<0.000000e+00> : vector<512x128xf32>
    %6 = tpu.matmul %4, %5, %cst {dimension_numbers = #tpu.dot_dimension_numbers<[1], [0], [0], [1], [0, 0, 1, 1], [], []>} : vector<512x128xbf16>, vector<128x128xbf16>, vector<512x128xf32> -> vector<512x128xf32>
    %7 = arith.addf %3, %6 : vector<512x128xf32>
    %c0_6 = arith.constant 0 : index
    %c0_7 = arith.constant 0 : index
    %8 = vector.load %arg7[%c0_6, %c0_7] : memref<512x128xf32, #tpu.memory_space<vmem>>, vector<512x128xf32>
    tpu.vector_store %arg7[%c0_6, %c0_7], %7 {strides = array<i32>} : memref<512x128xf32, #tpu.memory_space<vmem>>, vector<512x128xf32>,
    %c0_i32_8 = arith.constant 0 : i32
    %9 = arith.cmpi eq, %arg2, %c0_i32_8 : i32
    %10 = arith.extui %9 : i1 to i32
    %c0_i32_9 = arith.constant 0 : i32
    %11 = arith.cmpi ne, %10, %c0_i32_9 : i32
    scf.if %11 {
      %c0_10 = arith.constant 0 : index
      %c0_11 = arith.constant 0 : index
      %12 = vector.load %arg7[%c0_10, %c0_11] : memref<512x128xf32, #tpu.memory_space<vmem>>, vector<512x128xf32>
      %c0_12 = arith.constant 0 : index
      %c0_13 = arith.constant 0 : index
      %13 = vector.load %arg5[%c0_12, %c0_13] : memref<1x128xf32, #tpu.memory_space<vmem>>, vector<1x128xf32>
      %14 = vector.broadcast %13 : vector<1x128xf32> to vector<512x128xf32>
      %15 = arith.addf %12, %14 : vector<512x128xf32>
      %16 = arith.truncf %15 : vector<512x128xf32> to vector<512x128xbf16>
      %c0_14 = arith.constant 0 : index
      %c0_15 = arith.constant 0 : index
      %17 = vector.load %arg6[%c0_14, %c0_15] : memref<512x128xbf16, #tpu.memory_space<vmem>>, vector<512x128xbf16>
      tpu.vector_store %arg6[%c0_14, %c0_15], %16 {strides = array<i32>} : memref<512x128xbf16, #tpu.memory_space<vmem>>, vector<512x128xbf16>,
    } else {
    }
    return
  }
  func.func @transform_0(%arg0: i32, %arg1: i32, %arg2: i32) -> (i32, i32) {
    %c0_i32 = arith.constant 0 : i32
    return %arg0, %arg2 : i32, i32
  }
  func.func @transform_1(%arg0: i32, %arg1: i32, %arg2: i32) -> (i32, i32) {
    %c0_i32 = arith.constant 0 : i32
    return %arg2, %arg1 : i32, i32
  }
  func.func @transform_2(%arg0: i32, %arg1: i32, %arg2: i32) -> (i32, i32) {
    %c0_i32 = arith.constant 0 : i32
    %c0_i32_0 = arith.constant 0 : i32
    return %c0_i32, %arg1 : i32, i32
  }
  func.func @transform_3(%arg0: i32, %arg1: i32, %arg2: i32) -> (i32, i32) {
    %c0_i32 = arith.constant 0 : i32
    return %arg0, %arg1 : i32, i32
  }
}

module attributes {stable_mosaic.version = 11 : i64} {
  func.func @_conv3x3_stats_kernel(%arg0: i32, %arg1: i32, %arg2: i32, %arg3: memref<1x1x3x1088x8xbf16, #tpu.memory_space<vmem>>, %arg4: memref<9x8x128xbf16, #tpu.memory_space<vmem>>, %arg5: memref<1024x128xbf16, #tpu.memory_space<vmem>>, %arg6: memref<8x128xf32, #tpu.memory_space<vmem>>) attributes {dimension_semantics = [#tpu.dimension_semantics<parallel>, #tpu.dimension_semantics<parallel>, #tpu.dimension_semantics<parallel>], iteration_bounds = array<i64: 2, 1, 1>, scalar_prefetch = 0 : i64, scratch_operands = 0 : i64, tpu.core_type = #tpu.core_type<tc>, window_params = [{transform_indices = @transform_0, window_bounds = array<i64: 1, 1, 3, 1088, 8>}, {transform_indices = @transform_1, window_bounds = array<i64: 9, 8, 128>}, {transform_indices = @transform_2, window_bounds = array<i64: 1024, 128>}, {transform_indices = @transform_3, window_bounds = array<i64: 8, 128>}]} {
    %cst = arith.constant 0.000000e+00 : f32
    %0 = vector.broadcast %cst : f32 to vector<1024x128xf32>
    %c0 = arith.constant 0 : index
    %c0_0 = arith.constant 0 : index
    %c0_1 = arith.constant 0 : index
    %c0_2 = arith.constant 0 : index
    %c0_3 = arith.constant 0 : index
    %1 = vector.load %arg3[%c0, %c0_0, %c0_1, %c0_2, %c0_3] : memref<1x1x3x1088x8xbf16, #tpu.memory_space<vmem>>, vector<1x1x1x1024x8xbf16>
    %2 = vector.shape_cast %1 : vector<1x1x1x1024x8xbf16> to vector<1024x8xbf16>
    %c0_4 = arith.constant 0 : index
    %c0_5 = arith.constant 0 : index
    %c0_6 = arith.constant 0 : index
    %3 = vector.load %arg4[%c0_4, %c0_5, %c0_6] : memref<9x8x128xbf16, #tpu.memory_space<vmem>>, vector<1x8x128xbf16>
    %4 = vector.shape_cast %3 : vector<1x8x128xbf16> to vector<8x128xbf16>
    %cst_7 = arith.constant dense<0.000000e+00> : vector<1024x128xf32>
    %5 = tpu.matmul %2, %4, %cst_7 {dimension_numbers = #tpu.dot_dimension_numbers<[1], [0], [0], [1], [0, 0, 1, 1], [], []>} : vector<1024x8xbf16>, vector<8x128xbf16>, vector<1024x128xf32> -> vector<1024x128xf32>
    %6 = arith.addf %0, %5 : vector<1024x128xf32>
    %c0_8 = arith.constant 0 : index
    %c0_9 = arith.constant 0 : index
    %c1 = arith.constant 1 : index
    %c0_10 = arith.constant 0 : index
    %c0_11 = arith.constant 0 : index
    %7 = vector.load %arg3[%c0_8, %c0_9, %c1, %c0_10, %c0_11] : memref<1x1x3x1088x8xbf16, #tpu.memory_space<vmem>>, vector<1x1x1x1024x8xbf16>
    %8 = vector.shape_cast %7 : vector<1x1x1x1024x8xbf16> to vector<1024x8xbf16>
    %c1_12 = arith.constant 1 : index
    %c0_13 = arith.constant 0 : index
    %c0_14 = arith.constant 0 : index
    %9 = vector.load %arg4[%c1_12, %c0_13, %c0_14] : memref<9x8x128xbf16, #tpu.memory_space<vmem>>, vector<1x8x128xbf16>
    %10 = vector.shape_cast %9 : vector<1x8x128xbf16> to vector<8x128xbf16>
    %cst_15 = arith.constant dense<0.000000e+00> : vector<1024x128xf32>
    %11 = tpu.matmul %8, %10, %cst_15 {dimension_numbers = #tpu.dot_dimension_numbers<[1], [0], [0], [1], [0, 0, 1, 1], [], []>} : vector<1024x8xbf16>, vector<8x128xbf16>, vector<1024x128xf32> -> vector<1024x128xf32>
    %12 = arith.addf %6, %11 : vector<1024x128xf32>
    %c0_16 = arith.constant 0 : index
    %c0_17 = arith.constant 0 : index
    %c2 = arith.constant 2 : index
    %c0_18 = arith.constant 0 : index
    %c0_19 = arith.constant 0 : index
    %13 = vector.load %arg3[%c0_16, %c0_17, %c2, %c0_18, %c0_19] : memref<1x1x3x1088x8xbf16, #tpu.memory_space<vmem>>, vector<1x1x1x1024x8xbf16>
    %14 = vector.shape_cast %13 : vector<1x1x1x1024x8xbf16> to vector<1024x8xbf16>
    %c2_20 = arith.constant 2 : index
    %c0_21 = arith.constant 0 : index
    %c0_22 = arith.constant 0 : index
    %15 = vector.load %arg4[%c2_20, %c0_21, %c0_22] : memref<9x8x128xbf16, #tpu.memory_space<vmem>>, vector<1x8x128xbf16>
    %16 = vector.shape_cast %15 : vector<1x8x128xbf16> to vector<8x128xbf16>
    %cst_23 = arith.constant dense<0.000000e+00> : vector<1024x128xf32>
    %17 = tpu.matmul %14, %16, %cst_23 {dimension_numbers = #tpu.dot_dimension_numbers<[1], [0], [0], [1], [0, 0, 1, 1], [], []>} : vector<1024x8xbf16>, vector<8x128xbf16>, vector<1024x128xf32> -> vector<1024x128xf32>
    %18 = arith.addf %12, %17 : vector<1024x128xf32>
    %c0_24 = arith.constant 0 : index
    %c0_25 = arith.constant 0 : index
    %c0_26 = arith.constant 0 : index
    %c32 = arith.constant 32 : index
    %c0_27 = arith.constant 0 : index
    %19 = vector.load %arg3[%c0_24, %c0_25, %c0_26, %c32, %c0_27] : memref<1x1x3x1088x8xbf16, #tpu.memory_space<vmem>>, vector<1x1x1x1024x8xbf16>
    %20 = vector.shape_cast %19 : vector<1x1x1x1024x8xbf16> to vector<1024x8xbf16>
    %c3 = arith.constant 3 : index
    %c0_28 = arith.constant 0 : index
    %c0_29 = arith.constant 0 : index
    %21 = vector.load %arg4[%c3, %c0_28, %c0_29] : memref<9x8x128xbf16, #tpu.memory_space<vmem>>, vector<1x8x128xbf16>
    %22 = vector.shape_cast %21 : vector<1x8x128xbf16> to vector<8x128xbf16>
    %cst_30 = arith.constant dense<0.000000e+00> : vector<1024x128xf32>
    %23 = tpu.matmul %20, %22, %cst_30 {dimension_numbers = #tpu.dot_dimension_numbers<[1], [0], [0], [1], [0, 0, 1, 1], [], []>} : vector<1024x8xbf16>, vector<8x128xbf16>, vector<1024x128xf32> -> vector<1024x128xf32>
    %24 = arith.addf %18, %23 : vector<1024x128xf32>
    %c0_31 = arith.constant 0 : index
    %c0_32 = arith.constant 0 : index
    %c1_33 = arith.constant 1 : index
    %c32_34 = arith.constant 32 : index
    %c0_35 = arith.constant 0 : index
    %25 = vector.load %arg3[%c0_31, %c0_32, %c1_33, %c32_34, %c0_35] : memref<1x1x3x1088x8xbf16, #tpu.memory_space<vmem>>, vector<1x1x1x1024x8xbf16>
    %26 = vector.shape_cast %25 : vector<1x1x1x1024x8xbf16> to vector<1024x8xbf16>
    %c4 = arith.constant 4 : index
    %c0_36 = arith.constant 0 : index
    %c0_37 = arith.constant 0 : index
    %27 = vector.load %arg4[%c4, %c0_36, %c0_37] : memref<9x8x128xbf16, #tpu.memory_space<vmem>>, vector<1x8x128xbf16>
    %28 = vector.shape_cast %27 : vector<1x8x128xbf16> to vector<8x128xbf16>
    %cst_38 = arith.constant dense<0.000000e+00> : vector<1024x128xf32>
    %29 = tpu.matmul %26, %28, %cst_38 {dimension_numbers = #tpu.dot_dimension_numbers<[1], [0], [0], [1], [0, 0, 1, 1], [], []>} : vector<1024x8xbf16>, vector<8x128xbf16>, vector<1024x128xf32> -> vector<1024x128xf32>
    %30 = arith.addf %24, %29 : vector<1024x128xf32>
    %c0_39 = arith.constant 0 : index
    %c0_40 = arith.constant 0 : index
    %c2_41 = arith.constant 2 : index
    %c32_42 = arith.constant 32 : index
    %c0_43 = arith.constant 0 : index
    %31 = vector.load %arg3[%c0_39, %c0_40, %c2_41, %c32_42, %c0_43] : memref<1x1x3x1088x8xbf16, #tpu.memory_space<vmem>>, vector<1x1x1x1024x8xbf16>
    %32 = vector.shape_cast %31 : vector<1x1x1x1024x8xbf16> to vector<1024x8xbf16>
    %c5 = arith.constant 5 : index
    %c0_44 = arith.constant 0 : index
    %c0_45 = arith.constant 0 : index
    %33 = vector.load %arg4[%c5, %c0_44, %c0_45] : memref<9x8x128xbf16, #tpu.memory_space<vmem>>, vector<1x8x128xbf16>
    %34 = vector.shape_cast %33 : vector<1x8x128xbf16> to vector<8x128xbf16>
    %cst_46 = arith.constant dense<0.000000e+00> : vector<1024x128xf32>
    %35 = tpu.matmul %32, %34, %cst_46 {dimension_numbers = #tpu.dot_dimension_numbers<[1], [0], [0], [1], [0, 0, 1, 1], [], []>} : vector<1024x8xbf16>, vector<8x128xbf16>, vector<1024x128xf32> -> vector<1024x128xf32>
    %36 = arith.addf %30, %35 : vector<1024x128xf32>
    %c0_47 = arith.constant 0 : index
    %c0_48 = arith.constant 0 : index
    %c0_49 = arith.constant 0 : index
    %c64 = arith.constant 64 : index
    %c0_50 = arith.constant 0 : index
    %37 = vector.load %arg3[%c0_47, %c0_48, %c0_49, %c64, %c0_50] : memref<1x1x3x1088x8xbf16, #tpu.memory_space<vmem>>, vector<1x1x1x1024x8xbf16>
    %38 = vector.shape_cast %37 : vector<1x1x1x1024x8xbf16> to vector<1024x8xbf16>
    %c6 = arith.constant 6 : index
    %c0_51 = arith.constant 0 : index
    %c0_52 = arith.constant 0 : index
    %39 = vector.load %arg4[%c6, %c0_51, %c0_52] : memref<9x8x128xbf16, #tpu.memory_space<vmem>>, vector<1x8x128xbf16>
    %40 = vector.shape_cast %39 : vector<1x8x128xbf16> to vector<8x128xbf16>
    %cst_53 = arith.constant dense<0.000000e+00> : vector<1024x128xf32>
    %41 = tpu.matmul %38, %40, %cst_53 {dimension_numbers = #tpu.dot_dimension_numbers<[1], [0], [0], [1], [0, 0, 1, 1], [], []>} : vector<1024x8xbf16>, vector<8x128xbf16>, vector<1024x128xf32> -> vector<1024x128xf32>
    %42 = arith.addf %36, %41 : vector<1024x128xf32>
    %c0_54 = arith.constant 0 : index
    %c0_55 = arith.constant 0 : index
    %c1_56 = arith.constant 1 : index
    %c64_57 = arith.constant 64 : index
    %c0_58 = arith.constant 0 : index
    %43 = vector.load %arg3[%c0_54, %c0_55, %c1_56, %c64_57, %c0_58] : memref<1x1x3x1088x8xbf16, #tpu.memory_space<vmem>>, vector<1x1x1x1024x8xbf16>
    %44 = vector.shape_cast %43 : vector<1x1x1x1024x8xbf16> to vector<1024x8xbf16>
    %c7 = arith.constant 7 : index
    %c0_59 = arith.constant 0 : index
    %c0_60 = arith.constant 0 : index
    %45 = vector.load %arg4[%c7, %c0_59, %c0_60] : memref<9x8x128xbf16, #tpu.memory_space<vmem>>, vector<1x8x128xbf16>
    %46 = vector.shape_cast %45 : vector<1x8x128xbf16> to vector<8x128xbf16>
    %cst_61 = arith.constant dense<0.000000e+00> : vector<1024x128xf32>
    %47 = tpu.matmul %44, %46, %cst_61 {dimension_numbers = #tpu.dot_dimension_numbers<[1], [0], [0], [1], [0, 0, 1, 1], [], []>} : vector<1024x8xbf16>, vector<8x128xbf16>, vector<1024x128xf32> -> vector<1024x128xf32>
    %48 = arith.addf %42, %47 : vector<1024x128xf32>
    %c0_62 = arith.constant 0 : index
    %c0_63 = arith.constant 0 : index
    %c2_64 = arith.constant 2 : index
    %c64_65 = arith.constant 64 : index
    %c0_66 = arith.constant 0 : index
    %49 = vector.load %arg3[%c0_62, %c0_63, %c2_64, %c64_65, %c0_66] : memref<1x1x3x1088x8xbf16, #tpu.memory_space<vmem>>, vector<1x1x1x1024x8xbf16>
    %50 = vector.shape_cast %49 : vector<1x1x1x1024x8xbf16> to vector<1024x8xbf16>
    %c8 = arith.constant 8 : index
    %c0_67 = arith.constant 0 : index
    %c0_68 = arith.constant 0 : index
    %51 = vector.load %arg4[%c8, %c0_67, %c0_68] : memref<9x8x128xbf16, #tpu.memory_space<vmem>>, vector<1x8x128xbf16>
    %52 = vector.shape_cast %51 : vector<1x8x128xbf16> to vector<8x128xbf16>
    %cst_69 = arith.constant dense<0.000000e+00> : vector<1024x128xf32>
    %53 = tpu.matmul %50, %52, %cst_69 {dimension_numbers = #tpu.dot_dimension_numbers<[1], [0], [0], [1], [0, 0, 1, 1], [], []>} : vector<1024x8xbf16>, vector<8x128xbf16>, vector<1024x128xf32> -> vector<1024x128xf32>
    %54 = arith.addf %48, %53 : vector<1024x128xf32>
    %55 = arith.truncf %54 : vector<1024x128xf32> to vector<1024x128xbf16>
    %c0_70 = arith.constant 0 : index
    %c0_71 = arith.constant 0 : index
    %56 = vector.load %arg5[%c0_70, %c0_71] : memref<1024x128xbf16, #tpu.memory_space<vmem>>, vector<1024x128xbf16>
    tpu.vector_store %arg5[%c0_70, %c0_71], %55 {strides = array<i32>} : memref<1024x128xbf16, #tpu.memory_space<vmem>>, vector<1024x128xbf16>,
    %cst_72 = arith.constant dense<0.000000e+00> : vector<128xf32>
    %57 = vector.multi_reduction <add>, %54, %cst_72 [0] : vector<1024x128xf32> to vector<128xf32>
    %58 = vector.shape_cast %57 : vector<128xf32> to vector<1x128xf32>
    %59 = arith.mulf %54, %54 : vector<1024x128xf32>
    %cst_73 = arith.constant dense<0.000000e+00> : vector<128xf32>
    %60 = vector.multi_reduction <add>, %59, %cst_73 [0] : vector<1024x128xf32> to vector<128xf32>
    %61 = vector.shape_cast %60 : vector<128xf32> to vector<1x128xf32>
    %62 = tpu.iota {dimensions = array<i32: 0>} : vector<8x128xi32>
    %c0_i32 = arith.constant 0 : i32
    %63 = vector.broadcast %c0_i32 : i32 to vector<8x128xi32>
    %64 = arith.cmpi eq, %62, %63 : vector<8x128xi32>
    %c1_i32 = arith.constant 1 : i32
    %65 = vector.broadcast %c1_i32 : i32 to vector<8x128xi32>
    %66 = arith.cmpi eq, %62, %65 : vector<8x128xi32>
    %cst_74 = arith.constant 0.000000e+00 : f32
    %67 = vector.shape_cast %61 : vector<1x128xf32> to vector<1x128xf32>
    %68 = vector.broadcast %67 : vector<1x128xf32> to vector<8x128xf32>
    %69 = vector.broadcast %cst_74 : f32 to vector<8x128xf32>
    %70 = arith.select %66, %68, %69 : vector<8x128xi1>, vector<8x128xf32>
    %71 = vector.shape_cast %58 : vector<1x128xf32> to vector<1x128xf32>
    %72 = vector.broadcast %71 : vector<1x128xf32> to vector<8x128xf32>
    %73 = arith.select %64, %72, %70 : vector<8x128xi1>, vector<8x128xf32>
    %c0_75 = arith.constant 0 : index
    %c0_76 = arith.constant 0 : index
    %74 = vector.load %arg6[%c0_75, %c0_76] : memref<8x128xf32, #tpu.memory_space<vmem>>, vector<8x128xf32>
    tpu.vector_store %arg6[%c0_75, %c0_76], %73 {strides = array<i32>} : memref<8x128xf32, #tpu.memory_space<vmem>>, vector<8x128xf32>,
    return
  }
  func.func @transform_0(%arg0: i32, %arg1: i32, %arg2: i32) -> (i32, i32, i32, i32, i32) {
    %c0_i32 = arith.constant 0 : i32
    %c0_i32_0 = arith.constant 0 : i32
    %c0_i32_1 = arith.constant 0 : i32
    %c0_i32_2 = arith.constant 0 : i32
    return %arg0, %arg1, %c0_i32, %c0_i32_0, %c0_i32_1 : i32, i32, i32, i32, i32
  }
  func.func @transform_1(%arg0: i32, %arg1: i32, %arg2: i32) -> (i32, i32, i32) {
    %c0_i32 = arith.constant 0 : i32
    %c0_i32_0 = arith.constant 0 : i32
    %c0_i32_1 = arith.constant 0 : i32
    return %c0_i32, %c0_i32_0, %arg2 : i32, i32, i32
  }
  func.func @transform_2(%arg0: i32, %arg1: i32, %arg2: i32) -> (i32, i32) {
    %c1_i32 = arith.constant 1 : i32
    %0 = arith.muli %arg0, %c1_i32 : i32
    %1 = arith.addi %0, %arg1 : i32
    %c0_i32 = arith.constant 0 : i32
    return %1, %arg2 : i32, i32
  }
  func.func @transform_3(%arg0: i32, %arg1: i32, %arg2: i32) -> (i32, i32) {
    %c1_i32 = arith.constant 1 : i32
    %0 = arith.muli %arg0, %c1_i32 : i32
    %1 = arith.addi %0, %arg1 : i32
    %c0_i32 = arith.constant 0 : i32
    return %1, %arg2 : i32, i32
  }
}

module attributes {stable_mosaic.version = 11 : i64} {
  func.func @_bn_lrelu_kernel(%arg0: i32, %arg1: i32, %arg2: memref<1024x128xbf16, #tpu.memory_space<vmem>>, %arg3: memref<1x128xf32, #tpu.memory_space<vmem>>, %arg4: memref<1x128xf32, #tpu.memory_space<vmem>>, %arg5: memref<1024x128xbf16, #tpu.memory_space<vmem>>) attributes {dimension_semantics = [#tpu.dimension_semantics<parallel>, #tpu.dimension_semantics<parallel>], iteration_bounds = array<i64: 1, 2>, scalar_prefetch = 0 : i64, scratch_operands = 0 : i64, tpu.core_type = #tpu.core_type<tc>, window_params = [{transform_indices = @transform_0, window_bounds = array<i64: 1024, 128>}, {transform_indices = @transform_1, window_bounds = array<i64: 1, 128>}, {transform_indices = @transform_2, window_bounds = array<i64: 1, 128>}, {transform_indices = @transform_3, window_bounds = array<i64: 1024, 128>}]} {
    %c0 = arith.constant 0 : index
    %c0_0 = arith.constant 0 : index
    %0 = vector.load %arg2[%c0, %c0_0] : memref<1024x128xbf16, #tpu.memory_space<vmem>>, vector<1024x128xbf16>
    %1 = arith.extf %0 : vector<1024x128xbf16> to vector<1024x128xf32>
    %c0_1 = arith.constant 0 : index
    %c0_2 = arith.constant 0 : index
    %2 = vector.load %arg3[%c0_1, %c0_2] : memref<1x128xf32, #tpu.memory_space<vmem>>, vector<1x128xf32>
    %3 = vector.broadcast %2 : vector<1x128xf32> to vector<1024x128xf32>
    %4 = arith.mulf %1, %3 : vector<1024x128xf32>
    %c0_3 = arith.constant 0 : index
    %c0_4 = arith.constant 0 : index
    %5 = vector.load %arg4[%c0_3, %c0_4] : memref<1x128xf32, #tpu.memory_space<vmem>>, vector<1x128xf32>
    %6 = vector.broadcast %5 : vector<1x128xf32> to vector<1024x128xf32>
    %7 = arith.addf %4, %6 : vector<1024x128xf32>
    %cst = arith.constant 0.000000e+00 : f32
    %8 = vector.broadcast %cst : f32 to vector<1024x128xf32>
    %9 = arith.cmpf oge, %7, %8 : vector<1024x128xf32>
    %cst_5 = arith.constant 0.00999999977 : f32
    %10 = vector.broadcast %cst_5 : f32 to vector<1024x128xf32>
    %11 = arith.mulf %10, %7 : vector<1024x128xf32>
    %12 = arith.select %9, %7, %11 : vector<1024x128xi1>, vector<1024x128xf32>
    %13 = arith.truncf %12 : vector<1024x128xf32> to vector<1024x128xbf16>
    %c0_6 = arith.constant 0 : index
    %c0_7 = arith.constant 0 : index
    %14 = vector.load %arg5[%c0_6, %c0_7] : memref<1024x128xbf16, #tpu.memory_space<vmem>>, vector<1024x128xbf16>
    tpu.vector_store %arg5[%c0_6, %c0_7], %13 {strides = array<i32>} : memref<1024x128xbf16, #tpu.memory_space<vmem>>, vector<1024x128xbf16>,
    return
  }
  func.func @transform_0(%arg0: i32, %arg1: i32) -> (i32, i32) {
    %c0_i32 = arith.constant 0 : i32
    return %arg1, %arg0 : i32, i32
  }
  func.func @transform_1(%arg0: i32, %arg1: i32) -> (i32, i32) {
    %c0_i32 = arith.constant 0 : i32
    %c0_i32_0 = arith.constant 0 : i32
    return %c0_i32, %arg0 : i32, i32
  }
  func.func @transform_2(%arg0: i32, %arg1: i32) -> (i32, i32) {
    %c0_i32 = arith.constant 0 : i32
    %c0_i32_0 = arith.constant 0 : i32
    return %c0_i32, %arg0 : i32, i32
  }
  func.func @transform_3(%arg0: i32, %arg1: i32) -> (i32, i32) {
    %c0_i32 = arith.constant 0 : i32
    return %arg1, %arg0 : i32, i32
  }
}

module attributes {stable_mosaic.version = 11 : i64} {
  func.func @_bn_lrelu_kernel(%arg0: i32, %arg1: i32, %arg2: memref<1024x128xbf16, #tpu.memory_space<vmem>>, %arg3: memref<1x128xf32, #tpu.memory_space<vmem>>, %arg4: memref<1x128xf32, #tpu.memory_space<vmem>>, %arg5: memref<1024x128xf32, #tpu.memory_space<vmem>>) attributes {dimension_semantics = [#tpu.dimension_semantics<parallel>, #tpu.dimension_semantics<parallel>], iteration_bounds = array<i64: 1, 2>, scalar_prefetch = 0 : i64, scratch_operands = 0 : i64, tpu.core_type = #tpu.core_type<tc>, window_params = [{transform_indices = @transform_0, window_bounds = array<i64: 1024, 128>}, {transform_indices = @transform_1, window_bounds = array<i64: 1, 128>}, {transform_indices = @transform_2, window_bounds = array<i64: 1, 128>}, {transform_indices = @transform_3, window_bounds = array<i64: 1024, 128>}]} {
    %c0 = arith.constant 0 : index
    %c0_0 = arith.constant 0 : index
    %0 = vector.load %arg2[%c0, %c0_0] : memref<1024x128xbf16, #tpu.memory_space<vmem>>, vector<1024x128xbf16>
    %1 = arith.extf %0 : vector<1024x128xbf16> to vector<1024x128xf32>
    %c0_1 = arith.constant 0 : index
    %c0_2 = arith.constant 0 : index
    %2 = vector.load %arg3[%c0_1, %c0_2] : memref<1x128xf32, #tpu.memory_space<vmem>>, vector<1x128xf32>
    %3 = vector.broadcast %2 : vector<1x128xf32> to vector<1024x128xf32>
    %4 = arith.mulf %1, %3 : vector<1024x128xf32>
    %c0_3 = arith.constant 0 : index
    %c0_4 = arith.constant 0 : index
    %5 = vector.load %arg4[%c0_3, %c0_4] : memref<1x128xf32, #tpu.memory_space<vmem>>, vector<1x128xf32>
    %6 = vector.broadcast %5 : vector<1x128xf32> to vector<1024x128xf32>
    %7 = arith.addf %4, %6 : vector<1024x128xf32>
    %cst = arith.constant 0.000000e+00 : f32
    %8 = vector.broadcast %cst : f32 to vector<1024x128xf32>
    %9 = arith.cmpf oge, %7, %8 : vector<1024x128xf32>
    %cst_5 = arith.constant 0.00999999977 : f32
    %10 = vector.broadcast %cst_5 : f32 to vector<1024x128xf32>
    %11 = arith.mulf %10, %7 : vector<1024x128xf32>
    %12 = arith.select %9, %7, %11 : vector<1024x128xi1>, vector<1024x128xf32>
    %c0_6 = arith.constant 0 : index
    %c0_7 = arith.constant 0 : index
    %13 = vector.load %arg5[%c0_6, %c0_7] : memref<1024x128xf32, #tpu.memory_space<vmem>>, vector<1024x128xf32>
    tpu.vector_store %arg5[%c0_6, %c0_7], %12 {strides = array<i32>} : memref<1024x128xf32, #tpu.memory_space<vmem>>, vector<1024x128xf32>,
    return
  }
  func.func @transform_0(%arg0: i32, %arg1: i32) -> (i32, i32) {
    %c0_i32 = arith.constant 0 : i32
    return %arg1, %arg0 : i32, i32
  }
  func.func @transform_1(%arg0: i32, %arg1: i32) -> (i32, i32) {
    %c0_i32 = arith.constant 0 : i32
    %c0_i32_0 = arith.constant 0 : i32
    return %c0_i32, %arg0 : i32, i32
  }
  func.func @transform_2(%arg0: i32, %arg1: i32) -> (i32, i32) {
    %c0_i32 = arith.constant 0 : i32
    %c0_i32_0 = arith.constant 0 : i32
    return %c0_i32, %arg0 : i32, i32
  }
  func.func @transform_3(%arg0: i32, %arg1: i32) -> (i32, i32) {
    %c0_i32 = arith.constant 0 : i32
    return %arg1, %arg0 : i32, i32
  }
}

</mosaic_0001>

<bundles_post_ra>
// kernel: tile.8
= control target key start
LH: loop header
LB: loop body
LE: loop exit
PB: predicated region body
PF: predicated region fallthrough
CT: control target
= control target key end

     0   :  { %2 = vsyncpa [#allocation1], 0  ;;  %s48_s8 = smov [#allocation0]   ;;  %s65_s0 = inlined_call_operand.hbm [shape: f32[4], index: 0, kind: input, shape index: {}]   ;;  %s66_s1 = inlined_call_operand.vmem [shape: f32[4,4], index: 1, kind: output, shape index: {}]  }
   0x1   :  { %s8_s0 = sshll.u32 %s65_s0, 4  ;;  %s10_s9 = sshll.u32 %s48_s8, 4  ;;  %s9_s0 = int_to_ptr.hbm [resolvable:$true] %s8_s0  ;;  %s11_s9 = int_to_ptr.vmem [resolvable:$true] %s10_s9 }
   0x2   :  { %13 = dma.hbm_to_vmem [thread:$0]  %s9_s0, 16, %s11_s9, [#allocation1]  }
   0x3   :  { %46 = dma.done.wait [#allocation1], 16  }
   0x4   :  { %47 = vsyncadd [#allocation1], 4294967280  ;;  %v18_v0 = vld [vmem:[#allocation0] ss:$0 sm:$0xff] }
   0x5   :  { %19 = vst [vmem:[%s66_s1] sm:$0xf] %v18_v0 }
   0x6   :  { %20 = vsyncpa [#allocation1], 1 }

// kernel: tile.9
= control target key start
LH: loop header
LB: loop body
LE: loop exit
PB: predicated region body
PF: predicated region fallthrough
CT: control target
= control target key end

     0   :  { %s37_s8 = smov 4   ;;  %s38_s9 = smov 8   ;;  %vm7_vm0 = vcmask 31744   ;;  %vm13_vm1 = vcmask 130144   ;;  %vm19_vm2 = vcmask 97344   ;;  %vm25_vm3 = vcmask 64544   ;;  %s55_s0 = inlined_call_operand.vmem [shape: f32[4,4], index: 0, kind: input, shape index: {}]   ;;  %s56_s1 = inlined_call_operand.vmem [shape: f32[1,16], index: 1, kind: output, shape index: {}]  }
   0x1   :  { %v4_v0 = vld [vmem:[%s55_s0] sm:$0xf]  ;;  %s36_s0 = smov 12  }
   0x2   :  { %5 = vst [vmem:[#allocation1] sm:$0xf] %v4_v0 }
   0x9   :  { %v10_v1 = vld [vmem:[#allocation1 + $0x3] sm:$0x1]   ;;  %v22_v2 = vld [vmem:[#allocation1 + $0x1] sm:$0x1]   ;;  %v16_v3 = vld [vmem:[#allocation1 + $0x2] sm:$0x1]  }
   0xa   :  { %11 = vrot.lane.b32.xlu0 %v10_v1, %s36_s0  ;;  %23 = vrot.lane.b32.xlu1 %v22_v2, %s37_s8  ;;  %v6_v4 = vld [vmem:[#allocation1] sm:$0x1]  }
   0xb   :  { %8 = vst.msk [vmem:[#allocation0] sm:$0x1] %vm7_vm0, %v6_v4  }
  0x12   :  { %17 = vrot.lane.b32.xlu0 %v16_v3, %s38_s9 }
  0x7c   :  { %v12_v5 = vpop.permute.xlu0 %11   ;;  %v24_v6 = vpop.permute.xlu1 %23  }
  0x7d   :  { %14 = vst.msk [vmem:[#allocation0] sm:$0x1] %vm13_vm1, %v12_v5  }
  0x84   :  { %v18_v7 = vpop.permute.xlu0 %17  }
  0x85   :  { %20 = vst.msk [vmem:[#allocation0] sm:$0x1] %vm19_vm2, %v18_v7  }
  0x86   :  { %26 = vst.msk [vmem:[#allocation0] sm:$0x1] %vm25_vm3, %v24_v6  }
  0x8d   :  { %v29_v8 = vld [vmem:[#allocation0] sm:$0x1] }
  0x8e   :  { %32 = vst [vmem:[%s56_s1] sm:$0x1] %v29_v8 }

// kernel: upsample_bn_forward.5
= control target key start
LH: loop header
LB: loop body
LE: loop exit
PB: predicated region body
PF: predicated region fallthrough
CT: control target
= control target key end

     0   :  { %s1751_s1 = inlined_call_operand.vmem [shape: bf16[128,128], index: 1, kind: input, shape index: {}]   ;;  %s1752_s2 = inlined_call_operand.vmem [shape: f32[1,128], index: 2, kind: input, shape index: {}]   ;;  %s1753_s0 = inlined_call_operand.vmem [shape: bf16[512,128], index: 0, kind: input, shape index: {}]   ;;  %s1754_s3 = inlined_call_operand.vmem [shape: bf16[512,128], index: 3, kind: output, shape index: {}]  }
   0x1   :  { %v1229_v0 = vld [vmem:[%s1751_s1 + $0x38] sm:$0xff]  ;;  %v1228_v1 = vld [vmem:[%s1751_s1 + $0x30] sm:$0xff]  ;;  %v1227_v2 = vld [vmem:[%s1751_s1 + $0x28] sm:$0xff] }
   0x2   :  { %466 = vmatpush.bf16.msra.mxu0 %v1229_v0  ;;  %1421 = vmatpush.bf16.msra.mxu1 %v1229_v0  ;;  %v1226_v3 = vld [vmem:[%s1751_s1 + $0x20] sm:$0xff]  ;;  %v1225_v4 = vld [vmem:[%s1751_s1 + $0x18] sm:$0xff]  ;;  %v1224_v5 = vld [vmem:[%s1751_s1 + $0x10] sm:$0xff] }
   0x3   :  { %1422 = vmatpush.bf16.msra.mxu2 %v1229_v0  ;;  %1423 = vmatpush.bf16.msra.mxu3 %v1229_v0  ;;  %v1223_v6 = vld [vmem:[%s1751_s1 + $0x8] sm:$0xff]  ;;  %v1222_v7 = vld [vmem:[%s1751_s1] sm:$0xff]  ;;  %v1192_v16 = vld [vmem:[%s1753_s0 + $0x10] sm:$0xff] }
   0x4   :  { %v1190_v8 = vld [vmem:[%s1753_s0] sm:$0xff]  ;;  %v1191_v12 = vld [vmem:[%s1753_s0 + $0x8] sm:$0xff]  ;;  %v1200_v17 = vld [vmem:[%s1753_s0 + $0x50] sm:$0xff] }
   0x5   :  { %v1198_v9 = vld [vmem:[%s1753_s0 + $0x40] sm:$0xff]  ;;  %v1199_v13 = vld [vmem:[%s1753_s0 + $0x48] sm:$0xff]  ;;  %v1208_v18 = vld [vmem:[%s1753_s0 + $0x90] sm:$0xff] }
   0x6   :  { %467 = vmatpush.bf16.msra.mxu0 %v1228_v1  ;;  %1424 = vmatpush.bf16.msra.mxu1 %v1228_v1  ;;  %v1206_v10 = vld [vmem:[%s1753_s0 + $0x80] sm:$0xff]  ;;  %v1207_v14 = vld [vmem:[%s1753_s0 + $0x88] sm:$0xff]  ;;  %v1216_v19 = vld [vmem:[%s1753_s0 + $0xd0] sm:$0xff] }
   0x7   :  { %1425 = vmatpush.bf16.msra.mxu2 %v1228_v1  ;;  %1426 = vmatpush.bf16.msra.mxu3 %v1228_v1  ;;  %v1214_v11 = vld [vmem:[%s1753_s0 + $0xc0] sm:$0xff]  ;;  %v1215_v15 = vld [vmem:[%s1753_s0 + $0xc8] sm:$0xff]  ;;  %v1193_v20 = vld [vmem:[%s1753_s0 + $0x18] sm:$0xff] }
   0x8   :  { %v1201_v21 = vld [vmem:[%s1753_s0 + $0x58] sm:$0xff]  ;;  %v1194_v24 = vld [vmem:[%s1753_s0 + $0x20] sm:$0xff]  ;;  %v1195_v28 = vld [vmem:[%s1753_s0 + $0x28] sm:$0xff] }
   0x9   :  { %v1209_v22 = vld [vmem:[%s1753_s0 + $0x98] sm:$0xff]  ;;  %v1202_v25 = vld [vmem:[%s1753_s0 + $0x60] sm:$0xff]  ;;  %v1203_v29 = vld [vmem:[%s1753_s0 + $0x68] sm:$0xff] }
   0xa   :  { %468 = vmatpush.bf16.msra.mxu0 %v1227_v2  ;;  %1427 = vmatpush.bf16.msra.mxu1 %v1227_v2  ;;  %v1217_v23 = vld [vmem:[%s1753_s0 + $0xd8] sm:$0xff]  ;;  %v1210_v26 = vld [vmem:[%s1753_s0 + $0xa0] sm:$0xff]  ;;  %v1211_v30 = vld [vmem:[%s1753_s0 + $0xa8] sm:$0xff] }
   0xb   :  { %1428 = vmatpush.bf16.msra.mxu2 %v1227_v2  ;;  %1429 = vmatpush.bf16.msra.mxu3 %v1227_v2  ;;  %v1218_v27 = vld [vmem:[%s1753_s0 + $0xe0] sm:$0xff]  ;;  %v1219_v31 = vld [vmem:[%s1753_s0 + $0xe8] sm:$0xff]  ;;  %v1196_v32 = vld [vmem:[%s1753_s0 + $0x30] sm:$0xff] }
   0xc   :  { %v1204_v33 = vld [vmem:[%s1753_s0 + $0x70] sm:$0xff]  ;;  %v1197_v36 = vld [vmem:[%s1753_s0 + $0x38] sm:$0xff]  ;;  %v1589_v42 = vld [vmem:[%s1752_s2] ss:$0 sm:$0xff] }
   0xd   :  { %v1212_v34 = vld [vmem:[%s1753_s0 + $0xb0] sm:$0xff]  ;;  %v1205_v37 = vld [vmem:[%s1753_s0 + $0x78] sm:$0xff] }
   0xe   :  { %469 = vmatpush.bf16.msra.mxu0 %v1226_v3  ;;  %1430 = vmatpush.bf16.msra.mxu1 %v1226_v3  ;;  %v1220_v35 = vld [vmem:[%s1753_s0 + $0xf0] sm:$0xff]  ;;  %v1213_v38 = vld [vmem:[%s1753_s0 + $0xb8] sm:$0xff] }
   0xf   :  { %1431 = vmatpush.bf16.msra.mxu2 %v1226_v3  ;;  %1432 = vmatpush.bf16.msra.mxu3 %v1226_v3  ;;  %v1221_v39 = vld [vmem:[%s1753_s0 + $0xf8] sm:$0xff] }
  0x12   :  { %470 = vmatpush.bf16.msra.mxu0 %v1225_v4  ;;  %1433 = vmatpush.bf16.msra.mxu1 %v1225_v4 }
  0x13   :  { %1434 = vmatpush.bf16.msra.mxu2 %v1225_v4  ;;  %1435 = vmatpush.bf16.msra.mxu3 %v1225_v4 }
  0x16   :  { %471 = vmatpush.bf16.msra.mxu0 %v1224_v5  ;;  %1436 = vmatpush.bf16.msra.mxu1 %v1224_v5 }
  0x17   :  { %1437 = vmatpush.bf16.msra.mxu2 %v1224_v5  ;;  %1438 = vmatpush.bf16.msra.mxu3 %v1224_v5 }
  0x1a   :  { %472 = vmatpush.bf16.msra.mxu0 %v1223_v6  ;;  %1439 = vmatpush.bf16.msra.mxu1 %v1223_v6 }
  0x1b   :  { %1440 = vmatpush.bf16.msra.mxu2 %v1223_v6  ;;  %1441 = vmatpush.bf16.msra.mxu3 %v1223_v6 }
  0x1e   :  { %473 = vmatpush.bf16.msra.mxu0 %v1222_v7  ;;  %1442 = vmatpush.bf16.msra.mxu1 %v1222_v7 }
  0x1f   :  { %1443 = vmatpush.bf16.msra.mxu2 %v1222_v7  ;;  %1444 = vmatpush.bf16.msra.mxu3 %v1222_v7 }
  0x21   :  { %474 = vmatmul.bf16.vlgmr.msra.gmra.mxu0 %v1190_v8  ;;  %514 = vmatmul.bf16.vlgmr.msra.gmra.mxu1 %v1198_v9 }
  0x22   :  { %554 = vmatmul.bf16.vlgmr.msra.gmra.mxu2 %v1206_v10  ;;  %594 = vmatmul.bf16.vlgmr.msra.gmra.mxu3 %v1214_v11 }
  0x31   :  { %479 = vmatmul.bf16.gmra.mxu0 %v1191_v12  ;;  %519 = vmatmul.bf16.gmra.mxu1 %v1199_v13 }
  0x32   :  { %559 = vmatmul.bf16.gmra.mxu2 %v1207_v14  ;;  %599 = vmatmul.bf16.gmra.mxu3 %v1215_v15 }
  0x41   :  { %484 = vmatmul.bf16.gmra.mxu0 %v1192_v16  ;;  %524 = vmatmul.bf16.gmra.mxu1 %v1200_v17 }
  0x42   :  { %564 = vmatmul.bf16.gmra.mxu2 %v1208_v18  ;;  %604 = vmatmul.bf16.gmra.mxu3 %v1216_v19 }
  0x51   :  { %489 = vmatmul.bf16.gmra.mxu0 %v1193_v20  ;;  %529 = vmatmul.bf16.gmra.mxu1 %v1201_v21 }
  0x52   :  { %569 = vmatmul.bf16.gmra.mxu2 %v1209_v22  ;;  %609 = vmatmul.bf16.gmra.mxu3 %v1217_v23 }
  0x61   :  { %494 = vmatmul.bf16.gmra.mxu0 %v1194_v24  ;;  %534 = vmatmul.bf16.gmra.mxu1 %v1202_v25 }
  0x62   :  { %574 = vmatmul.bf16.gmra.mxu2 %v1210_v26  ;;  %614 = vmatmul.bf16.gmra.mxu3 %v1218_v27 }
  0x71   :  { %499 = vmatmul.bf16.gmra.mxu0 %v1195_v28  ;;  %539 = vmatmul.bf16.gmra.mxu1 %v1203_v29 }
  0x72   :  { %579 = vmatmul.bf16.gmra.mxu2 %v1211_v30  ;;  %619 = vmatmul.bf16.gmra.mxu3 %v1219_v31 }
  0x81   :  { %504 = vmatmul.bf16.gmra.mxu0 %v1196_v32  ;;  %544 = vmatmul.bf16.gmra.mxu1 %v1204_v33 }
  0x82   :  { %584 = vmatmul.bf16.gmra.mxu2 %v1212_v34  ;;  %624 = vmatmul.bf16.gmra.mxu3 %v1220_v35 }
  0x91   :  { %509 = vmatmul.bf16.gmra.mxu0 %v1197_v36  ;;  %549 = vmatmul.bf16.gmra.mxu1 %v1205_v37 }
  0x92   :  { %589 = vmatmul.bf16.gmra.mxu2 %v1213_v38  ;;  %629 = vmatmul.bf16.gmra.mxu3 %v1221_v39 }
  0x9e   :  { %v475_v40 = vpop.f32.mrf.mxu0  ;;  %v515_v41 = vpop.f32.mrf.mxu1 }
  0x9f   :  { %v834_v47 = vadd.f32 %v1589_v42, %v475_v40  ;;  %v850_v48 = vadd.f32 %v1589_v42, %v515_v41 }
  0xa5   :  { %v555_v43 = vpop.f32.mrf.mxu2  ;;  %v595_v44 = vpop.f32.mrf.mxu3 }
  0xa6   :  { %v477_v45 = vpop.f32.mrf.mxu0  ;;  %v517_v46 = vpop.f32.mrf.mxu1  ;;  %v866_v55 = vadd.f32 %v1589_v42, %v555_v43  ;;  %v882_v56 = vadd.f32 %v1589_v42, %v595_v44 }
  0xa7   :  { %v835_v49 = vadd.f32 %v1589_v42, %v477_v45  ;;  %v851_v50 = vadd.f32 %v1589_v42, %v517_v46 }
  0xa9   :  { %v1233_v51 = vpack.c.bf16 %v835_v49, %v834_v47  ;;  %v1273_v52 = vpack.c.bf16 %v851_v50, %v850_v48 }
  0xab   :  { %1234 = vst [vmem:[%s1754_s3] sm:$0xff] %v1233_v51  }
  0xac   :  { %1397 = vst [vmem:[%s1754_s3 + $0x40] sm:$0xff] %v1273_v52  }
  0xad   :  { %v557_v53 = vpop.f32.mrf.mxu2  ;;  %v597_v54 = vpop.f32.mrf.mxu3 }
  0xae   :  { %v867_v57 = vadd.f32 %v1589_v42, %v557_v53  ;;  %v883_v58 = vadd.f32 %v1589_v42, %v597_v54  ;;  %v480_v59 = vpop.f32.mrf.mxu0  ;;  %v520_v60 = vpop.f32.mrf.mxu1 }
  0xaf   :  { %v836_v3 = vadd.f32 %v1589_v42, %v480_v59  ;;  %v852_v4 = vadd.f32 %v1589_v42, %v520_v60 }
  0xb0   :  { %v1313_v61 = vpack.c.bf16 %v867_v57, %v866_v55  ;;  %v1353_v62 = vpack.c.bf16 %v883_v58, %v882_v56 }
  0xb2   :  { %1405 = vst [vmem:[%s1754_s3 + $0x80] sm:$0xff] %v1313_v61  }
  0xb3   :  { %1413 = vst [vmem:[%s1754_s3 + $0xc0] sm:$0xff] %v1353_v62  }
  0xb5   :  { %v560_v63 = vpop.f32.mrf.mxu2  ;;  %v600_v0 = vpop.f32.mrf.mxu3 }
  0xb6   :  { %v482_v1 = vpop.f32.mrf.mxu0  ;;  %v522_v2 = vpop.f32.mrf.mxu1  ;;  %v868_v11 = vadd.f32 %v1589_v42, %v560_v63  ;;  %v884_v12 = vadd.f32 %v1589_v42, %v600_v0 }
  0xb7   :  { %v837_v5 = vadd.f32 %v1589_v42, %v482_v1  ;;  %v853_v6 = vadd.f32 %v1589_v42, %v522_v2 }
  0xb9   :  { %v1238_v7 = vpack.c.bf16 %v837_v5, %v836_v3  ;;  %v1278_v8 = vpack.c.bf16 %v853_v6, %v852_v4 }
  0xbb   :  { %1390 = vst [vmem:[%s1754_s3 + $0x8] sm:$0xff] %v1238_v7  }
  0xbc   :  { %1398 = vst [vmem:[%s1754_s3 + $0x48] sm:$0xff] %v1278_v8  }
  0xbd   :  { %v562_v9 = vpop.f32.mrf.mxu2  ;;  %v602_v10 = vpop.f32.mrf.mxu3 }
  0xbe   :  { %v869_v13 = vadd.f32 %v1589_v42, %v562_v9  ;;  %v885_v14 = vadd.f32 %v1589_v42, %v602_v10  ;;  %v485_v15 = vpop.f32.mrf.mxu0  ;;  %v525_v16 = vpop.f32.mrf.mxu1 }
  0xbf   :  { %v838_v23 = vadd.f32 %v1589_v42, %v485_v15  ;;  %v854_v24 = vadd.f32 %v1589_v42, %v525_v16 }
  0xc0   :  { %v1318_v17 = vpack.c.bf16 %v869_v13, %v868_v11  ;;  %v1358_v18 = vpack.c.bf16 %v885_v14, %v884_v12 }
  0xc2   :  { %1406 = vst [vmem:[%s1754_s3 + $0x88] sm:$0xff] %v1318_v17  }
  0xc3   :  { %1414 = vst [vmem:[%s1754_s3 + $0xc8] sm:$0xff] %v1358_v18  }
  0xc5   :  { %v565_v19 = vpop.f32.mrf.mxu2  ;;  %v605_v20 = vpop.f32.mrf.mxu3 }
  0xc6   :  { %v487_v21 = vpop.f32.mrf.mxu0  ;;  %v527_v22 = vpop.f32.mrf.mxu1  ;;  %v870_v31 = vadd.f32 %v1589_v42, %v565_v19  ;;  %v886_v32 = vadd.f32 %v1589_v42, %v605_v20 }
  0xc7   :  { %v839_v25 = vadd.f32 %v1589_v42, %v487_v21  ;;  %v855_v26 = vadd.f32 %v1589_v42, %v527_v22 }
  0xc9   :  { %v1243_v27 = vpack.c.bf16 %v839_v25, %v838_v23  ;;  %v1283_v28 = vpack.c.bf16 %v855_v26, %v854_v24 }
  0xcb   :  { %1391 = vst [vmem:[%s1754_s3 + $0x10] sm:$0xff] %v1243_v27  }
  0xcc   :  { %1399 = vst [vmem:[%s1754_s3 + $0x50] sm:$0xff] %v1283_v28  }
  0xcd   :  { %v567_v29 = vpop.f32.mrf.mxu2  ;;  %v607_v30 = vpop.f32.mrf.mxu3 }
  0xce   :  { %v871_v33 = vadd.f32 %v1589_v42, %v567_v29  ;;  %v887_v34 = vadd.f32 %v1589_v42, %v607_v30  ;;  %v490_v35 = vpop.f32.mrf.mxu0  ;;  %v530_v36 = vpop.f32.mrf.mxu1 }
  0xcf   :  { %v840_v44 = vadd.f32 %v1589_v42, %v490_v35  ;;  %v856_v45 = vadd.f32 %v1589_v42, %v530_v36 }
  0xd0   :  { %v1323_v37 = vpack.c.bf16 %v871_v33, %v870_v31  ;;  %v1363_v38 = vpack.c.bf16 %v887_v34, %v886_v32 }
  0xd2   :  { %1407 = vst [vmem:[%s1754_s3 + $0x90] sm:$0xff] %v1323_v37  }
  0xd3   :  { %1415 = vst [vmem:[%s1754_s3 + $0xd0] sm:$0xff] %v1363_v38  }
  0xd5   :  { %v570_v39 = vpop.f32.mrf.mxu2  ;;  %v610_v40 = vpop.f32.mrf.mxu3 }
  0xd6   :  { %v492_v41 = vpop.f32.mrf.mxu0  ;;  %v532_v43 = vpop.f32.mrf.mxu1  ;;  %v872_v52 = vadd.f32 %v1589_v42, %v570_v39  ;;  %v888_v53 = vadd.f32 %v1589_v42, %v610_v40 }
  0xd7   :  { %v841_v46 = vadd.f32 %v1589_v42, %v492_v41  ;;  %v857_v47 = vadd.f32 %v1589_v42, %v532_v43 }
  0xd9   :  { %v1248_v48 = vpack.c.bf16 %v841_v46, %v840_v44  ;;  %v1288_v49 = vpack.c.bf16 %v857_v47, %v856_v45 }
  0xdb   :  { %1392 = vst [vmem:[%s1754_s3 + $0x18] sm:$0xff] %v1248_v48  }
  0xdc   :  { %1400 = vst [vmem:[%s1754_s3 + $0x58] sm:$0xff] %v1288_v49  }
  0xdd   :  { %v572_v50 = vpop.f32.mrf.mxu2  ;;  %v612_v51 = vpop.f32.mrf.mxu3 }
  0xde   :  { %v873_v54 = vadd.f32 %v1589_v42, %v572_v50  ;;  %v889_v55 = vadd.f32 %v1589_v42, %v612_v51  ;;  %v495_v56 = vpop.f32.mrf.mxu0  ;;  %v535_v57 = vpop.f32.mrf.mxu1 }
  0xdf   :  { %v842_v0 = vadd.f32 %v1589_v42, %v495_v56  ;;  %v858_v1 = vadd.f32 %v1589_v42, %v535_v57 }
  0xe0   :  { %v1328_v58 = vpack.c.bf16 %v873_v54, %v872_v52  ;;  %v1368_v59 = vpack.c.bf16 %v889_v55, %v888_v53 }
  0xe2   :  { %1408 = vst [vmem:[%s1754_s3 + $0x98] sm:$0xff] %v1328_v58  }
  0xe3   :  { %1416 = vst [vmem:[%s1754_s3 + $0xd8] sm:$0xff] %v1368_v59  }
  0xe5   :  { %v575_v60 = vpop.f32.mrf.mxu2  ;;  %v615_v61 = vpop.f32.mrf.mxu3 }
  0xe6   :  { %v497_v62 = vpop.f32.mrf.mxu0  ;;  %v537_v63 = vpop.f32.mrf.mxu1  ;;  %v874_v8 = vadd.f32 %v1589_v42, %v575_v60  ;;  %v890_v9 = vadd.f32 %v1589_v42, %v615_v61 }
  0xe7   :  { %v843_v2 = vadd.f32 %v1589_v42, %v497_v62  ;;  %v859_v3 = vadd.f32 %v1589_v42, %v537_v63 }
  0xe9   :  { %v1253_v4 = vpack.c.bf16 %v843_v2, %v842_v0  ;;  %v1293_v5 = vpack.c.bf16 %v859_v3, %v858_v1 }
  0xeb   :  { %1393 = vst [vmem:[%s1754_s3 + $0x20] sm:$0xff] %v1253_v4  }
  0xec   :  { %1401 = vst [vmem:[%s1754_s3 + $0x60] sm:$0xff] %v1293_v5  }
  0xed   :  { %v577_v6 = vpop.f32.mrf.mxu2  ;;  %v617_v7 = vpop.f32.mrf.mxu3 }
  0xee   :  { %v875_v10 = vadd.f32 %v1589_v42, %v577_v6  ;;  %v891_v11 = vadd.f32 %v1589_v42, %v617_v7  ;;  %v500_v12 = vpop.f32.mrf.mxu0  ;;  %v540_v13 = vpop.f32.mrf.mxu1 }
  0xef   :  { %v844_v20 = vadd.f32 %v1589_v42, %v500_v12  ;;  %v860_v21 = vadd.f32 %v1589_v42, %v540_v13 }
  0xf0   :  { %v1333_v14 = vpack.c.bf16 %v875_v10, %v874_v8  ;;  %v1373_v15 = vpack.c.bf16 %v891_v11, %v890_v9 }
  0xf2   :  { %1409 = vst [vmem:[%s1754_s3 + $0xa0] sm:$0xff] %v1333_v14  }
  0xf3   :  { %1417 = vst [vmem:[%s1754_s3 + $0xe0] sm:$0xff] %v1373_v15  }
  0xf5   :  { %v580_v16 = vpop.f32.mrf.mxu2  ;;  %v620_v17 = vpop.f32.mrf.mxu3 }
  0xf6   :  { %v502_v18 = vpop.f32.mrf.mxu0  ;;  %v542_v19 = vpop.f32.mrf.mxu1  ;;  %v876_v28 = vadd.f32 %v1589_v42, %v580_v16  ;;  %v892_v29 = vadd.f32 %v1589_v42, %v620_v17 }
  0xf7   :  { %v845_v22 = vadd.f32 %v1589_v42, %v502_v18  ;;  %v861_v23 = vadd.f32 %v1589_v42, %v542_v19 }
  0xf9   :  { %v1258_v24 = vpack.c.bf16 %v845_v22, %v844_v20  ;;  %v1298_v25 = vpack.c.bf16 %v861_v23, %v860_v21 }
  0xfb   :  { %1394 = vst [vmem:[%s1754_s3 + $0x28] sm:$0xff] %v1258_v24  }
  0xfc   :  { %1402 = vst [vmem:[%s1754_s3 + $0x68] sm:$0xff] %v1298_v25  }
  0xfd   :  { %v582_v26 = vpop.f32.mrf.mxu2  ;;  %v622_v27 = vpop.f32.mrf.mxu3 }
  0xfe   :  { %v877_v30 = vadd.f32 %v1589_v42, %v582_v26  ;;  %v893_v31 = vadd.f32 %v1589_v42, %v622_v27  ;;  %v505_v32 = vpop.f32.mrf.mxu0  ;;  %v545_v33 = vpop.f32.mrf.mxu1 }
  0xff   :  { %v846_v40 = vadd.f32 %v1589_v42, %v505_v32  ;;  %v862_v41 = vadd.f32 %v1589_v42, %v545_v33 }
 0x100   :  { %v1338_v34 = vpack.c.bf16 %v877_v30, %v876_v28  ;;  %v1378_v35 = vpack.c.bf16 %v893_v31, %v892_v29 }
 0x102   :  { %1410 = vst [vmem:[%s1754_s3 + $0xa8] sm:$0xff] %v1338_v34  }
 0x103   :  { %1418 = vst [vmem:[%s1754_s3 + $0xe8] sm:$0xff] %v1378_v35  }
 0x105   :  { %v585_v36 = vpop.f32.mrf.mxu2  ;;  %v625_v37 = vpop.f32.mrf.mxu3 }
 0x106   :  { %v507_v38 = vpop.f32.mrf.mxu0  ;;  %v547_v39 = vpop.f32.mrf.mxu1  ;;  %v878_v49 = vadd.f32 %v1589_v42, %v585_v36  ;;  %v894_v50 = vadd.f32 %v1589_v42, %v625_v37 }
 0x107   :  { %v847_v43 = vadd.f32 %v1589_v42, %v507_v38  ;;  %v863_v44 = vadd.f32 %v1589_v42, %v547_v39 }
 0x109   :  { %v1263_v45 = vpack.c.bf16 %v847_v43, %v846_v40  ;;  %v1303_v46 = vpack.c.bf16 %v863_v44, %v862_v41 }
 0x10b   :  { %1395 = vst [vmem:[%s1754_s3 + $0x30] sm:$0xff] %v1263_v45  }
 0x10c   :  { %1403 = vst [vmem:[%s1754_s3 + $0x70] sm:$0xff] %v1303_v46  }
 0x10d   :  { %v587_v47 = vpop.f32.mrf.mxu2  ;;  %v627_v48 = vpop.f32.mrf.mxu3 }
 0x10e   :  { %v879_v51 = vadd.f32 %v1589_v42, %v587_v47  ;;  %v895_v52 = vadd.f32 %v1589_v42, %v627_v48  ;;  %v510_v53 = vpop.f32.mrf.mxu0  ;;  %v550_v54 = vpop.f32.mrf.mxu1 }
 0x10f   :  { %v848_v61 = vadd.f32 %v1589_v42, %v510_v53  ;;  %v864_v62 = vadd.f32 %v1589_v42, %v550_v54 }
 0x110   :  { %v1343_v55 = vpack.c.bf16 %v879_v51, %v878_v49  ;;  %v1383_v56 = vpack.c.bf16 %v895_v52, %v894_v50 }
 0x112   :  { %1411 = vst [vmem:[%s1754_s3 + $0xb0] sm:$0xff] %v1343_v55  }
 0x113   :  { %1419 = vst [vmem:[%s1754_s3 + $0xf0] sm:$0xff] %v1383_v56  }
 0x115   :  { %v590_v57 = vpop.f32.mrf.mxu2  ;;  %v630_v58 = vpop.f32.mrf.mxu3 }
 0x116   :  { %v512_v59 = vpop.f32.mrf.mxu0  ;;  %v552_v60 = vpop.f32.mrf.mxu1  ;;  %v880_v5 = vadd.f32 %v1589_v42, %v590_v57  ;;  %v896_v6 = vadd.f32 %v1589_v42, %v630_v58 }
 0x117   :  { %v849_v63 = vadd.f32 %v1589_v42, %v512_v59  ;;  %v865_v0 = vadd.f32 %v1589_v42, %v552_v60 }
 0x119   :  { %v1268_v1 = vpack.c.bf16 %v849_v63, %v848_v61  ;;  %v1308_v2 = vpack.c.bf16 %v865_v0, %v864_v62 }
 0x11b   :  { %1396 = vst [vmem:[%s1754_s3 + $0x38] sm:$0xff] %v1268_v1  }
 0x11c   :  { %1404 = vst [vmem:[%s1754_s3 + $0x78] sm:$0xff] %v1308_v2  }
 0x11d   :  { %v592_v3 = vpop.f32.mrf.mxu2  ;;  %v632_v4 = vpop.f32.mrf.mxu3 }
 0x11e   :  { %v881_v7 = vadd.f32 %v1589_v42, %v592_v3  ;;  %v897_v8 = vadd.f32 %v1589_v42, %v632_v4 }
 0x120   :  { %v1348_v9 = vpack.c.bf16 %v881_v7, %v880_v5  ;;  %v1388_v10 = vpack.c.bf16 %v897_v8, %v896_v6 }
 0x122   :  { %1412 = vst [vmem:[%s1754_s3 + $0xb8] sm:$0xff] %v1348_v9  }
 0x123   :  { %1420 = vst [vmem:[%s1754_s3 + $0xf8] sm:$0xff] %v1388_v10  }

// kernel: upsample_bn_forward.7
= control target key start
LH: loop header
LB: loop body
LE: loop exit
PB: predicated region body
PF: predicated region fallthrough
CT: control target
= control target key end

     0   :  { %s2282_s12 = smov 0   ;;  %s2284_s13 = smov 0   ;;  %s2731_s0 = inlined_call_operand.vmem [shape: bf16[2048,128], index: 0, kind: input, shape index: {}]   ;;  %s2732_s1 = inlined_call_operand.vmem [shape: f32[1,128], index: 1, kind: input, shape index: {}]   ;;  %s2733_s2 = inlined_call_operand.vmem [shape: f32[1,128], index: 2, kind: input, shape index: {}]   ;;  %s2734_s3 = inlined_call_operand.vmem [shape: bf16[2048,128], index: 3, kind: output, shape index: {}]  }
   0x1   :  { %s2286_s14 = smov 0  }
   0x2 LB: > { %s22_s15 = sadd.s32 1, %s2256_s13  ;;  %p1501_p0 = scmp.ge.s32.totalorder %s2260_s14, 1  ;;  %s2260_s14 = sphi %s2286_s14, %s13_s14   ;;  %s2256_s13 = sphi %s2284_s13, %s2736_s13   ;;  %s2252_s12 = sphi %s2282_s12, %s2735_s12  }
   0x3   : > { %p23_p1 = scmp.ge.s32.totalorder %s22_s15, 2  ;;  %p173_p2 = scmp.lt.s32.totalorder %s2260_s14, 3 }
   0x5   : > { %s2738_s15 = smov (%p23_p1, %s22_s15), 0  ;;  %p174_p3 = pnand %p1501_p0, %p173_p2 }
   0x6   : > { %s1502_s16 = sshll.u32 (!%p174_p3), %s2252_s12, 7 }
   0x7   : > { %177 = sbr.rel (%p174_p3) target bundleno = 228 (0xe4), region = 32  ;;  %p210_p4 = scmp.lt.s32.totalorder (!%p174_p3), %s1502_s16, 255 }
   0xc   : > { %s2740_s16 = smov (!%p210_p4, %s1502_s16), 255  ;;  %v2313_v0 = vld [vmem:[%s2732_s1] ss:$0 sm:$0xff] }
   0xd   : > { %s1503_s17 = sshll.u32 %s2740_s16, 2  ;;  %v2321_v6 = vld [vmem:[%s2733_s2] ss:$0 sm:$0xff] }
   0xe   : > { %s2308_s20 = scalar_lea.vmem %s2731_s0, %s1503_s17  ;;  %s2345_s27 = scalar_lea.vmem %s2734_s3, %s1503_s17 }
   0xf   : > { %v1509_v1 = vld [vmem:[%s2308_s20] sm:$0xff]   ;;  %v2084_v2 = vld [vmem:[%s2308_s20 + $0x8] sm:$0xff]   ;;  %v2085_v3 = vld [vmem:[%s2308_s20 + $0x10] sm:$0xff]  }
  0x10   : > { %v1510_v4 = vunpack.c.l.bf16 %v1509_v1  ;;  %v1511_v5 = vunpack.c.h.bf16 %v1509_v1  ;;  %v1514_v7 = vunpack.c.l.bf16 %v2084_v2  ;;  %v1515_v8 = vunpack.c.h.bf16 %v2084_v2  ;;  %v2086_v9 = vld [vmem:[%s2308_s20 + $0x18] sm:$0xff]   ;;  %v2087_v36 = vld [vmem:[%s2308_s20 + $0x20] sm:$0xff]   ;;  %v2088_v41 = vld [vmem:[%s2308_s20 + $0x28] sm:$0xff]  }
  0x11   : > { %v1518_v10 = vunpack.c.l.bf16 %v2085_v3  ;;  %v1519_v11 = vunpack.c.h.bf16 %v2085_v3  ;;  %v1522_v12 = vunpack.c.l.bf16 %v2086_v9  ;;  %v1523_v13 = vunpack.c.h.bf16 %v2086_v9  ;;  %v2089_v52 = vld [vmem:[%s2308_s20 + $0x30] sm:$0xff]   ;;  %v2090_v53 = vld [vmem:[%s2308_s20 + $0x38] sm:$0xff]  }
  0x12   : > { %v493_v14 = vmul.f32 %v2313_v0, %v1510_v4  ;;  %v494_v15 = vmul.f32 %v2313_v0, %v1511_v5  ;;  %v495_v16 = vmul.f32 %v2313_v0, %v1514_v7  ;;  %v496_v17 = vmul.f32 %v2313_v0, %v1515_v8 }
  0x13   : > { %v497_v18 = vmul.f32 %v2313_v0, %v1518_v10  ;;  %v498_v19 = vmul.f32 %v2313_v0, %v1519_v11  ;;  %v499_v20 = vmul.f32 %v2313_v0, %v1522_v12  ;;  %v500_v21 = vmul.f32 %v2313_v0, %v1523_v13 }
  0x14   : > { %v625_v22 = vadd.f32 %v2321_v6, %v493_v14  ;;  %v626_v23 = vadd.f32 %v2321_v6, %v494_v15  ;;  %v627_v24 = vadd.f32 %v2321_v6, %v495_v16  ;;  %v628_v25 = vadd.f32 %v2321_v6, %v496_v17 }
  0x15   : > { %v629_v26 = vadd.f32 %v2321_v6, %v497_v18  ;;  %v630_v27 = vadd.f32 %v2321_v6, %v498_v19  ;;  %v631_v28 = vadd.f32 %v2321_v6, %v499_v20  ;;  %v632_v29 = vadd.f32 %v2321_v6, %v500_v21  ;;  %v2091_v20 = vld [vmem:[%s2308_s20 + $0x40] sm:$0xff]  }
  0x16   : > { %vm753_vm0 = vcmp.ge.f32.partialorder %v625_v22, 0.0  ;;  %vm754_vm1 = vcmp.ge.f32.partialorder %v626_v23, 0.0  ;;  %v881_v30 = vmul.f32 0.01, %v625_v22  ;;  %v882_v31 = vmul.f32 0.01, %v626_v23 }
  0x17   : > { %vm755_vm2 = vcmp.ge.f32.partialorder %v627_v24, 0.0  ;;  %vm756_vm3 = vcmp.ge.f32.partialorder %v628_v25, 0.0  ;;  %v883_v32 = vmul.f32 0.01, %v627_v24  ;;  %v884_v33 = vmul.f32 0.01, %v628_v25 }
  0x18   : > { %v1009_v34 = vsel %vm753_vm0, %v625_v22, %v881_v30  ;;  %v1010_v35 = vsel %vm754_vm1, %v626_v23, %v882_v31  ;;  %vm757_vm4 = vcmp.ge.f32.partialorder %v629_v26, 0.0  ;;  %vm758_vm5 = vcmp.ge.f32.partialorder %v630_v27, 0.0 }
  0x19   : > { %v1767_v37 = vpack.c.bf16 %v1010_v35, %v1009_v34  ;;  %v1011_v38 = vsel %vm755_vm2, %v627_v24, %v883_v32  ;;  %v1012_v39 = vsel %vm756_vm3, %v628_v25, %v884_v33  ;;  %v885_v40 = vmul.f32 0.01, %v629_v26  ;;  %v2092_v24 = vld [vmem:[%s2308_s20 + $0x48] sm:$0xff]  }
  0x1a   : > { %v1772_v42 = vpack.c.bf16 %v1012_v39, %v1011_v38  ;;  %v886_v43 = vmul.f32 0.01, %v630_v27  ;;  %vm759_vm6 = vcmp.ge.f32.partialorder %v631_v28, 0.0  ;;  %vm760_vm7 = vcmp.ge.f32.partialorder %v632_v29, 0.0 }
  0x1b   : > { %1768 = vst [vmem:[%s2345_s27] sm:$0xff] %v1767_v37   ;;  %v1013_v44 = vsel %vm757_vm4, %v629_v26, %v885_v40  ;;  %v887_v45 = vmul.f32 0.01, %v631_v28  ;;  %v888_v46 = vmul.f32 0.01, %v632_v29  ;;  %v1526_v47 = vunpack.c.l.bf16 %v2087_v36 }
  0x1c   : > { %2147 = vst [vmem:[%s2345_s27 + $0x8] sm:$0xff] %v1772_v42   ;;  %v1014_v48 = vsel %vm758_vm5, %v630_v27, %v886_v43  ;;  %v1527_v49 = vunpack.c.h.bf16 %v2087_v36  ;;  %v1530_v50 = vunpack.c.l.bf16 %v2088_v41  ;;  %v1531_v51 = vunpack.c.h.bf16 %v2088_v41  ;;  %v2093_v36 = vld [vmem:[%s2308_s20 + $0x50] sm:$0xff]  }
  0x1d   : > { %v1777_v54 = vpack.c.bf16 %v1014_v48, %v1013_v44  ;;  %v1015_v55 = vsel %vm759_vm6, %v631_v28, %v887_v45  ;;  %v1016_v56 = vsel %vm760_vm7, %v632_v29, %v888_v46  ;;  %v501_v57 = vmul.f32 %v2313_v0, %v1526_v47 }
  0x1e   : > { %v1782_v58 = vpack.c.bf16 %v1016_v56, %v1015_v55  ;;  %v502_v59 = vmul.f32 %v2313_v0, %v1527_v49  ;;  %v503_v60 = vmul.f32 %v2313_v0, %v1530_v50  ;;  %v504_v61 = vmul.f32 %v2313_v0, %v1531_v51 }
  0x1f   : > { %2148 = vst [vmem:[%s2345_s27 + $0x10] sm:$0xff] %v1777_v54   ;;  %v633_v62 = vadd.f32 %v2321_v6, %v501_v57  ;;  %v1534_v63 = vunpack.c.l.bf16 %v2089_v52  ;;  %v1535_v1 = vunpack.c.h.bf16 %v2089_v52  ;;  %v1538_v2 = vunpack.c.l.bf16 %v2090_v53 }
  0x20   : > { %2149 = vst [vmem:[%s2345_s27 + $0x18] sm:$0xff] %v1782_v58   ;;  %v634_v3 = vadd.f32 %v2321_v6, %v502_v59  ;;  %v635_v4 = vadd.f32 %v2321_v6, %v503_v60  ;;  %v636_v5 = vadd.f32 %v2321_v6, %v504_v61  ;;  %v1539_v7 = vunpack.c.h.bf16 %v2090_v53  ;;  %v2094_v59 = vld [vmem:[%s2308_s20 + $0x58] sm:$0xff]  }
  0x21   : > { %vm761_vm8 = vcmp.ge.f32.partialorder %v633_v62, 0.0  ;;  %v889_v8 = vmul.f32 0.01, %v633_v62  ;;  %v505_v9 = vmul.f32 %v2313_v0, %v1534_v63  ;;  %v506_v10 = vmul.f32 %v2313_v0, %v1535_v1  ;;  %v2095_v1 = vld [vmem:[%s2308_s20 + $0x60] sm:$0xff]  }
  0x22   : > { %vm762_vm9 = vcmp.ge.f32.partialorder %v634_v3, 0.0  ;;  %v890_v11 = vmul.f32 0.01, %v634_v3  ;;  %vm763_vm10 = vcmp.ge.f32.partialorder %v635_v4, 0.0  ;;  %vm764_vm11 = vcmp.ge.f32.partialorder %v636_v5, 0.0 }
  0x23   : > { %v1017_v12 = vsel %vm761_vm8, %v633_v62, %v889_v8  ;;  %v891_v13 = vmul.f32 0.01, %v635_v4  ;;  %v892_v14 = vmul.f32 0.01, %v636_v5  ;;  %v637_v15 = vadd.f32 %v2321_v6, %v505_v9 }
  0x24   : > { %v1018_v16 = vsel %vm762_vm9, %v634_v3, %v890_v11  ;;  %v638_v17 = vadd.f32 %v2321_v6, %v506_v10  ;;  %v507_v18 = vmul.f32 %v2313_v0, %v1538_v2  ;;  %v508_v19 = vmul.f32 %v2313_v0, %v1539_v7 }
  0x25   : > { %v1787_v21 = vpack.c.bf16 %v1018_v16, %v1017_v12  ;;  %v1019_v22 = vsel %vm763_vm10, %v635_v4, %v891_v13  ;;  %v1020_v23 = vsel %vm764_vm11, %v636_v5, %v892_v14  ;;  %vm765_vm12 = vcmp.ge.f32.partialorder %v637_v15, 0.0  ;;  %v2096_v5 = vld [vmem:[%s2308_s20 + $0x68] sm:$0xff]   ;;  %v2097_v14 = vld [vmem:[%s2308_s20 + $0x70] sm:$0xff]  }
  0x26   : > { %v1792_v25 = vpack.c.bf16 %v1020_v23, %v1019_v22  ;;  %vm766_vm13 = vcmp.ge.f32.partialorder %v638_v17, 0.0  ;;  %v893_v26 = vmul.f32 0.01, %v637_v15  ;;  %v894_v27 = vmul.f32 0.01, %v638_v17 }
  0x27   : > { %2150 = vst [vmem:[%s2345_s27 + $0x20] sm:$0xff] %v1787_v21   ;;  %v639_v28 = vadd.f32 %v2321_v6, %v507_v18  ;;  %v640_v29 = vadd.f32 %v2321_v6, %v508_v19  ;;  %v1542_v30 = vunpack.c.l.bf16 %v2091_v20  ;;  %v1543_v31 = vunpack.c.h.bf16 %v2091_v20 }
  0x28   : > { %2151 = vst [vmem:[%s2345_s27 + $0x28] sm:$0xff] %v1792_v25   ;;  %v1021_v32 = vsel %vm765_vm12, %v637_v15, %v893_v26  ;;  %v1022_v33 = vsel %vm766_vm13, %v638_v17, %v894_v27  ;;  %v1546_v34 = vunpack.c.l.bf16 %v2092_v24  ;;  %v1547_v35 = vunpack.c.h.bf16 %v2092_v24 }
  0x29   : > { %v1797_v37 = vpack.c.bf16 %v1022_v33, %v1021_v32  ;;  %vm767_vm14 = vcmp.ge.f32.partialorder %v639_v28, 0.0  ;;  %vm768_vm15 = vcmp.ge.f32.partialorder %v640_v29, 0.0  ;;  %v895_v38 = vmul.f32 0.01, %v639_v28 }
  0x2a   : > { %v896_v39 = vmul.f32 0.01, %v640_v29  ;;  %v509_v40 = vmul.f32 %v2313_v0, %v1542_v30  ;;  %v510_v41 = vmul.f32 %v2313_v0, %v1543_v31  ;;  %v511_v42 = vmul.f32 %v2313_v0, %v1546_v34 }
  0x2b   : > { %2152 = vst [vmem:[%s2345_s27 + $0x30] sm:$0xff] %v1797_v37   ;;  %v1023_v43 = vsel %vm767_vm14, %v639_v28, %v895_v38  ;;  %v512_v44 = vmul.f32 %v2313_v0, %v1547_v35  ;;  %v1550_v45 = vunpack.c.l.bf16 %v2093_v36  ;;  %v1551_v46 = vunpack.c.h.bf16 %v2093_v36 }
  0x2c   : > { %v1024_v47 = vsel %vm768_vm15, %v640_v29, %v896_v39  ;;  %v641_v48 = vadd.f32 %v2321_v6, %v509_v40  ;;  %v642_v49 = vadd.f32 %v2321_v6, %v510_v41  ;;  %v643_v50 = vadd.f32 %v2321_v6, %v511_v42  ;;  %v2098_v42 = vld [vmem:[%s2308_s20 + $0x78] sm:$0xff]  }
  0x2d   : > { %v1802_v51 = vpack.c.bf16 %v1024_v47, %v1023_v43  ;;  %v644_v52 = vadd.f32 %v2321_v6, %v512_v44  ;;  %v513_v53 = vmul.f32 %v2313_v0, %v1550_v45  ;;  %v514_v54 = vmul.f32 %v2313_v0, %v1551_v46  ;;  %v2099_v43 = vld [vmem:[%s2308_s20 + $0x80] sm:$0xff]  }
  0x2e   : > { %vm769_vm0 = vcmp.ge.f32.partialorder %v641_v48, 0.0  ;;  %vm770_vm1 = vcmp.ge.f32.partialorder %v642_v49, 0.0  ;;  %v897_v55 = vmul.f32 0.01, %v641_v48  ;;  %v898_v56 = vmul.f32 0.01, %v642_v49 }
  0x2f   : > { %2153 = vst [vmem:[%s2345_s27 + $0x38] sm:$0xff] %v1802_v51   ;;  %vm771_vm2 = vcmp.ge.f32.partialorder %v643_v50, 0.0  ;;  %vm772_vm3 = vcmp.ge.f32.partialorder %v644_v52, 0.0  ;;  %v899_v57 = vmul.f32 0.01, %v643_v50  ;;  %v645_v58 = vadd.f32 %v2321_v6, %v513_v53  ;;  %v2100_v51 = vld [vmem:[%s2308_s20 + $0x88] sm:$0xff]  }
  0x30   : > { %v1025_v60 = vsel %vm769_vm0, %v641_v48, %v897_v55  ;;  %v1026_v61 = vsel %vm770_vm1, %v642_v49, %v898_v56  ;;  %v900_v62 = vmul.f32 0.01, %v644_v52  ;;  %v646_v63 = vadd.f32 %v2321_v6, %v514_v54 }
  0x31   : > { %v1807_v2 = vpack.c.bf16 %v1026_v61, %v1025_v60  ;;  %v1027_v3 = vsel %vm771_vm2, %v643_v50, %v899_v57  ;;  %vm773_vm4 = vcmp.ge.f32.partialorder %v645_v58, 0.0  ;;  %v901_v4 = vmul.f32 0.01, %v645_v58 }
  0x32   : > { %v1028_v7 = vsel %vm772_vm3, %v644_v52, %v900_v62  ;;  %vm774_vm5 = vcmp.ge.f32.partialorder %v646_v63, 0.0  ;;  %v902_v8 = vmul.f32 0.01, %v646_v63  ;;  %v1554_v9 = vunpack.c.l.bf16 %v2094_v59 }
  0x33   : > { %2154 = vst [vmem:[%s2345_s27 + $0x40] sm:$0xff] %v1807_v2   ;;  %v1812_v10 = vpack.c.bf16 %v1028_v7, %v1027_v3  ;;  %v1029_v11 = vsel %vm773_vm4, %v645_v58, %v901_v4  ;;  %v1555_v12 = vunpack.c.h.bf16 %v2094_v59  ;;  %v1558_v13 = vunpack.c.l.bf16 %v2095_v1 }
  0x34   : > { %v1030_v15 = vsel %vm774_vm5, %v646_v63, %v902_v8  ;;  %v515_v16 = vmul.f32 %v2313_v0, %v1554_v9  ;;  %v1559_v17 = vunpack.c.h.bf16 %v2095_v1  ;;  %v1562_v18 = vunpack.c.l.bf16 %v2096_v5 }
  0x35   : > { %2155 = vst [vmem:[%s2345_s27 + $0x48] sm:$0xff] %v1812_v10   ;;  %v1817_v19 = vpack.c.bf16 %v1030_v15, %v1029_v11  ;;  %v516_v20 = vmul.f32 %v2313_v0, %v1555_v12  ;;  %v517_v21 = vmul.f32 %v2313_v0, %v1558_v13  ;;  %v1563_v22 = vunpack.c.h.bf16 %v2096_v5 }
  0x36   : > { %v647_v23 = vadd.f32 %v2321_v6, %v515_v16  ;;  %v518_v24 = vmul.f32 %v2313_v0, %v1559_v17  ;;  %v519_v25 = vmul.f32 %v2313_v0, %v1562_v18  ;;  %v1566_v26 = vunpack.c.l.bf16 %v2097_v14 }
  0x37   : > { %2156 = vst [vmem:[%s2345_s27 + $0x50] sm:$0xff] %v1817_v19   ;;  %v648_v27 = vadd.f32 %v2321_v6, %v516_v20  ;;  %v649_v28 = vadd.f32 %v2321_v6, %v517_v21  ;;  %v520_v29 = vmul.f32 %v2313_v0, %v1563_v22  ;;  %v1567_v30 = vunpack.c.h.bf16 %v2097_v14  ;;  %v2101_v14 = vld [vmem:[%s2308_s20 + $0x90] sm:$0xff]  }
  0x38   : > { %vm775_vm6 = vcmp.ge.f32.partialorder %v647_v23, 0.0  ;;  %v903_v31 = vmul.f32 0.01, %v647_v23  ;;  %v650_v32 = vadd.f32 %v2321_v6, %v518_v24  ;;  %v651_v33 = vadd.f32 %v2321_v6, %v519_v25  ;;  %v2102_v25 = vld [vmem:[%s2308_s20 + $0x98] sm:$0xff]  }
  0x39   : > { %vm776_vm7 = vcmp.ge.f32.partialorder %v648_v27, 0.0  ;;  %v904_v34 = vmul.f32 0.01, %v648_v27  ;;  %vm777_vm8 = vcmp.ge.f32.partialorder %v649_v28, 0.0  ;;  %v905_v35 = vmul.f32 0.01, %v649_v28 }
  0x3a   : > { %v1031_v36 = vsel %vm775_vm6, %v647_v23, %v903_v31  ;;  %vm778_vm9 = vcmp.ge.f32.partialorder %v650_v32, 0.0  ;;  %v906_v37 = vmul.f32 0.01, %v650_v32  ;;  %v652_v38 = vadd.f32 %v2321_v6, %v520_v29 }
  0x3b   : > { %v1032_v39 = vsel %vm776_vm7, %v648_v27, %v904_v34  ;;  %v1033_v40 = vsel %vm777_vm8, %v649_v28, %v905_v35  ;;  %vm779_vm10 = vcmp.ge.f32.partialorder %v651_v33, 0.0  ;;  %v907_v41 = vmul.f32 0.01, %v651_v33 }
  0x3c   : > { %v1822_v44 = vpack.c.bf16 %v1032_v39, %v1031_v36  ;;  %v1034_v45 = vsel %vm778_vm9, %v650_v32, %v906_v37  ;;  %vm780_vm11 = vcmp.ge.f32.partialorder %v652_v38, 0.0  ;;  %v908_v46 = vmul.f32 0.01, %v652_v38 }
  0x3d   : > { %v1827_v47 = vpack.c.bf16 %v1034_v45, %v1033_v40  ;;  %v1035_v48 = vsel %vm779_vm10, %v651_v33, %v907_v41  ;;  %v521_v49 = vmul.f32 %v2313_v0, %v1566_v26  ;;  %v522_v50 = vmul.f32 %v2313_v0, %v1567_v30  ;;  %v2103_v30 = vld [vmem:[%s2308_s20 + $0xa0] sm:$0xff]   ;;  %v2104_v45 = vld [vmem:[%s2308_s20 + $0xa8] sm:$0xff]  }
  0x3e   : > { %2157 = vst [vmem:[%s2345_s27 + $0x58] sm:$0xff] %v1822_v44   ;;  %v1036_v52 = vsel %vm780_vm11, %v652_v38, %v908_v46  ;;  %v1570_v53 = vunpack.c.l.bf16 %v2098_v42  ;;  %v1571_v54 = vunpack.c.h.bf16 %v2098_v42  ;;  %v1574_v55 = vunpack.c.l.bf16 %v2099_v43 }
  0x3f   : > { %2158 = vst [vmem:[%s2345_s27 + $0x60] sm:$0xff] %v1827_v47   ;;  %v1832_v56 = vpack.c.bf16 %v1036_v52, %v1035_v48  ;;  %v653_v57 = vadd.f32 %v2321_v6, %v521_v49  ;;  %v654_v58 = vadd.f32 %v2321_v6, %v522_v50  ;;  %v1575_v59 = vunpack.c.h.bf16 %v2099_v43 }
  0x40   : > { %v523_v60 = vmul.f32 %v2313_v0, %v1570_v53  ;;  %v524_v61 = vmul.f32 %v2313_v0, %v1571_v54  ;;  %v525_v62 = vmul.f32 %v2313_v0, %v1574_v55  ;;  %v1578_v63 = vunpack.c.l.bf16 %v2100_v51 }
  0x41   : > { %2159 = vst [vmem:[%s2345_s27 + $0x68] sm:$0xff] %v1832_v56   ;;  %vm781_vm12 = vcmp.ge.f32.partialorder %v653_v57, 0.0  ;;  %vm782_vm13 = vcmp.ge.f32.partialorder %v654_v58, 0.0  ;;  %v909_v1 = vmul.f32 0.01, %v653_v57  ;;  %v526_v2 = vmul.f32 %v2313_v0, %v1575_v59 }
  0x42   : > { %v910_v3 = vmul.f32 0.01, %v654_v58  ;;  %v655_v4 = vadd.f32 %v2321_v6, %v523_v60  ;;  %v656_v5 = vadd.f32 %v2321_v6, %v524_v61  ;;  %v657_v7 = vadd.f32 %v2321_v6, %v525_v62  ;;  %v2105_v62 = vld [vmem:[%s2308_s20 + $0xb0] sm:$0xff]  }
  0x43   : > { %v1037_v8 = vsel %vm781_vm12, %v653_v57, %v909_v1  ;;  %v658_v9 = vadd.f32 %v2321_v6, %v526_v2  ;;  %v1579_v10 = vunpack.c.h.bf16 %v2100_v51  ;;  %v527_v11 = vmul.f32 %v2313_v0, %v1578_v63 }
  0x44   : > { %v1038_v12 = vsel %vm782_vm13, %v654_v58, %v910_v3  ;;  %vm783_vm14 = vcmp.ge.f32.partialorder %v655_v4, 0.0  ;;  %vm784_vm15 = vcmp.ge.f32.partialorder %v656_v5, 0.0  ;;  %v911_v13 = vmul.f32 0.01, %v655_v4  ;;  %v2106_v3 = vld [vmem:[%s2308_s20 + $0xb8] sm:$0xff]  }
  0x45   : > { %v1837_v15 = vpack.c.bf16 %v1038_v12, %v1037_v8  ;;  %v912_v16 = vmul.f32 0.01, %v656_v5  ;;  %vm785_vm0 = vcmp.ge.f32.partialorder %v657_v7, 0.0  ;;  %vm786_vm1 = vcmp.ge.f32.partialorder %v658_v9, 0.0 }
  0x46   : > { %v1039_v17 = vsel %vm783_vm14, %v655_v4, %v911_v13  ;;  %v913_v18 = vmul.f32 0.01, %v657_v7  ;;  %v914_v19 = vmul.f32 0.01, %v658_v9  ;;  %v528_v20 = vmul.f32 %v2313_v0, %v1579_v10 }
  0x47   : > { %2160 = vst [vmem:[%s2345_s27 + $0x70] sm:$0xff] %v1837_v15   ;;  %v1040_v21 = vsel %vm784_vm15, %v656_v5, %v912_v16  ;;  %v659_v22 = vadd.f32 %v2321_v6, %v527_v11  ;;  %v1582_v23 = vunpack.c.l.bf16 %v2101_v14  ;;  %v1583_v24 = vunpack.c.h.bf16 %v2101_v14 }
  0x48   : > { %v1842_v26 = vpack.c.bf16 %v1040_v21, %v1039_v17  ;;  %v1041_v27 = vsel %vm785_vm0, %v657_v7, %v913_v18  ;;  %v1042_v28 = vsel %vm786_vm1, %v658_v9, %v914_v19  ;;  %v660_v29 = vadd.f32 %v2321_v6, %v528_v20  ;;  %v2107_v20 = vld [vmem:[%s2308_s20 + $0xc0] sm:$0xff]  }
  0x49   : > { %v1847_v31 = vpack.c.bf16 %v1042_v28, %v1041_v27  ;;  %vm787_vm2 = vcmp.ge.f32.partialorder %v659_v22, 0.0  ;;  %v915_v32 = vmul.f32 0.01, %v659_v22  ;;  %v529_v33 = vmul.f32 %v2313_v0, %v1582_v23 }
  0x4a   : > { %2161 = vst [vmem:[%s2345_s27 + $0x78] sm:$0xff] %v1842_v26   ;;  %vm788_vm3 = vcmp.ge.f32.partialorder %v660_v29, 0.0  ;;  %v916_v34 = vmul.f32 0.01, %v660_v29  ;;  %v530_v35 = vmul.f32 %v2313_v0, %v1583_v24  ;;  %v1586_v36 = vunpack.c.l.bf16 %v2102_v25 }
  0x4b   : > { %2162 = vst [vmem:[%s2345_s27 + $0x80] sm:$0xff] %v1847_v31   ;;  %v1043_v37 = vsel %vm787_vm2, %v659_v22, %v915_v32  ;;  %v661_v38 = vadd.f32 %v2321_v6, %v529_v33  ;;  %v1587_v39 = vunpack.c.h.bf16 %v2102_v25  ;;  %v1590_v40 = vunpack.c.l.bf16 %v2103_v30 }
  0x4c   : > { %v1044_v41 = vsel %vm788_vm3, %v660_v29, %v916_v34  ;;  %v662_v42 = vadd.f32 %v2321_v6, %v530_v35  ;;  %v531_v43 = vmul.f32 %v2313_v0, %v1586_v36  ;;  %v1591_v44 = vunpack.c.h.bf16 %v2103_v30  ;;  %v2108_v34 = vld [vmem:[%s2308_s20 + $0xc8] sm:$0xff]  }
  0x4d   : > { %v1852_v46 = vpack.c.bf16 %v1044_v41, %v1043_v37  ;;  %vm789_vm4 = vcmp.ge.f32.partialorder %v661_v38, 0.0  ;;  %v917_v47 = vmul.f32 0.01, %v661_v38  ;;  %v532_v48 = vmul.f32 %v2313_v0, %v1587_v39 }
  0x4e   : > { %vm790_vm5 = vcmp.ge.f32.partialorder %v662_v42, 0.0  ;;  %v918_v49 = vmul.f32 0.01, %v662_v42  ;;  %v663_v50 = vadd.f32 %v2321_v6, %v531_v43  ;;  %v533_v51 = vmul.f32 %v2313_v0, %v1590_v40 }
  0x4f   : > { %2163 = vst [vmem:[%s2345_s27 + $0x88] sm:$0xff] %v1852_v46   ;;  %v1045_v52 = vsel %vm789_vm4, %v661_v38, %v917_v47  ;;  %v664_v53 = vadd.f32 %v2321_v6, %v532_v48  ;;  %v534_v54 = vmul.f32 %v2313_v0, %v1591_v44  ;;  %v1594_v55 = vunpack.c.l.bf16 %v2104_v45  ;;  %v2109_v44 = vld [vmem:[%s2308_s20 + $0xd0] sm:$0xff]  }
  0x50   : > { %v1046_v56 = vsel %vm790_vm5, %v662_v42, %v918_v49  ;;  %vm791_vm6 = vcmp.ge.f32.partialorder %v663_v50, 0.0  ;;  %v919_v57 = vmul.f32 0.01, %v663_v50  ;;  %v665_v58 = vadd.f32 %v2321_v6, %v533_v51 }
  0x51   : > { %v1857_v59 = vpack.c.bf16 %v1046_v56, %v1045_v52  ;;  %vm792_vm7 = vcmp.ge.f32.partialorder %v664_v53, 0.0  ;;  %v920_v60 = vmul.f32 0.01, %v664_v53  ;;  %v666_v61 = vadd.f32 %v2321_v6, %v534_v54 }
  0x52   : > { %v1047_v63 = vsel %vm791_vm6, %v663_v50, %v919_v57  ;;  %vm793_vm8 = vcmp.ge.f32.partialorder %v665_v58, 0.0  ;;  %v921_v1 = vmul.f32 0.01, %v665_v58  ;;  %v1595_v2 = vunpack.c.h.bf16 %v2104_v45  ;;  %v2110_v45 = vld [vmem:[%s2308_s20 + $0xd8] sm:$0xff]  }
  0x53   : > { %2164 = vst [vmem:[%s2345_s27 + $0x90] sm:$0xff] %v1857_v59   ;;  %v1048_v4 = vsel %vm792_vm7, %v664_v53, %v920_v60  ;;  %vm794_vm9 = vcmp.ge.f32.partialorder %v666_v61, 0.0  ;;  %v922_v5 = vmul.f32 0.01, %v666_v61  ;;  %v535_v7 = vmul.f32 %v2313_v0, %v1594_v55 }
  0x54   : > { %v1862_v8 = vpack.c.bf16 %v1048_v4, %v1047_v63  ;;  %v1049_v9 = vsel %vm793_vm8, %v665_v58, %v921_v1  ;;  %v536_v10 = vmul.f32 %v2313_v0, %v1595_v2  ;;  %v1598_v11 = vunpack.c.l.bf16 %v2105_v62 }
  0x55   : > { %v1050_v12 = vsel %vm794_vm9, %v666_v61, %v922_v5  ;;  %v667_v13 = vadd.f32 %v2321_v6, %v535_v7  ;;  %v1599_v14 = vunpack.c.h.bf16 %v2105_v62  ;;  %v1602_v15 = vunpack.c.l.bf16 %v2106_v3 }
  0x56   : > { %2165 = vst [vmem:[%s2345_s27 + $0x98] sm:$0xff] %v1862_v8   ;;  %v1867_v16 = vpack.c.bf16 %v1050_v12, %v1049_v9  ;;  %v668_v17 = vadd.f32 %v2321_v6, %v536_v10  ;;  %v537_v18 = vmul.f32 %v2313_v0, %v1598_v11  ;;  %v1603_v19 = vunpack.c.h.bf16 %v2106_v3  ;;  %v2111_v12 = vld [vmem:[%s2308_s20 + $0xe0] sm:$0xff]  }
  0x57   : > { %vm795_vm10 = vcmp.ge.f32.partialorder %v667_v13, 0.0  ;;  %v923_v21 = vmul.f32 0.01, %v667_v13  ;;  %v538_v22 = vmul.f32 %v2313_v0, %v1599_v14  ;;  %v539_v23 = vmul.f32 %v2313_v0, %v1602_v15 }
  0x58   : > { %2166 = vst [vmem:[%s2345_s27 + $0xa0] sm:$0xff] %v1867_v16   ;;  %vm796_vm11 = vcmp.ge.f32.partialorder %v668_v17, 0.0  ;;  %v924_v24 = vmul.f32 0.01, %v668_v17  ;;  %v669_v25 = vadd.f32 %v2321_v6, %v537_v18  ;;  %v540_v26 = vmul.f32 %v2313_v0, %v1603_v19  ;;  %v2112_v16 = vld [vmem:[%s2308_s20 + $0xe8] sm:$0xff]  }
  0x59   : > { %v1051_v27 = vsel %vm795_vm10, %v667_v13, %v923_v21  ;;  %v670_v28 = vadd.f32 %v2321_v6, %v538_v22  ;;  %v671_v29 = vadd.f32 %v2321_v6, %v539_v23  ;;  %v1606_v30 = vunpack.c.l.bf16 %v2107_v20 }
  0x5a   : > { %v1052_v31 = vsel %vm796_vm11, %v668_v17, %v924_v24  ;;  %vm797_vm12 = vcmp.ge.f32.partialorder %v669_v25, 0.0  ;;  %v925_v32 = vmul.f32 0.01, %v669_v25  ;;  %v672_v33 = vadd.f32 %v2321_v6, %v540_v26 }
  0x5b   : > { %v1872_v35 = vpack.c.bf16 %v1052_v31, %v1051_v27  ;;  %vm798_vm13 = vcmp.ge.f32.partialorder %v670_v28, 0.0  ;;  %v926_v36 = vmul.f32 0.01, %v670_v28  ;;  %vm799_vm14 = vcmp.ge.f32.partialorder %v671_v29, 0.0 }
  0x5c   : > { %v1053_v37 = vsel %vm797_vm12, %v669_v25, %v925_v32  ;;  %vm800_vm15 = vcmp.ge.f32.partialorder %v672_v33, 0.0  ;;  %v927_v38 = vmul.f32 0.01, %v671_v29  ;;  %v928_v39 = vmul.f32 0.01, %v672_v33 }
  0x5d   : > { %2167 = vst [vmem:[%s2345_s27 + $0xa8] sm:$0xff] %v1872_v35   ;;  %v1054_v40 = vsel %vm798_vm13, %v670_v28, %v926_v36  ;;  %v1607_v41 = vunpack.c.h.bf16 %v2107_v20  ;;  %v541_v42 = vmul.f32 %v2313_v0, %v1606_v30  ;;  %v1610_v43 = vunpack.c.l.bf16 %v2108_v34  ;;  %v2113_v28 = vld [vmem:[%s2308_s20 + $0xf0] sm:$0xff]  }
  0x5e   : > { %v1877_v46 = vpack.c.bf16 %v1054_v40, %v1053_v37  ;;  %v1055_v47 = vsel %vm799_vm14, %v671_v29, %v927_v38  ;;  %v1056_v48 = vsel %vm800_vm15, %v672_v33, %v928_v39  ;;  %v1611_v49 = vunpack.c.h.bf16 %v2108_v34 }
  0x5f   : > { %v1882_v50 = vpack.c.bf16 %v1056_v48, %v1055_v47  ;;  %v542_v51 = vmul.f32 %v2313_v0, %v1607_v41  ;;  %v673_v52 = vadd.f32 %v2321_v6, %v541_v42  ;;  %v543_v53 = vmul.f32 %v2313_v0, %v1610_v43 }
  0x60   : > { %2168 = vst [vmem:[%s2345_s27 + $0xb0] sm:$0xff] %v1877_v46   ;;  %v544_v54 = vmul.f32 %v2313_v0, %v1611_v49  ;;  %v1614_v55 = vunpack.c.l.bf16 %v2109_v44  ;;  %v1615_v56 = vunpack.c.h.bf16 %v2109_v44  ;;  %v1618_v57 = vunpack.c.l.bf16 %v2110_v45 }
  0x61   : > { %2169 = vst [vmem:[%s2345_s27 + $0xb8] sm:$0xff] %v1882_v50   ;;  %v674_v58 = vadd.f32 %v2321_v6, %v542_v51  ;;  %vm801_vm0 = vcmp.ge.f32.partialorder %v673_v52, 0.0  ;;  %v929_v59 = vmul.f32 0.01, %v673_v52  ;;  %v675_v60 = vadd.f32 %v2321_v6, %v543_v53  ;;  %v2114_v51 = vld [vmem:[%s2308_s20 + $0xf8] sm:$0xff]  }
  0x62   : > { %v676_v61 = vadd.f32 %v2321_v6, %v544_v54  ;;  %v545_v62 = vmul.f32 %v2313_v0, %v1614_v55  ;;  %v546_v63 = vmul.f32 %v2313_v0, %v1615_v56  ;;  %v1619_v1 = vunpack.c.h.bf16 %v2110_v45  ;;  %v2115_v56 = vld [vmem:[%s2308_s20 + $0x100] sm:$0xff]  }
  0x63   : > { %vm802_vm1 = vcmp.ge.f32.partialorder %v674_v58, 0.0  ;;  %v930_v2 = vmul.f32 0.01, %v674_v58  ;;  %v1057_v3 = vsel %vm801_vm0, %v673_v52, %v929_v59  ;;  %vm803_vm2 = vcmp.ge.f32.partialorder %v675_v60, 0.0 }
  0x64   : > { %vm804_vm3 = vcmp.ge.f32.partialorder %v676_v61, 0.0  ;;  %v931_v4 = vmul.f32 0.01, %v675_v60  ;;  %v932_v5 = vmul.f32 0.01, %v676_v61  ;;  %v677_v7 = vadd.f32 %v2321_v6, %v545_v62 }
  0x65   : > { %v1058_v8 = vsel %vm802_vm1, %v674_v58, %v930_v2  ;;  %v678_v9 = vadd.f32 %v2321_v6, %v546_v63  ;;  %v547_v10 = vmul.f32 %v2313_v0, %v1618_v57  ;;  %v548_v11 = vmul.f32 %v2313_v0, %v1619_v1 }
  0x66   : > { %v1887_v13 = vpack.c.bf16 %v1058_v8, %v1057_v3  ;;  %v1059_v14 = vsel %vm803_vm2, %v675_v60, %v931_v4  ;;  %v1060_v15 = vsel %vm804_vm3, %v676_v61, %v932_v5  ;;  %vm805_vm4 = vcmp.ge.f32.partialorder %v677_v7, 0.0  ;;  %v2116_v60 = vld [vmem:[%s2308_s20 + $0x108] sm:$0xff]   ;;  %v2117_v5 = vld [vmem:[%s2308_s20 + $0x110] sm:$0xff]  }
  0x67   : > { %v1892_v17 = vpack.c.bf16 %v1060_v15, %v1059_v14  ;;  %vm806_vm5 = vcmp.ge.f32.partialorder %v678_v9, 0.0  ;;  %v933_v18 = vmul.f32 0.01, %v677_v7  ;;  %v934_v19 = vmul.f32 0.01, %v678_v9 }
  0x68   : > { %2170 = vst [vmem:[%s2345_s27 + $0xc0] sm:$0xff] %v1887_v13   ;;  %v679_v20 = vadd.f32 %v2321_v6, %v547_v10  ;;  %v680_v21 = vadd.f32 %v2321_v6, %v548_v11  ;;  %v1622_v22 = vunpack.c.l.bf16 %v2111_v12  ;;  %v1623_v23 = vunpack.c.h.bf16 %v2111_v12 }
  0x69   : > { %2171 = vst [vmem:[%s2345_s27 + $0xc8] sm:$0xff] %v1892_v17   ;;  %v1061_v24 = vsel %vm805_vm4, %v677_v7, %v933_v18  ;;  %v1062_v25 = vsel %vm806_vm5, %v678_v9, %v934_v19  ;;  %v1626_v26 = vunpack.c.l.bf16 %v2112_v16  ;;  %v1627_v27 = vunpack.c.h.bf16 %v2112_v16 }
  0x6a   : > { %v1897_v29 = vpack.c.bf16 %v1062_v25, %v1061_v24  ;;  %vm807_vm6 = vcmp.ge.f32.partialorder %v679_v20, 0.0  ;;  %vm808_vm7 = vcmp.ge.f32.partialorder %v680_v21, 0.0  ;;  %v935_v30 = vmul.f32 0.01, %v679_v20 }
  0x6b   : > { %v936_v31 = vmul.f32 0.01, %v680_v21  ;;  %v549_v32 = vmul.f32 %v2313_v0, %v1622_v22  ;;  %v550_v33 = vmul.f32 %v2313_v0, %v1623_v23  ;;  %v551_v34 = vmul.f32 %v2313_v0, %v1626_v26 }
  0x6c   : > { %2172 = vst [vmem:[%s2345_s27 + $0xd0] sm:$0xff] %v1897_v29   ;;  %v1063_v35 = vsel %vm807_vm6, %v679_v20, %v935_v30  ;;  %v552_v36 = vmul.f32 %v2313_v0, %v1627_v27  ;;  %v1630_v37 = vunpack.c.l.bf16 %v2113_v28  ;;  %v1631_v38 = vunpack.c.h.bf16 %v2113_v28 }
  0x6d   : > { %v1064_v39 = vsel %vm808_vm7, %v680_v21, %v936_v31  ;;  %v681_v40 = vadd.f32 %v2321_v6, %v549_v32  ;;  %v682_v41 = vadd.f32 %v2321_v6, %v550_v33  ;;  %v683_v42 = vadd.f32 %v2321_v6, %v551_v34  ;;  %v2118_v33 = vld [vmem:[%s2308_s20 + $0x118] sm:$0xff]   ;;  %v2119_v34 = vld [vmem:[%s2308_s20 + $0x120] sm:$0xff]  }
  0x6e   : > { %v1902_v43 = vpack.c.bf16 %v1064_v39, %v1063_v35  ;;  %v684_v44 = vadd.f32 %v2321_v6, %v552_v36  ;;  %v553_v45 = vmul.f32 %v2313_v0, %v1630_v37  ;;  %v554_v46 = vmul.f32 %v2313_v0, %v1631_v38 }
  0x6f   : > { %vm809_vm8 = vcmp.ge.f32.partialorder %v681_v40, 0.0  ;;  %vm810_vm9 = vcmp.ge.f32.partialorder %v682_v41, 0.0  ;;  %v937_v47 = vmul.f32 0.01, %v681_v40  ;;  %v938_v48 = vmul.f32 0.01, %v682_v41 }
  0x70   : > { %2173 = vst [vmem:[%s2345_s27 + $0xd8] sm:$0xff] %v1902_v43   ;;  %vm811_vm10 = vcmp.ge.f32.partialorder %v683_v42, 0.0  ;;  %vm812_vm11 = vcmp.ge.f32.partialorder %v684_v44, 0.0  ;;  %v939_v49 = vmul.f32 0.01, %v683_v42  ;;  %v685_v50 = vadd.f32 %v2321_v6, %v553_v45 }
  0x71   : > { %v1065_v52 = vsel %vm809_vm8, %v681_v40, %v937_v47  ;;  %v1066_v53 = vsel %vm810_vm9, %v682_v41, %v938_v48  ;;  %v940_v54 = vmul.f32 0.01, %v684_v44  ;;  %v686_v55 = vadd.f32 %v2321_v6, %v554_v46  ;;  %v2535_v40 = vld [vmem:[%s2732_s1] ss:$0 sm:$0xff] }
  0x72   : > { %v1907_v57 = vpack.c.bf16 %v1066_v53, %v1065_v52  ;;  %v1067_v58 = vsel %vm811_vm10, %v683_v42, %v939_v49  ;;  %vm813_vm12 = vcmp.ge.f32.partialorder %v685_v50, 0.0  ;;  %v941_v59 = vmul.f32 0.01, %v685_v50  ;;  %v2120_v42 = vld [vmem:[%s2308_s20 + $0x128] sm:$0xff]   ;;  %v2545_v48 = vld [vmem:[%s2733_s2] ss:$0 sm:$0xff] }
  0x73   : > { %v1068_v61 = vsel %vm812_vm11, %v684_v44, %v940_v54  ;;  %vm814_vm13 = vcmp.ge.f32.partialorder %v686_v55, 0.0  ;;  %v942_v62 = vmul.f32 0.01, %v686_v55  ;;  %v1634_v63 = vunpack.c.l.bf16 %v2114_v51 }
  0x74   : > { %2174 = vst [vmem:[%s2345_s27 + $0xe0] sm:$0xff] %v1907_v57   ;;  %v1912_v1 = vpack.c.bf16 %v1068_v61, %v1067_v58  ;;  %v1069_v2 = vsel %vm813_vm12, %v685_v50, %v941_v59  ;;  %v1635_v3 = vunpack.c.h.bf16 %v2114_v51  ;;  %v1638_v4 = vunpack.c.l.bf16 %v2115_v56 }
  0x75   : > { %v1070_v7 = vsel %vm814_vm13, %v686_v55, %v942_v62  ;;  %v555_v8 = vmul.f32 %v2313_v0, %v1634_v63  ;;  %v1639_v9 = vunpack.c.h.bf16 %v2115_v56  ;;  %v1642_v10 = vunpack.c.l.bf16 %v2116_v60 }
  0x76   : > { %2175 = vst [vmem:[%s2345_s27 + $0xe8] sm:$0xff] %v1912_v1   ;;  %v1917_v11 = vpack.c.bf16 %v1070_v7, %v1069_v2  ;;  %v556_v12 = vmul.f32 %v2313_v0, %v1635_v3  ;;  %v557_v13 = vmul.f32 %v2313_v0, %v1638_v4  ;;  %v1643_v14 = vunpack.c.h.bf16 %v2116_v60 }
  0x77   : > { %v687_v15 = vadd.f32 %v2321_v6, %v555_v8  ;;  %v558_v16 = vmul.f32 %v2313_v0, %v1639_v9  ;;  %v559_v17 = vmul.f32 %v2313_v0, %v1642_v10  ;;  %v1646_v18 = vunpack.c.l.bf16 %v2117_v5 }
  0x78   : > { %2176 = vst [vmem:[%s2345_s27 + $0xf0] sm:$0xff] %v1917_v11   ;;  %v688_v19 = vadd.f32 %v2321_v6, %v556_v12  ;;  %v689_v20 = vadd.f32 %v2321_v6, %v557_v13  ;;  %v560_v21 = vmul.f32 %v2313_v0, %v1643_v14  ;;  %v1647_v22 = vunpack.c.h.bf16 %v2117_v5  ;;  %v2121_v5 = vld [vmem:[%s2308_s20 + $0x130] sm:$0xff]  }
  0x79   : > { %vm815_vm14 = vcmp.ge.f32.partialorder %v687_v15, 0.0  ;;  %v943_v23 = vmul.f32 0.01, %v687_v15  ;;  %v690_v24 = vadd.f32 %v2321_v6, %v558_v16  ;;  %v691_v25 = vadd.f32 %v2321_v6, %v559_v17  ;;  %v2122_v17 = vld [vmem:[%s2308_s20 + $0x138] sm:$0xff]  }
  0x7a   : > { %vm816_vm15 = vcmp.ge.f32.partialorder %v688_v19, 0.0  ;;  %v944_v26 = vmul.f32 0.01, %v688_v19  ;;  %vm817_vm0 = vcmp.ge.f32.partialorder %v689_v20, 0.0  ;;  %v945_v27 = vmul.f32 0.01, %v689_v20 }
  0x7b   : > { %v1071_v28 = vsel %vm815_vm14, %v687_v15, %v943_v23  ;;  %vm818_vm1 = vcmp.ge.f32.partialorder %v690_v24, 0.0  ;;  %v946_v29 = vmul.f32 0.01, %v690_v24  ;;  %v692_v30 = vadd.f32 %v2321_v6, %v560_v21 }
  0x7c   : > { %v1072_v0 = vsel %vm816_vm15, %v688_v19, %v944_v26  ;;  %v1073_v31 = vsel %vm817_vm0, %v689_v20, %v945_v27  ;;  %vm819_vm2 = vcmp.ge.f32.partialorder %v691_v25, 0.0  ;;  %v947_v32 = vmul.f32 0.01, %v691_v25 }
  0x7d   : > { %v1922_v35 = vpack.c.bf16 %v1072_v0, %v1071_v28  ;;  %v1074_v36 = vsel %vm818_vm1, %v690_v24, %v946_v29  ;;  %vm820_vm3 = vcmp.ge.f32.partialorder %v692_v30, 0.0  ;;  %v948_v37 = vmul.f32 0.01, %v692_v30 }
  0x7e   : > { %v1927_v38 = vpack.c.bf16 %v1074_v36, %v1073_v31  ;;  %v1075_v39 = vsel %vm819_vm2, %v691_v25, %v947_v32  ;;  %v561_v6 = vmul.f32 %v2535_v40, %v1646_v18  ;;  %v562_v41 = vmul.f32 %v2535_v40, %v1647_v22  ;;  %v2123_v22 = vld [vmem:[%s2308_s20 + $0x140] sm:$0xff]   ;;  %v2124_v36 = vld [vmem:[%s2308_s20 + $0x148] sm:$0xff]  }
  0x7f   : > { %2177 = vst [vmem:[%s2345_s27 + $0xf8] sm:$0xff] %v1922_v35   ;;  %v1076_v43 = vsel %vm820_vm3, %v692_v30, %v948_v37  ;;  %v1650_v44 = vunpack.c.l.bf16 %v2118_v33  ;;  %v1651_v45 = vunpack.c.h.bf16 %v2118_v33  ;;  %v1654_v46 = vunpack.c.l.bf16 %v2119_v34 }
  0x80   : > { %2178 = vst [vmem:[%s2345_s27 + $0x100] sm:$0xff] %v1927_v38   ;;  %v1932_v47 = vpack.c.bf16 %v1076_v43, %v1075_v39  ;;  %v693_v49 = vadd.f32 %v2545_v48, %v561_v6  ;;  %v694_v50 = vadd.f32 %v2545_v48, %v562_v41  ;;  %v1655_v51 = vunpack.c.h.bf16 %v2119_v34 }
  0x81   : > { %v563_v52 = vmul.f32 %v2535_v40, %v1650_v44  ;;  %v564_v53 = vmul.f32 %v2535_v40, %v1651_v45  ;;  %v565_v54 = vmul.f32 %v2535_v40, %v1654_v46  ;;  %v1658_v55 = vunpack.c.l.bf16 %v2120_v42 }
  0x82   : > { %2179 = vst [vmem:[%s2345_s27 + $0x108] sm:$0xff] %v1932_v47   ;;  %vm821_vm4 = vcmp.ge.f32.partialorder %v693_v49, 0.0  ;;  %vm822_vm5 = vcmp.ge.f32.partialorder %v694_v50, 0.0  ;;  %v949_v56 = vmul.f32 0.01, %v693_v49  ;;  %v566_v57 = vmul.f32 %v2535_v40, %v1655_v51 }
  0x83   : > { %v950_v58 = vmul.f32 0.01, %v694_v50  ;;  %v695_v59 = vadd.f32 %v2545_v48, %v563_v52  ;;  %v696_v60 = vadd.f32 %v2545_v48, %v564_v53  ;;  %v697_v61 = vadd.f32 %v2545_v48, %v565_v54  ;;  %v2125_v54 = vld [vmem:[%s2308_s20 + $0x150] sm:$0xff]  }
  0x84   : > { %v1077_v62 = vsel %vm821_vm4, %v693_v49, %v949_v56  ;;  %v698_v63 = vadd.f32 %v2545_v48, %v566_v57  ;;  %v1659_v1 = vunpack.c.h.bf16 %v2120_v42  ;;  %v567_v2 = vmul.f32 %v2535_v40, %v1658_v55 }
  0x85   : > { %v1078_v3 = vsel %vm822_vm5, %v694_v50, %v950_v58  ;;  %vm823_vm6 = vcmp.ge.f32.partialorder %v695_v59, 0.0  ;;  %vm824_vm7 = vcmp.ge.f32.partialorder %v696_v60, 0.0  ;;  %v951_v4 = vmul.f32 0.01, %v695_v59  ;;  %v2126_v58 = vld [vmem:[%s2308_s20 + $0x158] sm:$0xff]  }
  0x86   : > { %v1937_v7 = vpack.c.bf16 %v1078_v3, %v1077_v62  ;;  %v952_v8 = vmul.f32 0.01, %v696_v60  ;;  %vm825_vm8 = vcmp.ge.f32.partialorder %v697_v61, 0.0  ;;  %vm826_vm9 = vcmp.ge.f32.partialorder %v698_v63, 0.0 }
  0x87   : > { %v1079_v9 = vsel %vm823_vm6, %v695_v59, %v951_v4  ;;  %v953_v10 = vmul.f32 0.01, %v697_v61  ;;  %v954_v11 = vmul.f32 0.01, %v698_v63  ;;  %v568_v12 = vmul.f32 %v2535_v40, %v1659_v1 }
  0x88   : > { %2180 = vst [vmem:[%s2345_s27 + $0x110] sm:$0xff] %v1937_v7   ;;  %v1080_v13 = vsel %vm824_vm7, %v696_v60, %v952_v8  ;;  %v699_v14 = vadd.f32 %v2545_v48, %v567_v2  ;;  %v1662_v15 = vunpack.c.l.bf16 %v2121_v5  ;;  %v1663_v16 = vunpack.c.h.bf16 %v2121_v5 }
  0x89   : > { %v1942_v18 = vpack.c.bf16 %v1080_v13, %v1079_v9  ;;  %v1081_v19 = vsel %vm825_vm8, %v697_v61, %v953_v10  ;;  %v1082_v20 = vsel %vm826_vm9, %v698_v63, %v954_v11  ;;  %v700_v21 = vadd.f32 %v2545_v48, %v568_v12  ;;  %v2127_v12 = vld [vmem:[%s2308_s20 + $0x160] sm:$0xff]  }
  0x8a   : > { %v1947_v23 = vpack.c.bf16 %v1082_v20, %v1081_v19  ;;  %vm827_vm10 = vcmp.ge.f32.partialorder %v699_v14, 0.0  ;;  %v955_v24 = vmul.f32 0.01, %v699_v14  ;;  %v569_v25 = vmul.f32 %v2535_v40, %v1662_v15 }
  0x8b   : > { %2181 = vst [vmem:[%s2345_s27 + $0x118] sm:$0xff] %v1942_v18   ;;  %vm828_vm11 = vcmp.ge.f32.partialorder %v700_v21, 0.0  ;;  %v956_v26 = vmul.f32 0.01, %v700_v21  ;;  %v570_v27 = vmul.f32 %v2535_v40, %v1663_v16  ;;  %v1666_v28 = vunpack.c.l.bf16 %v2122_v17 }
  0x8c   : > { %2182 = vst [vmem:[%s2345_s27 + $0x120] sm:$0xff] %v1947_v23   ;;  %v1083_v29 = vsel %vm827_vm10, %v699_v14, %v955_v24  ;;  %v701_v30 = vadd.f32 %v2545_v48, %v569_v25  ;;  %v1667_v0 = vunpack.c.h.bf16 %v2122_v17  ;;  %v1670_v31 = vunpack.c.l.bf16 %v2123_v22 }
  0x8d   : > { %v1084_v32 = vsel %vm828_vm11, %v700_v21, %v956_v26  ;;  %v702_v33 = vadd.f32 %v2545_v48, %v570_v27  ;;  %v571_v34 = vmul.f32 %v2535_v40, %v1666_v28  ;;  %v1671_v35 = vunpack.c.h.bf16 %v2123_v22  ;;  %v2128_v26 = vld [vmem:[%s2308_s20 + $0x168] sm:$0xff]  }
  0x8e   : > { %v1952_v37 = vpack.c.bf16 %v1084_v32, %v1083_v29  ;;  %vm829_vm12 = vcmp.ge.f32.partialorder %v701_v30, 0.0  ;;  %v957_v38 = vmul.f32 0.01, %v701_v30  ;;  %v572_v39 = vmul.f32 %v2535_v40, %v1667_v0 }
  0x8f   : > { %vm830_vm13 = vcmp.ge.f32.partialorder %v702_v33, 0.0  ;;  %v958_v6 = vmul.f32 0.01, %v702_v33  ;;  %v703_v41 = vadd.f32 %v2545_v48, %v571_v34  ;;  %v573_v42 = vmul.f32 %v2535_v40, %v1670_v31 }
  0x90   : > { %2183 = vst [vmem:[%s2345_s27 + $0x128] sm:$0xff] %v1952_v37   ;;  %v1085_v43 = vsel %vm829_vm12, %v701_v30, %v957_v38  ;;  %v704_v44 = vadd.f32 %v2545_v48, %v572_v39  ;;  %v574_v45 = vmul.f32 %v2535_v40, %v1671_v35  ;;  %v1674_v46 = vunpack.c.l.bf16 %v2124_v36  ;;  %v2129_v35 = vld [vmem:[%s2308_s20 + $0x170] sm:$0xff]  }
  0x91   : > { %v1086_v47 = vsel %vm830_vm13, %v702_v33, %v958_v6  ;;  %vm831_vm14 = vcmp.ge.f32.partialorder %v703_v41, 0.0  ;;  %v959_v49 = vmul.f32 0.01, %v703_v41  ;;  %v705_v50 = vadd.f32 %v2545_v48, %v573_v42 }
  0x92   : > { %v1957_v51 = vpack.c.bf16 %v1086_v47, %v1085_v43  ;;  %vm832_vm15 = vcmp.ge.f32.partialorder %v704_v44, 0.0  ;;  %v960_v52 = vmul.f32 0.01, %v704_v44  ;;  %v706_v53 = vadd.f32 %v2545_v48, %v574_v45 }
  0x93   : > { %v1087_v55 = vsel %vm831_vm14, %v703_v41, %v959_v49  ;;  %vm833_vm0 = vcmp.ge.f32.partialorder %v705_v50, 0.0  ;;  %v961_v56 = vmul.f32 0.01, %v705_v50  ;;  %v1675_v57 = vunpack.c.h.bf16 %v2124_v36  ;;  %v2130_v36 = vld [vmem:[%s2308_s20 + $0x178] sm:$0xff]  }
  0x94   : > { %2184 = vst [vmem:[%s2345_s27 + $0x130] sm:$0xff] %v1957_v51   ;;  %v1088_v59 = vsel %vm832_vm15, %v704_v44, %v960_v52  ;;  %vm834_vm1 = vcmp.ge.f32.partialorder %v706_v53, 0.0  ;;  %v962_v60 = vmul.f32 0.01, %v706_v53  ;;  %v575_v61 = vmul.f32 %v2535_v40, %v1674_v46 }
  0x95   : > { %v1962_v62 = vpack.c.bf16 %v1088_v59, %v1087_v55  ;;  %v1089_v63 = vsel %vm833_vm0, %v705_v50, %v961_v56  ;;  %v576_v1 = vmul.f32 %v2535_v40, %v1675_v57  ;;  %v1678_v2 = vunpack.c.l.bf16 %v2125_v54 }
  0x96   : > { %v1090_v3 = vsel %vm834_vm1, %v706_v53, %v962_v60  ;;  %v707_v4 = vadd.f32 %v2545_v48, %v575_v61  ;;  %v1679_v5 = vunpack.c.h.bf16 %v2125_v54  ;;  %v1682_v7 = vunpack.c.l.bf16 %v2126_v58 }
  0x97   : > { %2185 = vst [vmem:[%s2345_s27 + $0x138] sm:$0xff] %v1962_v62   ;;  %v1967_v8 = vpack.c.bf16 %v1090_v3, %v1089_v63  ;;  %v708_v9 = vadd.f32 %v2545_v48, %v576_v1  ;;  %v577_v10 = vmul.f32 %v2535_v40, %v1678_v2  ;;  %v1683_v11 = vunpack.c.h.bf16 %v2126_v58  ;;  %v2131_v3 = vld [vmem:[%s2308_s20 + $0x180] sm:$0xff]  }
  0x98   : > { %vm835_vm2 = vcmp.ge.f32.partialorder %v707_v4, 0.0  ;;  %v963_v13 = vmul.f32 0.01, %v707_v4  ;;  %v578_v14 = vmul.f32 %v2535_v40, %v1679_v5  ;;  %v579_v15 = vmul.f32 %v2535_v40, %v1682_v7 }
  0x99   : > { %2186 = vst [vmem:[%s2345_s27 + $0x140] sm:$0xff] %v1967_v8   ;;  %vm836_vm3 = vcmp.ge.f32.partialorder %v708_v9, 0.0  ;;  %v964_v16 = vmul.f32 0.01, %v708_v9  ;;  %v709_v17 = vadd.f32 %v2545_v48, %v577_v10  ;;  %v580_v18 = vmul.f32 %v2535_v40, %v1683_v11  ;;  %v2132_v8 = vld [vmem:[%s2308_s20 + $0x188] sm:$0xff]  }
  0x9a   : > { %v1091_v19 = vsel %vm835_vm2, %v707_v4, %v963_v13  ;;  %v710_v20 = vadd.f32 %v2545_v48, %v578_v14  ;;  %v711_v21 = vadd.f32 %v2545_v48, %v579_v15  ;;  %v1686_v22 = vunpack.c.l.bf16 %v2127_v12 }
  0x9b   : > { %v1092_v23 = vsel %vm836_vm3, %v708_v9, %v964_v16  ;;  %vm837_vm4 = vcmp.ge.f32.partialorder %v709_v17, 0.0  ;;  %v965_v24 = vmul.f32 0.01, %v709_v17  ;;  %v712_v25 = vadd.f32 %v2545_v48, %v580_v18 }
  0x9c   : > { %v1972_v27 = vpack.c.bf16 %v1092_v23, %v1091_v19  ;;  %vm838_vm5 = vcmp.ge.f32.partialorder %v710_v20, 0.0  ;;  %v966_v28 = vmul.f32 0.01, %v710_v20  ;;  %vm839_vm6 = vcmp.ge.f32.partialorder %v711_v21, 0.0 }
  0x9d   : > { %v1093_v29 = vsel %vm837_vm4, %v709_v17, %v965_v24  ;;  %vm840_vm7 = vcmp.ge.f32.partialorder %v712_v25, 0.0  ;;  %v967_v30 = vmul.f32 0.01, %v711_v21  ;;  %v968_v0 = vmul.f32 0.01, %v712_v25 }
  0x9e   : > { %2187 = vst [vmem:[%s2345_s27 + $0x148] sm:$0xff] %v1972_v27   ;;  %v1094_v31 = vsel %vm838_vm5, %v710_v20, %v966_v28  ;;  %v1687_v32 = vunpack.c.h.bf16 %v2127_v12  ;;  %v581_v33 = vmul.f32 %v2535_v40, %v1686_v22  ;;  %v1690_v34 = vunpack.c.l.bf16 %v2128_v26  ;;  %v2133_v20 = vld [vmem:[%s2308_s20 + $0x190] sm:$0xff]  }
  0x9f   : > { %v1977_v37 = vpack.c.bf16 %v1094_v31, %v1093_v29  ;;  %v1095_v38 = vsel %vm839_vm6, %v711_v21, %v967_v30  ;;  %v1096_v39 = vsel %vm840_vm7, %v712_v25, %v968_v0  ;;  %v1691_v6 = vunpack.c.h.bf16 %v2128_v26 }
  0xa0   : > { %v1982_v41 = vpack.c.bf16 %v1096_v39, %v1095_v38  ;;  %v582_v42 = vmul.f32 %v2535_v40, %v1687_v32  ;;  %v713_v43 = vadd.f32 %v2545_v48, %v581_v33  ;;  %v583_v44 = vmul.f32 %v2535_v40, %v1690_v34 }
  0xa1   : > { %2188 = vst [vmem:[%s2345_s27 + $0x150] sm:$0xff] %v1977_v37   ;;  %v584_v45 = vmul.f32 %v2535_v40, %v1691_v6  ;;  %v1694_v46 = vunpack.c.l.bf16 %v2129_v35  ;;  %v1695_v47 = vunpack.c.h.bf16 %v2129_v35  ;;  %v1698_v49 = vunpack.c.l.bf16 %v2130_v36 }
  0xa2   : > { %2189 = vst [vmem:[%s2345_s27 + $0x158] sm:$0xff] %v1982_v41   ;;  %v714_v50 = vadd.f32 %v2545_v48, %v582_v42  ;;  %vm841_vm8 = vcmp.ge.f32.partialorder %v713_v43, 0.0  ;;  %v969_v51 = vmul.f32 0.01, %v713_v43  ;;  %v715_v52 = vadd.f32 %v2545_v48, %v583_v44  ;;  %v2134_v42 = vld [vmem:[%s2308_s20 + $0x198] sm:$0xff]  }
  0xa3   : > { %v716_v53 = vadd.f32 %v2545_v48, %v584_v45  ;;  %v585_v54 = vmul.f32 %v2535_v40, %v1694_v46  ;;  %v586_v55 = vmul.f32 %v2535_v40, %v1695_v47  ;;  %v1699_v56 = vunpack.c.h.bf16 %v2130_v36  ;;  %v2135_v47 = vld [vmem:[%s2308_s20 + $0x1a0] sm:$0xff]  }
  0xa4   : > { %vm842_vm9 = vcmp.ge.f32.partialorder %v714_v50, 0.0  ;;  %v970_v57 = vmul.f32 0.01, %v714_v50  ;;  %v1097_v58 = vsel %vm841_vm8, %v713_v43, %v969_v51  ;;  %vm843_vm10 = vcmp.ge.f32.partialorder %v715_v52, 0.0 }
  0xa5   : > { %vm844_vm11 = vcmp.ge.f32.partialorder %v716_v53, 0.0  ;;  %v971_v59 = vmul.f32 0.01, %v715_v52  ;;  %v972_v60 = vmul.f32 0.01, %v716_v53  ;;  %v717_v61 = vadd.f32 %v2545_v48, %v585_v54 }
  0xa6   : > { %v1098_v62 = vsel %vm842_vm9, %v714_v50, %v970_v57  ;;  %v718_v63 = vadd.f32 %v2545_v48, %v586_v55  ;;  %v587_v1 = vmul.f32 %v2535_v40, %v1698_v49  ;;  %v588_v2 = vmul.f32 %v2535_v40, %v1699_v56 }
  0xa7   : > { %v1987_v4 = vpack.c.bf16 %v1098_v62, %v1097_v58  ;;  %v1099_v5 = vsel %vm843_vm10, %v715_v52, %v971_v59  ;;  %v1100_v7 = vsel %vm844_vm11, %v716_v53, %v972_v60  ;;  %vm845_vm12 = vcmp.ge.f32.partialorder %v717_v61, 0.0  ;;  %v2136_v52 = vld [vmem:[%s2308_s20 + $0x1a8] sm:$0xff]   ;;  %v2137_v60 = vld [vmem:[%s2308_s20 + $0x1b0] sm:$0xff]  }
  0xa8   : > { %v1992_v9 = vpack.c.bf16 %v1100_v7, %v1099_v5  ;;  %vm846_vm13 = vcmp.ge.f32.partialorder %v718_v63, 0.0  ;;  %v973_v10 = vmul.f32 0.01, %v717_v61  ;;  %v974_v11 = vmul.f32 0.01, %v718_v63 }
  0xa9   : > { %2190 = vst [vmem:[%s2345_s27 + $0x160] sm:$0xff] %v1987_v4   ;;  %v719_v12 = vadd.f32 %v2545_v48, %v587_v1  ;;  %v720_v13 = vadd.f32 %v2545_v48, %v588_v2  ;;  %v1702_v14 = vunpack.c.l.bf16 %v2131_v3  ;;  %v1703_v15 = vunpack.c.h.bf16 %v2131_v3 }
  0xaa   : > { %2191 = vst [vmem:[%s2345_s27 + $0x168] sm:$0xff] %v1992_v9   ;;  %v1101_v16 = vsel %vm845_vm12, %v717_v61, %v973_v10  ;;  %v1102_v17 = vsel %vm846_vm13, %v718_v63, %v974_v11  ;;  %v1706_v18 = vunpack.c.l.bf16 %v2132_v8  ;;  %v1707_v19 = vunpack.c.h.bf16 %v2132_v8 }
  0xab   : > { %v1997_v21 = vpack.c.bf16 %v1102_v17, %v1101_v16  ;;  %vm847_vm14 = vcmp.ge.f32.partialorder %v719_v12, 0.0  ;;  %vm848_vm15 = vcmp.ge.f32.partialorder %v720_v13, 0.0  ;;  %v975_v22 = vmul.f32 0.01, %v719_v12 }
  0xac   : > { %v976_v23 = vmul.f32 0.01, %v720_v13  ;;  %v589_v24 = vmul.f32 %v2535_v40, %v1702_v14  ;;  %v590_v25 = vmul.f32 %v2535_v40, %v1703_v15  ;;  %v591_v26 = vmul.f32 %v2535_v40, %v1706_v18 }
  0xad   : > { %2192 = vst [vmem:[%s2345_s27 + $0x170] sm:$0xff] %v1997_v21   ;;  %v1103_v27 = vsel %vm847_vm14, %v719_v12, %v975_v22  ;;  %v592_v28 = vmul.f32 %v2535_v40, %v1707_v19  ;;  %v1710_v29 = vunpack.c.l.bf16 %v2133_v20  ;;  %v1711_v30 = vunpack.c.h.bf16 %v2133_v20 }
  0xae   : > { %v1104_v0 = vsel %vm848_vm15, %v720_v13, %v976_v23  ;;  %v721_v31 = vadd.f32 %v2545_v48, %v589_v24  ;;  %v722_v32 = vadd.f32 %v2545_v48, %v590_v25  ;;  %v723_v33 = vadd.f32 %v2545_v48, %v591_v26  ;;  %v2138_v26 = vld [vmem:[%s2308_s20 + $0x1b8] sm:$0xff]  }
  0xaf   : > { %v2002_v34 = vpack.c.bf16 %v1104_v0, %v1103_v27  ;;  %v724_v35 = vadd.f32 %v2545_v48, %v592_v28  ;;  %v593_v36 = vmul.f32 %v2535_v40, %v1710_v29  ;;  %v594_v37 = vmul.f32 %v2535_v40, %v1711_v30  ;;  %v2139_v27 = vld [vmem:[%s2308_s20 + $0x1c0] sm:$0xff]  }
  0xb0   : > { %vm849_vm0 = vcmp.ge.f32.partialorder %v721_v31, 0.0  ;;  %vm850_vm1 = vcmp.ge.f32.partialorder %v722_v32, 0.0  ;;  %v977_v38 = vmul.f32 0.01, %v721_v31  ;;  %v978_v39 = vmul.f32 0.01, %v722_v32 }
  0xb1   : > { %2193 = vst [vmem:[%s2345_s27 + $0x178] sm:$0xff] %v2002_v34   ;;  %vm851_vm2 = vcmp.ge.f32.partialorder %v723_v33, 0.0  ;;  %vm852_vm3 = vcmp.ge.f32.partialorder %v724_v35, 0.0  ;;  %v979_v6 = vmul.f32 0.01, %v723_v33  ;;  %v725_v41 = vadd.f32 %v2545_v48, %v593_v36  ;;  %v2140_v34 = vld [vmem:[%s2308_s20 + $0x1c8] sm:$0xff]  }
  0xb2   : > { %v1105_v43 = vsel %vm849_vm0, %v721_v31, %v977_v38  ;;  %v1106_v44 = vsel %vm850_vm1, %v722_v32, %v978_v39  ;;  %v980_v45 = vmul.f32 0.01, %v724_v35  ;;  %v726_v46 = vadd.f32 %v2545_v48, %v594_v37 }
  0xb3   : > { %v2007_v49 = vpack.c.bf16 %v1106_v44, %v1105_v43  ;;  %v1107_v50 = vsel %vm851_vm2, %v723_v33, %v979_v6  ;;  %vm853_vm4 = vcmp.ge.f32.partialorder %v725_v41, 0.0  ;;  %v981_v51 = vmul.f32 0.01, %v725_v41 }
  0xb4   : > { %v1108_v53 = vsel %vm852_vm3, %v724_v35, %v980_v45  ;;  %vm854_vm5 = vcmp.ge.f32.partialorder %v726_v46, 0.0  ;;  %v982_v54 = vmul.f32 0.01, %v726_v46  ;;  %v1714_v55 = vunpack.c.l.bf16 %v2134_v42 }
  0xb5   : > { %2194 = vst [vmem:[%s2345_s27 + $0x180] sm:$0xff] %v2007_v49   ;;  %v2012_v56 = vpack.c.bf16 %v1108_v53, %v1107_v50  ;;  %v1109_v57 = vsel %vm853_vm4, %v725_v41, %v981_v51  ;;  %v1715_v58 = vunpack.c.h.bf16 %v2134_v42  ;;  %v1718_v59 = vunpack.c.l.bf16 %v2135_v47 }
  0xb6   : > { %v1110_v61 = vsel %vm854_vm5, %v726_v46, %v982_v54  ;;  %v595_v62 = vmul.f32 %v2535_v40, %v1714_v55  ;;  %v1719_v63 = vunpack.c.h.bf16 %v2135_v47  ;;  %v1722_v1 = vunpack.c.l.bf16 %v2136_v52 }
  0xb7   : > { %2195 = vst [vmem:[%s2345_s27 + $0x188] sm:$0xff] %v2012_v56   ;;  %v2017_v2 = vpack.c.bf16 %v1110_v61, %v1109_v57  ;;  %v596_v3 = vmul.f32 %v2535_v40, %v1715_v58  ;;  %v597_v4 = vmul.f32 %v2535_v40, %v1718_v59  ;;  %v1723_v5 = vunpack.c.h.bf16 %v2136_v52 }
  0xb8   : > { %v727_v7 = vadd.f32 %v2545_v48, %v595_v62  ;;  %v598_v8 = vmul.f32 %v2535_v40, %v1719_v63  ;;  %v599_v9 = vmul.f32 %v2535_v40, %v1722_v1  ;;  %v1726_v10 = vunpack.c.l.bf16 %v2137_v60 }
  0xb9   : > { %2196 = vst [vmem:[%s2345_s27 + $0x190] sm:$0xff] %v2017_v2   ;;  %v728_v11 = vadd.f32 %v2545_v48, %v596_v3  ;;  %v729_v12 = vadd.f32 %v2545_v48, %v597_v4  ;;  %v600_v13 = vmul.f32 %v2535_v40, %v1723_v5  ;;  %v1727_v14 = vunpack.c.h.bf16 %v2137_v60  ;;  %v2141_v60 = vld [vmem:[%s2308_s20 + $0x1d0] sm:$0xff]  }
  0xba   : > { %vm855_vm6 = vcmp.ge.f32.partialorder %v727_v7, 0.0  ;;  %v983_v15 = vmul.f32 0.01, %v727_v7  ;;  %v730_v16 = vadd.f32 %v2545_v48, %v598_v8  ;;  %v731_v17 = vadd.f32 %v2545_v48, %v599_v9  ;;  %v2142_v9 = vld [vmem:[%s2308_s20 + $0x1d8] sm:$0xff]  }
  0xbb   : > { %vm856_vm7 = vcmp.ge.f32.partialorder %v728_v11, 0.0  ;;  %v984_v18 = vmul.f32 0.01, %v728_v11  ;;  %vm857_vm8 = vcmp.ge.f32.partialorder %v729_v12, 0.0  ;;  %v985_v19 = vmul.f32 0.01, %v729_v12 }
  0xbc   : > { %v1111_v20 = vsel %vm855_vm6, %v727_v7, %v983_v15  ;;  %vm858_vm9 = vcmp.ge.f32.partialorder %v730_v16, 0.0  ;;  %v986_v21 = vmul.f32 0.01, %v730_v16  ;;  %v732_v22 = vadd.f32 %v2545_v48, %v600_v13 }
  0xbd   : > { %v1112_v23 = vsel %vm856_vm7, %v728_v11, %v984_v18  ;;  %v1113_v24 = vsel %vm857_vm8, %v729_v12, %v985_v19  ;;  %vm859_vm10 = vcmp.ge.f32.partialorder %v731_v17, 0.0  ;;  %v987_v25 = vmul.f32 0.01, %v731_v17 }
  0xbe   : > { %v2022_v28 = vpack.c.bf16 %v1112_v23, %v1111_v20  ;;  %v1114_v29 = vsel %vm858_vm9, %v730_v16, %v986_v21  ;;  %vm860_vm11 = vcmp.ge.f32.partialorder %v732_v22, 0.0  ;;  %v988_v30 = vmul.f32 0.01, %v732_v22 }
  0xbf   : > { %v2027_v0 = vpack.c.bf16 %v1114_v29, %v1113_v24  ;;  %v1115_v31 = vsel %vm859_vm10, %v731_v17, %v987_v25  ;;  %v601_v32 = vmul.f32 %v2535_v40, %v1726_v10  ;;  %v602_v33 = vmul.f32 %v2535_v40, %v1727_v14  ;;  %v2143_v14 = vld [vmem:[%s2308_s20 + $0x1e0] sm:$0xff]   ;;  %v2144_v29 = vld [vmem:[%s2308_s20 + $0x1e8] sm:$0xff]  }
  0xc0   : > { %2197 = vst [vmem:[%s2345_s27 + $0x198] sm:$0xff] %v2022_v28   ;;  %v1116_v35 = vsel %vm860_vm11, %v732_v22, %v988_v30  ;;  %v1730_v36 = vunpack.c.l.bf16 %v2138_v26  ;;  %v1731_v37 = vunpack.c.h.bf16 %v2138_v26  ;;  %v1734_v38 = vunpack.c.l.bf16 %v2139_v27 }
  0xc1   : > { %2198 = vst [vmem:[%s2345_s27 + $0x1a0] sm:$0xff] %v2027_v0   ;;  %v2032_v39 = vpack.c.bf16 %v1116_v35, %v1115_v31  ;;  %v733_v6 = vadd.f32 %v2545_v48, %v601_v32  ;;  %v734_v41 = vadd.f32 %v2545_v48, %v602_v33  ;;  %v1735_v42 = vunpack.c.h.bf16 %v2139_v27 }
  0xc2   : > { %v603_v43 = vmul.f32 %v2535_v40, %v1730_v36  ;;  %v604_v44 = vmul.f32 %v2535_v40, %v1731_v37  ;;  %v605_v45 = vmul.f32 %v2535_v40, %v1734_v38  ;;  %v1738_v46 = vunpack.c.l.bf16 %v2140_v34 }
  0xc3   : > { %2199 = vst [vmem:[%s2345_s27 + $0x1a8] sm:$0xff] %v2032_v39   ;;  %vm861_vm12 = vcmp.ge.f32.partialorder %v733_v6, 0.0  ;;  %vm862_vm13 = vcmp.ge.f32.partialorder %v734_v41, 0.0  ;;  %v989_v47 = vmul.f32 0.01, %v733_v6  ;;  %v606_v49 = vmul.f32 %v2535_v40, %v1735_v42 }
  0xc4   : > { %v990_v50 = vmul.f32 0.01, %v734_v41  ;;  %v735_v51 = vadd.f32 %v2545_v48, %v603_v43  ;;  %v736_v52 = vadd.f32 %v2545_v48, %v604_v44  ;;  %v737_v53 = vadd.f32 %v2545_v48, %v605_v45  ;;  %v2145_v45 = vld [vmem:[%s2308_s20 + $0x1f0] sm:$0xff]  }
  0xc5   : > { %v1117_v54 = vsel %vm861_vm12, %v733_v6, %v989_v47  ;;  %v738_v55 = vadd.f32 %v2545_v48, %v606_v49  ;;  %v1739_v56 = vunpack.c.h.bf16 %v2140_v34  ;;  %v607_v57 = vmul.f32 %v2535_v40, %v1738_v46 }
  0xc6   : > { %v1118_v58 = vsel %vm862_vm13, %v734_v41, %v990_v50  ;;  %vm863_vm14 = vcmp.ge.f32.partialorder %v735_v51, 0.0  ;;  %vm864_vm15 = vcmp.ge.f32.partialorder %v736_v52, 0.0  ;;  %v991_v59 = vmul.f32 0.01, %v735_v51  ;;  %v2146_v50 = vld [vmem:[%s2308_s20 + $0x1f8] sm:$0xff]  }
  0xc7   : > { %v2037_v61 = vpack.c.bf16 %v1118_v58, %v1117_v54  ;;  %v992_v62 = vmul.f32 0.01, %v736_v52  ;;  %vm865_vm0 = vcmp.ge.f32.partialorder %v737_v53, 0.0  ;;  %vm866_vm1 = vcmp.ge.f32.partialorder %v738_v55, 0.0 }
  0xc8   : > { %v1119_v63 = vsel %vm863_vm14, %v735_v51, %v991_v59  ;;  %v993_v1 = vmul.f32 0.01, %v737_v53  ;;  %v994_v2 = vmul.f32 0.01, %v738_v55  ;;  %v608_v3 = vmul.f32 %v2535_v40, %v1739_v56 }
  0xc9   : > { %2200 = vst [vmem:[%s2345_s27 + $0x1b0] sm:$0xff] %v2037_v61   ;;  %v1120_v4 = vsel %vm864_vm15, %v736_v52, %v992_v62  ;;  %v739_v5 = vadd.f32 %v2545_v48, %v607_v57  ;;  %v1742_v7 = vunpack.c.l.bf16 %v2141_v60  ;;  %v1743_v8 = vunpack.c.h.bf16 %v2141_v60 }
  0xca   : > { %v2042_v10 = vpack.c.bf16 %v1120_v4, %v1119_v63  ;;  %v1121_v11 = vsel %vm865_vm0, %v737_v53, %v993_v1  ;;  %v1122_v12 = vsel %vm866_vm1, %v738_v55, %v994_v2  ;;  %v740_v13 = vadd.f32 %v2545_v48, %v608_v3 }
  0xcb   : > { %v2047_v15 = vpack.c.bf16 %v1122_v12, %v1121_v11  ;;  %vm867_vm2 = vcmp.ge.f32.partialorder %v739_v5, 0.0  ;;  %v995_v16 = vmul.f32 0.01, %v739_v5  ;;  %v609_v17 = vmul.f32 %v2535_v40, %v1742_v7 }
  0xcc   : > { %2201 = vst [vmem:[%s2345_s27 + $0x1b8] sm:$0xff] %v2042_v10   ;;  %vm868_vm3 = vcmp.ge.f32.partialorder %v740_v13, 0.0  ;;  %v996_v18 = vmul.f32 0.01, %v740_v13  ;;  %v610_v19 = vmul.f32 %v2535_v40, %v1743_v8  ;;  %v1746_v20 = vunpack.c.l.bf16 %v2142_v9 }
  0xcd   : > { %2202 = vst [vmem:[%s2345_s27 + $0x1c0] sm:$0xff] %v2047_v15   ;;  %v1123_v21 = vsel %vm867_vm2, %v739_v5, %v995_v16  ;;  %v741_v22 = vadd.f32 %v2545_v48, %v609_v17  ;;  %v1747_v23 = vunpack.c.h.bf16 %v2142_v9  ;;  %v1750_v24 = vunpack.c.l.bf16 %v2143_v14 }
  0xce   : > { %v1124_v25 = vsel %vm868_vm3, %v740_v13, %v996_v18  ;;  %v742_v26 = vadd.f32 %v2545_v48, %v610_v19  ;;  %v611_v27 = vmul.f32 %v2535_v40, %v1746_v20  ;;  %v1751_v28 = vunpack.c.h.bf16 %v2143_v14 }
  0xcf   : > { %v2052_v30 = vpack.c.bf16 %v1124_v25, %v1123_v21  ;;  %vm869_vm4 = vcmp.ge.f32.partialorder %v741_v22, 0.0  ;;  %v997_v0 = vmul.f32 0.01, %v741_v22  ;;  %v612_v31 = vmul.f32 %v2535_v40, %v1747_v23 }
  0xd0   : > { %vm870_vm5 = vcmp.ge.f32.partialorder %v742_v26, 0.0  ;;  %v998_v32 = vmul.f32 0.01, %v742_v26  ;;  %v743_v33 = vadd.f32 %v2545_v48, %v611_v27  ;;  %v613_v34 = vmul.f32 %v2535_v40, %v1750_v24 }
  0xd1   : > { %2203 = vst [vmem:[%s2345_s27 + $0x1c8] sm:$0xff] %v2052_v30   ;;  %v1125_v35 = vsel %vm869_vm4, %v741_v22, %v997_v0  ;;  %v744_v36 = vadd.f32 %v2545_v48, %v612_v31  ;;  %v614_v37 = vmul.f32 %v2535_v40, %v1751_v28  ;;  %v1754_v38 = vunpack.c.l.bf16 %v2144_v29 }
  0xd2   : > { %v1126_v39 = vsel %vm870_vm5, %v742_v26, %v998_v32  ;;  %vm871_vm6 = vcmp.ge.f32.partialorder %v743_v33, 0.0  ;;  %v999_v6 = vmul.f32 0.01, %v743_v33  ;;  %v745_v41 = vadd.f32 %v2545_v48, %v613_v34 }
  0xd3   : > { %v2057_v42 = vpack.c.bf16 %v1126_v39, %v1125_v35  ;;  %vm872_vm7 = vcmp.ge.f32.partialorder %v744_v36, 0.0  ;;  %v1000_v43 = vmul.f32 0.01, %v744_v36  ;;  %v746_v44 = vadd.f32 %v2545_v48, %v614_v37 }
  0xd4   : > { %v1127_v46 = vsel %vm871_vm6, %v743_v33, %v999_v6  ;;  %vm873_vm8 = vcmp.ge.f32.partialorder %v745_v41, 0.0  ;;  %v1001_v47 = vmul.f32 0.01, %v745_v41  ;;  %v1755_v49 = vunpack.c.h.bf16 %v2144_v29 }
  0xd5   : > { %2204 = vst [vmem:[%s2345_s27 + $0x1d0] sm:$0xff] %v2057_v42   ;;  %v1128_v51 = vsel %vm872_vm7, %v744_v36, %v1000_v43  ;;  %vm874_vm9 = vcmp.ge.f32.partialorder %v746_v44, 0.0  ;;  %v1002_v52 = vmul.f32 0.01, %v746_v44  ;;  %v615_v53 = vmul.f32 %v2535_v40, %v1754_v38 }
  0xd6   : > { %v2062_v54 = vpack.c.bf16 %v1128_v51, %v1127_v46  ;;  %v1129_v55 = vsel %vm873_vm8, %v745_v41, %v1001_v47  ;;  %v616_v56 = vmul.f32 %v2535_v40, %v1755_v49  ;;  %v1758_v57 = vunpack.c.l.bf16 %v2145_v45 }
  0xd7   : > { %v1130_v58 = vsel %vm874_vm9, %v746_v44, %v1002_v52  ;;  %v747_v59 = vadd.f32 %v2545_v48, %v615_v53  ;;  %v1759_v60 = vunpack.c.h.bf16 %v2145_v45  ;;  %v1762_v61 = vunpack.c.l.bf16 %v2146_v50 }
  0xd8   : > { %2205 = vst [vmem:[%s2345_s27 + $0x1d8] sm:$0xff] %v2062_v54   ;;  %v2067_v62 = vpack.c.bf16 %v1130_v58, %v1129_v55  ;;  %v748_v63 = vadd.f32 %v2545_v48, %v616_v56  ;;  %v617_v1 = vmul.f32 %v2535_v40, %v1758_v57  ;;  %v1763_v2 = vunpack.c.h.bf16 %v2146_v50 }
  0xd9   : > { %vm875_vm10 = vcmp.ge.f32.partialorder %v747_v59, 0.0  ;;  %v1003_v3 = vmul.f32 0.01, %v747_v59  ;;  %v618_v4 = vmul.f32 %v2535_v40, %v1759_v60  ;;  %v619_v5 = vmul.f32 %v2535_v40, %v1762_v61 }
  0xda   : > { %2206 = vst [vmem:[%s2345_s27 + $0x1e0] sm:$0xff] %v2067_v62   ;;  %vm876_vm11 = vcmp.ge.f32.partialorder %v748_v63, 0.0  ;;  %v1004_v7 = vmul.f32 0.01, %v748_v63  ;;  %v749_v8 = vadd.f32 %v2545_v48, %v617_v1  ;;  %v620_v9 = vmul.f32 %v2535_v40, %v1763_v2 }
  0xdb   : > { %v1131_v10 = vsel %vm875_vm10, %v747_v59, %v1003_v3  ;;  %v750_v11 = vadd.f32 %v2545_v48, %v618_v4  ;;  %v751_v12 = vadd.f32 %v2545_v48, %v619_v5 }
  0xdc   : > { %v1132_v13 = vsel %vm876_vm11, %v748_v63, %v1004_v7  ;;  %vm877_vm12 = vcmp.ge.f32.partialorder %v749_v8, 0.0  ;;  %v1005_v14 = vmul.f32 0.01, %v749_v8  ;;  %v752_v15 = vadd.f32 %v2545_v48, %v620_v9 }
  0xdd   : > { %v2072_v16 = vpack.c.bf16 %v1132_v13, %v1131_v10  ;;  %vm878_vm13 = vcmp.ge.f32.partialorder %v750_v11, 0.0  ;;  %v1006_v17 = vmul.f32 0.01, %v750_v11  ;;  %vm879_vm14 = vcmp.ge.f32.partialorder %v751_v12, 0.0 }
  0xde   : > { %v1133_v18 = vsel %vm877_vm12, %v749_v8, %v1005_v14  ;;  %vm880_vm15 = vcmp.ge.f32.partialorder %v752_v15, 0.0  ;;  %v1007_v40 = vmul.f32 0.01, %v751_v12  ;;  %v1008_v19 = vmul.f32 0.01, %v752_v15 }
  0xdf   : > { %2207 = vst [vmem:[%s2345_s27 + $0x1e8] sm:$0xff] %v2072_v16   ;;  %v1134_v20 = vsel %vm878_vm13, %v750_v11, %v1006_v17 }
  0xe0   : > { %v2077_v21 = vpack.c.bf16 %v1134_v20, %v1133_v18  ;;  %v1135_v22 = vsel %vm879_vm14, %v751_v12, %v1007_v40  ;;  %v1136_v23 = vsel %vm880_vm15, %v752_v15, %v1008_v19 }
  0xe1   : > { %v2082_v24 = vpack.c.bf16 %v1136_v23, %v1135_v22 }
  0xe2   : > { %2208 = vst [vmem:[%s2345_s27 + $0x1f0] sm:$0xff] %v2077_v21  }
  0xe3   : > { %2209 = vst [vmem:[%s2345_s27 + $0x1f8] sm:$0xff] %v2082_v24  }
  0xe4 PF: > { %s13_s14 = sadd.s32 1, %s2260_s14   ;;  %s2735_s12 = smov %s2256_s13 }
  0xe5   : > { %p10_p5 = scmp.ge.s32.totalorder %s13_s14, 4   ;;  %s2736_s13 = smov %s2738_s15 }
  0xe7   :  { %12 = sbr.rel (!%p10_p5) target bundleno = 2 (0x2), region = 68 }

// kernel: upsample_bn_forward.9
= control target key start
LH: loop header
LB: loop body
LE: loop exit
PB: predicated region body
PF: predicated region fallthrough
CT: control target
= control target key end

     0   :  { %s1771_s12 = smov 0   ;;  %s1773_s13 = smov 0   ;;  %s2280_s0 = inlined_call_operand.vmem [shape: bf16[2048,128], index: 0, kind: input, shape index: {}]   ;;  %s2281_s1 = inlined_call_operand.vmem [shape: f32[1,128], index: 1, kind: input, shape index: {}]   ;;  %s2282_s2 = inlined_call_operand.vmem [shape: f32[1,128], index: 2, kind: input, shape index: {}]   ;;  %s2283_s3 = inlined_call_operand.vmem [shape: f32[2048,128], index: 3, kind: output, shape index: {}]  }
   0x1   :  { %s1775_s14 = smov 0  }
   0x2 LB: > { %s22_s15 = sadd.s32 1, %s1745_s13  ;;  %p1373_p0 = scmp.ge.s32.totalorder %s1749_s14, 1  ;;  %s1749_s14 = sphi %s1775_s14, %s13_s14   ;;  %s1745_s13 = sphi %s1773_s13, %s2285_s13   ;;  %s1741_s12 = sphi %s1771_s12, %s2284_s12  }
   0x3   : > { %p23_p1 = scmp.ge.s32.totalorder %s22_s15, 2  ;;  %p173_p2 = scmp.lt.s32.totalorder %s1749_s14, 3 }
   0x5   : > { %s2287_s15 = smov (%p23_p1, %s22_s15), 0  ;;  %p174_p3 = pnand %p1373_p0, %p173_p2 }
   0x6   : > { %s1374_s16 = sshll.u32 (!%p174_p3), %s1741_s12, 7 }
   0x7   : > { %177 = sbr.rel (%p174_p3) target bundleno = 213 (0xd5), region = 32  ;;  %p210_p4 = scmp.lt.s32.totalorder (!%p174_p3), %s1374_s16, 255 }
   0xc   : > { %s2289_s16 = smov (!%p210_p4, %s1374_s16), 255  ;;  %v1800_v0 = vld [vmem:[%s2281_s1] ss:$0 sm:$0xff] }
   0xd   : > { %s1375_s17 = sshll.u32 %s2289_s16, 2  ;;  %v1808_v5 = vld [vmem:[%s2282_s2] ss:$0 sm:$0xff]  ;;  %s1377_s25 = sshll.u32 %s2289_s16, 3 }
   0xe   : > { %s1795_s20 = scalar_lea.vmem %s2280_s0, %s1375_s17  ;;  %s1831_s28 = scalar_lea.vmem %s2283_s3, %s1377_s25 }
   0xf   : > { %v1381_v1 = vld [vmem:[%s1795_s20] sm:$0xff]   ;;  %v1636_v2 = vld [vmem:[%s1795_s20 + $0x8] sm:$0xff]   ;;  %v1637_v3 = vld [vmem:[%s1795_s20 + $0x10] sm:$0xff]  }
  0x10   : > { %v1382_v4 = vunpack.c.l.bf16 %v1381_v1  ;;  %v1383_v6 = vunpack.c.h.bf16 %v1381_v1  ;;  %v1386_v7 = vunpack.c.l.bf16 %v1636_v2  ;;  %v1387_v8 = vunpack.c.h.bf16 %v1636_v2  ;;  %v1638_v9 = vld [vmem:[%s1795_s20 + $0x18] sm:$0xff]   ;;  %v1639_v37 = vld [vmem:[%s1795_s20 + $0x20] sm:$0xff]   ;;  %v1640_v41 = vld [vmem:[%s1795_s20 + $0x28] sm:$0xff]  }
  0x11   : > { %v1390_v10 = vunpack.c.l.bf16 %v1637_v3  ;;  %v1391_v11 = vunpack.c.h.bf16 %v1637_v3  ;;  %v1394_v12 = vunpack.c.l.bf16 %v1638_v9  ;;  %v1395_v13 = vunpack.c.h.bf16 %v1638_v9  ;;  %v1641_v42 = vld [vmem:[%s1795_s20 + $0x30] sm:$0xff]   ;;  %v1642_v49 = vld [vmem:[%s1795_s20 + $0x38] sm:$0xff]  }
  0x12   : > { %v493_v14 = vmul.f32 %v1800_v0, %v1382_v4  ;;  %v494_v15 = vmul.f32 %v1800_v0, %v1383_v6  ;;  %v495_v16 = vmul.f32 %v1800_v0, %v1386_v7  ;;  %v496_v17 = vmul.f32 %v1800_v0, %v1387_v8  ;;  %v1643_v8 = vld [vmem:[%s1795_s20 + $0x40] sm:$0xff]  }
  0x13   : > { %v497_v18 = vmul.f32 %v1800_v0, %v1390_v10  ;;  %v498_v19 = vmul.f32 %v1800_v0, %v1391_v11  ;;  %v499_v20 = vmul.f32 %v1800_v0, %v1394_v12  ;;  %v500_v21 = vmul.f32 %v1800_v0, %v1395_v13 }
  0x14   : > { %v625_v22 = vadd.f32 %v1808_v5, %v493_v14  ;;  %v626_v23 = vadd.f32 %v1808_v5, %v494_v15  ;;  %v627_v24 = vadd.f32 %v1808_v5, %v495_v16  ;;  %v628_v25 = vadd.f32 %v1808_v5, %v496_v17  ;;  %v1644_v16 = vld [vmem:[%s1795_s20 + $0x48] sm:$0xff]  }
  0x15   : > { %v629_v26 = vadd.f32 %v1808_v5, %v497_v18  ;;  %v630_v27 = vadd.f32 %v1808_v5, %v498_v19  ;;  %v631_v28 = vadd.f32 %v1808_v5, %v499_v20  ;;  %v632_v29 = vadd.f32 %v1808_v5, %v500_v21 }
  0x16   : > { %vm753_vm0 = vcmp.ge.f32.partialorder %v625_v22, 0.0  ;;  %v881_v30 = vmul.f32 0.01, %v625_v22  ;;  %vm754_vm1 = vcmp.ge.f32.partialorder %v626_v23, 0.0  ;;  %v882_v31 = vmul.f32 0.01, %v626_v23 }
  0x17   : > { %vm755_vm2 = vcmp.ge.f32.partialorder %v627_v24, 0.0  ;;  %v883_v32 = vmul.f32 0.01, %v627_v24  ;;  %vm756_vm3 = vcmp.ge.f32.partialorder %v628_v25, 0.0  ;;  %v884_v33 = vmul.f32 0.01, %v628_v25 }
  0x18   : > { %v1009_v34 = vsel %vm753_vm0, %v625_v22, %v881_v30  ;;  %v1010_v35 = vsel %vm754_vm1, %v626_v23, %v882_v31  ;;  %vm757_vm4 = vcmp.ge.f32.partialorder %v629_v26, 0.0  ;;  %v885_v36 = vmul.f32 0.01, %v629_v26 }
  0x19   : > { %1137 = vst [vmem:[%s1831_s28] sm:$0xff] %v1009_v34  ;;  %v1011_v38 = vsel %vm755_vm2, %v627_v24, %v883_v32  ;;  %v1012_v39 = vsel %vm756_vm3, %v628_v25, %v884_v33  ;;  %vm758_vm5 = vcmp.ge.f32.partialorder %v630_v27, 0.0  ;;  %v886_v40 = vmul.f32 0.01, %v630_v27  ;;  %v1645_v25 = vld [vmem:[%s1795_s20 + $0x50] sm:$0xff]  }
  0x1a   : > { %1138 = vst [vmem:[%s1831_s28 + $0x8] sm:$0xff] %v1010_v35  ;;  %v1013_v43 = vsel %vm757_vm4, %v629_v26, %v885_v36  ;;  %vm759_vm6 = vcmp.ge.f32.partialorder %v631_v28, 0.0  ;;  %v887_v44 = vmul.f32 0.01, %v631_v28  ;;  %vm760_vm7 = vcmp.ge.f32.partialorder %v632_v29, 0.0 }
  0x1b   : > { %1139 = vst [vmem:[%s1831_s28 + $0x10] sm:$0xff] %v1011_v38  ;;  %v1014_v45 = vsel %vm758_vm5, %v630_v27, %v886_v40  ;;  %v888_v46 = vmul.f32 0.01, %v632_v29  ;;  %v1398_v47 = vunpack.c.l.bf16 %v1639_v37  ;;  %v1399_v48 = vunpack.c.h.bf16 %v1639_v37 }
  0x1c   : > { %1140 = vst [vmem:[%s1831_s28 + $0x18] sm:$0xff] %v1012_v39  ;;  %v1015_v50 = vsel %vm759_vm6, %v631_v28, %v887_v44  ;;  %v1402_v51 = vunpack.c.l.bf16 %v1640_v41  ;;  %v1403_v52 = vunpack.c.h.bf16 %v1640_v41  ;;  %v1406_v53 = vunpack.c.l.bf16 %v1641_v42 }
  0x1d   : > { %1141 = vst [vmem:[%s1831_s28 + $0x20] sm:$0xff] %v1013_v43  ;;  %v1016_v54 = vsel %vm760_vm7, %v632_v29, %v888_v46  ;;  %v501_v55 = vmul.f32 %v1800_v0, %v1398_v47  ;;  %v502_v56 = vmul.f32 %v1800_v0, %v1399_v48  ;;  %v1407_v57 = vunpack.c.h.bf16 %v1641_v42  ;;  %v1646_v46 = vld [vmem:[%s1795_s20 + $0x58] sm:$0xff]  }
  0x1e   : > { %1142 = vst [vmem:[%s1831_s28 + $0x28] sm:$0xff] %v1014_v45  ;;  %v503_v58 = vmul.f32 %v1800_v0, %v1402_v51  ;;  %v504_v59 = vmul.f32 %v1800_v0, %v1403_v52  ;;  %v505_v60 = vmul.f32 %v1800_v0, %v1406_v53  ;;  %v1410_v61 = vunpack.c.l.bf16 %v1642_v49  ;;  %v1647_v53 = vld [vmem:[%s1795_s20 + $0x60] sm:$0xff]  }
  0x1f   : > { %1143 = vst [vmem:[%s1831_s28 + $0x30] sm:$0xff] %v1015_v50  ;;  %v633_v62 = vadd.f32 %v1808_v5, %v501_v55  ;;  %v634_v63 = vadd.f32 %v1808_v5, %v502_v56  ;;  %v506_v1 = vmul.f32 %v1800_v0, %v1407_v57  ;;  %v1411_v2 = vunpack.c.h.bf16 %v1642_v49 }
  0x20   : > { %1144 = vst [vmem:[%s1831_s28 + $0x38] sm:$0xff] %v1016_v54  ;;  %v635_v3 = vadd.f32 %v1808_v5, %v503_v58  ;;  %v636_v4 = vadd.f32 %v1808_v5, %v504_v59  ;;  %v637_v6 = vadd.f32 %v1808_v5, %v505_v60  ;;  %v507_v7 = vmul.f32 %v1800_v0, %v1410_v61  ;;  %v1648_v60 = vld [vmem:[%s1795_s20 + $0x68] sm:$0xff]  }
  0x21   : > { %vm761_vm8 = vcmp.ge.f32.partialorder %v633_v62, 0.0  ;;  %v889_v9 = vmul.f32 0.01, %v633_v62  ;;  %vm762_vm9 = vcmp.ge.f32.partialorder %v634_v63, 0.0  ;;  %v890_v10 = vmul.f32 0.01, %v634_v63 }
  0x22   : > { %vm763_vm10 = vcmp.ge.f32.partialorder %v635_v3, 0.0  ;;  %v891_v11 = vmul.f32 0.01, %v635_v3  ;;  %vm764_vm11 = vcmp.ge.f32.partialorder %v636_v4, 0.0  ;;  %v892_v12 = vmul.f32 0.01, %v636_v4 }
  0x23   : > { %v1017_v13 = vsel %vm761_vm8, %v633_v62, %v889_v9  ;;  %v1018_v14 = vsel %vm762_vm9, %v634_v63, %v890_v10  ;;  %vm765_vm12 = vcmp.ge.f32.partialorder %v637_v6, 0.0  ;;  %v893_v15 = vmul.f32 0.01, %v637_v6 }
  0x24   : > { %1145 = vst [vmem:[%s1831_s28 + $0x40] sm:$0xff] %v1017_v13  ;;  %v1019_v17 = vsel %vm763_vm10, %v635_v3, %v891_v11  ;;  %v1020_v18 = vsel %vm764_vm11, %v636_v4, %v892_v12  ;;  %v638_v19 = vadd.f32 %v1808_v5, %v506_v1  ;;  %v639_v20 = vadd.f32 %v1808_v5, %v507_v7 }
  0x25   : > { %1146 = vst [vmem:[%s1831_s28 + $0x48] sm:$0xff] %v1018_v14  ;;  %v1021_v21 = vsel %vm765_vm12, %v637_v6, %v893_v15  ;;  %v508_v22 = vmul.f32 %v1800_v0, %v1411_v2  ;;  %v1414_v23 = vunpack.c.l.bf16 %v1643_v8  ;;  %v1415_v24 = vunpack.c.h.bf16 %v1643_v8  ;;  %v1649_v2 = vld [vmem:[%s1795_s20 + $0x70] sm:$0xff]  }
  0x26   : > { %1147 = vst [vmem:[%s1831_s28 + $0x50] sm:$0xff] %v1019_v17  ;;  %vm766_vm13 = vcmp.ge.f32.partialorder %v638_v19, 0.0  ;;  %v894_v26 = vmul.f32 0.01, %v638_v19  ;;  %vm767_vm14 = vcmp.ge.f32.partialorder %v639_v20, 0.0  ;;  %v1418_v27 = vunpack.c.l.bf16 %v1644_v16 }
  0x27   : > { %1148 = vst [vmem:[%s1831_s28 + $0x58] sm:$0xff] %v1020_v18  ;;  %v895_v28 = vmul.f32 0.01, %v639_v20  ;;  %v640_v29 = vadd.f32 %v1808_v5, %v508_v22  ;;  %v509_v30 = vmul.f32 %v1800_v0, %v1414_v23  ;;  %v510_v31 = vmul.f32 %v1800_v0, %v1415_v24 }
  0x28   : > { %1149 = vst [vmem:[%s1831_s28 + $0x60] sm:$0xff] %v1021_v21  ;;  %v1022_v32 = vsel %vm766_vm13, %v638_v19, %v894_v26  ;;  %v511_v33 = vmul.f32 %v1800_v0, %v1418_v27  ;;  %v1419_v34 = vunpack.c.h.bf16 %v1644_v16  ;;  %v1422_v35 = vunpack.c.l.bf16 %v1645_v25 }
  0x29   : > { %1150 = vst [vmem:[%s1831_s28 + $0x68] sm:$0xff] %v1022_v32  ;;  %v1023_v36 = vsel %vm767_vm14, %v639_v20, %v895_v28  ;;  %vm768_vm15 = vcmp.ge.f32.partialorder %v640_v29, 0.0  ;;  %v896_v37 = vmul.f32 0.01, %v640_v29  ;;  %v641_v38 = vadd.f32 %v1808_v5, %v509_v30 }
  0x2a   : > { %1151 = vst [vmem:[%s1831_s28 + $0x70] sm:$0xff] %v1023_v36  ;;  %v642_v39 = vadd.f32 %v1808_v5, %v510_v31  ;;  %v643_v40 = vadd.f32 %v1808_v5, %v511_v33  ;;  %v512_v41 = vmul.f32 %v1800_v0, %v1419_v34  ;;  %v513_v42 = vmul.f32 %v1800_v0, %v1422_v35  ;;  %v1650_v31 = vld [vmem:[%s1795_s20 + $0x78] sm:$0xff]   ;;  %v1651_v35 = vld [vmem:[%s1795_s20 + $0x80] sm:$0xff]  }
  0x2b   : > { %v1024_v43 = vsel %vm768_vm15, %v640_v29, %v896_v37  ;;  %vm769_vm0 = vcmp.ge.f32.partialorder %v641_v38, 0.0  ;;  %v897_v44 = vmul.f32 0.01, %v641_v38  ;;  %v1423_v45 = vunpack.c.h.bf16 %v1645_v25 }
  0x2c   : > { %1152 = vst [vmem:[%s1831_s28 + $0x78] sm:$0xff] %v1024_v43  ;;  %vm770_vm1 = vcmp.ge.f32.partialorder %v642_v39, 0.0  ;;  %v898_v47 = vmul.f32 0.01, %v642_v39  ;;  %vm771_vm2 = vcmp.ge.f32.partialorder %v643_v40, 0.0  ;;  %v644_v48 = vadd.f32 %v1808_v5, %v512_v41 }
  0x2d   : > { %v1025_v49 = vsel %vm769_vm0, %v641_v38, %v897_v44  ;;  %v899_v50 = vmul.f32 0.01, %v643_v40  ;;  %v645_v51 = vadd.f32 %v1808_v5, %v513_v42  ;;  %v514_v52 = vmul.f32 %v1800_v0, %v1423_v45  ;;  %v1652_v38 = vld [vmem:[%s1795_s20 + $0x88] sm:$0xff]  }
  0x2e   : > { %1153 = vst [vmem:[%s1831_s28 + $0x80] sm:$0xff] %v1025_v49  ;;  %v1026_v54 = vsel %vm770_vm1, %v642_v39, %v898_v47  ;;  %vm772_vm3 = vcmp.ge.f32.partialorder %v644_v48, 0.0  ;;  %v900_v55 = vmul.f32 0.01, %v644_v48  ;;  %v1426_v56 = vunpack.c.l.bf16 %v1646_v46 }
  0x2f   : > { %1154 = vst [vmem:[%s1831_s28 + $0x88] sm:$0xff] %v1026_v54  ;;  %v1027_v57 = vsel %vm771_vm2, %v643_v40, %v899_v50  ;;  %vm773_vm4 = vcmp.ge.f32.partialorder %v645_v51, 0.0  ;;  %v901_v58 = vmul.f32 0.01, %v645_v51  ;;  %v646_v59 = vadd.f32 %v1808_v5, %v514_v52 }
  0x30   : > { %1155 = vst [vmem:[%s1831_s28 + $0x90] sm:$0xff] %v1027_v57  ;;  %v1028_v61 = vsel %vm772_vm3, %v644_v48, %v900_v55  ;;  %v515_v62 = vmul.f32 %v1800_v0, %v1426_v56  ;;  %v1427_v63 = vunpack.c.h.bf16 %v1646_v46  ;;  %v1430_v1 = vunpack.c.l.bf16 %v1647_v53 }
  0x31   : > { %1156 = vst [vmem:[%s1831_s28 + $0x98] sm:$0xff] %v1028_v61  ;;  %v1029_v3 = vsel %vm773_vm4, %v645_v51, %v901_v58  ;;  %vm774_vm5 = vcmp.ge.f32.partialorder %v646_v59, 0.0  ;;  %v902_v4 = vmul.f32 0.01, %v646_v59  ;;  %v1431_v6 = vunpack.c.h.bf16 %v1647_v53  ;;  %v1653_v51 = vld [vmem:[%s1795_s20 + $0x90] sm:$0xff]  }
  0x32   : > { %1157 = vst [vmem:[%s1831_s28 + $0xa0] sm:$0xff] %v1029_v3  ;;  %v647_v7 = vadd.f32 %v1808_v5, %v515_v62  ;;  %v516_v8 = vmul.f32 %v1800_v0, %v1427_v63  ;;  %v517_v9 = vmul.f32 %v1800_v0, %v1430_v1  ;;  %v1434_v10 = vunpack.c.l.bf16 %v1648_v60 }
  0x33   : > { %v1030_v11 = vsel %vm774_vm5, %v646_v59, %v902_v4  ;;  %v518_v12 = vmul.f32 %v1800_v0, %v1431_v6  ;;  %v1435_v13 = vunpack.c.h.bf16 %v1648_v60  ;;  %v1438_v14 = vunpack.c.l.bf16 %v1649_v2 }
  0x34   : > { %1158 = vst [vmem:[%s1831_s28 + $0xa8] sm:$0xff] %v1030_v11  ;;  %vm775_vm6 = vcmp.ge.f32.partialorder %v647_v7, 0.0  ;;  %v903_v15 = vmul.f32 0.01, %v647_v7  ;;  %v648_v16 = vadd.f32 %v1808_v5, %v516_v8  ;;  %v649_v17 = vadd.f32 %v1808_v5, %v517_v9  ;;  %v1655_v9 = vld [vmem:[%s1795_s20 + $0xa0] sm:$0xff]  }
  0x35   : > { %v650_v18 = vadd.f32 %v1808_v5, %v518_v12  ;;  %v519_v19 = vmul.f32 %v1800_v0, %v1434_v10  ;;  %v520_v20 = vmul.f32 %v1800_v0, %v1435_v13  ;;  %v521_v21 = vmul.f32 %v1800_v0, %v1438_v14  ;;  %v1656_v14 = vld [vmem:[%s1795_s20 + $0xa8] sm:$0xff]  }
  0x36   : > { %v1031_v22 = vsel %vm775_vm6, %v647_v7, %v903_v15  ;;  %vm776_vm7 = vcmp.ge.f32.partialorder %v648_v16, 0.0  ;;  %v904_v23 = vmul.f32 0.01, %v648_v16  ;;  %vm777_vm8 = vcmp.ge.f32.partialorder %v649_v17, 0.0 }
  0x37   : > { %1159 = vst [vmem:[%s1831_s28 + $0xb0] sm:$0xff] %v1031_v22  ;;  %v905_v24 = vmul.f32 0.01, %v649_v17  ;;  %vm778_vm9 = vcmp.ge.f32.partialorder %v650_v18, 0.0  ;;  %v906_v25 = vmul.f32 0.01, %v650_v18  ;;  %v651_v26 = vadd.f32 %v1808_v5, %v519_v19 }
  0x38   : > { %v1032_v27 = vsel %vm776_vm7, %v648_v16, %v904_v23  ;;  %v652_v28 = vadd.f32 %v1808_v5, %v520_v20  ;;  %v653_v29 = vadd.f32 %v1808_v5, %v521_v21  ;;  %v1439_v30 = vunpack.c.h.bf16 %v1649_v2  ;;  %v1654_v2 = vld [vmem:[%s1795_s20 + $0x98] sm:$0xff]  }
  0x39   : > { %1160 = vst [vmem:[%s1831_s28 + $0xb8] sm:$0xff] %v1032_v27  ;;  %v1033_v32 = vsel %vm777_vm8, %v649_v17, %v905_v24  ;;  %v1034_v33 = vsel %vm778_vm9, %v650_v18, %v906_v25  ;;  %vm779_vm10 = vcmp.ge.f32.partialorder %v651_v26, 0.0  ;;  %v907_v34 = vmul.f32 0.01, %v651_v26 }
  0x3a   : > { %1161 = vst [vmem:[%s1831_s28 + $0xc0] sm:$0xff] %v1033_v32  ;;  %vm780_vm11 = vcmp.ge.f32.partialorder %v652_v28, 0.0  ;;  %v908_v36 = vmul.f32 0.01, %v652_v28  ;;  %vm781_vm12 = vcmp.ge.f32.partialorder %v653_v29, 0.0  ;;  %v522_v37 = vmul.f32 %v1800_v0, %v1439_v30 }
  0x3b   : > { %1162 = vst [vmem:[%s1831_s28 + $0xc8] sm:$0xff] %v1034_v33  ;;  %v1035_v39 = vsel %vm779_vm10, %v651_v26, %v907_v34  ;;  %v909_v40 = vmul.f32 0.01, %v653_v29  ;;  %v1442_v41 = vunpack.c.l.bf16 %v1650_v31  ;;  %v1443_v42 = vunpack.c.h.bf16 %v1650_v31 }
  0x3c   : > { %1163 = vst [vmem:[%s1831_s28 + $0xd0] sm:$0xff] %v1035_v39  ;;  %v1036_v43 = vsel %vm780_vm11, %v652_v28, %v908_v36  ;;  %v654_v44 = vadd.f32 %v1808_v5, %v522_v37  ;;  %v1446_v45 = vunpack.c.l.bf16 %v1651_v35  ;;  %v1447_v46 = vunpack.c.h.bf16 %v1651_v35 }
  0x3d   : > { %1164 = vst [vmem:[%s1831_s28 + $0xd8] sm:$0xff] %v1036_v43  ;;  %v1037_v47 = vsel %vm781_vm12, %v653_v29, %v909_v40  ;;  %v523_v48 = vmul.f32 %v1800_v0, %v1442_v41  ;;  %v524_v49 = vmul.f32 %v1800_v0, %v1443_v42  ;;  %v1450_v50 = vunpack.c.l.bf16 %v1652_v38 }
  0x3e   : > { %1165 = vst [vmem:[%s1831_s28 + $0xe0] sm:$0xff] %v1037_v47  ;;  %vm782_vm13 = vcmp.ge.f32.partialorder %v654_v44, 0.0  ;;  %v910_v52 = vmul.f32 0.01, %v654_v44  ;;  %v525_v53 = vmul.f32 %v1800_v0, %v1446_v45  ;;  %v526_v54 = vmul.f32 %v1800_v0, %v1447_v46  ;;  %v1657_v46 = vld [vmem:[%s1795_s20 + $0xb0] sm:$0xff]  }
  0x3f   : > { %v655_v55 = vadd.f32 %v1808_v5, %v523_v48  ;;  %v656_v56 = vadd.f32 %v1808_v5, %v524_v49  ;;  %v527_v57 = vmul.f32 %v1800_v0, %v1450_v50  ;;  %v1451_v58 = vunpack.c.h.bf16 %v1652_v38  ;;  %v1658_v50 = vld [vmem:[%s1795_s20 + $0xb8] sm:$0xff]  }
  0x40   : > { %v1038_v59 = vsel %vm782_vm13, %v654_v44, %v910_v52  ;;  %v657_v60 = vadd.f32 %v1808_v5, %v525_v53  ;;  %v658_v61 = vadd.f32 %v1808_v5, %v526_v54  ;;  %v1454_v62 = vunpack.c.l.bf16 %v1653_v51  ;;  %v1659_v53 = vld [vmem:[%s1795_s20 + $0xc0] sm:$0xff]  }
  0x41   : > { %1166 = vst [vmem:[%s1831_s28 + $0xe8] sm:$0xff] %v1038_v59  ;;  %vm783_vm14 = vcmp.ge.f32.partialorder %v655_v55, 0.0  ;;  %v911_v63 = vmul.f32 0.01, %v655_v55  ;;  %vm784_vm15 = vcmp.ge.f32.partialorder %v656_v56, 0.0  ;;  %v659_v1 = vadd.f32 %v1808_v5, %v527_v57 }
  0x42   : > { %v912_v3 = vmul.f32 0.01, %v656_v56  ;;  %vm785_vm0 = vcmp.ge.f32.partialorder %v657_v60, 0.0  ;;  %v913_v4 = vmul.f32 0.01, %v657_v60  ;;  %vm786_vm1 = vcmp.ge.f32.partialorder %v658_v61, 0.0 }
  0x43   : > { %v1039_v6 = vsel %vm783_vm14, %v655_v55, %v911_v63  ;;  %v914_v7 = vmul.f32 0.01, %v658_v61  ;;  %vm787_vm2 = vcmp.ge.f32.partialorder %v659_v1, 0.0  ;;  %v915_v8 = vmul.f32 0.01, %v659_v1 }
  0x44   : > { %1167 = vst [vmem:[%s1831_s28 + $0xf0] sm:$0xff] %v1039_v6  ;;  %v1040_v10 = vsel %vm784_vm15, %v656_v56, %v912_v3  ;;  %v1041_v11 = vsel %vm785_vm0, %v657_v60, %v913_v4  ;;  %v528_v12 = vmul.f32 %v1800_v0, %v1451_v58  ;;  %v529_v13 = vmul.f32 %v1800_v0, %v1454_v62  ;;  %v1660_v3 = vld [vmem:[%s1795_s20 + $0xc8] sm:$0xff]  }
  0x45   : > { %1168 = vst [vmem:[%s1831_s28 + $0xf8] sm:$0xff] %v1040_v10  ;;  %v1042_v15 = vsel %vm786_vm1, %v658_v61, %v914_v7  ;;  %v1043_v16 = vsel %vm787_vm2, %v659_v1, %v915_v8  ;;  %v1455_v17 = vunpack.c.h.bf16 %v1653_v51  ;;  %v1458_v18 = vunpack.c.l.bf16 %v1654_v2 }
  0x46   : > { %1169 = vst [vmem:[%s1831_s28 + $0x100] sm:$0xff] %v1041_v11  ;;  %v660_v19 = vadd.f32 %v1808_v5, %v528_v12  ;;  %v661_v20 = vadd.f32 %v1808_v5, %v529_v13  ;;  %v1459_v21 = vunpack.c.h.bf16 %v1654_v2  ;;  %v1462_v22 = vunpack.c.l.bf16 %v1655_v9 }
  0x47   : > { %1170 = vst [vmem:[%s1831_s28 + $0x108] sm:$0xff] %v1042_v15  ;;  %v530_v23 = vmul.f32 %v1800_v0, %v1455_v17  ;;  %v531_v24 = vmul.f32 %v1800_v0, %v1458_v18  ;;  %v1463_v25 = vunpack.c.h.bf16 %v1655_v9  ;;  %v1466_v26 = vunpack.c.l.bf16 %v1656_v14  ;;  %v1661_v18 = vld [vmem:[%s1795_s20 + $0xd0] sm:$0xff]  }
  0x48   : > { %1171 = vst [vmem:[%s1831_s28 + $0x110] sm:$0xff] %v1043_v16  ;;  %vm788_vm3 = vcmp.ge.f32.partialorder %v660_v19, 0.0  ;;  %v916_v27 = vmul.f32 0.01, %v660_v19  ;;  %vm789_vm4 = vcmp.ge.f32.partialorder %v661_v20, 0.0  ;;  %v532_v28 = vmul.f32 %v1800_v0, %v1459_v21 }
  0x49   : > { %v917_v29 = vmul.f32 0.01, %v661_v20  ;;  %v662_v30 = vadd.f32 %v1808_v5, %v530_v23  ;;  %v663_v31 = vadd.f32 %v1808_v5, %v531_v24  ;;  %v533_v32 = vmul.f32 %v1800_v0, %v1462_v22  ;;  %v1662_v24 = vld [vmem:[%s1795_s20 + $0xd8] sm:$0xff]  }
  0x4a   : > { %v1044_v33 = vsel %vm788_vm3, %v660_v19, %v916_v27  ;;  %v664_v34 = vadd.f32 %v1808_v5, %v532_v28  ;;  %v534_v35 = vmul.f32 %v1800_v0, %v1463_v25  ;;  %v535_v36 = vmul.f32 %v1800_v0, %v1466_v26 }
  0x4b   : > { %1172 = vst [vmem:[%s1831_s28 + $0x118] sm:$0xff] %v1044_v33  ;;  %v1045_v37 = vsel %vm789_vm4, %v661_v20, %v917_v29  ;;  %vm790_vm5 = vcmp.ge.f32.partialorder %v662_v30, 0.0  ;;  %v918_v38 = vmul.f32 0.01, %v662_v30  ;;  %vm791_vm6 = vcmp.ge.f32.partialorder %v663_v31, 0.0  ;;  %v1663_v29 = vld [vmem:[%s1795_s20 + $0xe0] sm:$0xff]  }
  0x4c   : > { %1173 = vst [vmem:[%s1831_s28 + $0x120] sm:$0xff] %v1045_v37  ;;  %v919_v39 = vmul.f32 0.01, %v663_v31  ;;  %vm792_vm7 = vcmp.ge.f32.partialorder %v664_v34, 0.0  ;;  %v920_v40 = vmul.f32 0.01, %v664_v34  ;;  %v665_v41 = vadd.f32 %v1808_v5, %v533_v32 }
  0x4d   : > { %v1046_v42 = vsel %vm790_vm5, %v662_v30, %v918_v38  ;;  %v666_v43 = vadd.f32 %v1808_v5, %v534_v35  ;;  %v667_v44 = vadd.f32 %v1808_v5, %v535_v36  ;;  %v1467_v45 = vunpack.c.h.bf16 %v1656_v14 }
  0x4e   : > { %1174 = vst [vmem:[%s1831_s28 + $0x128] sm:$0xff] %v1046_v42  ;;  %v1047_v47 = vsel %vm791_vm6, %v663_v31, %v919_v39  ;;  %v1048_v48 = vsel %vm792_vm7, %v664_v34, %v920_v40  ;;  %vm793_vm8 = vcmp.ge.f32.partialorder %v665_v41, 0.0  ;;  %v921_v49 = vmul.f32 0.01, %v665_v41 }
  0x4f   : > { %1175 = vst [vmem:[%s1831_s28 + $0x130] sm:$0xff] %v1047_v47  ;;  %vm794_vm9 = vcmp.ge.f32.partialorder %v666_v43, 0.0  ;;  %v922_v51 = vmul.f32 0.01, %v666_v43  ;;  %vm795_vm10 = vcmp.ge.f32.partialorder %v667_v44, 0.0  ;;  %v536_v52 = vmul.f32 %v1800_v0, %v1467_v45 }
  0x50   : > { %1176 = vst [vmem:[%s1831_s28 + $0x138] sm:$0xff] %v1048_v48  ;;  %v1049_v54 = vsel %vm793_vm8, %v665_v41, %v921_v49  ;;  %v923_v55 = vmul.f32 0.01, %v667_v44  ;;  %v1470_v56 = vunpack.c.l.bf16 %v1657_v46  ;;  %v1471_v57 = vunpack.c.h.bf16 %v1657_v46 }
  0x51   : > { %1177 = vst [vmem:[%s1831_s28 + $0x140] sm:$0xff] %v1049_v54  ;;  %v1050_v58 = vsel %vm794_vm9, %v666_v43, %v922_v51  ;;  %v668_v59 = vadd.f32 %v1808_v5, %v536_v52  ;;  %v1474_v60 = vunpack.c.l.bf16 %v1658_v50  ;;  %v1475_v61 = vunpack.c.h.bf16 %v1658_v50 }
  0x52   : > { %1178 = vst [vmem:[%s1831_s28 + $0x148] sm:$0xff] %v1050_v58  ;;  %v1051_v62 = vsel %vm795_vm10, %v667_v44, %v923_v55  ;;  %v537_v63 = vmul.f32 %v1800_v0, %v1470_v56  ;;  %v538_v1 = vmul.f32 %v1800_v0, %v1471_v57  ;;  %v1478_v2 = vunpack.c.l.bf16 %v1659_v53 }
  0x53   : > { %1179 = vst [vmem:[%s1831_s28 + $0x150] sm:$0xff] %v1051_v62  ;;  %vm796_vm11 = vcmp.ge.f32.partialorder %v668_v59, 0.0  ;;  %v924_v4 = vmul.f32 0.01, %v668_v59  ;;  %v539_v6 = vmul.f32 %v1800_v0, %v1474_v60  ;;  %v540_v7 = vmul.f32 %v1800_v0, %v1475_v61  ;;  %v1664_v61 = vld [vmem:[%s1795_s20 + $0xe8] sm:$0xff]  }
  0x54   : > { %v669_v8 = vadd.f32 %v1808_v5, %v537_v63  ;;  %v670_v9 = vadd.f32 %v1808_v5, %v538_v1  ;;  %v541_v10 = vmul.f32 %v1800_v0, %v1478_v2  ;;  %v1479_v11 = vunpack.c.h.bf16 %v1659_v53  ;;  %v1665_v2 = vld [vmem:[%s1795_s20 + $0xf0] sm:$0xff]  }
  0x55   : > { %v1052_v12 = vsel %vm796_vm11, %v668_v59, %v924_v4  ;;  %v671_v13 = vadd.f32 %v1808_v5, %v539_v6  ;;  %v672_v14 = vadd.f32 %v1808_v5, %v540_v7  ;;  %v1482_v15 = vunpack.c.l.bf16 %v1660_v3  ;;  %v1666_v6 = vld [vmem:[%s1795_s20 + $0xf8] sm:$0xff]  }
  0x56   : > { %1180 = vst [vmem:[%s1831_s28 + $0x158] sm:$0xff] %v1052_v12  ;;  %vm797_vm12 = vcmp.ge.f32.partialorder %v669_v8, 0.0  ;;  %v925_v16 = vmul.f32 0.01, %v669_v8  ;;  %vm798_vm13 = vcmp.ge.f32.partialorder %v670_v9, 0.0  ;;  %v673_v17 = vadd.f32 %v1808_v5, %v541_v10 }
  0x57   : > { %v926_v19 = vmul.f32 0.01, %v670_v9  ;;  %vm799_vm14 = vcmp.ge.f32.partialorder %v671_v13, 0.0  ;;  %v927_v20 = vmul.f32 0.01, %v671_v13  ;;  %vm800_vm15 = vcmp.ge.f32.partialorder %v672_v14, 0.0 }
  0x58   : > { %v1053_v21 = vsel %vm797_vm12, %v669_v8, %v925_v16  ;;  %v928_v22 = vmul.f32 0.01, %v672_v14  ;;  %vm801_vm0 = vcmp.ge.f32.partialorder %v673_v17, 0.0  ;;  %v929_v23 = vmul.f32 0.01, %v673_v17 }
  0x59   : > { %1181 = vst [vmem:[%s1831_s28 + $0x160] sm:$0xff] %v1053_v21  ;;  %v1054_v25 = vsel %vm798_vm13, %v670_v9, %v926_v19  ;;  %v1055_v26 = vsel %vm799_vm14, %v671_v13, %v927_v20  ;;  %v542_v27 = vmul.f32 %v1800_v0, %v1479_v11  ;;  %v543_v28 = vmul.f32 %v1800_v0, %v1482_v15  ;;  %v1667_v19 = vld [vmem:[%s1795_s20 + $0x100] sm:$0xff]  }
  0x5a   : > { %1182 = vst [vmem:[%s1831_s28 + $0x168] sm:$0xff] %v1054_v25  ;;  %v1056_v30 = vsel %vm800_vm15, %v672_v14, %v928_v22  ;;  %v1057_v31 = vsel %vm801_vm0, %v673_v17, %v929_v23  ;;  %v1483_v32 = vunpack.c.h.bf16 %v1660_v3  ;;  %v1486_v33 = vunpack.c.l.bf16 %v1661_v18 }
  0x5b   : > { %1183 = vst [vmem:[%s1831_s28 + $0x170] sm:$0xff] %v1055_v26  ;;  %v674_v34 = vadd.f32 %v1808_v5, %v542_v27  ;;  %v675_v35 = vadd.f32 %v1808_v5, %v543_v28  ;;  %v1487_v36 = vunpack.c.h.bf16 %v1661_v18  ;;  %v1490_v37 = vunpack.c.l.bf16 %v1662_v24 }
  0x5c   : > { %1184 = vst [vmem:[%s1831_s28 + $0x178] sm:$0xff] %v1056_v30  ;;  %v544_v38 = vmul.f32 %v1800_v0, %v1483_v32  ;;  %v545_v39 = vmul.f32 %v1800_v0, %v1486_v33  ;;  %v1491_v40 = vunpack.c.h.bf16 %v1662_v24  ;;  %v1494_v41 = vunpack.c.l.bf16 %v1663_v29  ;;  %v1668_v33 = vld [vmem:[%s1795_s20 + $0x108] sm:$0xff]  }
  0x5d   : > { %1185 = vst [vmem:[%s1831_s28 + $0x180] sm:$0xff] %v1057_v31  ;;  %vm802_vm1 = vcmp.ge.f32.partialorder %v674_v34, 0.0  ;;  %v930_v42 = vmul.f32 0.01, %v674_v34  ;;  %vm803_vm2 = vcmp.ge.f32.partialorder %v675_v35, 0.0  ;;  %v546_v43 = vmul.f32 %v1800_v0, %v1487_v36 }
  0x5e   : > { %v931_v44 = vmul.f32 0.01, %v675_v35  ;;  %v676_v45 = vadd.f32 %v1808_v5, %v544_v38  ;;  %v677_v46 = vadd.f32 %v1808_v5, %v545_v39  ;;  %v547_v47 = vmul.f32 %v1800_v0, %v1490_v37  ;;  %v1669_v39 = vld [vmem:[%s1795_s20 + $0x110] sm:$0xff]  }
  0x5f   : > { %v1058_v48 = vsel %vm802_vm1, %v674_v34, %v930_v42  ;;  %v678_v49 = vadd.f32 %v1808_v5, %v546_v43  ;;  %v548_v50 = vmul.f32 %v1800_v0, %v1491_v40  ;;  %v549_v51 = vmul.f32 %v1800_v0, %v1494_v41 }
  0x60   : > { %1186 = vst [vmem:[%s1831_s28 + $0x188] sm:$0xff] %v1058_v48  ;;  %v1059_v52 = vsel %vm803_vm2, %v675_v35, %v931_v44  ;;  %vm804_vm3 = vcmp.ge.f32.partialorder %v676_v45, 0.0  ;;  %v932_v53 = vmul.f32 0.01, %v676_v45  ;;  %vm805_vm4 = vcmp.ge.f32.partialorder %v677_v46, 0.0  ;;  %v1670_v44 = vld [vmem:[%s1795_s20 + $0x118] sm:$0xff]  }
  0x61   : > { %1187 = vst [vmem:[%s1831_s28 + $0x190] sm:$0xff] %v1059_v52  ;;  %v933_v54 = vmul.f32 0.01, %v677_v46  ;;  %vm806_vm5 = vcmp.ge.f32.partialorder %v678_v49, 0.0  ;;  %v934_v55 = vmul.f32 0.01, %v678_v49  ;;  %v679_v56 = vadd.f32 %v1808_v5, %v547_v47 }
  0x62   : > { %v1060_v57 = vsel %vm804_vm3, %v676_v45, %v932_v53  ;;  %v680_v58 = vadd.f32 %v1808_v5, %v548_v50  ;;  %v681_v59 = vadd.f32 %v1808_v5, %v549_v51  ;;  %v1495_v60 = vunpack.c.h.bf16 %v1663_v29 }
  0x63   : > { %1188 = vst [vmem:[%s1831_s28 + $0x198] sm:$0xff] %v1060_v57  ;;  %v1061_v62 = vsel %vm805_vm4, %v677_v46, %v933_v54  ;;  %v1062_v63 = vsel %vm806_vm5, %v678_v49, %v934_v55  ;;  %vm807_vm6 = vcmp.ge.f32.partialorder %v679_v56, 0.0  ;;  %v935_v1 = vmul.f32 0.01, %v679_v56 }
  0x64   : > { %1189 = vst [vmem:[%s1831_s28 + $0x1a0] sm:$0xff] %v1061_v62  ;;  %vm808_vm7 = vcmp.ge.f32.partialorder %v680_v58, 0.0  ;;  %v936_v3 = vmul.f32 0.01, %v680_v58  ;;  %vm809_vm8 = vcmp.ge.f32.partialorder %v681_v59, 0.0  ;;  %v550_v4 = vmul.f32 %v1800_v0, %v1495_v60 }
  0x65   : > { %1190 = vst [vmem:[%s1831_s28 + $0x1a8] sm:$0xff] %v1062_v63  ;;  %v1063_v7 = vsel %vm807_vm6, %v679_v56, %v935_v1  ;;  %v937_v8 = vmul.f32 0.01, %v681_v59  ;;  %v1498_v9 = vunpack.c.l.bf16 %v1664_v61  ;;  %v1499_v10 = vunpack.c.h.bf16 %v1664_v61 }
  0x66   : > { %1191 = vst [vmem:[%s1831_s28 + $0x1b0] sm:$0xff] %v1063_v7  ;;  %v1064_v11 = vsel %vm808_vm7, %v680_v58, %v936_v3  ;;  %v682_v12 = vadd.f32 %v1808_v5, %v550_v4  ;;  %v1502_v13 = vunpack.c.l.bf16 %v1665_v2  ;;  %v1503_v14 = vunpack.c.h.bf16 %v1665_v2 }
  0x67   : > { %1192 = vst [vmem:[%s1831_s28 + $0x1b8] sm:$0xff] %v1064_v11  ;;  %v1065_v15 = vsel %vm809_vm8, %v681_v59, %v937_v8  ;;  %v551_v16 = vmul.f32 %v1800_v0, %v1498_v9  ;;  %v552_v17 = vmul.f32 %v1800_v0, %v1499_v10  ;;  %v1506_v18 = vunpack.c.l.bf16 %v1666_v6 }
  0x68   : > { %1193 = vst [vmem:[%s1831_s28 + $0x1c0] sm:$0xff] %v1065_v15  ;;  %vm810_vm9 = vcmp.ge.f32.partialorder %v682_v12, 0.0  ;;  %v938_v20 = vmul.f32 0.01, %v682_v12  ;;  %v553_v21 = vmul.f32 %v1800_v0, %v1502_v13  ;;  %v554_v22 = vmul.f32 %v1800_v0, %v1503_v14  ;;  %v1671_v14 = vld [vmem:[%s1795_s20 + $0x120] sm:$0xff]  }
  0x69   : > { %v683_v23 = vadd.f32 %v1808_v5, %v551_v16  ;;  %v684_v24 = vadd.f32 %v1808_v5, %v552_v17  ;;  %v555_v25 = vmul.f32 %v1800_v0, %v1506_v18  ;;  %v1507_v26 = vunpack.c.h.bf16 %v1666_v6  ;;  %v1672_v17 = vld [vmem:[%s1795_s20 + $0x128] sm:$0xff]  }
  0x6a   : > { %v1066_v27 = vsel %vm810_vm9, %v682_v12, %v938_v20  ;;  %v685_v28 = vadd.f32 %v1808_v5, %v553_v21  ;;  %v686_v29 = vadd.f32 %v1808_v5, %v554_v22  ;;  %v1510_v30 = vunpack.c.l.bf16 %v1667_v19  ;;  %v1673_v21 = vld [vmem:[%s1795_s20 + $0x130] sm:$0xff]  }
  0x6b   : > { %1194 = vst [vmem:[%s1831_s28 + $0x1c8] sm:$0xff] %v1066_v27  ;;  %vm811_vm10 = vcmp.ge.f32.partialorder %v683_v23, 0.0  ;;  %v939_v31 = vmul.f32 0.01, %v683_v23  ;;  %vm812_vm11 = vcmp.ge.f32.partialorder %v684_v24, 0.0  ;;  %v687_v32 = vadd.f32 %v1808_v5, %v555_v25 }
  0x6c   : > { %v940_v34 = vmul.f32 0.01, %v684_v24  ;;  %vm813_vm12 = vcmp.ge.f32.partialorder %v685_v28, 0.0  ;;  %v941_v35 = vmul.f32 0.01, %v685_v28  ;;  %vm814_vm13 = vcmp.ge.f32.partialorder %v686_v29, 0.0 }
  0x6d   : > { %v1067_v36 = vsel %vm811_vm10, %v683_v23, %v939_v31  ;;  %v942_v37 = vmul.f32 0.01, %v686_v29  ;;  %vm815_vm14 = vcmp.ge.f32.partialorder %v687_v32, 0.0  ;;  %v943_v38 = vmul.f32 0.01, %v687_v32 }
  0x6e   : > { %1195 = vst [vmem:[%s1831_s28 + $0x1d0] sm:$0xff] %v1067_v36  ;;  %v1068_v40 = vsel %vm812_vm11, %v684_v24, %v940_v34  ;;  %v1069_v41 = vsel %vm813_vm12, %v685_v28, %v941_v35  ;;  %v556_v42 = vmul.f32 %v1800_v0, %v1507_v26  ;;  %v557_v43 = vmul.f32 %v1800_v0, %v1510_v30  ;;  %v1674_v34 = vld [vmem:[%s1795_s20 + $0x138] sm:$0xff]  }
  0x6f   : > { %1196 = vst [vmem:[%s1831_s28 + $0x1d8] sm:$0xff] %v1068_v40  ;;  %v1070_v45 = vsel %vm814_vm13, %v686_v29, %v942_v37  ;;  %v1071_v46 = vsel %vm815_vm14, %v687_v32, %v943_v38  ;;  %v1511_v47 = vunpack.c.h.bf16 %v1667_v19  ;;  %v1514_v48 = vunpack.c.l.bf16 %v1668_v33  ;;  %v2068_v19 = vld [vmem:[%s2281_s1] ss:$0 sm:$0xff] }
  0x70   : > { %1197 = vst [vmem:[%s1831_s28 + $0x1e0] sm:$0xff] %v1069_v41  ;;  %v688_v49 = vadd.f32 %v1808_v5, %v556_v42  ;;  %v689_v50 = vadd.f32 %v1808_v5, %v557_v43  ;;  %v1515_v51 = vunpack.c.h.bf16 %v1668_v33  ;;  %v1518_v52 = vunpack.c.l.bf16 %v1669_v39 }
  0x71   : > { %1198 = vst [vmem:[%s1831_s28 + $0x1e8] sm:$0xff] %v1070_v45  ;;  %v558_v53 = vmul.f32 %v1800_v0, %v1511_v47  ;;  %v559_v54 = vmul.f32 %v1800_v0, %v1514_v48  ;;  %v1519_v55 = vunpack.c.h.bf16 %v1669_v39  ;;  %v1522_v56 = vunpack.c.l.bf16 %v1670_v44  ;;  %v1675_v48 = vld [vmem:[%s1795_s20 + $0x140] sm:$0xff]  }
  0x72   : > { %1199 = vst [vmem:[%s1831_s28 + $0x1f0] sm:$0xff] %v1071_v46  ;;  %vm816_vm15 = vcmp.ge.f32.partialorder %v688_v49, 0.0  ;;  %v944_v57 = vmul.f32 0.01, %v688_v49  ;;  %vm817_vm0 = vcmp.ge.f32.partialorder %v689_v50, 0.0  ;;  %v560_v58 = vmul.f32 %v1800_v0, %v1515_v51 }
  0x73   : > { %v945_v59 = vmul.f32 0.01, %v689_v50  ;;  %v690_v60 = vadd.f32 %v1808_v5, %v558_v53  ;;  %v691_v61 = vadd.f32 %v1808_v5, %v559_v54  ;;  %v561_v62 = vmul.f32 %v1800_v0, %v1518_v52  ;;  %v1676_v54 = vld [vmem:[%s1795_s20 + $0x148] sm:$0xff]  }
  0x74   : > { %v1072_v63 = vsel %vm816_vm15, %v688_v49, %v944_v57  ;;  %v692_v1 = vadd.f32 %v1808_v5, %v560_v58  ;;  %v562_v2 = vmul.f32 %v1800_v0, %v1519_v55  ;;  %v563_v3 = vmul.f32 %v1800_v0, %v1522_v56  ;;  %v2057_v0 = vld [vmem:[%s2282_s2] ss:$0 sm:$0xff] }
  0x75   : > { %1200 = vst [vmem:[%s1831_s28 + $0x1f8] sm:$0xff] %v1072_v63  ;;  %v1073_v4 = vsel %vm817_vm0, %v689_v50, %v945_v59  ;;  %vm818_vm1 = vcmp.ge.f32.partialorder %v690_v60, 0.0  ;;  %v946_v6 = vmul.f32 0.01, %v690_v60  ;;  %vm819_vm2 = vcmp.ge.f32.partialorder %v691_v61, 0.0  ;;  %v1677_v59 = vld [vmem:[%s1795_s20 + $0x150] sm:$0xff]  }
  0x76   : > { %1201 = vst [vmem:[%s1831_s28 + $0x200] sm:$0xff] %v1073_v4  ;;  %v947_v7 = vmul.f32 0.01, %v691_v61  ;;  %vm820_vm3 = vcmp.ge.f32.partialorder %v692_v1, 0.0  ;;  %v948_v8 = vmul.f32 0.01, %v692_v1  ;;  %v693_v9 = vadd.f32 %v1808_v5, %v561_v62 }
  0x77   : > { %v1074_v10 = vsel %vm818_vm1, %v690_v60, %v946_v6  ;;  %v694_v11 = vadd.f32 %v2057_v0, %v562_v2  ;;  %v695_v12 = vadd.f32 %v2057_v0, %v563_v3  ;;  %v1523_v13 = vunpack.c.h.bf16 %v1670_v44 }
  0x78   : > { %1202 = vst [vmem:[%s1831_s28 + $0x208] sm:$0xff] %v1074_v10  ;;  %v1075_v15 = vsel %vm819_vm2, %v691_v61, %v947_v7  ;;  %v1076_v16 = vsel %vm820_vm3, %v692_v1, %v948_v8  ;;  %vm821_vm4 = vcmp.ge.f32.partialorder %v693_v9, 0.0  ;;  %v949_v5 = vmul.f32 0.01, %v693_v9 }
  0x79   : > { %1203 = vst [vmem:[%s1831_s28 + $0x210] sm:$0xff] %v1075_v15  ;;  %vm822_vm5 = vcmp.ge.f32.partialorder %v694_v11, 0.0  ;;  %v950_v18 = vmul.f32 0.01, %v694_v11  ;;  %vm823_vm6 = vcmp.ge.f32.partialorder %v695_v12, 0.0  ;;  %v564_v20 = vmul.f32 %v2068_v19, %v1523_v13 }
  0x7a   : > { %1204 = vst [vmem:[%s1831_s28 + $0x218] sm:$0xff] %v1076_v16  ;;  %v1077_v22 = vsel %vm821_vm4, %v693_v9, %v949_v5  ;;  %v951_v23 = vmul.f32 0.01, %v695_v12  ;;  %v1526_v24 = vunpack.c.l.bf16 %v1671_v14  ;;  %v1527_v25 = vunpack.c.h.bf16 %v1671_v14 }
  0x7b   : > { %1205 = vst [vmem:[%s1831_s28 + $0x220] sm:$0xff] %v1077_v22  ;;  %v1078_v26 = vsel %vm822_vm5, %v694_v11, %v950_v18  ;;  %v696_v27 = vadd.f32 %v2057_v0, %v564_v20  ;;  %v1530_v28 = vunpack.c.l.bf16 %v1672_v17  ;;  %v1531_v29 = vunpack.c.h.bf16 %v1672_v17 }
  0x7c   : > { %1206 = vst [vmem:[%s1831_s28 + $0x228] sm:$0xff] %v1078_v26  ;;  %v1079_v30 = vsel %vm823_vm6, %v695_v12, %v951_v23  ;;  %v565_v31 = vmul.f32 %v2068_v19, %v1526_v24  ;;  %v566_v32 = vmul.f32 %v2068_v19, %v1527_v25  ;;  %v1534_v33 = vunpack.c.l.bf16 %v1673_v21 }
  0x7d   : > { %1207 = vst [vmem:[%s1831_s28 + $0x230] sm:$0xff] %v1079_v30  ;;  %vm824_vm7 = vcmp.ge.f32.partialorder %v696_v27, 0.0  ;;  %v952_v35 = vmul.f32 0.01, %v696_v27  ;;  %v567_v36 = vmul.f32 %v2068_v19, %v1530_v28  ;;  %v568_v37 = vmul.f32 %v2068_v19, %v1531_v29  ;;  %v1678_v29 = vld [vmem:[%s1795_s20 + $0x158] sm:$0xff]  }
  0x7e   : > { %v697_v38 = vadd.f32 %v2057_v0, %v565_v31  ;;  %v698_v39 = vadd.f32 %v2057_v0, %v566_v32  ;;  %v569_v40 = vmul.f32 %v2068_v19, %v1534_v33  ;;  %v1535_v41 = vunpack.c.h.bf16 %v1673_v21  ;;  %v1679_v33 = vld [vmem:[%s1795_s20 + $0x160] sm:$0xff]  }
  0x7f   : > { %v1080_v42 = vsel %vm824_vm7, %v696_v27, %v952_v35  ;;  %v699_v43 = vadd.f32 %v2057_v0, %v567_v36  ;;  %v700_v44 = vadd.f32 %v2057_v0, %v568_v37  ;;  %v1538_v45 = vunpack.c.l.bf16 %v1674_v34  ;;  %v1680_v36 = vld [vmem:[%s1795_s20 + $0x168] sm:$0xff]  }
  0x80   : > { %1208 = vst [vmem:[%s1831_s28 + $0x238] sm:$0xff] %v1080_v42  ;;  %vm825_vm8 = vcmp.ge.f32.partialorder %v697_v38, 0.0  ;;  %v953_v46 = vmul.f32 0.01, %v697_v38  ;;  %vm826_vm9 = vcmp.ge.f32.partialorder %v698_v39, 0.0  ;;  %v701_v47 = vadd.f32 %v2057_v0, %v569_v40 }
  0x81   : > { %v954_v49 = vmul.f32 0.01, %v698_v39  ;;  %vm827_vm10 = vcmp.ge.f32.partialorder %v699_v43, 0.0  ;;  %v955_v50 = vmul.f32 0.01, %v699_v43  ;;  %vm828_vm11 = vcmp.ge.f32.partialorder %v700_v44, 0.0 }
  0x82   : > { %v1081_v51 = vsel %vm825_vm8, %v697_v38, %v953_v46  ;;  %v956_v52 = vmul.f32 0.01, %v700_v44  ;;  %vm829_vm12 = vcmp.ge.f32.partialorder %v701_v47, 0.0  ;;  %v957_v53 = vmul.f32 0.01, %v701_v47 }
  0x83   : > { %1209 = vst [vmem:[%s1831_s28 + $0x240] sm:$0xff] %v1081_v51  ;;  %v1082_v55 = vsel %vm826_vm9, %v698_v39, %v954_v49  ;;  %v1083_v56 = vsel %vm827_vm10, %v699_v43, %v955_v50  ;;  %v570_v57 = vmul.f32 %v2068_v19, %v1535_v41  ;;  %v571_v58 = vmul.f32 %v2068_v19, %v1538_v45  ;;  %v1681_v49 = vld [vmem:[%s1795_s20 + $0x170] sm:$0xff]  }
  0x84   : > { %1210 = vst [vmem:[%s1831_s28 + $0x248] sm:$0xff] %v1082_v55  ;;  %v1084_v60 = vsel %vm828_vm11, %v700_v44, %v956_v52  ;;  %v1085_v61 = vsel %vm829_vm12, %v701_v47, %v957_v53  ;;  %v1539_v62 = vunpack.c.h.bf16 %v1674_v34  ;;  %v1542_v63 = vunpack.c.l.bf16 %v1675_v48 }
  0x85   : > { %1211 = vst [vmem:[%s1831_s28 + $0x250] sm:$0xff] %v1083_v56  ;;  %v702_v1 = vadd.f32 %v2057_v0, %v570_v57  ;;  %v703_v2 = vadd.f32 %v2057_v0, %v571_v58  ;;  %v1543_v3 = vunpack.c.h.bf16 %v1675_v48  ;;  %v1546_v4 = vunpack.c.l.bf16 %v1676_v54 }
  0x86   : > { %1212 = vst [vmem:[%s1831_s28 + $0x258] sm:$0xff] %v1084_v60  ;;  %v572_v6 = vmul.f32 %v2068_v19, %v1539_v62  ;;  %v573_v7 = vmul.f32 %v2068_v19, %v1542_v63  ;;  %v1547_v8 = vunpack.c.h.bf16 %v1676_v54  ;;  %v1550_v9 = vunpack.c.l.bf16 %v1677_v59  ;;  %v1682_v63 = vld [vmem:[%s1795_s20 + $0x178] sm:$0xff]  }
  0x87   : > { %1213 = vst [vmem:[%s1831_s28 + $0x260] sm:$0xff] %v1085_v61  ;;  %vm830_vm13 = vcmp.ge.f32.partialorder %v702_v1, 0.0  ;;  %v958_v10 = vmul.f32 0.01, %v702_v1  ;;  %vm831_vm14 = vcmp.ge.f32.partialorder %v703_v2, 0.0  ;;  %v574_v11 = vmul.f32 %v2068_v19, %v1543_v3 }
  0x88   : > { %v959_v12 = vmul.f32 0.01, %v703_v2  ;;  %v704_v13 = vadd.f32 %v2057_v0, %v572_v6  ;;  %v705_v14 = vadd.f32 %v2057_v0, %v573_v7  ;;  %v575_v15 = vmul.f32 %v2068_v19, %v1546_v4  ;;  %v1683_v7 = vld [vmem:[%s1795_s20 + $0x180] sm:$0xff]  }
  0x89   : > { %v1086_v16 = vsel %vm830_vm13, %v702_v1, %v958_v10  ;;  %v706_v5 = vadd.f32 %v2057_v0, %v574_v11  ;;  %v576_v17 = vmul.f32 %v2068_v19, %v1547_v8  ;;  %v577_v18 = vmul.f32 %v2068_v19, %v1550_v9 }
  0x8a   : > { %1214 = vst [vmem:[%s1831_s28 + $0x268] sm:$0xff] %v1086_v16  ;;  %v1087_v20 = vsel %vm831_vm14, %v703_v2, %v959_v12  ;;  %vm832_vm15 = vcmp.ge.f32.partialorder %v704_v13, 0.0  ;;  %v960_v21 = vmul.f32 0.01, %v704_v13  ;;  %vm833_vm0 = vcmp.ge.f32.partialorder %v705_v14, 0.0  ;;  %v1684_v12 = vld [vmem:[%s1795_s20 + $0x188] sm:$0xff]  }
  0x8b   : > { %1215 = vst [vmem:[%s1831_s28 + $0x270] sm:$0xff] %v1087_v20  ;;  %v961_v22 = vmul.f32 0.01, %v705_v14  ;;  %vm834_vm1 = vcmp.ge.f32.partialorder %v706_v5, 0.0  ;;  %v962_v23 = vmul.f32 0.01, %v706_v5  ;;  %v707_v24 = vadd.f32 %v2057_v0, %v575_v15 }
  0x8c   : > { %v1088_v25 = vsel %vm832_vm15, %v704_v13, %v960_v21  ;;  %v708_v26 = vadd.f32 %v2057_v0, %v576_v17  ;;  %v709_v27 = vadd.f32 %v2057_v0, %v577_v18  ;;  %v1551_v28 = vunpack.c.h.bf16 %v1677_v59 }
  0x8d   : > { %1216 = vst [vmem:[%s1831_s28 + $0x278] sm:$0xff] %v1088_v25  ;;  %v1089_v30 = vsel %vm833_vm0, %v705_v14, %v961_v22  ;;  %v1090_v31 = vsel %vm834_vm1, %v706_v5, %v962_v23  ;;  %vm835_vm2 = vcmp.ge.f32.partialorder %v707_v24, 0.0  ;;  %v963_v32 = vmul.f32 0.01, %v707_v24 }
  0x8e   : > { %1217 = vst [vmem:[%s1831_s28 + $0x280] sm:$0xff] %v1089_v30  ;;  %vm836_vm3 = vcmp.ge.f32.partialorder %v708_v26, 0.0  ;;  %v964_v34 = vmul.f32 0.01, %v708_v26  ;;  %vm837_vm4 = vcmp.ge.f32.partialorder %v709_v27, 0.0  ;;  %v578_v35 = vmul.f32 %v2068_v19, %v1551_v28 }
  0x8f   : > { %1218 = vst [vmem:[%s1831_s28 + $0x288] sm:$0xff] %v1090_v31  ;;  %v1091_v37 = vsel %vm835_vm2, %v707_v24, %v963_v32  ;;  %v965_v38 = vmul.f32 0.01, %v709_v27  ;;  %v1554_v39 = vunpack.c.l.bf16 %v1678_v29  ;;  %v1555_v40 = vunpack.c.h.bf16 %v1678_v29 }
  0x90   : > { %1219 = vst [vmem:[%s1831_s28 + $0x290] sm:$0xff] %v1091_v37  ;;  %v1092_v41 = vsel %vm836_vm3, %v708_v26, %v964_v34  ;;  %v710_v42 = vadd.f32 %v2057_v0, %v578_v35  ;;  %v1558_v43 = vunpack.c.l.bf16 %v1679_v33  ;;  %v1559_v44 = vunpack.c.h.bf16 %v1679_v33 }
  0x91   : > { %1220 = vst [vmem:[%s1831_s28 + $0x298] sm:$0xff] %v1092_v41  ;;  %v1093_v45 = vsel %vm837_vm4, %v709_v27, %v965_v38  ;;  %v579_v46 = vmul.f32 %v2068_v19, %v1554_v39  ;;  %v580_v47 = vmul.f32 %v2068_v19, %v1555_v40  ;;  %v1562_v48 = vunpack.c.l.bf16 %v1680_v36 }
  0x92   : > { %1221 = vst [vmem:[%s1831_s28 + $0x2a0] sm:$0xff] %v1093_v45  ;;  %vm838_vm5 = vcmp.ge.f32.partialorder %v710_v42, 0.0  ;;  %v966_v50 = vmul.f32 0.01, %v710_v42  ;;  %v581_v51 = vmul.f32 %v2068_v19, %v1558_v43  ;;  %v582_v52 = vmul.f32 %v2068_v19, %v1559_v44  ;;  %v1685_v44 = vld [vmem:[%s1795_s20 + $0x190] sm:$0xff]  }
  0x93   : > { %v711_v53 = vadd.f32 %v2057_v0, %v579_v46  ;;  %v712_v54 = vadd.f32 %v2057_v0, %v580_v47  ;;  %v583_v55 = vmul.f32 %v2068_v19, %v1562_v48  ;;  %v1563_v56 = vunpack.c.h.bf16 %v1680_v36  ;;  %v1686_v48 = vld [vmem:[%s1795_s20 + $0x198] sm:$0xff]  }
  0x94   : > { %v1094_v57 = vsel %vm838_vm5, %v710_v42, %v966_v50  ;;  %v713_v58 = vadd.f32 %v2057_v0, %v581_v51  ;;  %v714_v59 = vadd.f32 %v2057_v0, %v582_v52  ;;  %v1566_v60 = vunpack.c.l.bf16 %v1681_v49  ;;  %v1687_v51 = vld [vmem:[%s1795_s20 + $0x1a0] sm:$0xff]  }
  0x95   : > { %1222 = vst [vmem:[%s1831_s28 + $0x2a8] sm:$0xff] %v1094_v57  ;;  %vm839_vm6 = vcmp.ge.f32.partialorder %v711_v53, 0.0  ;;  %v967_v61 = vmul.f32 0.01, %v711_v53  ;;  %vm840_vm7 = vcmp.ge.f32.partialorder %v712_v54, 0.0  ;;  %v715_v62 = vadd.f32 %v2057_v0, %v583_v55 }
  0x96   : > { %v968_v1 = vmul.f32 0.01, %v712_v54  ;;  %vm841_vm8 = vcmp.ge.f32.partialorder %v713_v58, 0.0  ;;  %v969_v2 = vmul.f32 0.01, %v713_v58  ;;  %vm842_vm9 = vcmp.ge.f32.partialorder %v714_v59, 0.0 }
  0x97   : > { %v1095_v3 = vsel %vm839_vm6, %v711_v53, %v967_v61  ;;  %v970_v4 = vmul.f32 0.01, %v714_v59  ;;  %vm843_vm10 = vcmp.ge.f32.partialorder %v715_v62, 0.0  ;;  %v971_v6 = vmul.f32 0.01, %v715_v62 }
  0x98   : > { %1223 = vst [vmem:[%s1831_s28 + $0x2b0] sm:$0xff] %v1095_v3  ;;  %v1096_v8 = vsel %vm840_vm7, %v712_v54, %v968_v1  ;;  %v1097_v9 = vsel %vm841_vm8, %v713_v58, %v969_v2  ;;  %v584_v10 = vmul.f32 %v2068_v19, %v1563_v56  ;;  %v585_v11 = vmul.f32 %v2068_v19, %v1566_v60  ;;  %v1688_v1 = vld [vmem:[%s1795_s20 + $0x1a8] sm:$0xff]  }
  0x99   : > { %1224 = vst [vmem:[%s1831_s28 + $0x2b8] sm:$0xff] %v1096_v8  ;;  %v1098_v13 = vsel %vm842_vm9, %v714_v59, %v970_v4  ;;  %v1099_v14 = vsel %vm843_vm10, %v715_v62, %v971_v6  ;;  %v1567_v15 = vunpack.c.h.bf16 %v1681_v49  ;;  %v1570_v16 = vunpack.c.l.bf16 %v1682_v63 }
  0x9a   : > { %1225 = vst [vmem:[%s1831_s28 + $0x2c0] sm:$0xff] %v1097_v9  ;;  %v716_v5 = vadd.f32 %v2057_v0, %v584_v10  ;;  %v717_v17 = vadd.f32 %v2057_v0, %v585_v11  ;;  %v1571_v18 = vunpack.c.h.bf16 %v1682_v63  ;;  %v1574_v20 = vunpack.c.l.bf16 %v1683_v7 }
  0x9b   : > { %1226 = vst [vmem:[%s1831_s28 + $0x2c8] sm:$0xff] %v1098_v13  ;;  %v586_v21 = vmul.f32 %v2068_v19, %v1567_v15  ;;  %v587_v22 = vmul.f32 %v2068_v19, %v1570_v16  ;;  %v1575_v23 = vunpack.c.h.bf16 %v1683_v7  ;;  %v1578_v24 = vunpack.c.l.bf16 %v1684_v12  ;;  %v1689_v16 = vld [vmem:[%s1795_s20 + $0x1b0] sm:$0xff]  }
  0x9c   : > { %1227 = vst [vmem:[%s1831_s28 + $0x2d0] sm:$0xff] %v1099_v14  ;;  %vm844_vm11 = vcmp.ge.f32.partialorder %v716_v5, 0.0  ;;  %v972_v25 = vmul.f32 0.01, %v716_v5  ;;  %vm845_vm12 = vcmp.ge.f32.partialorder %v717_v17, 0.0  ;;  %v588_v26 = vmul.f32 %v2068_v19, %v1571_v18 }
  0x9d   : > { %v973_v27 = vmul.f32 0.01, %v717_v17  ;;  %v718_v28 = vadd.f32 %v2057_v0, %v586_v21  ;;  %v719_v29 = vadd.f32 %v2057_v0, %v587_v22  ;;  %v589_v30 = vmul.f32 %v2068_v19, %v1574_v20  ;;  %v1690_v22 = vld [vmem:[%s1795_s20 + $0x1b8] sm:$0xff]  }
  0x9e   : > { %v1100_v31 = vsel %vm844_vm11, %v716_v5, %v972_v25  ;;  %v720_v32 = vadd.f32 %v2057_v0, %v588_v26  ;;  %v590_v33 = vmul.f32 %v2068_v19, %v1575_v23  ;;  %v591_v34 = vmul.f32 %v2068_v19, %v1578_v24 }
  0x9f   : > { %1228 = vst [vmem:[%s1831_s28 + $0x2d8] sm:$0xff] %v1100_v31  ;;  %v1101_v35 = vsel %vm845_vm12, %v717_v17, %v973_v27  ;;  %vm846_vm13 = vcmp.ge.f32.partialorder %v718_v28, 0.0  ;;  %v974_v36 = vmul.f32 0.01, %v718_v28  ;;  %vm847_vm14 = vcmp.ge.f32.partialorder %v719_v29, 0.0  ;;  %v1691_v27 = vld [vmem:[%s1795_s20 + $0x1c0] sm:$0xff]  }
  0xa0   : > { %1229 = vst [vmem:[%s1831_s28 + $0x2e0] sm:$0xff] %v1101_v35  ;;  %v975_v37 = vmul.f32 0.01, %v719_v29  ;;  %vm848_vm15 = vcmp.ge.f32.partialorder %v720_v32, 0.0  ;;  %v976_v38 = vmul.f32 0.01, %v720_v32  ;;  %v721_v39 = vadd.f32 %v2057_v0, %v589_v30 }
  0xa1   : > { %v1102_v40 = vsel %vm846_vm13, %v718_v28, %v974_v36  ;;  %v722_v41 = vadd.f32 %v2057_v0, %v590_v33  ;;  %v723_v42 = vadd.f32 %v2057_v0, %v591_v34  ;;  %v1579_v43 = vunpack.c.h.bf16 %v1684_v12 }
  0xa2   : > { %1230 = vst [vmem:[%s1831_s28 + $0x2e8] sm:$0xff] %v1102_v40  ;;  %v1103_v45 = vsel %vm847_vm14, %v719_v29, %v975_v37  ;;  %v1104_v46 = vsel %vm848_vm15, %v720_v32, %v976_v38  ;;  %vm849_vm0 = vcmp.ge.f32.partialorder %v721_v39, 0.0  ;;  %v977_v47 = vmul.f32 0.01, %v721_v39 }
  0xa3   : > { %1231 = vst [vmem:[%s1831_s28 + $0x2f0] sm:$0xff] %v1103_v45  ;;  %vm850_vm1 = vcmp.ge.f32.partialorder %v722_v41, 0.0  ;;  %v978_v49 = vmul.f32 0.01, %v722_v41  ;;  %vm851_vm2 = vcmp.ge.f32.partialorder %v723_v42, 0.0  ;;  %v592_v50 = vmul.f32 %v2068_v19, %v1579_v43 }
  0xa4   : > { %1232 = vst [vmem:[%s1831_s28 + $0x2f8] sm:$0xff] %v1104_v46  ;;  %v1105_v52 = vsel %vm849_vm0, %v721_v39, %v977_v47  ;;  %v979_v53 = vmul.f32 0.01, %v723_v42  ;;  %v1582_v54 = vunpack.c.l.bf16 %v1685_v44  ;;  %v1583_v55 = vunpack.c.h.bf16 %v1685_v44 }
  0xa5   : > { %1233 = vst [vmem:[%s1831_s28 + $0x300] sm:$0xff] %v1105_v52  ;;  %v1106_v56 = vsel %vm850_vm1, %v722_v41, %v978_v49  ;;  %v724_v57 = vadd.f32 %v2057_v0, %v592_v50  ;;  %v1586_v58 = vunpack.c.l.bf16 %v1686_v48  ;;  %v1587_v59 = vunpack.c.h.bf16 %v1686_v48 }
  0xa6   : > { %1234 = vst [vmem:[%s1831_s28 + $0x308] sm:$0xff] %v1106_v56  ;;  %v1107_v60 = vsel %vm851_vm2, %v723_v42, %v979_v53  ;;  %v593_v61 = vmul.f32 %v2068_v19, %v1582_v54  ;;  %v594_v62 = vmul.f32 %v2068_v19, %v1583_v55  ;;  %v1590_v63 = vunpack.c.l.bf16 %v1687_v51 }
  0xa7   : > { %1235 = vst [vmem:[%s1831_s28 + $0x310] sm:$0xff] %v1107_v60  ;;  %vm852_vm3 = vcmp.ge.f32.partialorder %v724_v57, 0.0  ;;  %v980_v2 = vmul.f32 0.01, %v724_v57  ;;  %v595_v3 = vmul.f32 %v2068_v19, %v1586_v58  ;;  %v596_v4 = vmul.f32 %v2068_v19, %v1587_v59  ;;  %v1692_v59 = vld [vmem:[%s1795_s20 + $0x1c8] sm:$0xff]  }
  0xa8   : > { %v725_v6 = vadd.f32 %v2057_v0, %v593_v61  ;;  %v726_v7 = vadd.f32 %v2057_v0, %v594_v62  ;;  %v597_v8 = vmul.f32 %v2068_v19, %v1590_v63  ;;  %v1591_v9 = vunpack.c.h.bf16 %v1687_v51  ;;  %v1693_v63 = vld [vmem:[%s1795_s20 + $0x1d0] sm:$0xff]  }
  0xa9   : > { %v1108_v10 = vsel %vm852_vm3, %v724_v57, %v980_v2  ;;  %v727_v11 = vadd.f32 %v2057_v0, %v595_v3  ;;  %v728_v12 = vadd.f32 %v2057_v0, %v596_v4  ;;  %v1594_v13 = vunpack.c.l.bf16 %v1688_v1  ;;  %v1694_v3 = vld [vmem:[%s1795_s20 + $0x1d8] sm:$0xff]  }
  0xaa   : > { %1236 = vst [vmem:[%s1831_s28 + $0x318] sm:$0xff] %v1108_v10  ;;  %vm853_vm4 = vcmp.ge.f32.partialorder %v725_v6, 0.0  ;;  %v981_v14 = vmul.f32 0.01, %v725_v6  ;;  %vm854_vm5 = vcmp.ge.f32.partialorder %v726_v7, 0.0  ;;  %v729_v15 = vadd.f32 %v2057_v0, %v597_v8 }
  0xab   : > { %v982_v5 = vmul.f32 0.01, %v726_v7  ;;  %vm855_vm6 = vcmp.ge.f32.partialorder %v727_v11, 0.0  ;;  %v983_v17 = vmul.f32 0.01, %v727_v11  ;;  %vm856_vm7 = vcmp.ge.f32.partialorder %v728_v12, 0.0 }
  0xac   : > { %v1109_v18 = vsel %vm853_vm4, %v725_v6, %v981_v14  ;;  %v984_v20 = vmul.f32 0.01, %v728_v12  ;;  %vm857_vm8 = vcmp.ge.f32.partialorder %v729_v15, 0.0  ;;  %v985_v21 = vmul.f32 0.01, %v729_v15 }
  0xad   : > { %1237 = vst [vmem:[%s1831_s28 + $0x320] sm:$0xff] %v1109_v18  ;;  %v1110_v23 = vsel %vm854_vm5, %v726_v7, %v982_v5  ;;  %v1111_v24 = vsel %vm855_vm6, %v727_v11, %v983_v17  ;;  %v598_v25 = vmul.f32 %v2068_v19, %v1591_v9  ;;  %v599_v26 = vmul.f32 %v2068_v19, %v1594_v13  ;;  %v1695_v5 = vld [vmem:[%s1795_s20 + $0x1e0] sm:$0xff]  }
  0xae   : > { %1238 = vst [vmem:[%s1831_s28 + $0x328] sm:$0xff] %v1110_v23  ;;  %v1112_v28 = vsel %vm856_vm7, %v728_v12, %v984_v20  ;;  %v1113_v29 = vsel %vm857_vm8, %v729_v15, %v985_v21  ;;  %v1595_v30 = vunpack.c.h.bf16 %v1688_v1  ;;  %v1598_v31 = vunpack.c.l.bf16 %v1689_v16 }
  0xaf   : > { %1239 = vst [vmem:[%s1831_s28 + $0x330] sm:$0xff] %v1111_v24  ;;  %v730_v32 = vadd.f32 %v2057_v0, %v598_v25  ;;  %v731_v33 = vadd.f32 %v2057_v0, %v599_v26  ;;  %v1599_v34 = vunpack.c.h.bf16 %v1689_v16  ;;  %v1602_v35 = vunpack.c.l.bf16 %v1690_v22 }
  0xb0   : > { %1240 = vst [vmem:[%s1831_s28 + $0x338] sm:$0xff] %v1112_v28  ;;  %v600_v36 = vmul.f32 %v2068_v19, %v1595_v30  ;;  %v601_v37 = vmul.f32 %v2068_v19, %v1598_v31  ;;  %v1603_v38 = vunpack.c.h.bf16 %v1690_v22  ;;  %v1606_v39 = vunpack.c.l.bf16 %v1691_v27  ;;  %v1696_v31 = vld [vmem:[%s1795_s20 + $0x1e8] sm:$0xff]  }
  0xb1   : > { %1241 = vst [vmem:[%s1831_s28 + $0x340] sm:$0xff] %v1113_v29  ;;  %vm858_vm9 = vcmp.ge.f32.partialorder %v730_v32, 0.0  ;;  %v986_v40 = vmul.f32 0.01, %v730_v32  ;;  %vm859_vm10 = vcmp.ge.f32.partialorder %v731_v33, 0.0  ;;  %v602_v41 = vmul.f32 %v2068_v19, %v1599_v34 }
  0xb2   : > { %v987_v42 = vmul.f32 0.01, %v731_v33  ;;  %v732_v43 = vadd.f32 %v2057_v0, %v600_v36  ;;  %v733_v44 = vadd.f32 %v2057_v0, %v601_v37  ;;  %v603_v45 = vmul.f32 %v2068_v19, %v1602_v35  ;;  %v1697_v37 = vld [vmem:[%s1795_s20 + $0x1f0] sm:$0xff]  }
  0xb3   : > { %v1114_v46 = vsel %vm858_vm9, %v730_v32, %v986_v40  ;;  %v734_v47 = vadd.f32 %v2057_v0, %v602_v41  ;;  %v604_v48 = vmul.f32 %v2068_v19, %v1603_v38  ;;  %v605_v49 = vmul.f32 %v2068_v19, %v1606_v39 }
  0xb4   : > { %1242 = vst [vmem:[%s1831_s28 + $0x348] sm:$0xff] %v1114_v46  ;;  %v1115_v50 = vsel %vm859_vm10, %v731_v33, %v987_v42  ;;  %vm860_vm11 = vcmp.ge.f32.partialorder %v732_v43, 0.0  ;;  %v988_v51 = vmul.f32 0.01, %v732_v43  ;;  %vm861_vm12 = vcmp.ge.f32.partialorder %v733_v44, 0.0  ;;  %v1698_v42 = vld [vmem:[%s1795_s20 + $0x1f8] sm:$0xff]  }
  0xb5   : > { %1243 = vst [vmem:[%s1831_s28 + $0x350] sm:$0xff] %v1115_v50  ;;  %v989_v52 = vmul.f32 0.01, %v733_v44  ;;  %vm862_vm13 = vcmp.ge.f32.partialorder %v734_v47, 0.0  ;;  %v990_v53 = vmul.f32 0.01, %v734_v47  ;;  %v735_v54 = vadd.f32 %v2057_v0, %v603_v45 }
  0xb6   : > { %v1116_v55 = vsel %vm860_vm11, %v732_v43, %v988_v51  ;;  %v736_v56 = vadd.f32 %v2057_v0, %v604_v48  ;;  %v737_v57 = vadd.f32 %v2057_v0, %v605_v49  ;;  %v1607_v58 = vunpack.c.h.bf16 %v1691_v27 }
  0xb7   : > { %1244 = vst [vmem:[%s1831_s28 + $0x358] sm:$0xff] %v1116_v55  ;;  %v1117_v60 = vsel %vm861_vm12, %v733_v44, %v989_v52  ;;  %v1118_v61 = vsel %vm862_vm13, %v734_v47, %v990_v53  ;;  %vm863_vm14 = vcmp.ge.f32.partialorder %v735_v54, 0.0  ;;  %v991_v62 = vmul.f32 0.01, %v735_v54 }
  0xb8   : > { %1245 = vst [vmem:[%s1831_s28 + $0x360] sm:$0xff] %v1117_v60  ;;  %vm864_vm15 = vcmp.ge.f32.partialorder %v736_v56, 0.0  ;;  %v992_v1 = vmul.f32 0.01, %v736_v56  ;;  %vm865_vm0 = vcmp.ge.f32.partialorder %v737_v57, 0.0  ;;  %v606_v2 = vmul.f32 %v2068_v19, %v1607_v58 }
  0xb9   : > { %1246 = vst [vmem:[%s1831_s28 + $0x368] sm:$0xff] %v1118_v61  ;;  %v1119_v4 = vsel %vm863_vm14, %v735_v54, %v991_v62  ;;  %v993_v6 = vmul.f32 0.01, %v737_v57  ;;  %v1610_v7 = vunpack.c.l.bf16 %v1692_v59  ;;  %v1611_v8 = vunpack.c.h.bf16 %v1692_v59 }
  0xba   : > { %1247 = vst [vmem:[%s1831_s28 + $0x370] sm:$0xff] %v1119_v4  ;;  %v1120_v9 = vsel %vm864_vm15, %v736_v56, %v992_v1  ;;  %v738_v10 = vadd.f32 %v2057_v0, %v606_v2  ;;  %v1614_v11 = vunpack.c.l.bf16 %v1693_v63  ;;  %v1615_v12 = vunpack.c.h.bf16 %v1693_v63 }
  0xbb   : > { %1248 = vst [vmem:[%s1831_s28 + $0x378] sm:$0xff] %v1120_v9  ;;  %v1121_v13 = vsel %vm865_vm0, %v737_v57, %v993_v6  ;;  %v607_v14 = vmul.f32 %v2068_v19, %v1610_v7  ;;  %v608_v15 = vmul.f32 %v2068_v19, %v1611_v8  ;;  %v1618_v16 = vunpack.c.l.bf16 %v1694_v3 }
  0xbc   : > { %1249 = vst [vmem:[%s1831_s28 + $0x380] sm:$0xff] %v1121_v13  ;;  %vm866_vm1 = vcmp.ge.f32.partialorder %v738_v10, 0.0  ;;  %v994_v17 = vmul.f32 0.01, %v738_v10  ;;  %v609_v18 = vmul.f32 %v2068_v19, %v1614_v11  ;;  %v610_v20 = vmul.f32 %v2068_v19, %v1615_v12 }
  0xbd   : > { %v739_v21 = vadd.f32 %v2057_v0, %v607_v14  ;;  %v740_v22 = vadd.f32 %v2057_v0, %v608_v15  ;;  %v611_v23 = vmul.f32 %v2068_v19, %v1618_v16  ;;  %v1619_v24 = vunpack.c.h.bf16 %v1694_v3 }
  0xbe   : > { %v1122_v25 = vsel %vm866_vm1, %v738_v10, %v994_v17  ;;  %v741_v26 = vadd.f32 %v2057_v0, %v609_v18  ;;  %v742_v27 = vadd.f32 %v2057_v0, %v610_v20  ;;  %v1622_v28 = vunpack.c.l.bf16 %v1695_v5 }
  0xbf   : > { %1250 = vst [vmem:[%s1831_s28 + $0x388] sm:$0xff] %v1122_v25  ;;  %vm867_vm2 = vcmp.ge.f32.partialorder %v739_v21, 0.0  ;;  %v995_v29 = vmul.f32 0.01, %v739_v21  ;;  %vm868_vm3 = vcmp.ge.f32.partialorder %v740_v22, 0.0  ;;  %v743_v30 = vadd.f32 %v2057_v0, %v611_v23 }
  0xc0   : > { %v996_v32 = vmul.f32 0.01, %v740_v22  ;;  %vm869_vm4 = vcmp.ge.f32.partialorder %v741_v26, 0.0  ;;  %v997_v33 = vmul.f32 0.01, %v741_v26  ;;  %vm870_vm5 = vcmp.ge.f32.partialorder %v742_v27, 0.0 }
  0xc1   : > { %v1123_v34 = vsel %vm867_vm2, %v739_v21, %v995_v29  ;;  %v998_v35 = vmul.f32 0.01, %v742_v27  ;;  %vm871_vm6 = vcmp.ge.f32.partialorder %v743_v30, 0.0  ;;  %v999_v36 = vmul.f32 0.01, %v743_v30 }
  0xc2   : > { %1251 = vst [vmem:[%s1831_s28 + $0x390] sm:$0xff] %v1123_v34  ;;  %v1124_v38 = vsel %vm868_vm3, %v740_v22, %v996_v32  ;;  %v1125_v39 = vsel %vm869_vm4, %v741_v26, %v997_v33  ;;  %v612_v40 = vmul.f32 %v2068_v19, %v1619_v24  ;;  %v613_v41 = vmul.f32 %v2068_v19, %v1622_v28 }
  0xc3   : > { %1252 = vst [vmem:[%s1831_s28 + $0x398] sm:$0xff] %v1124_v38  ;;  %v1126_v43 = vsel %vm870_vm5, %v742_v27, %v998_v35  ;;  %v1127_v44 = vsel %vm871_vm6, %v743_v30, %v999_v36  ;;  %v1623_v45 = vunpack.c.h.bf16 %v1695_v5  ;;  %v1626_v46 = vunpack.c.l.bf16 %v1696_v31 }
  0xc4   : > { %1253 = vst [vmem:[%s1831_s28 + $0x3a0] sm:$0xff] %v1125_v39  ;;  %v744_v47 = vadd.f32 %v2057_v0, %v612_v40  ;;  %v745_v48 = vadd.f32 %v2057_v0, %v613_v41  ;;  %v1627_v49 = vunpack.c.h.bf16 %v1696_v31  ;;  %v1630_v50 = vunpack.c.l.bf16 %v1697_v37 }
  0xc5   : > { %1254 = vst [vmem:[%s1831_s28 + $0x3a8] sm:$0xff] %v1126_v43  ;;  %v614_v51 = vmul.f32 %v2068_v19, %v1623_v45  ;;  %v615_v52 = vmul.f32 %v2068_v19, %v1626_v46  ;;  %v1631_v53 = vunpack.c.h.bf16 %v1697_v37  ;;  %v1634_v54 = vunpack.c.l.bf16 %v1698_v42 }
  0xc6   : > { %1255 = vst [vmem:[%s1831_s28 + $0x3b0] sm:$0xff] %v1127_v44  ;;  %vm872_vm7 = vcmp.ge.f32.partialorder %v744_v47, 0.0  ;;  %v1000_v55 = vmul.f32 0.01, %v744_v47  ;;  %vm873_vm8 = vcmp.ge.f32.partialorder %v745_v48, 0.0  ;;  %v616_v56 = vmul.f32 %v2068_v19, %v1627_v49 }
  0xc7   : > { %v1001_v57 = vmul.f32 0.01, %v745_v48  ;;  %v746_v58 = vadd.f32 %v2057_v0, %v614_v51  ;;  %v747_v59 = vadd.f32 %v2057_v0, %v615_v52  ;;  %v617_v60 = vmul.f32 %v2068_v19, %v1630_v50 }
  0xc8   : > { %v1128_v61 = vsel %vm872_vm7, %v744_v47, %v1000_v55  ;;  %v748_v62 = vadd.f32 %v2057_v0, %v616_v56  ;;  %v618_v63 = vmul.f32 %v2068_v19, %v1631_v53  ;;  %v619_v1 = vmul.f32 %v2068_v19, %v1634_v54 }
  0xc9   : > { %1256 = vst [vmem:[%s1831_s28 + $0x3b8] sm:$0xff] %v1128_v61  ;;  %v1129_v2 = vsel %vm873_vm8, %v745_v48, %v1001_v57  ;;  %vm874_vm9 = vcmp.ge.f32.partialorder %v746_v58, 0.0  ;;  %v1002_v3 = vmul.f32 0.01, %v746_v58  ;;  %vm875_vm10 = vcmp.ge.f32.partialorder %v747_v59, 0.0 }
  0xca   : > { %1257 = vst [vmem:[%s1831_s28 + $0x3c0] sm:$0xff] %v1129_v2  ;;  %v1003_v4 = vmul.f32 0.01, %v747_v59  ;;  %vm876_vm11 = vcmp.ge.f32.partialorder %v748_v62, 0.0  ;;  %v1004_v6 = vmul.f32 0.01, %v748_v62  ;;  %v749_v7 = vadd.f32 %v2057_v0, %v617_v60 }
  0xcb   : > { %v1130_v8 = vsel %vm874_vm9, %v746_v58, %v1002_v3  ;;  %v750_v9 = vadd.f32 %v2057_v0, %v618_v63  ;;  %v751_v10 = vadd.f32 %v2057_v0, %v619_v1  ;;  %v1635_v11 = vunpack.c.h.bf16 %v1698_v42 }
  0xcc   : > { %1258 = vst [vmem:[%s1831_s28 + $0x3c8] sm:$0xff] %v1130_v8  ;;  %v1131_v12 = vsel %vm875_vm10, %v747_v59, %v1003_v4  ;;  %v1132_v13 = vsel %vm876_vm11, %v748_v62, %v1004_v6  ;;  %vm877_vm12 = vcmp.ge.f32.partialorder %v749_v7, 0.0  ;;  %v1005_v14 = vmul.f32 0.01, %v749_v7 }
  0xcd   : > { %1259 = vst [vmem:[%s1831_s28 + $0x3d0] sm:$0xff] %v1131_v12  ;;  %vm878_vm13 = vcmp.ge.f32.partialorder %v750_v9, 0.0  ;;  %v1006_v15 = vmul.f32 0.01, %v750_v9  ;;  %vm879_vm14 = vcmp.ge.f32.partialorder %v751_v10, 0.0  ;;  %v620_v16 = vmul.f32 %v2068_v19, %v1635_v11 }
  0xce   : > { %1260 = vst [vmem:[%s1831_s28 + $0x3d8] sm:$0xff] %v1132_v13  ;;  %v1133_v5 = vsel %vm877_vm12, %v749_v7, %v1005_v14  ;;  %v1007_v17 = vmul.f32 0.01, %v751_v10 }
  0xcf   : > { %1261 = vst [vmem:[%s1831_s28 + $0x3e0] sm:$0xff] %v1133_v5  ;;  %v1134_v18 = vsel %vm878_vm13, %v750_v9, %v1006_v15  ;;  %v752_v20 = vadd.f32 %v2057_v0, %v620_v16 }
  0xd0   : > { %1262 = vst [vmem:[%s1831_s28 + $0x3e8] sm:$0xff] %v1134_v18  ;;  %v1135_v21 = vsel %vm879_vm14, %v751_v10, %v1007_v17 }
  0xd1   : > { %1263 = vst [vmem:[%s1831_s28 + $0x3f0] sm:$0xff] %v1135_v21  ;;  %vm880_vm15 = vcmp.ge.f32.partialorder %v752_v20, 0.0  ;;  %v1008_v22 = vmul.f32 0.01, %v752_v20 }
  0xd3   : > { %v1136_v23 = vsel %vm880_vm15, %v752_v20, %v1008_v22 }
  0xd4   : > { %1264 = vst [vmem:[%s1831_s28 + $0x3f8] sm:$0xff] %v1136_v23 }
  0xd5 PF: > { %s13_s14 = sadd.s32 1, %s1749_s14   ;;  %s2284_s12 = smov %s1745_s13 }
  0xd6   : > { %p10_p5 = scmp.ge.s32.totalorder %s13_s14, 4   ;;  %s2285_s13 = smov %s2287_s15 }
  0xd8   :  { %12 = sbr.rel (!%p10_p5) target bundleno = 2 (0x2), region = 68 }

// kernel: upsample_bn_forward.6
= control target key start
LH: loop header
LB: loop body
LE: loop exit
PB: predicated region body
PF: predicated region fallthrough
CT: control target
= control target key end

     0   :  { %s15430_s12 = smov 0   ;;  %s15432_s13 = smov 0   ;;  %s17499_s0 = inlined_call_operand.vmem [shape: bf16[2,1,3,1088,8], index: 0, kind: input, shape index: {}]   ;;  %s17500_s1 = inlined_call_operand.vmem [shape: bf16[9,8,128], index: 1, kind: input, shape index: {}]   ;;  %s17501_s2 = inlined_call_operand.vmem [shape: bf16[2048,128], index: 2, kind: output, shape index: {0}]   ;;  %s17502_s3 = inlined_call_operand.vmem [shape: f32[16,128], index: 3, kind: output, shape index: {1}]  }
   0x1   :  { %s15434_s14 = smov 0  }
   0x2 LB: > { %s33_s15 = sadd.s32 1, %s15404_s13  ;;  %p10736_p0 = scmp.ge.s32.totalorder %s15408_s14, 1  ;;  %s15408_s14 = sphi %s15434_s14, %s14_s14   ;;  %s15404_s13 = sphi %s15432_s13, %s17840_s13   ;;  %s15400_s12 = sphi %s15430_s12, %s17839_s12  }
   0x3   : > { %p35_p1 = scmp.ge.s32.totalorder %s33_s15, 2  ;;  %p182_p2 = scmp.lt.s32.totalorder %s15408_s14, 3 }
   0x5   : > { %s17842_s15 = smov (%p35_p1, %s33_s15), 0  ;;  %p183_p3 = pnand %p10736_p0, %p182_p2 }
   0x7   : > { %186 = sbr.rel (%p183_p3) target bundleno = 2474 (0x9aa), region = 28 }
   0xc   : > { %v10869_v0 = vld [vmem:[%s17500_s1 + $0x4] sm:$0xf]  ;;  %vm1033_vm0 = vcmask 1043456   ;;  %p226_p4 = scmp.lt.s32.totalorder %s15400_s12, 1  ;;  %v11638_v2 = vld [vmem:[%s17500_s1 + $0x8] sm:$0xf] }
   0xd   : > { %v1035_v1 = vsel %vm1033_vm0, %v10869_v0, 0  ;;  %v11959_v3 = vld [vmem:[%s17500_s1 + $0xc] sm:$0xf]  ;;  %v2854_v4 = vsel %vm1033_vm0, %v11638_v2, 0  ;;  %v388_v6 = vld [vmem:[%s17500_s1] sm:$0xf] }
   0xe   : > { %15358 = vmatpush.bf16.msra.mxu1 %v1035_v1  ;;  %15359 = vmatpush.bf16.msra.mxu2 %v1035_v1  ;;  %s15462_s22 = scalar_select %p226_p4, %s15400_s12, 1  ;;  %v3956_v5 = vsel %vm1033_vm0, %v11959_v3, 0  ;;  %v1879_v7 = vsel %vm1033_vm0, %v388_v6, 0  ;;  %v12408_v8 = vld [vmem:[%s17500_s1 + $0x10] sm:$0xf]  ;;  %vm840_vm1 = vcmask 64512  }
   0xf   : > { %15360 = vmatpush.bf16.msra.mxu3 %v1035_v1  ;;  %1044 = vmatpush.bf16.msra.mxu0 %v1035_v1  ;;  %v5058_v9 = vsel %vm1033_vm0, %v12408_v8, 0  ;;  %s10738_s16 = sshll.u32 %s15400_s12, 7 }
  0x10   : > { %s15361_s27 = smul.u32 1632, %s15462_s22  ;;  %p241_p5 = scmp.lt.s32.totalorder %s10738_s16, 255 }
  0x11   : > { %s10740_s20 = sshll.u32 %s15462_s22, 3 }
  0x12   : > { %2863 = vmatpush.bf16.msrb.mxu2 %v2854_v4  ;;  %1888 = vmatpush.bf16.msrb.mxu1 %v1879_v7  ;;  %s15478_s30 = scalar_lea.vmem %s17499_s0, %s15361_s27  ;;  %s17844_s16 = smov (!%p241_p5, %s10738_s16), 255 }
  0x13   : > { %3965 = vmatpush.bf16.msrb.mxu3 %v3956_v5  ;;  %5067 = vmatpush.bf16.msrb.mxu0 %v5058_v9  ;;  %v14479_v10 = vld [vmem:[%s15478_s30 + $0x2a0] sm:$0xff]  ;;  %v14480_v14 = vld [vmem:[%s15478_s30 + $0x2a8] sm:$0xff]  ;;  %v14481_v18 = vld [vmem:[%s15478_s30 + $0x2b0] sm:$0xff]  ;;  %s10739_s12 = sshll.u32 %s17844_s16, 2  ;;  %s257_s24 = scalar_lea.vmem %s17502_s3, %s10740_s20 }
  0x14   : > { %v14495_v11 = vld [vmem:[%s15478_s30 + $0x320] sm:$0xff]  ;;  %11142 = vmatmul.msk.bf16.vlgmr.msra.gmra.mxu1 %vm840_vm1, %v14479_v10  ;;  %v14496_v15 = vld [vmem:[%s15478_s30 + $0x328] sm:$0xff]  ;;  %v14497_v19 = vld [vmem:[%s15478_s30 + $0x330] sm:$0xff]  ;;  %s16860_s19 = scalar_lea.vmem %s17501_s2, %s10739_s12 }
  0x15   : > { %v14511_v12 = vld [vmem:[%s15478_s30 + $0x3a0] sm:$0xff]  ;;  %11158 = vmatmul.msk.bf16.vlgmr.msra.gmra.mxu2 %vm840_vm1, %v14495_v11  ;;  %v14512_v16 = vld [vmem:[%s15478_s30 + $0x3a8] sm:$0xff]  ;;  %v14513_v20 = vld [vmem:[%s15478_s30 + $0x3b0] sm:$0xff] }
  0x16   : > { %v14463_v13 = vld [vmem:[%s15478_s30 + $0x220] sm:$0xff]  ;;  %11174 = vmatmul.msk.bf16.vlgmr.msra.gmra.mxu3 %vm840_vm1, %v14511_v12  ;;  %v14464_v17 = vld [vmem:[%s15478_s30 + $0x228] sm:$0xff]  ;;  %v14465_v21 = vld [vmem:[%s15478_s30 + $0x230] sm:$0xff] }
  0x17   : > { %11126 = vmatmul.msk.bf16.vlgmr.msra.gmra.mxu0 %vm840_vm1, %v14463_v13  ;;  %v14482_v22 = vld [vmem:[%s15478_s30 + $0x2b8] sm:$0xff]  ;;  %v14483_v26 = vld [vmem:[%s15478_s30 + $0x2c0] sm:$0xff]  ;;  %v14484_v30 = vld [vmem:[%s15478_s30 + $0x2c8] sm:$0xff] }
  0x18   : > { %v14498_v23 = vld [vmem:[%s15478_s30 + $0x338] sm:$0xff]  ;;  %v14499_v27 = vld [vmem:[%s15478_s30 + $0x340] sm:$0xff]  ;;  %v14500_v31 = vld [vmem:[%s15478_s30 + $0x348] sm:$0xff] }
  0x19   : > { %v14514_v24 = vld [vmem:[%s15478_s30 + $0x3b8] sm:$0xff]  ;;  %v14515_v28 = vld [vmem:[%s15478_s30 + $0x3c0] sm:$0xff]  ;;  %v14516_v32 = vld [vmem:[%s15478_s30 + $0x3c8] sm:$0xff] }
  0x1a   : > { %v14466_v25 = vld [vmem:[%s15478_s30 + $0x238] sm:$0xff]  ;;  %v14467_v29 = vld [vmem:[%s15478_s30 + $0x240] sm:$0xff]  ;;  %v14468_v33 = vld [vmem:[%s15478_s30 + $0x248] sm:$0xff] }
  0x1b   : > { %v14485_v34 = vld [vmem:[%s15478_s30 + $0x2d0] sm:$0xff]  ;;  %v14486_v38 = vld [vmem:[%s15478_s30 + $0x2d8] sm:$0xff]  ;;  %v14487_v42 = vld [vmem:[%s15478_s30 + $0x2e0] sm:$0xff] }
  0x1c   : > { %v14501_v35 = vld [vmem:[%s15478_s30 + $0x350] sm:$0xff]  ;;  %v14502_v39 = vld [vmem:[%s15478_s30 + $0x358] sm:$0xff]  ;;  %v14503_v43 = vld [vmem:[%s15478_s30 + $0x360] sm:$0xff] }
  0x1d   : > { %v14517_v36 = vld [vmem:[%s15478_s30 + $0x3d0] sm:$0xff]  ;;  %v14518_v40 = vld [vmem:[%s15478_s30 + $0x3d8] sm:$0xff]  ;;  %v14519_v45 = vld [vmem:[%s15478_s30 + $0x3e0] sm:$0xff] }
  0x1e   : > { %v14469_v37 = vld [vmem:[%s15478_s30 + $0x250] sm:$0xff]  ;;  %v14470_v41 = vld [vmem:[%s15478_s30 + $0x258] sm:$0xff]  ;;  %v14471_v46 = vld [vmem:[%s15478_s30 + $0x260] sm:$0xff] }
  0x1f   : > { %v14488_v54 = vld [vmem:[%s15478_s30 + $0x2e8] sm:$0xff]  ;;  %v14489_v2 = vld [vmem:[%s15478_s30 + $0x2f0] sm:$0xff] }
  0x20   : > { %v14504_v55 = vld [vmem:[%s15478_s30 + $0x368] sm:$0xff]  ;;  %v14505_v3 = vld [vmem:[%s15478_s30 + $0x370] sm:$0xff] }
  0x21   : > { %v14520_v57 = vld [vmem:[%s15478_s30 + $0x3e8] sm:$0xff]  ;;  %v14521_v5 = vld [vmem:[%s15478_s30 + $0x3f0] sm:$0xff] }
  0x22   : > { %v14472_v58 = vld [vmem:[%s15478_s30 + $0x268] sm:$0xff]  ;;  %v14473_v6 = vld [vmem:[%s15478_s30 + $0x270] sm:$0xff] }
  0x24   : > { %11143 = vmatmul.msk.bf16.gmra.mxu1 %vm840_vm1, %v14480_v14  ;;  %v14490_v14 = vld [vmem:[%s15478_s30 + $0x2f8] sm:$0xff] }
  0x25   : > { %11159 = vmatmul.msk.bf16.gmra.mxu2 %vm840_vm1, %v14496_v15  ;;  %v14506_v15 = vld [vmem:[%s15478_s30 + $0x378] sm:$0xff] }
  0x26   : > { %11175 = vmatmul.msk.bf16.gmra.mxu3 %vm840_vm1, %v14512_v16 }
  0x27   : > { %11127 = vmatmul.msk.bf16.gmra.mxu0 %vm840_vm1, %v14464_v17  ;;  %v14522_v17 = vld [vmem:[%s15478_s30 + $0x3f8] sm:$0xff] }
  0x34   : > { %11144 = vmatmul.msk.bf16.gmra.mxu1 %vm840_vm1, %v14481_v18  ;;  %v14474_v18 = vld [vmem:[%s15478_s30 + $0x278] sm:$0xff] }
  0x35   : > { %11160 = vmatmul.msk.bf16.gmra.mxu2 %vm840_vm1, %v14497_v19 }
  0x36   : > { %11176 = vmatmul.msk.bf16.gmra.mxu3 %vm840_vm1, %v14513_v20 }
  0x37   : > { %11128 = vmatmul.msk.bf16.gmra.mxu0 %vm840_vm1, %v14465_v21 }
  0x44   : > { %11145 = vmatmul.msk.bf16.gmra.mxu1 %vm840_vm1, %v14482_v22 }
  0x45   : > { %11161 = vmatmul.msk.bf16.gmra.mxu2 %vm840_vm1, %v14498_v23 }
  0x46   : > { %11177 = vmatmul.msk.bf16.gmra.mxu3 %vm840_vm1, %v14514_v24 }
  0x47   : > { %11129 = vmatmul.msk.bf16.gmra.mxu0 %vm840_vm1, %v14466_v25 }
  0x54   : > { %11146 = vmatmul.msk.bf16.gmra.mxu1 %vm840_vm1, %v14483_v26  ;;  %v14491_v26 = vld [vmem:[%s15478_s30 + $0x300] sm:$0xff] }
  0x55   : > { %11162 = vmatmul.msk.bf16.gmra.mxu2 %vm840_vm1, %v14499_v27  ;;  %v14507_v27 = vld [vmem:[%s15478_s30 + $0x380] sm:$0xff] }
  0x56   : > { %11178 = vmatmul.msk.bf16.gmra.mxu3 %vm840_vm1, %v14515_v28 }
  0x57   : > { %11130 = vmatmul.msk.bf16.gmra.mxu0 %vm840_vm1, %v14467_v29  ;;  %v14523_v29 = vld [vmem:[%s15478_s30 + $0x400] sm:$0xff] }
  0x64   : > { %11147 = vmatmul.msk.bf16.gmra.mxu1 %vm840_vm1, %v14484_v30  ;;  %v14475_v30 = vld [vmem:[%s15478_s30 + $0x280] sm:$0xff] }
  0x65   : > { %11163 = vmatmul.msk.bf16.gmra.mxu2 %vm840_vm1, %v14500_v31 }
  0x66   : > { %11179 = vmatmul.msk.bf16.gmra.mxu3 %vm840_vm1, %v14516_v32 }
  0x67   : > { %11131 = vmatmul.msk.bf16.gmra.mxu0 %vm840_vm1, %v14468_v33 }
  0x74   : > { %11148 = vmatmul.msk.bf16.gmra.mxu1 %vm840_vm1, %v14485_v34 }
  0x75   : > { %11164 = vmatmul.msk.bf16.gmra.mxu2 %vm840_vm1, %v14501_v35 }
  0x76   : > { %11180 = vmatmul.msk.bf16.gmra.mxu3 %vm840_vm1, %v14517_v36 }
  0x77   : > { %11132 = vmatmul.msk.bf16.gmra.mxu0 %vm840_vm1, %v14469_v37 }
  0x84   : > { %11149 = vmatmul.msk.bf16.gmra.mxu1 %vm840_vm1, %v14486_v38  ;;  %v14492_v38 = vld [vmem:[%s15478_s30 + $0x308] sm:$0xff] }
  0x85   : > { %11165 = vmatmul.msk.bf16.gmra.mxu2 %vm840_vm1, %v14502_v39  ;;  %v14508_v39 = vld [vmem:[%s15478_s30 + $0x388] sm:$0xff] }
  0x86   : > { %11181 = vmatmul.msk.bf16.gmra.mxu3 %vm840_vm1, %v14518_v40 }
  0x87   : > { %11133 = vmatmul.msk.bf16.gmra.mxu0 %vm840_vm1, %v14470_v41  ;;  %v14524_v41 = vld [vmem:[%s15478_s30 + $0x408] sm:$0xff] }
  0x91   : > { %v15546_v44 = vpop.f32.mrf.mxu1 }
  0x94   : > { %v15550_v47 = vpop.f32.mrf.mxu0  ;;  %11150 = vmatmul.msk.bf16.gmra.mxu1 %vm840_vm1, %v14487_v42  ;;  %v14476_v42 = vld [vmem:[%s15478_s30 + $0x288] sm:$0xff] }
  0x95   : > { %11166 = vmatmul.msk.bf16.gmra.mxu2 %vm840_vm1, %v14503_v43 }
  0x96   : > { %11182 = vmatmul.msk.bf16.gmra.mxu3 %vm840_vm1, %v14519_v45 }
  0x97   : > { %11134 = vmatmul.msk.bf16.gmra.mxu0 %vm840_vm1, %v14471_v46 }
  0x98   : > { %v15556_v48 = vpop.f32.mrf.mxu2 }
  0x99   : > { %17503 = vst [vmem:[#allocation2_spill] sm:$0xff] %v15556_v48  ;;  %v15558_v49 = vpop.f32.mrf.mxu3  ;;  %v15560_v50 = vpop.f32.mrf.mxu1 }
  0x9a   : > { %17504 = vst [vmem:[#allocation3_spill] sm:$0xff] %v15558_v49 }
  0x9c   : > { %v15562_v51 = vpop.f32.mrf.mxu0 }
  0xa0   : > { %v15564_v52 = vpop.f32.mrf.mxu2 }
  0xa1   : > { %17505 = vst [vmem:[#allocation4_spill] sm:$0xff] %v15564_v52  ;;  %v15566_v53 = vpop.f32.mrf.mxu3  ;;  %v15570_v56 = vpop.f32.mrf.mxu1 }
  0xa2   : > { %17506 = vst [vmem:[#allocation5_spill] sm:$0xff] %v15566_v53 }
  0xa4   : > { %v15574_v59 = vpop.f32.mrf.mxu0  ;;  %11151 = vmatmul.msk.bf16.gmra.mxu1 %vm840_vm1, %v14488_v54 }
  0xa5   : > { %11167 = vmatmul.msk.bf16.gmra.mxu2 %vm840_vm1, %v14504_v55 }
  0xa6   : > { %11183 = vmatmul.msk.bf16.gmra.mxu3 %vm840_vm1, %v14520_v57 }
  0xa7   : > { %11135 = vmatmul.msk.bf16.gmra.mxu0 %vm840_vm1, %v14472_v58 }
  0xa8   : > { %v15580_v60 = vpop.f32.mrf.mxu2 }
  0xa9   : > { %17507 = vst [vmem:[#allocation6_spill] sm:$0xff] %v15580_v60  ;;  %v15582_v61 = vpop.f32.mrf.mxu3  ;;  %v15584_v62 = vpop.f32.mrf.mxu1 }
  0xaa   : > { %17508 = vst [vmem:[#allocation7_spill] sm:$0xff] %v15582_v61 }
  0xac   : > { %v15586_v63 = vpop.f32.mrf.mxu0 }
  0xb0   : > { %v15588_v0 = vpop.f32.mrf.mxu2 }
  0xb1   : > { %17509 = vst [vmem:[#allocation8_spill] sm:$0xff] %v15588_v0  ;;  %v15590_v1 = vpop.f32.mrf.mxu3  ;;  %v15594_v4 = vpop.f32.mrf.mxu1  ;;  %v14404_v0 = vld [vmem:[%s15478_s30 + $0x28] sm:$0xff] }
  0xb2   : > { %17510 = vst [vmem:[#allocation9_spill] sm:$0xff] %v15590_v1  ;;  %v14400_v1 = vld [vmem:[%s15478_s30 + $0x8] sm:$0xff] }
  0xb4   : > { %v15598_v7 = vpop.f32.mrf.mxu0  ;;  %11152 = vmatmul.msk.bf16.gmra.mxu1 %vm840_vm1, %v14489_v2  ;;  %v14493_v2 = vld [vmem:[%s15478_s30 + $0x310] sm:$0xff] }
  0xb5   : > { %11168 = vmatmul.msk.bf16.gmra.mxu2 %vm840_vm1, %v14505_v3  ;;  %v14509_v3 = vld [vmem:[%s15478_s30 + $0x390] sm:$0xff] }
  0xb6   : > { %11184 = vmatmul.msk.bf16.gmra.mxu3 %vm840_vm1, %v14521_v5 }
  0xb7   : > { %11136 = vmatmul.msk.bf16.gmra.mxu0 %vm840_vm1, %v14473_v6  ;;  %v14525_v6 = vld [vmem:[%s15478_s30 + $0x410] sm:$0xff] }
  0xb8   : > { %v15604_v8 = vpop.f32.mrf.mxu2 }
  0xb9   : > { %17511 = vst [vmem:[#allocation10_spill] sm:$0xff] %v15604_v8  ;;  %v15606_v9 = vpop.f32.mrf.mxu3  ;;  %v15608_v10 = vpop.f32.mrf.mxu1 }
  0xba   : > { %17512 = vst [vmem:[#allocation11_spill] sm:$0xff] %v15606_v9 }
  0xbc   : > { %v15610_v11 = vpop.f32.mrf.mxu0 }
  0xc0   : > { %v15612_v12 = vpop.f32.mrf.mxu2 }
  0xc1   : > { %17513 = vst [vmem:[#allocation12_spill] sm:$0xff] %v15612_v12  ;;  %v15614_v13 = vpop.f32.mrf.mxu3  ;;  %v15618_v16 = vpop.f32.mrf.mxu1 }
  0xc2   : > { %17514 = vst [vmem:[#allocation13_spill] sm:$0xff] %v15614_v13 }
  0xc4   : > { %v15622_v19 = vpop.f32.mrf.mxu0  ;;  %11153 = vmatmul.msk.bf16.gmra.mxu1 %vm840_vm1, %v14490_v14  ;;  %v14477_v14 = vld [vmem:[%s15478_s30 + $0x290] sm:$0xff] }
  0xc5   : > { %11169 = vmatmul.msk.bf16.gmra.mxu2 %vm840_vm1, %v14506_v15 }
  0xc6   : > { %11185 = vmatmul.msk.bf16.gmra.mxu3 %vm840_vm1, %v14522_v17  ;;  %v13178_v17 = vld [vmem:[%s17500_s1 + $0x18] sm:$0xf] }
  0xc7   : > { %11137 = vmatmul.msk.bf16.gmra.mxu0 %vm840_vm1, %v14474_v18  ;;  %v13627_v18 = vld [vmem:[%s17500_s1 + $0x1c] sm:$0xf] }
  0xc8   : > { %v15628_v20 = vpop.f32.mrf.mxu2 }
  0xc9   : > { %17515 = vst [vmem:[#allocation14_spill] sm:$0xff] %v15628_v20  ;;  %v15630_v21 = vpop.f32.mrf.mxu3  ;;  %v15632_v22 = vpop.f32.mrf.mxu1 }
  0xca   : > { %17516 = vst [vmem:[#allocation15_spill] sm:$0xff] %v15630_v21 }
  0xcc   : > { %v15634_v23 = vpop.f32.mrf.mxu0 }
  0xd0   : > { %v15636_v24 = vpop.f32.mrf.mxu2 }
  0xd1   : > { %17517 = vst [vmem:[#allocation16_spill] sm:$0xff] %v15636_v24  ;;  %v15638_v25 = vpop.f32.mrf.mxu3  ;;  %v15642_v28 = vpop.f32.mrf.mxu1  ;;  %v14403_v24 = vld [vmem:[%s15478_s30 + $0x20] sm:$0xff] }
  0xd2   : > { %17518 = vst [vmem:[#allocation17_spill] sm:$0xff] %v15638_v25 }
  0xd4   : > { %v15646_v31 = vpop.f32.mrf.mxu0  ;;  %11154 = vmatmul.msk.bf16.gmra.mxu1 %vm840_vm1, %v14491_v26  ;;  %v7262_v26 = vsel %vm1033_vm0, %v13178_v17, 0  ;;  %v14494_v17 = vld [vmem:[%s15478_s30 + $0x318] sm:$0xff] }
  0xd5   : > { %11170 = vmatmul.msk.bf16.gmra.mxu2 %vm840_vm1, %v14507_v27  ;;  %v8364_v27 = vsel %vm1033_vm0, %v13627_v18, 0  ;;  %v14510_v18 = vld [vmem:[%s15478_s30 + $0x398] sm:$0xff] }
  0xd6   : > { %11186 = vmatmul.msk.bf16.gmra.mxu3 %vm840_vm1, %v14523_v29  ;;  %7271 = vmatpush.bf16.msra.mxu2 %v7262_v26 }
  0xd7   : > { %11138 = vmatmul.msk.bf16.gmra.mxu0 %vm840_vm1, %v14475_v30  ;;  %8373 = vmatpush.bf16.msra.mxu3 %v8364_v27  ;;  %v14526_v27 = vld [vmem:[%s15478_s30 + $0x418] sm:$0xff] }
  0xd8   : > { %v15652_v32 = vpop.f32.mrf.mxu2 }
  0xd9   : > { %17519 = vst [vmem:[#allocation18_spill] sm:$0xff] %v15652_v32  ;;  %v15654_v33 = vpop.f32.mrf.mxu3  ;;  %v15656_v34 = vpop.f32.mrf.mxu1 }
  0xda   : > { %17520 = vst [vmem:[#allocation19_spill] sm:$0xff] %v15654_v33 }
  0xdc   : > { %v15658_v35 = vpop.f32.mrf.mxu0 }
  0xe0   : > { %v15660_v36 = vpop.f32.mrf.mxu2 }
  0xe1   : > { %17521 = vst [vmem:[#allocation20_spill] sm:$0xff] %v15660_v36  ;;  %v15662_v37 = vpop.f32.mrf.mxu3  ;;  %v15666_v40 = vpop.f32.mrf.mxu1 }
  0xe2   : > { %17522 = vst [vmem:[#allocation21_spill] sm:$0xff] %v15662_v37  ;;  %v14399_v37 = vld [vmem:[%s15478_s30] sm:$0xff] }
  0xe4   : > { %v15670_v43 = vpop.f32.mrf.mxu0  ;;  %11155 = vmatmul.msk.bf16.gmra.mxu1 %vm840_vm1, %v14492_v38  ;;  %v12857_v38 = vld [vmem:[%s17500_s1 + $0x14] sm:$0xf] }
  0xe5   : > { %11171 = vmatmul.msk.bf16.gmra.mxu2 %vm840_vm1, %v14508_v39 }
  0xe6   : > { %11187 = vmatmul.msk.bf16.gmra.mxu3 %vm840_vm1, %v14524_v41  ;;  %v6160_v41 = vsel %vm1033_vm0, %v12857_v38, 0  ;;  %v14478_v38 = vld [vmem:[%s15478_s30 + $0x298] sm:$0xff] }
  0xe7   : > { %11139 = vmatmul.msk.bf16.gmra.mxu0 %vm840_vm1, %v14476_v42  ;;  %6169 = vmatpush.bf16.msra.mxu1 %v6160_v41 }
  0xe8   : > { %v15676_v45 = vpop.f32.mrf.mxu2 }
  0xe9   : > { %17523 = vst [vmem:[#allocation22_spill] sm:$0xff] %v15676_v45  ;;  %v15678_v46 = vpop.f32.mrf.mxu3  ;;  %v15680_v54 = vpop.f32.mrf.mxu1 }
  0xea   : > { %17524 = vst [vmem:[#allocation23_spill] sm:$0xff] %v15678_v46 }
  0xec   : > { %v15682_v55 = vpop.f32.mrf.mxu0 }
  0xf0   : > { %v15684_v57 = vpop.f32.mrf.mxu2 }
  0xf1   : > { %17525 = vst [vmem:[#allocation24_spill] sm:$0xff] %v15684_v57  ;;  %v15686_v58 = vpop.f32.mrf.mxu3  ;;  %v15690_v5 = vpop.f32.mrf.mxu1  ;;  %v14402_v57 = vld [vmem:[%s15478_s30 + $0x18] sm:$0xff] }
  0xf2   : > { %17526 = vst [vmem:[#allocation25_spill] sm:$0xff] %v15686_v58 }
  0xf4   : > { %v15694_v15 = vpop.f32.mrf.mxu0  ;;  %11156 = vmatmul.msk.bf16.gmra.mxu1 %vm840_vm1, %v14493_v2  ;;  %v14076_v2 = vld [vmem:[%s17500_s1 + $0x20] sm:$0xf] }
  0xf5   : > { %11172 = vmatmul.msk.bf16.gmra.mxu2 %vm840_vm1, %v14509_v3  ;;  %v9466_v3 = vsel %vm1033_vm0, %v14076_v2, 0 }
  0xf6   : > { %11188 = vmatmul.msk.bf16.gmra.mxu3 %vm840_vm1, %v14525_v6  ;;  %9475 = vmatpush.bf16.msra.mxu0 %v9466_v3 }
  0xf7   : > { %11140 = vmatmul.msk.bf16.gmra.mxu0 %vm840_vm1, %v14477_v14 }
  0xf8   : > { %v15708_v29 = vpop.f32.mrf.mxu2 }
  0xf9   : > { %17527 = vst [vmem:[#allocation26_spill] sm:$0xff] %v15708_v29  ;;  %v15710_v30 = vpop.f32.mrf.mxu3  ;;  %v15715_v39 = vpop.f32.mrf.mxu1 }
  0xfa   : > { %17528 = vst [vmem:[#allocation27_spill] sm:$0xff] %v15710_v30 }
  0xfb   : > { %17529 = vst [vmem:[#allocation28_spill] sm:$0xff] %v15715_v39  ;;  %v14664_v39 = vld [vmem:[%s15478_s30 + $0x278] sm:$0xff] }
  0xfc   : > { %v15718_v42 = vpop.f32.mrf.mxu0 }
 0x100   : > { %v15724_v6 = vpop.f32.mrf.mxu2 }
 0x101   : > { %17530 = vst [vmem:[#allocation29_spill] sm:$0xff] %v15724_v6  ;;  %v15726_v14 = vpop.f32.mrf.mxu3  ;;  %v15730_v26 = vpop.f32.mrf.mxu1 }
 0x102   : > { %17531 = vst [vmem:[#allocation30_spill] sm:$0xff] %v15726_v14 }
 0x103   : > { %17532 = vst [vmem:[#allocation31_spill] sm:$0xff] %v15730_v26  ;;  %v14600_v26 = vld [vmem:[%s15478_s30 + $0x58] sm:$0xff] }
 0x104   : > { %v15734_v41 = vpop.f32.mrf.mxu0  ;;  %11157 = vmatmul.msk.bf16.gmra.mxu1 %vm840_vm1, %v14494_v17  ;;  %v14527_v17 = vld [vmem:[%s15478_s30 + $0x440] sm:$0xff] }
 0x105   : > { %11173 = vmatmul.msk.bf16.gmra.mxu2 %vm840_vm1, %v14510_v18 }
 0x106   : > { %11189 = vmatmul.msk.bf16.gmra.mxu3 %vm840_vm1, %v14526_v27  ;;  %v14591_v27 = vld [vmem:[%s15478_s30 + $0x10] sm:$0xff] }
 0x107   : > { %11141 = vmatmul.msk.bf16.gmra.mxu0 %vm840_vm1, %v14478_v38  ;;  %v14655_v38 = vld [vmem:[%s15478_s30 + $0x230] sm:$0xff] }
 0x108   : > { %v15740_v2 = vpop.f32.mrf.mxu2 }
 0x109   : > { %17533 = vst [vmem:[#allocation32_spill] sm:$0xff] %v15740_v2  ;;  %v15742_v3 = vpop.f32.mrf.mxu3  ;;  %v15744_v14 = vpop.f32.mrf.mxu1 }
 0x10a   : > { %17534 = vst [vmem:[#allocation33_spill] sm:$0xff] %v15742_v3 }
 0x10b   : > { %17535 = vst [vmem:[#allocation34_spill] sm:$0xff] %v15744_v14  ;;  %v14536_v14 = vld [vmem:[%s15478_s30 + $0x488] sm:$0xff] }
 0x10c   : > { %v15746_v30 = vpop.f32.mrf.mxu0 }
 0x110   : > { %v15748_v58 = vpop.f32.mrf.mxu2 }
 0x111   : > { %17536 = vst [vmem:[#allocation35_spill] sm:$0xff] %v15748_v58  ;;  %v15750_v46 = vpop.f32.mrf.mxu3  ;;  %v15754_v18 = vpop.f32.mrf.mxu1  ;;  %v14401_v58 = vld [vmem:[%s15478_s30 + $0x10] sm:$0xff] }
 0x112   : > { %17537 = vst [vmem:[#allocation36_spill] sm:$0xff] %v15750_v46 }
 0x113   : > { %17538 = vst [vmem:[#allocation37_spill] sm:$0xff] %v15754_v18 }
 0x114   : > { %v15758_v33 = vpop.f32.mrf.mxu0  ;;  %11446 = vmatmul.msk.bf16.vlgmr.msrb.gmra.mxu1 %vm840_vm1, %v14399_v37  ;;  %v14528_v37 = vld [vmem:[%s15478_s30 + $0x448] sm:$0xff] }
 0x115   : > { %11895 = vmatmul.msk.bf16.vlgmr.msrb.gmra.mxu2 %vm840_vm1, %v14527_v17 }
 0x116   : > { %12216 = vmatmul.msk.bf16.vlgmr.msrb.gmra.mxu3 %vm840_vm1, %v14591_v27  ;;  %v14592_v27 = vld [vmem:[%s15478_s30 + $0x18] sm:$0xff] }
 0x117   : > { %12665 = vmatmul.msk.bf16.vlgmr.msrb.gmra.mxu0 %vm840_vm1, %v14655_v38  ;;  %v14656_v38 = vld [vmem:[%s15478_s30 + $0x238] sm:$0xff] }
 0x118   : > { %v15764_v46 = vpop.f32.mrf.mxu2 }
 0x119   : > { %17539 = vst [vmem:[#allocation38_spill] sm:$0xff] %v15764_v46  ;;  %v15766_v3 = vpop.f32.mrf.mxu3  ;;  %v15768_v25 = vpop.f32.mrf.mxu1 }
 0x11a   : > { %17540 = vst [vmem:[#allocation39_spill] sm:$0xff] %v15766_v3 }
 0x11b   : > { %17541 = vst [vmem:[#allocation40_spill] sm:$0xff] %v15768_v25 }
 0x11c   : > { %v15770_v21 = vpop.f32.mrf.mxu0 }
 0x120   : > { %v15772_v13 = vpop.f32.mrf.mxu2 }
 0x121   : > { %17542 = vst [vmem:[#allocation41_spill] sm:$0xff] %v15772_v13  ;;  %v15774_v9 = vpop.f32.mrf.mxu3  ;;  %v15778_v17 = vpop.f32.mrf.mxu1 }
 0x122   : > { %17543 = vst [vmem:[#allocation42_spill] sm:$0xff] %v15774_v9 }
 0x123   : > { %17544 = vst [vmem:[#allocation43_spill] sm:$0xff] %v15778_v17 }
 0x124   : > { %v15782_v61 = vpop.f32.mrf.mxu0  ;;  %11447 = vmatmul.msk.bf16.gmra.mxu1 %vm840_vm1, %v14400_v1  ;;  %v14529_v1 = vld [vmem:[%s15478_s30 + $0x450] sm:$0xff] }
 0x125   : > { %11896 = vmatmul.msk.bf16.gmra.mxu2 %vm840_vm1, %v14528_v37 }
 0x126   : > { %12217 = vmatmul.msk.bf16.gmra.mxu3 %vm840_vm1, %v14592_v27  ;;  %v14593_v27 = vld [vmem:[%s15478_s30 + $0x20] sm:$0xff] }
 0x127   : > { %12666 = vmatmul.msk.bf16.gmra.mxu0 %vm840_vm1, %v14656_v38  ;;  %v14657_v38 = vld [vmem:[%s15478_s30 + $0x240] sm:$0xff] }
 0x128   : > { %v15788_v9 = vpop.f32.mrf.mxu2 }
 0x129   : > { %17545 = vst [vmem:[#allocation44_spill] sm:$0xff] %v15788_v9  ;;  %v15790_v3 = vpop.f32.mrf.mxu3  ;;  %v15792_v53 = vpop.f32.mrf.mxu1 }
 0x12a   : > { %17546 = vst [vmem:[#allocation45_spill] sm:$0xff] %v15790_v3 }
 0x12b   : > { %17547 = vst [vmem:[#allocation46_spill] sm:$0xff] %v15792_v53 }
 0x12c   : > { %v15794_v49 = vpop.f32.mrf.mxu0 }
 0x130   : > { %v15796_v13 = vpop.f32.mrf.mxu2 }
 0x131   : > { %17548 = vst [vmem:[#allocation47_spill] sm:$0xff] %v15796_v13  ;;  %v15798_v46 = vpop.f32.mrf.mxu3  ;;  %v15802_v37 = vpop.f32.mrf.mxu1 }
 0x132   : > { %17549 = vst [vmem:[#allocation48_spill] sm:$0xff] %v15798_v46 }
 0x133   : > { %17550 = vst [vmem:[#allocation49_spill] sm:$0xff] %v15802_v37  ;;  %v14663_v37 = vld [vmem:[%s15478_s30 + $0x270] sm:$0xff] }
 0x134   : > { %v15806_v9 = vpop.f32.mrf.mxu0  ;;  %11448 = vmatmul.msk.bf16.gmra.mxu1 %vm840_vm1, %v14401_v58  ;;  %v14530_v58 = vld [vmem:[%s15478_s30 + $0x458] sm:$0xff] }
 0x135   : > { %11897 = vmatmul.msk.bf16.gmra.mxu2 %vm840_vm1, %v14529_v1 }
 0x136   : > { %12218 = vmatmul.msk.bf16.gmra.mxu3 %vm840_vm1, %v14593_v27  ;;  %v14594_v27 = vld [vmem:[%s15478_s30 + $0x28] sm:$0xff] }
 0x137   : > { %12667 = vmatmul.msk.bf16.gmra.mxu0 %vm840_vm1, %v14657_v38  ;;  %v14658_v38 = vld [vmem:[%s15478_s30 + $0x248] sm:$0xff] }
 0x138   : > { %v15812_v46 = vpop.f32.mrf.mxu2 }
 0x139   : > { %17551 = vst [vmem:[#allocation50_spill] sm:$0xff] %v15812_v46  ;;  %v15814_v3 = vpop.f32.mrf.mxu3  ;;  %v15816_v13 = vpop.f32.mrf.mxu1 }
 0x13a   : > { %17552 = vst [vmem:[#allocation51_spill] sm:$0xff] %v15814_v3 }
 0x13b   : > { %17553 = vst [vmem:[#allocation52_spill] sm:$0xff] %v15816_v13 }
 0x13c   : > { %v15818_v2 = vpop.f32.mrf.mxu0 }
 0x140   : > { %v15820_v6 = vpop.f32.mrf.mxu2 }
 0x141   : > { %17554 = vst [vmem:[#allocation53_spill] sm:$0xff] %v15820_v6  ;;  %v15822_v29 = vpop.f32.mrf.mxu3  ;;  %v15826_v1 = vpop.f32.mrf.mxu1 }
 0x142   : > { %17555 = vst [vmem:[#allocation54_spill] sm:$0xff] %v15822_v29 }
 0x143   : > { %17556 = vst [vmem:[#allocation55_spill] sm:$0xff] %v15826_v1  ;;  %v14407_v1 = vld [vmem:[%s15478_s30 + $0x40] sm:$0xff] }
 0x144   : > { %v15830_v46 = vpop.f32.mrf.mxu0  ;;  %11449 = vmatmul.msk.bf16.gmra.mxu1 %vm840_vm1, %v14402_v57  ;;  %v14531_v57 = vld [vmem:[%s15478_s30 + $0x460] sm:$0xff] }
 0x145   : > { %11898 = vmatmul.msk.bf16.gmra.mxu2 %vm840_vm1, %v14530_v58 }
 0x146   : > { %12219 = vmatmul.msk.bf16.gmra.mxu3 %vm840_vm1, %v14594_v27  ;;  %v14595_v27 = vld [vmem:[%s15478_s30 + $0x30] sm:$0xff] }
 0x147   : > { %12668 = vmatmul.msk.bf16.gmra.mxu0 %vm840_vm1, %v14658_v38  ;;  %v14659_v38 = vld [vmem:[%s15478_s30 + $0x250] sm:$0xff] }
 0x148   : > { %v15836_v29 = vpop.f32.mrf.mxu2 }
 0x149   : > { %17557 = vst [vmem:[#allocation56_spill] sm:$0xff] %v15836_v29  ;;  %v15838_v3 = vpop.f32.mrf.mxu3  ;;  %v15840_v6 = vpop.f32.mrf.mxu1 }
 0x14a   : > { %17558 = vst [vmem:[#allocation57_spill] sm:$0xff] %v15838_v3 }
 0x14b   : > { %17559 = vst [vmem:[#allocation58_spill] sm:$0xff] %v15840_v6 }
 0x14c   : > { %v15842_v45 = vpop.f32.mrf.mxu0 }
 0x150   : > { %v15844_v36 = vpop.f32.mrf.mxu2 }
 0x151   : > { %17560 = vst [vmem:[#allocation59_spill] sm:$0xff] %v15844_v36  ;;  %v15846_v32 = vpop.f32.mrf.mxu3  ;;  %v15850_v58 = vpop.f32.mrf.mxu1 }
 0x152   : > { %17561 = vst [vmem:[#allocation60_spill] sm:$0xff] %v15846_v32 }
 0x153   : > { %17562 = vst [vmem:[#allocation61_spill] sm:$0xff] %v15850_v58  ;;  %v14406_v58 = vld [vmem:[%s15478_s30 + $0x38] sm:$0xff] }
 0x154   : > { %v15854_v29 = vpop.f32.mrf.mxu0  ;;  %11450 = vmatmul.msk.bf16.gmra.mxu1 %vm840_vm1, %v14403_v24  ;;  %v14532_v24 = vld [vmem:[%s15478_s30 + $0x468] sm:$0xff] }
 0x155   : > { %11899 = vmatmul.msk.bf16.gmra.mxu2 %vm840_vm1, %v14531_v57 }
 0x156   : > { %12220 = vmatmul.msk.bf16.gmra.mxu3 %vm840_vm1, %v14595_v27  ;;  %v14596_v27 = vld [vmem:[%s15478_s30 + $0x38] sm:$0xff] }
 0x157   : > { %12669 = vmatmul.msk.bf16.gmra.mxu0 %vm840_vm1, %v14659_v38  ;;  %v14660_v38 = vld [vmem:[%s15478_s30 + $0x258] sm:$0xff] }
 0x158   : > { %v15860_v32 = vpop.f32.mrf.mxu2 }
 0x159   : > { %17563 = vst [vmem:[#allocation62_spill] sm:$0xff] %v15860_v32  ;;  %v15862_v3 = vpop.f32.mrf.mxu3  ;;  %v15864_v36 = vpop.f32.mrf.mxu1 }
 0x15a   : > { %17564 = vst [vmem:[#allocation63_spill] sm:$0xff] %v15862_v3 }
 0x15b   : > { %17565 = vst [vmem:[#allocation64_spill] sm:$0xff] %v15864_v36 }
 0x15c   : > { %v15866_v20 = vpop.f32.mrf.mxu0 }
 0x160   : > { %v15868_v12 = vpop.f32.mrf.mxu2 }
 0x161   : > { %17566 = vst [vmem:[#allocation65_spill] sm:$0xff] %v15868_v12  ;;  %v15870_v8 = vpop.f32.mrf.mxu3  ;;  %v15874_v57 = vpop.f32.mrf.mxu1 }
 0x162   : > { %17567 = vst [vmem:[#allocation66_spill] sm:$0xff] %v15870_v8 }
 0x163   : > { %17568 = vst [vmem:[#allocation67_spill] sm:$0xff] %v15874_v57  ;;  %v14405_v57 = vld [vmem:[%s15478_s30 + $0x30] sm:$0xff] }
 0x164   : > { %v15878_v32 = vpop.f32.mrf.mxu0  ;;  %11451 = vmatmul.msk.bf16.gmra.mxu1 %vm840_vm1, %v14404_v0  ;;  %v14533_v0 = vld [vmem:[%s15478_s30 + $0x470] sm:$0xff] }
 0x165   : > { %11900 = vmatmul.msk.bf16.gmra.mxu2 %vm840_vm1, %v14532_v24 }
 0x166   : > { %12221 = vmatmul.msk.bf16.gmra.mxu3 %vm840_vm1, %v14596_v27  ;;  %v14597_v27 = vld [vmem:[%s15478_s30 + $0x40] sm:$0xff] }
 0x167   : > { %12670 = vmatmul.msk.bf16.gmra.mxu0 %vm840_vm1, %v14660_v38  ;;  %v14661_v38 = vld [vmem:[%s15478_s30 + $0x260] sm:$0xff] }
 0x168   : > { %v15884_v8 = vpop.f32.mrf.mxu2 }
 0x169   : > { %17569 = vst [vmem:[#allocation68_spill] sm:$0xff] %v15884_v8  ;;  %v15886_v3 = vpop.f32.mrf.mxu3  ;;  %v15888_v12 = vpop.f32.mrf.mxu1 }
 0x16a   : > { %17570 = vst [vmem:[#allocation69_spill] sm:$0xff] %v15886_v3 }
 0x16b   : > { %17571 = vst [vmem:[#allocation70_spill] sm:$0xff] %v15888_v12 }
 0x16c   : > { %v15890_v60 = vpop.f32.mrf.mxu0 }
 0x170   : > { %v15892_v52 = vpop.f32.mrf.mxu2 }
 0x171   : > { %17572 = vst [vmem:[#allocation71_spill] sm:$0xff] %v15892_v52  ;;  %v15894_v48 = vpop.f32.mrf.mxu3  ;;  %v15898_v24 = vpop.f32.mrf.mxu1 }
 0x172   : > { %17573 = vst [vmem:[#allocation72_spill] sm:$0xff] %v15894_v48 }
 0x173   : > { %17574 = vst [vmem:[#allocation73_spill] sm:$0xff] %v15898_v24 }
 0x174   : > { %v15902_v8 = vpop.f32.mrf.mxu0  ;;  %11452 = vmatmul.msk.bf16.gmra.mxu1 %vm840_vm1, %v14405_v57  ;;  %v14534_v57 = vld [vmem:[%s15478_s30 + $0x478] sm:$0xff] }
 0x175   : > { %11901 = vmatmul.msk.bf16.gmra.mxu2 %vm840_vm1, %v14533_v0 }
 0x176   : > { %12222 = vmatmul.msk.bf16.gmra.mxu3 %vm840_vm1, %v14597_v27  ;;  %v14598_v27 = vld [vmem:[%s15478_s30 + $0x48] sm:$0xff] }
 0x177   : > { %12671 = vmatmul.msk.bf16.gmra.mxu0 %vm840_vm1, %v14661_v38  ;;  %v14662_v38 = vld [vmem:[%s15478_s30 + $0x268] sm:$0xff] }
 0x178   : > { %v15908_v48 = vpop.f32.mrf.mxu2 }
 0x179   : > { %17575 = vst [vmem:[#allocation74_spill] sm:$0xff] %v15908_v48  ;;  %v15910_v3 = vpop.f32.mrf.mxu3  ;;  %v15912_v52 = vpop.f32.mrf.mxu1 }
 0x17a   : > { %17576 = vst [vmem:[#allocation75_spill] sm:$0xff] %v15910_v3 }
 0x17b   : > { %17577 = vst [vmem:[#allocation76_spill] sm:$0xff] %v15912_v52 }
 0x17c   : > { %v15914_v24 = vpop.f32.mrf.mxu0 }
 0x180   : > { %v15916_v12 = vpop.f32.mrf.mxu2 }
 0x181   : > { %17578 = vst [vmem:[#allocation77_spill] sm:$0xff] %v15916_v12  ;;  %v15918_v36 = vpop.f32.mrf.mxu3  ;;  %v15922_v0 = vpop.f32.mrf.mxu1 }
 0x182   : > { %17579 = vst [vmem:[#allocation78_spill] sm:$0xff] %v15918_v36 }
 0x183   : > { %17580 = vst [vmem:[#allocation79_spill] sm:$0xff] %v15922_v0 }
 0x184   : > { %v15926_v48 = vpop.f32.mrf.mxu0  ;;  %11453 = vmatmul.msk.bf16.gmra.mxu1 %vm840_vm1, %v14406_v58  ;;  %v14535_v58 = vld [vmem:[%s15478_s30 + $0x480] sm:$0xff] }
 0x185   : > { %11902 = vmatmul.msk.bf16.gmra.mxu2 %vm840_vm1, %v14534_v57  ;;  %v14599_v57 = vld [vmem:[%s15478_s30 + $0x50] sm:$0xff] }
 0x186   : > { %12223 = vmatmul.msk.bf16.gmra.mxu3 %vm840_vm1, %v14598_v27 }
 0x187   : > { %12672 = vmatmul.msk.bf16.gmra.mxu0 %vm840_vm1, %v14662_v38 }
 0x188   : > { %v15932_v36 = vpop.f32.mrf.mxu2 }
 0x189   : > { %17581 = vst [vmem:[#allocation80_spill] sm:$0xff] %v15932_v36  ;;  %v15934_v3 = vpop.f32.mrf.mxu3  ;;  %v15936_v12 = vpop.f32.mrf.mxu1 }
 0x18a   : > { %17582 = vst [vmem:[#allocation81_spill] sm:$0xff] %v15934_v3 }
 0x18b   : > { %17583 = vst [vmem:[#allocation82_spill] sm:$0xff] %v15936_v12 }
 0x18c   : > { %v15938_v0 = vpop.f32.mrf.mxu0 }
 0x190   : > { %v15940_v52 = vpop.f32.mrf.mxu2 }
 0x191   : > { %17584 = vst [vmem:[#allocation83_spill] sm:$0xff] %v15940_v52  ;;  %v15942_v6 = vpop.f32.mrf.mxu3  ;;  %v1890_v13 = vpop.f32.mrf.mxu1 }
 0x192   : > { %17585 = vst [vmem:[#allocation84_spill] sm:$0xff] %v15942_v6  ;;  %v1891_v38 = vadd.f32 %v1890_v13, %v15550_v47 }
 0x194   : > { %v5069_v27 = vpop.f32.mrf.mxu0  ;;  %11454 = vmatmul.msk.bf16.gmra.mxu1 %vm840_vm1, %v14407_v1 }
 0x195   : > { %11903 = vmatmul.msk.bf16.gmra.mxu2 %vm840_vm1, %v14535_v58 }
 0x196   : > { %12224 = vmatmul.msk.bf16.gmra.mxu3 %vm840_vm1, %v14599_v57  ;;  %v14408_v57 = vld [vmem:[%s15478_s30 + $0x48] sm:$0xff] }
 0x197   : > { %12673 = vmatmul.msk.bf16.gmra.mxu0 %vm840_vm1, %v14663_v37 }
 0x198   : > { %v2865_v6 = vpop.f32.mrf.mxu2 }
 0x199   : > { %v3185_v3 = vadd.f32 %v2865_v6, %v1891_v38  ;;  %v3967_v52 = vpop.f32.mrf.mxu3  ;;  %v1892_v36 = vpop.f32.mrf.mxu1 }
 0x19a   : > { %v1893_v1 = vadd.f32 %v1892_v36, %v15562_v51 }
 0x19b   : > { %v4287_v12 = vadd.f32 %v3967_v52, %v3185_v3 }
 0x19c   : > { %v5071_v53 = vpop.f32.mrf.mxu0 }
 0x19d   : > { %v15953_v17 = vadd.f32 %v5069_v27, %v4287_v12 }
 0x1a0   : > { %v2867_v58 = vpop.f32.mrf.mxu2 }
 0x1a1   : > { %v3186_v25 = vadd.f32 %v2867_v58, %v1893_v1  ;;  %v3969_v18 = vpop.f32.mrf.mxu3  ;;  %v1895_v37 = vpop.f32.mrf.mxu1  ;;  %v14537_v58 = vld [vmem:[%s15478_s30 + $0x490] sm:$0xff] }
 0x1a2   : > { %v1896_v51 = vadd.f32 %v1895_v37, %v15574_v59 }
 0x1a3   : > { %v4288_v47 = vadd.f32 %v3969_v18, %v3186_v25 }
 0x1a4   : > { %v5074_v13 = vpop.f32.mrf.mxu0  ;;  %11455 = vmatmul.msk.bf16.gmra.mxu1 %vm840_vm1, %v14408_v57  ;;  %v14601_v57 = vld [vmem:[%s15478_s30 + $0x60] sm:$0xff] }
 0x1a5   : > { %11904 = vmatmul.msk.bf16.gmra.mxu2 %vm840_vm1, %v14536_v14  ;;  %v15962_v52 = vadd.f32 %v5071_v53, %v4288_v47  ;;  %v14665_v47 = vld [vmem:[%s15478_s30 + $0x280] sm:$0xff] }
 0x1a6   : > { %12225 = vmatmul.msk.bf16.gmra.mxu3 %vm840_vm1, %v14600_v26  ;;  %v14409_v26 = vld [vmem:[%s15478_s30 + $0x50] sm:$0xff] }
 0x1a7   : > { %12674 = vmatmul.msk.bf16.gmra.mxu0 %vm840_vm1, %v14664_v39 }
 0x1a8   : > { %v2870_v12 = vpop.f32.mrf.mxu2 }
 0x1a9   : > { %v3187_v36 = vadd.f32 %v2870_v12, %v1896_v51  ;;  %v3972_v25 = vpop.f32.mrf.mxu3  ;;  %v1897_v6 = vpop.f32.mrf.mxu1 }
 0x1aa   : > { %v1898_v53 = vadd.f32 %v1897_v6, %v15586_v63 }
 0x1ab   : > { %v4289_v3 = vadd.f32 %v3972_v25, %v3187_v36 }
 0x1ac   : > { %v5076_v18 = vpop.f32.mrf.mxu0 }
 0x1ad   : > { %v15967_v27 = vadd.f32 %v5074_v13, %v4289_v3 }
 0x1b0   : > { %v2872_v14 = vpop.f32.mrf.mxu2 }
 0x1b1   : > { %v3188_v38 = vadd.f32 %v2872_v14, %v1898_v53  ;;  %v3974_v1 = vpop.f32.mrf.mxu3  ;;  %v1900_v39 = vpop.f32.mrf.mxu1 }
 0x1b2   : > { %v1901_v63 = vadd.f32 %v1900_v39, %v15598_v7 }
 0x1b3   : > { %v4290_v59 = vadd.f32 %v3974_v1, %v3188_v38 }
 0x1b4   : > { %v5079_v37 = vpop.f32.mrf.mxu0  ;;  %11456 = vmatmul.msk.bf16.gmra.mxu1 %vm840_vm1, %v14409_v26  ;;  %v14410_v26 = vld [vmem:[%s15478_s30 + $0x58] sm:$0xff] }
 0x1b5   : > { %11905 = vmatmul.msk.bf16.gmra.mxu2 %vm840_vm1, %v14537_v58  ;;  %v15976_v51 = vadd.f32 %v5076_v18, %v4290_v59  ;;  %v14538_v58 = vld [vmem:[%s15478_s30 + $0x498] sm:$0xff]  ;;  %v14666_v59 = vld [vmem:[%s15478_s30 + $0x288] sm:$0xff] }
 0x1b6   : > { %12226 = vmatmul.msk.bf16.gmra.mxu3 %vm840_vm1, %v14601_v57 }
 0x1b7   : > { %12675 = vmatmul.msk.bf16.gmra.mxu0 %vm840_vm1, %v14665_v47  ;;  %v14602_v47 = vld [vmem:[%s15478_s30 + $0x68] sm:$0xff] }
 0x1b8   : > { %v2875_v13 = vpop.f32.mrf.mxu2 }
 0x1b9   : > { %v3189_v12 = vadd.f32 %v2875_v13, %v1901_v63  ;;  %v3977_v36 = vpop.f32.mrf.mxu3  ;;  %v1902_v25 = vpop.f32.mrf.mxu1 }
 0x1ba   : > { %v1903_v18 = vadd.f32 %v1902_v25, %v15610_v11 }
 0x1bb   : > { %v4291_v6 = vadd.f32 %v3977_v36, %v3189_v12 }
 0x1bc   : > { %v5081_v3 = vpop.f32.mrf.mxu0 }
 0x1bd   : > { %v15981_v53 = vadd.f32 %v5079_v37, %v4291_v6 }
 0x1c0   : > { %v2877_v14 = vpop.f32.mrf.mxu2 }
 0x1c1   : > { %v3190_v38 = vadd.f32 %v2877_v14, %v1903_v18  ;;  %v3979_v1 = vpop.f32.mrf.mxu3  ;;  %v1905_v57 = vpop.f32.mrf.mxu1 }
 0x1c2   : > { %v1906_v11 = vadd.f32 %v1905_v57, %v15622_v19 }
 0x1c3   : > { %v4292_v7 = vadd.f32 %v3979_v1, %v3190_v38 }
 0x1c4   : > { %v5084_v39 = vpop.f32.mrf.mxu0  ;;  %11457 = vmatmul.msk.bf16.gmra.mxu1 %vm840_vm1, %v14410_v26  ;;  %v14411_v26 = vld [vmem:[%s15478_s30 + $0x60] sm:$0xff] }
 0x1c5   : > { %11906 = vmatmul.msk.bf16.gmra.mxu2 %vm840_vm1, %v14538_v58  ;;  %v15990_v63 = vadd.f32 %v5081_v3, %v4292_v7  ;;  %v14539_v58 = vld [vmem:[%s15478_s30 + $0x4a0] sm:$0xff]  ;;  %v14667_v7 = vld [vmem:[%s15478_s30 + $0x290] sm:$0xff] }
 0x1c6   : > { %12227 = vmatmul.msk.bf16.gmra.mxu3 %vm840_vm1, %v14602_v47 }
 0x1c7   : > { %12676 = vmatmul.msk.bf16.gmra.mxu0 %vm840_vm1, %v14666_v59  ;;  %v14603_v59 = vld [vmem:[%s15478_s30 + $0x70] sm:$0xff] }
 0x1c8   : > { %v2880_v37 = vpop.f32.mrf.mxu2 }
 0x1c9   : > { %v3191_v13 = vadd.f32 %v2880_v37, %v1906_v11  ;;  %v3982_v12 = vpop.f32.mrf.mxu3  ;;  %v1907_v36 = vpop.f32.mrf.mxu1 }
 0x1ca   : > { %v1908_v3 = vadd.f32 %v1907_v36, %v15634_v23 }
 0x1cb   : > { %v4293_v25 = vadd.f32 %v3982_v12, %v3191_v13 }
 0x1cc   : > { %v5086_v6 = vpop.f32.mrf.mxu0 }
 0x1cd   : > { %v15995_v18 = vadd.f32 %v5084_v39, %v4293_v25 }
 0x1d0   : > { %v2882_v14 = vpop.f32.mrf.mxu2 }
 0x1d1   : > { %v3192_v38 = vadd.f32 %v2882_v14, %v1908_v3  ;;  %v3984_v1 = vpop.f32.mrf.mxu3  ;;  %v1910_v47 = vpop.f32.mrf.mxu1 }
 0x1d2   : > { %v1911_v23 = vadd.f32 %v1910_v47, %v15646_v31 }
 0x1d3   : > { %v4294_v19 = vadd.f32 %v3984_v1, %v3192_v38 }
 0x1d4   : > { %v5089_v57 = vpop.f32.mrf.mxu0  ;;  %11458 = vmatmul.msk.bf16.gmra.mxu1 %vm840_vm1, %v14411_v26  ;;  %v14412_v26 = vld [vmem:[%s15478_s30 + $0x68] sm:$0xff] }
 0x1d5   : > { %11907 = vmatmul.msk.bf16.gmra.mxu2 %vm840_vm1, %v14539_v58  ;;  %v16004_v11 = vadd.f32 %v5086_v6, %v4294_v19  ;;  %v14540_v58 = vld [vmem:[%s15478_s30 + $0x4a8] sm:$0xff]  ;;  %v14668_v19 = vld [vmem:[%s15478_s30 + $0x298] sm:$0xff] }
 0x1d6   : > { %12228 = vmatmul.msk.bf16.gmra.mxu3 %vm840_vm1, %v14603_v59 }
 0x1d7   : > { %12677 = vmatmul.msk.bf16.gmra.mxu0 %vm840_vm1, %v14667_v7  ;;  %v14604_v7 = vld [vmem:[%s15478_s30 + $0x78] sm:$0xff] }
 0x1d8   : > { %v2885_v39 = vpop.f32.mrf.mxu2 }
 0x1d9   : > { %v3193_v37 = vadd.f32 %v2885_v39, %v1911_v23  ;;  %v3987_v13 = vpop.f32.mrf.mxu3  ;;  %v1912_v12 = vpop.f32.mrf.mxu1 }
 0x1da   : > { %v1913_v6 = vadd.f32 %v1912_v12, %v15658_v35 }
 0x1db   : > { %v4295_v36 = vadd.f32 %v3987_v13, %v3193_v37 }
 0x1dc   : > { %v5091_v25 = vpop.f32.mrf.mxu0 }
 0x1dd   : > { %v16009_v3 = vadd.f32 %v5089_v57, %v4295_v36 }
 0x1e0   : > { %v2887_v14 = vpop.f32.mrf.mxu2 }
 0x1e1   : > { %v3194_v38 = vadd.f32 %v2887_v14, %v1913_v6  ;;  %v3989_v1 = vpop.f32.mrf.mxu3  ;;  %v1915_v59 = vpop.f32.mrf.mxu1 }
 0x1e2   : > { %v1916_v35 = vadd.f32 %v1915_v59, %v15670_v43 }
 0x1e3   : > { %v4296_v31 = vadd.f32 %v3989_v1, %v3194_v38 }
 0x1e4   : > { %v5094_v47 = vpop.f32.mrf.mxu0  ;;  %11459 = vmatmul.msk.bf16.gmra.mxu1 %vm840_vm1, %v14412_v26  ;;  %v14413_v26 = vld [vmem:[%s15478_s30 + $0x70] sm:$0xff] }
 0x1e5   : > { %11908 = vmatmul.msk.bf16.gmra.mxu2 %vm840_vm1, %v14540_v58  ;;  %v16018_v23 = vadd.f32 %v5091_v25, %v4296_v31  ;;  %v14541_v58 = vld [vmem:[%s15478_s30 + $0x4b0] sm:$0xff]  ;;  %v14669_v31 = vld [vmem:[%s15478_s30 + $0x2a0] sm:$0xff] }
 0x1e6   : > { %12229 = vmatmul.msk.bf16.gmra.mxu3 %vm840_vm1, %v14604_v7 }
 0x1e7   : > { %12678 = vmatmul.msk.bf16.gmra.mxu0 %vm840_vm1, %v14668_v19  ;;  %v14605_v19 = vld [vmem:[%s15478_s30 + $0x80] sm:$0xff] }
 0x1e8   : > { %v2890_v57 = vpop.f32.mrf.mxu2 }
 0x1e9   : > { %v3195_v39 = vadd.f32 %v2890_v57, %v1916_v35  ;;  %v3992_v37 = vpop.f32.mrf.mxu3  ;;  %v1917_v13 = vpop.f32.mrf.mxu1 }
 0x1ea   : > { %v1918_v25 = vadd.f32 %v1917_v13, %v15682_v55 }
 0x1eb   : > { %v4297_v12 = vadd.f32 %v3992_v37, %v3195_v39 }
 0x1ec   : > { %v5096_v36 = vpop.f32.mrf.mxu0 }
 0x1ed   : > { %v16023_v6 = vadd.f32 %v5094_v47, %v4297_v12 }
 0x1f0   : > { %v2892_v14 = vpop.f32.mrf.mxu2 }
 0x1f1   : > { %v3196_v38 = vadd.f32 %v2892_v14, %v1918_v25  ;;  %v3994_v1 = vpop.f32.mrf.mxu3  ;;  %v1920_v7 = vpop.f32.mrf.mxu1 }
 0x1f2   : > { %v1921_v55 = vadd.f32 %v1920_v7, %v15694_v15 }
 0x1f3   : > { %v4298_v43 = vadd.f32 %v3994_v1, %v3196_v38 }
 0x1f4   : > { %v5099_v59 = vpop.f32.mrf.mxu0  ;;  %11460 = vmatmul.msk.bf16.gmra.mxu1 %vm840_vm1, %v14413_v26  ;;  %v14414_v26 = vld [vmem:[%s15478_s30 + $0x78] sm:$0xff] }
 0x1f5   : > { %11909 = vmatmul.msk.bf16.gmra.mxu2 %vm840_vm1, %v14541_v58  ;;  %v16032_v35 = vadd.f32 %v5096_v36, %v4298_v43  ;;  %v14542_v58 = vld [vmem:[%s15478_s30 + $0x4b8] sm:$0xff]  ;;  %v14670_v43 = vld [vmem:[%s15478_s30 + $0x2a8] sm:$0xff] }
 0x1f6   : > { %12230 = vmatmul.msk.bf16.gmra.mxu3 %vm840_vm1, %v14605_v19 }
 0x1f7   : > { %12679 = vmatmul.msk.bf16.gmra.mxu0 %vm840_vm1, %v14669_v31  ;;  %v14606_v31 = vld [vmem:[%s15478_s30 + $0x88] sm:$0xff] }
 0x1f8   : > { %v2895_v47 = vpop.f32.mrf.mxu2 }
 0x1f9   : > { %v3197_v57 = vadd.f32 %v2895_v47, %v1921_v55  ;;  %v3997_v39 = vpop.f32.mrf.mxu3  ;;  %v1922_v37 = vpop.f32.mrf.mxu1 }
 0x1fa   : > { %v1923_v36 = vadd.f32 %v1922_v37, %v15718_v42 }
 0x1fb   : > { %v4299_v13 = vadd.f32 %v3997_v39, %v3197_v57 }
 0x1fc   : > { %v5101_v12 = vpop.f32.mrf.mxu0 }
 0x1fd   : > { %v16037_v25 = vadd.f32 %v5099_v59, %v4299_v13 }
 0x200   : > { %v2897_v14 = vpop.f32.mrf.mxu2 }
 0x201   : > { %v3198_v38 = vadd.f32 %v2897_v14, %v1923_v36  ;;  %v3999_v1 = vpop.f32.mrf.mxu3  ;;  %v1925_v19 = vpop.f32.mrf.mxu1 }
 0x202   : > { %v1926_v42 = vadd.f32 %v1925_v19, %v15734_v41 }
 0x203   : > { %v4300_v15 = vadd.f32 %v3999_v1, %v3198_v38 }
 0x204   : > { %v5104_v7 = vpop.f32.mrf.mxu0  ;;  %11461 = vmatmul.msk.bf16.gmra.mxu1 %vm840_vm1, %v14414_v26  ;;  %v14415_v26 = vld [vmem:[%s15478_s30 + $0x80] sm:$0xff] }
 0x205   : > { %11910 = vmatmul.msk.bf16.gmra.mxu2 %vm840_vm1, %v14542_v58  ;;  %v16046_v55 = vadd.f32 %v5101_v12, %v4300_v15  ;;  %v14543_v58 = vld [vmem:[%s15478_s30 + $0x4c0] sm:$0xff]  ;;  %v14671_v15 = vld [vmem:[%s15478_s30 + $0x2b0] sm:$0xff] }
 0x206   : > { %12231 = vmatmul.msk.bf16.gmra.mxu3 %vm840_vm1, %v14606_v31 }
 0x207   : > { %12680 = vmatmul.msk.bf16.gmra.mxu0 %vm840_vm1, %v14670_v43  ;;  %v14607_v43 = vld [vmem:[%s15478_s30 + $0x90] sm:$0xff] }
 0x208   : > { %v2900_v59 = vpop.f32.mrf.mxu2 }
 0x209   : > { %v3199_v47 = vadd.f32 %v2900_v59, %v1926_v42  ;;  %v4002_v57 = vpop.f32.mrf.mxu3  ;;  %v1927_v39 = vpop.f32.mrf.mxu1 }
 0x20a   : > { %v1928_v12 = vadd.f32 %v1927_v39, %v15746_v30 }
 0x20b   : > { %v4301_v37 = vadd.f32 %v4002_v57, %v3199_v47 }
 0x20c   : > { %v5106_v13 = vpop.f32.mrf.mxu0 }
 0x20d   : > { %v16051_v36 = vadd.f32 %v5104_v7, %v4301_v37 }
 0x210   : > { %v2902_v14 = vpop.f32.mrf.mxu2 }
 0x211   : > { %v3200_v38 = vadd.f32 %v2902_v14, %v1928_v12  ;;  %v4004_v1 = vpop.f32.mrf.mxu3  ;;  %v1930_v31 = vpop.f32.mrf.mxu1 }
 0x212   : > { %v1931_v30 = vadd.f32 %v1930_v31, %v15758_v33 }
 0x213   : > { %v4302_v41 = vadd.f32 %v4004_v1, %v3200_v38 }
 0x214   : > { %v5109_v19 = vpop.f32.mrf.mxu0  ;;  %11462 = vmatmul.msk.bf16.gmra.mxu1 %vm840_vm1, %v14415_v26  ;;  %v14416_v26 = vld [vmem:[%s15478_s30 + $0x88] sm:$0xff] }
 0x215   : > { %11911 = vmatmul.msk.bf16.gmra.mxu2 %vm840_vm1, %v14543_v58  ;;  %v16060_v42 = vadd.f32 %v5106_v13, %v4302_v41  ;;  %v14544_v58 = vld [vmem:[%s15478_s30 + $0x4c8] sm:$0xff]  ;;  %v14672_v41 = vld [vmem:[%s15478_s30 + $0x2b8] sm:$0xff] }
 0x216   : > { %12232 = vmatmul.msk.bf16.gmra.mxu3 %vm840_vm1, %v14607_v43 }
 0x217   : > { %12681 = vmatmul.msk.bf16.gmra.mxu0 %vm840_vm1, %v14671_v15  ;;  %v14608_v15 = vld [vmem:[%s15478_s30 + $0x98] sm:$0xff] }
 0x218   : > { %v2905_v7 = vpop.f32.mrf.mxu2 }
 0x219   : > { %v3201_v59 = vadd.f32 %v2905_v7, %v1931_v30  ;;  %v4007_v47 = vpop.f32.mrf.mxu3  ;;  %v1932_v57 = vpop.f32.mrf.mxu1 }
 0x21a   : > { %v1933_v13 = vadd.f32 %v1932_v57, %v15770_v21 }
 0x21b   : > { %v4303_v39 = vadd.f32 %v4007_v47, %v3201_v59 }
 0x21c   : > { %v5111_v37 = vpop.f32.mrf.mxu0 }
 0x21d   : > { %v16065_v12 = vadd.f32 %v5109_v19, %v4303_v39 }
 0x220   : > { %v2907_v14 = vpop.f32.mrf.mxu2 }
 0x221   : > { %v3202_v38 = vadd.f32 %v2907_v14, %v1933_v13  ;;  %v4009_v1 = vpop.f32.mrf.mxu3  ;;  %v1935_v43 = vpop.f32.mrf.mxu1 }
 0x222   : > { %v1936_v21 = vadd.f32 %v1935_v43, %v15782_v61 }
 0x223   : > { %v4304_v33 = vadd.f32 %v4009_v1, %v3202_v38 }
 0x224   : > { %v5114_v31 = vpop.f32.mrf.mxu0  ;;  %11463 = vmatmul.msk.bf16.gmra.mxu1 %vm840_vm1, %v14416_v26  ;;  %v14417_v26 = vld [vmem:[%s15478_s30 + $0x90] sm:$0xff] }
 0x225   : > { %11912 = vmatmul.msk.bf16.gmra.mxu2 %vm840_vm1, %v14544_v58  ;;  %v16074_v30 = vadd.f32 %v5111_v37, %v4304_v33  ;;  %v14545_v58 = vld [vmem:[%s15478_s30 + $0x4d0] sm:$0xff]  ;;  %v14673_v33 = vld [vmem:[%s15478_s30 + $0x2c0] sm:$0xff] }
 0x226   : > { %12233 = vmatmul.msk.bf16.gmra.mxu3 %vm840_vm1, %v14608_v15 }
 0x227   : > { %12682 = vmatmul.msk.bf16.gmra.mxu0 %vm840_vm1, %v14672_v41  ;;  %v14609_v41 = vld [vmem:[%s15478_s30 + $0xa0] sm:$0xff] }
 0x228   : > { %v2910_v19 = vpop.f32.mrf.mxu2 }
 0x229   : > { %v3203_v7 = vadd.f32 %v2910_v19, %v1936_v21  ;;  %v4012_v59 = vpop.f32.mrf.mxu3  ;;  %v1937_v47 = vpop.f32.mrf.mxu1 }
 0x22a   : > { %v1938_v37 = vadd.f32 %v1937_v47, %v15794_v49 }
 0x22b   : > { %v4305_v57 = vadd.f32 %v4012_v59, %v3203_v7 }
 0x22c   : > { %v5116_v39 = vpop.f32.mrf.mxu0 }
 0x22d   : > { %v16079_v13 = vadd.f32 %v5114_v31, %v4305_v57 }
 0x230   : > { %v2912_v14 = vpop.f32.mrf.mxu2 }
 0x231   : > { %v3204_v38 = vadd.f32 %v2912_v14, %v1938_v37  ;;  %v4014_v1 = vpop.f32.mrf.mxu3  ;;  %v1940_v15 = vpop.f32.mrf.mxu1 }
 0x232   : > { %v1941_v49 = vadd.f32 %v1940_v15, %v15806_v9 }
 0x233   : > { %v4306_v61 = vadd.f32 %v4014_v1, %v3204_v38 }
 0x234   : > { %v5119_v43 = vpop.f32.mrf.mxu0  ;;  %11464 = vmatmul.msk.bf16.gmra.mxu1 %vm840_vm1, %v14417_v26  ;;  %v14418_v26 = vld [vmem:[%s15478_s30 + $0x98] sm:$0xff] }
 0x235   : > { %11913 = vmatmul.msk.bf16.gmra.mxu2 %vm840_vm1, %v14545_v58  ;;  %v16088_v21 = vadd.f32 %v5116_v39, %v4306_v61  ;;  %v14546_v58 = vld [vmem:[%s15478_s30 + $0x4d8] sm:$0xff]  ;;  %v14674_v61 = vld [vmem:[%s15478_s30 + $0x2c8] sm:$0xff] }
 0x236   : > { %12234 = vmatmul.msk.bf16.gmra.mxu3 %vm840_vm1, %v14609_v41 }
 0x237   : > { %12683 = vmatmul.msk.bf16.gmra.mxu0 %vm840_vm1, %v14673_v33  ;;  %v14610_v33 = vld [vmem:[%s15478_s30 + $0xa8] sm:$0xff] }
 0x238   : > { %v2915_v31 = vpop.f32.mrf.mxu2 }
 0x239   : > { %v3205_v19 = vadd.f32 %v2915_v31, %v1941_v49  ;;  %v4017_v7 = vpop.f32.mrf.mxu3  ;;  %v1942_v59 = vpop.f32.mrf.mxu1 }
 0x23a   : > { %v1943_v39 = vadd.f32 %v1942_v59, %v15818_v2 }
 0x23b   : > { %v4307_v47 = vadd.f32 %v4017_v7, %v3205_v19 }
 0x23c   : > { %v5121_v57 = vpop.f32.mrf.mxu0 }
 0x23d   : > { %v16093_v37 = vadd.f32 %v5119_v43, %v4307_v47 }
 0x240   : > { %v2917_v14 = vpop.f32.mrf.mxu2 }
 0x241   : > { %v3206_v38 = vadd.f32 %v2917_v14, %v1943_v39  ;;  %v4019_v1 = vpop.f32.mrf.mxu3  ;;  %v1945_v41 = vpop.f32.mrf.mxu1 }
 0x242   : > { %v1946_v2 = vadd.f32 %v1945_v41, %v15830_v46 }
 0x243   : > { %v4308_v9 = vadd.f32 %v4019_v1, %v3206_v38 }
 0x244   : > { %v5124_v15 = vpop.f32.mrf.mxu0  ;;  %11465 = vmatmul.msk.bf16.gmra.mxu1 %vm840_vm1, %v14418_v26  ;;  %v14419_v26 = vld [vmem:[%s15478_s30 + $0xa0] sm:$0xff] }
 0x245   : > { %11914 = vmatmul.msk.bf16.gmra.mxu2 %vm840_vm1, %v14546_v58  ;;  %v16102_v49 = vadd.f32 %v5121_v57, %v4308_v9  ;;  %v14547_v58 = vld [vmem:[%s15478_s30 + $0x4e0] sm:$0xff]  ;;  %v14675_v9 = vld [vmem:[%s15478_s30 + $0x2d0] sm:$0xff] }
 0x246   : > { %12235 = vmatmul.msk.bf16.gmra.mxu3 %vm840_vm1, %v14610_v33 }
 0x247   : > { %12684 = vmatmul.msk.bf16.gmra.mxu0 %vm840_vm1, %v14674_v61  ;;  %v14611_v61 = vld [vmem:[%s15478_s30 + $0xb0] sm:$0xff] }
 0x248   : > { %v2920_v43 = vpop.f32.mrf.mxu2 }
 0x249   : > { %v3207_v31 = vadd.f32 %v2920_v43, %v1946_v2  ;;  %v4022_v19 = vpop.f32.mrf.mxu3  ;;  %v1947_v7 = vpop.f32.mrf.mxu1 }
 0x24a   : > { %v1948_v57 = vadd.f32 %v1947_v7, %v15842_v45 }
 0x24b   : > { %v4309_v59 = vadd.f32 %v4022_v19, %v3207_v31 }
 0x24c   : > { %v5126_v47 = vpop.f32.mrf.mxu0 }
 0x24d   : > { %v16107_v39 = vadd.f32 %v5124_v15, %v4309_v59 }
 0x250   : > { %v2922_v14 = vpop.f32.mrf.mxu2 }
 0x251   : > { %v3208_v38 = vadd.f32 %v2922_v14, %v1948_v57  ;;  %v4024_v1 = vpop.f32.mrf.mxu3  ;;  %v1950_v33 = vpop.f32.mrf.mxu1 }
 0x252   : > { %v1951_v45 = vadd.f32 %v1950_v33, %v15854_v29 }
 0x253   : > { %v4310_v46 = vadd.f32 %v4024_v1, %v3208_v38 }
 0x254   : > { %v5129_v41 = vpop.f32.mrf.mxu0  ;;  %11466 = vmatmul.msk.bf16.gmra.mxu1 %vm840_vm1, %v14419_v26  ;;  %v14420_v26 = vld [vmem:[%s15478_s30 + $0xa8] sm:$0xff] }
 0x255   : > { %11915 = vmatmul.msk.bf16.gmra.mxu2 %vm840_vm1, %v14547_v58  ;;  %v16116_v2 = vadd.f32 %v5126_v47, %v4310_v46  ;;  %v14548_v58 = vld [vmem:[%s15478_s30 + $0x4e8] sm:$0xff]  ;;  %v14676_v46 = vld [vmem:[%s15478_s30 + $0x2d8] sm:$0xff] }
 0x256   : > { %12236 = vmatmul.msk.bf16.gmra.mxu3 %vm840_vm1, %v14611_v61 }
 0x257   : > { %12685 = vmatmul.msk.bf16.gmra.mxu0 %vm840_vm1, %v14675_v9  ;;  %v14612_v9 = vld [vmem:[%s15478_s30 + $0xb8] sm:$0xff] }
 0x258   : > { %v2925_v15 = vpop.f32.mrf.mxu2 }
 0x259   : > { %v3209_v43 = vadd.f32 %v2925_v15, %v1951_v45  ;;  %v4027_v31 = vpop.f32.mrf.mxu3  ;;  %v1952_v19 = vpop.f32.mrf.mxu1 }
 0x25a   : > { %v1953_v47 = vadd.f32 %v1952_v19, %v15866_v20 }
 0x25b   : > { %v4311_v7 = vadd.f32 %v4027_v31, %v3209_v43 }
 0x25c   : > { %v5131_v59 = vpop.f32.mrf.mxu0 }
 0x25d   : > { %v16121_v57 = vadd.f32 %v5129_v41, %v4311_v7 }
 0x260   : > { %v2927_v14 = vpop.f32.mrf.mxu2 }
 0x261   : > { %v3210_v38 = vadd.f32 %v2927_v14, %v1953_v47  ;;  %v4029_v1 = vpop.f32.mrf.mxu3  ;;  %v1955_v61 = vpop.f32.mrf.mxu1 }
 0x262   : > { %v1956_v20 = vadd.f32 %v1955_v61, %v15878_v32 }
 0x263   : > { %v4312_v29 = vadd.f32 %v4029_v1, %v3210_v38 }
 0x264   : > { %v5134_v33 = vpop.f32.mrf.mxu0  ;;  %11467 = vmatmul.msk.bf16.gmra.mxu1 %vm840_vm1, %v14420_v26  ;;  %v14421_v26 = vld [vmem:[%s15478_s30 + $0xb0] sm:$0xff] }
 0x265   : > { %11916 = vmatmul.msk.bf16.gmra.mxu2 %vm840_vm1, %v14548_v58  ;;  %v16130_v45 = vadd.f32 %v5131_v59, %v4312_v29  ;;  %v14549_v58 = vld [vmem:[%s15478_s30 + $0x4f0] sm:$0xff]  ;;  %v14677_v29 = vld [vmem:[%s15478_s30 + $0x2e0] sm:$0xff] }
 0x266   : > { %12237 = vmatmul.msk.bf16.gmra.mxu3 %vm840_vm1, %v14612_v9 }
 0x267   : > { %12686 = vmatmul.msk.bf16.gmra.mxu0 %vm840_vm1, %v14676_v46  ;;  %v14613_v46 = vld [vmem:[%s15478_s30 + $0xc0] sm:$0xff] }
 0x268   : > { %v2930_v41 = vpop.f32.mrf.mxu2 }
 0x269   : > { %v3211_v15 = vadd.f32 %v2930_v41, %v1956_v20  ;;  %v4032_v43 = vpop.f32.mrf.mxu3  ;;  %v1957_v31 = vpop.f32.mrf.mxu1 }
 0x26a   : > { %v1958_v59 = vadd.f32 %v1957_v31, %v15890_v60 }
 0x26b   : > { %v4313_v19 = vadd.f32 %v4032_v43, %v3211_v15 }
 0x26c   : > { %v5136_v7 = vpop.f32.mrf.mxu0 }
 0x26d   : > { %v16135_v47 = vadd.f32 %v5134_v33, %v4313_v19 }
 0x270   : > { %v2932_v14 = vpop.f32.mrf.mxu2 }
 0x271   : > { %v3212_v38 = vadd.f32 %v2932_v14, %v1958_v59  ;;  %v4034_v1 = vpop.f32.mrf.mxu3  ;;  %v1960_v9 = vpop.f32.mrf.mxu1 }
 0x272   : > { %v1961_v60 = vadd.f32 %v1960_v9, %v15902_v8 }
 0x273   : > { %v4314_v32 = vadd.f32 %v4034_v1, %v3212_v38 }
 0x274   : > { %v5139_v61 = vpop.f32.mrf.mxu0  ;;  %11468 = vmatmul.msk.bf16.gmra.mxu1 %vm840_vm1, %v14421_v26  ;;  %v14422_v26 = vld [vmem:[%s15478_s30 + $0xb8] sm:$0xff] }
 0x275   : > { %11917 = vmatmul.msk.bf16.gmra.mxu2 %vm840_vm1, %v14549_v58  ;;  %v16144_v20 = vadd.f32 %v5136_v7, %v4314_v32  ;;  %v14550_v58 = vld [vmem:[%s15478_s30 + $0x4f8] sm:$0xff]  ;;  %v14678_v32 = vld [vmem:[%s15478_s30 + $0x2e8] sm:$0xff] }
 0x276   : > { %12238 = vmatmul.msk.bf16.gmra.mxu3 %vm840_vm1, %v14613_v46 }
 0x277   : > { %12687 = vmatmul.msk.bf16.gmra.mxu0 %vm840_vm1, %v14677_v29  ;;  %v14614_v29 = vld [vmem:[%s15478_s30 + $0xc8] sm:$0xff] }
 0x278   : > { %v2935_v33 = vpop.f32.mrf.mxu2 }
 0x279   : > { %v3213_v41 = vadd.f32 %v2935_v33, %v1961_v60  ;;  %v4037_v15 = vpop.f32.mrf.mxu3  ;;  %v1962_v43 = vpop.f32.mrf.mxu1 }
 0x27a   : > { %v1963_v7 = vadd.f32 %v1962_v43, %v15914_v24 }
 0x27b   : > { %v4315_v31 = vadd.f32 %v4037_v15, %v3213_v41 }
 0x27c   : > { %v5141_v19 = vpop.f32.mrf.mxu0 }
 0x27d   : > { %v16149_v59 = vadd.f32 %v5139_v61, %v4315_v31 }
 0x280   : > { %v2937_v14 = vpop.f32.mrf.mxu2 }
 0x281   : > { %v3214_v38 = vadd.f32 %v2937_v14, %v1963_v7  ;;  %v4039_v1 = vpop.f32.mrf.mxu3  ;;  %v1965_v46 = vpop.f32.mrf.mxu1 }
 0x282   : > { %v1966_v24 = vadd.f32 %v1965_v46, %v15926_v48 }
 0x283   : > { %v4316_v8 = vadd.f32 %v4039_v1, %v3214_v38 }
 0x284   : > { %v5144_v9 = vpop.f32.mrf.mxu0  ;;  %11469 = vmatmul.msk.bf16.gmra.mxu1 %vm840_vm1, %v14422_v26  ;;  %v14423_v26 = vld [vmem:[%s15478_s30 + $0xc0] sm:$0xff] }
 0x285   : > { %11918 = vmatmul.msk.bf16.gmra.mxu2 %vm840_vm1, %v14550_v58  ;;  %v16158_v60 = vadd.f32 %v5141_v19, %v4316_v8  ;;  %v14551_v58 = vld [vmem:[%s15478_s30 + $0x500] sm:$0xff]  ;;  %v14679_v8 = vld [vmem:[%s15478_s30 + $0x2f0] sm:$0xff] }
 0x286   : > { %12239 = vmatmul.msk.bf16.gmra.mxu3 %vm840_vm1, %v14614_v29 }
 0x287   : > { %12688 = vmatmul.msk.bf16.gmra.mxu0 %vm840_vm1, %v14678_v32  ;;  %v14615_v32 = vld [vmem:[%s15478_s30 + $0xd0] sm:$0xff] }
 0x288   : > { %v2940_v61 = vpop.f32.mrf.mxu2 }
 0x289   : > { %v3215_v33 = vadd.f32 %v2940_v61, %v1966_v24  ;;  %v4042_v41 = vpop.f32.mrf.mxu3  ;;  %v1967_v15 = vpop.f32.mrf.mxu1 }
 0x28a   : > { %v1968_v19 = vadd.f32 %v1967_v15, %v15938_v0 }
 0x28b   : > { %v4317_v43 = vadd.f32 %v4042_v41, %v3215_v33 }
 0x28c   : > { %v5146_v31 = vpop.f32.mrf.mxu0 }
 0x28d   : > { %v16163_v7 = vadd.f32 %v5144_v9, %v4317_v43 }
 0x290   : > { %v2942_v14 = vpop.f32.mrf.mxu2 }
 0x291   : > { %v3216_v38 = vadd.f32 %v2942_v14, %v1968_v19  ;;  %v4044_v1 = vpop.f32.mrf.mxu3  ;;  %v1970_v29 = vpop.f32.mrf.mxu1 }
 0x292   : > { %v1971_v0 = vadd.f32 %v1970_v29, %v15546_v44 }
 0x293   : > { %v4318_v48 = vadd.f32 %v4044_v1, %v3216_v38 }
 0x294   : > { %v5149_v46 = vpop.f32.mrf.mxu0  ;;  %11470 = vmatmul.msk.bf16.gmra.mxu1 %vm840_vm1, %v14423_v26  ;;  %v14424_v26 = vld [vmem:[%s15478_s30 + $0xc8] sm:$0xff] }
 0x295   : > { %11919 = vmatmul.msk.bf16.gmra.mxu2 %vm840_vm1, %v14551_v58  ;;  %v16172_v24 = vadd.f32 %v5146_v31, %v4318_v48  ;;  %v14552_v58 = vld [vmem:[%s15478_s30 + $0x508] sm:$0xff]  ;;  %v14680_v48 = vld [vmem:[%s15478_s30 + $0x2f8] sm:$0xff] }
 0x296   : > { %12240 = vmatmul.msk.bf16.gmra.mxu3 %vm840_vm1, %v14615_v32 }
 0x297   : > { %12689 = vmatmul.msk.bf16.gmra.mxu0 %vm840_vm1, %v14679_v8  ;;  %v14616_v8 = vld [vmem:[%s15478_s30 + $0xd8] sm:$0xff] }
 0x298   : > { %v2945_v9 = vpop.f32.mrf.mxu2 }
 0x299   : > { %v3217_v61 = vadd.f32 %v2945_v9, %v1971_v0  ;;  %v4047_v33 = vpop.f32.mrf.mxu3  ;;  %v1972_v41 = vpop.f32.mrf.mxu1 }
 0x29a   : > { %v1973_v31 = vadd.f32 %v1972_v41, %v15560_v50 }
 0x29b   : > { %v4319_v15 = vadd.f32 %v4047_v33, %v3217_v61 }
 0x29c   : > { %v5151_v43 = vpop.f32.mrf.mxu0 }
 0x29d   : > { %v16177_v19 = vadd.f32 %v5149_v46, %v4319_v15 }
 0x2a0   : > { %v2947_v14 = vpop.f32.mrf.mxu2 }
 0x2a1   : > { %v3218_v38 = vadd.f32 %v2947_v14, %v1973_v31  ;;  %v4049_v1 = vpop.f32.mrf.mxu3  ;;  %v1975_v32 = vpop.f32.mrf.mxu1 }
 0x2a2   : > { %v1976_v50 = vadd.f32 %v1975_v32, %v15570_v56 }
 0x2a3   : > { %v4320_v44 = vadd.f32 %v4049_v1, %v3218_v38 }
 0x2a4   : > { %v5154_v29 = vpop.f32.mrf.mxu0  ;;  %11471 = vmatmul.msk.bf16.gmra.mxu1 %vm840_vm1, %v14424_v26  ;;  %v14425_v26 = vld [vmem:[%s15478_s30 + $0xd0] sm:$0xff] }
 0x2a5   : > { %11920 = vmatmul.msk.bf16.gmra.mxu2 %vm840_vm1, %v14552_v58  ;;  %v16186_v0 = vadd.f32 %v5151_v43, %v4320_v44  ;;  %v14553_v58 = vld [vmem:[%s15478_s30 + $0x510] sm:$0xff]  ;;  %v14681_v44 = vld [vmem:[%s15478_s30 + $0x300] sm:$0xff] }
 0x2a6   : > { %12241 = vmatmul.msk.bf16.gmra.mxu3 %vm840_vm1, %v14616_v8 }
 0x2a7   : > { %12690 = vmatmul.msk.bf16.gmra.mxu0 %vm840_vm1, %v14680_v48  ;;  %v14617_v48 = vld [vmem:[%s15478_s30 + $0xe0] sm:$0xff] }
 0x2a8   : > { %v2950_v46 = vpop.f32.mrf.mxu2 }
 0x2a9   : > { %v3219_v9 = vadd.f32 %v2950_v46, %v1976_v50  ;;  %v4052_v61 = vpop.f32.mrf.mxu3  ;;  %v1977_v33 = vpop.f32.mrf.mxu1 }
 0x2aa   : > { %v1978_v43 = vadd.f32 %v1977_v33, %v15584_v62 }
 0x2ab   : > { %v4321_v41 = vadd.f32 %v4052_v61, %v3219_v9 }
 0x2ac   : > { %v5156_v15 = vpop.f32.mrf.mxu0 }
 0x2ad   : > { %v16191_v31 = vadd.f32 %v5154_v29, %v4321_v41 }
 0x2b0   : > { %v2952_v14 = vpop.f32.mrf.mxu2 }
 0x2b1   : > { %v3220_v38 = vadd.f32 %v2952_v14, %v1978_v43  ;;  %v4054_v1 = vpop.f32.mrf.mxu3  ;;  %v1980_v8 = vpop.f32.mrf.mxu1 }
 0x2b2   : > { %v1981_v62 = vadd.f32 %v1980_v8, %v15594_v4 }
 0x2b3   : > { %v4322_v56 = vadd.f32 %v4054_v1, %v3220_v38 }
 0x2b4   : > { %v5159_v32 = vpop.f32.mrf.mxu0  ;;  %11472 = vmatmul.msk.bf16.gmra.mxu1 %vm840_vm1, %v14425_v26  ;;  %v14426_v26 = vld [vmem:[%s15478_s30 + $0xd8] sm:$0xff] }
 0x2b5   : > { %11921 = vmatmul.msk.bf16.gmra.mxu2 %vm840_vm1, %v14553_v58  ;;  %v16200_v50 = vadd.f32 %v5156_v15, %v4322_v56  ;;  %v14554_v58 = vld [vmem:[%s15478_s30 + $0x518] sm:$0xff]  ;;  %v14682_v56 = vld [vmem:[%s15478_s30 + $0x308] sm:$0xff] }
 0x2b6   : > { %12242 = vmatmul.msk.bf16.gmra.mxu3 %vm840_vm1, %v14617_v48 }
 0x2b7   : > { %12691 = vmatmul.msk.bf16.gmra.mxu0 %vm840_vm1, %v14681_v44  ;;  %v14618_v44 = vld [vmem:[%s15478_s30 + $0xe8] sm:$0xff] }
 0x2b8   : > { %v2955_v29 = vpop.f32.mrf.mxu2 }
 0x2b9   : > { %v3221_v46 = vadd.f32 %v2955_v29, %v1981_v62  ;;  %v4057_v9 = vpop.f32.mrf.mxu3  ;;  %v1982_v61 = vpop.f32.mrf.mxu1 }
 0x2ba   : > { %v1983_v15 = vadd.f32 %v1982_v61, %v15608_v10 }
 0x2bb   : > { %v4323_v33 = vadd.f32 %v4057_v9, %v3221_v46 }
 0x2bc   : > { %v5161_v41 = vpop.f32.mrf.mxu0 }
 0x2bd   : > { %v16205_v43 = vadd.f32 %v5159_v32, %v4323_v33 }
 0x2c0   : > { %v2957_v14 = vpop.f32.mrf.mxu2 }
 0x2c1   : > { %v3222_v38 = vadd.f32 %v2957_v14, %v1983_v15  ;;  %v4059_v1 = vpop.f32.mrf.mxu3  ;;  %v1985_v48 = vpop.f32.mrf.mxu1 }
 0x2c2   : > { %v1986_v10 = vadd.f32 %v1985_v48, %v15618_v16 }
 0x2c3   : > { %v4324_v4 = vadd.f32 %v4059_v1, %v3222_v38 }
 0x2c4   : > { %v5164_v8 = vpop.f32.mrf.mxu0  ;;  %11473 = vmatmul.msk.bf16.gmra.mxu1 %vm840_vm1, %v14426_v26  ;;  %v14427_v26 = vld [vmem:[%s15478_s30 + $0xe0] sm:$0xff] }
 0x2c5   : > { %11922 = vmatmul.msk.bf16.gmra.mxu2 %vm840_vm1, %v14554_v58  ;;  %v16214_v62 = vadd.f32 %v5161_v41, %v4324_v4  ;;  %v14555_v58 = vld [vmem:[%s15478_s30 + $0x520] sm:$0xff]  ;;  %v14683_v4 = vld [vmem:[%s15478_s30 + $0x310] sm:$0xff] }
 0x2c6   : > { %12243 = vmatmul.msk.bf16.gmra.mxu3 %vm840_vm1, %v14618_v44 }
 0x2c7   : > { %12692 = vmatmul.msk.bf16.gmra.mxu0 %vm840_vm1, %v14682_v56  ;;  %v14619_v56 = vld [vmem:[%s15478_s30 + $0xf0] sm:$0xff] }
 0x2c8   : > { %v2960_v32 = vpop.f32.mrf.mxu2 }
 0x2c9   : > { %v3223_v29 = vadd.f32 %v2960_v32, %v1986_v10  ;;  %v4062_v46 = vpop.f32.mrf.mxu3  ;;  %v1987_v9 = vpop.f32.mrf.mxu1 }
 0x2ca   : > { %v1988_v41 = vadd.f32 %v1987_v9, %v15632_v22 }
 0x2cb   : > { %v4325_v61 = vadd.f32 %v4062_v46, %v3223_v29 }
 0x2cc   : > { %v5166_v33 = vpop.f32.mrf.mxu0 }
 0x2cd   : > { %v16219_v15 = vadd.f32 %v5164_v8, %v4325_v61 }
 0x2d0   : > { %v2962_v14 = vpop.f32.mrf.mxu2 }
 0x2d1   : > { %v3224_v38 = vadd.f32 %v2962_v14, %v1988_v41  ;;  %v4064_v1 = vpop.f32.mrf.mxu3  ;;  %v1990_v44 = vpop.f32.mrf.mxu1 }
 0x2d2   : > { %v1991_v22 = vadd.f32 %v1990_v44, %v15642_v28 }
 0x2d3   : > { %v4326_v16 = vadd.f32 %v4064_v1, %v3224_v38 }
 0x2d4   : > { %v5169_v48 = vpop.f32.mrf.mxu0  ;;  %11474 = vmatmul.msk.bf16.gmra.mxu1 %vm840_vm1, %v14427_v26  ;;  %v14428_v26 = vld [vmem:[%s15478_s30 + $0xe8] sm:$0xff] }
 0x2d5   : > { %11923 = vmatmul.msk.bf16.gmra.mxu2 %vm840_vm1, %v14555_v58  ;;  %v16228_v10 = vadd.f32 %v5166_v33, %v4326_v16  ;;  %v14556_v58 = vld [vmem:[%s15478_s30 + $0x528] sm:$0xff]  ;;  %v14684_v16 = vld [vmem:[%s15478_s30 + $0x318] sm:$0xff] }
 0x2d6   : > { %12244 = vmatmul.msk.bf16.gmra.mxu3 %vm840_vm1, %v14619_v56 }
 0x2d7   : > { %12693 = vmatmul.msk.bf16.gmra.mxu0 %vm840_vm1, %v14683_v4  ;;  %v14620_v4 = vld [vmem:[%s15478_s30 + $0xf8] sm:$0xff] }
 0x2d8   : > { %v2965_v8 = vpop.f32.mrf.mxu2 }
 0x2d9   : > { %v3225_v32 = vadd.f32 %v2965_v8, %v1991_v22  ;;  %v4067_v29 = vpop.f32.mrf.mxu3  ;;  %v1992_v46 = vpop.f32.mrf.mxu1 }
 0x2da   : > { %v1993_v33 = vadd.f32 %v1992_v46, %v15656_v34 }
 0x2db   : > { %v4327_v9 = vadd.f32 %v4067_v29, %v3225_v32 }
 0x2dc   : > { %v5171_v61 = vpop.f32.mrf.mxu0 }
 0x2dd   : > { %v16233_v41 = vadd.f32 %v5169_v48, %v4327_v9 }
 0x2e0   : > { %v2967_v14 = vpop.f32.mrf.mxu2 }
 0x2e1   : > { %v3226_v38 = vadd.f32 %v2967_v14, %v1993_v33  ;;  %v4069_v1 = vpop.f32.mrf.mxu3  ;;  %v1995_v56 = vpop.f32.mrf.mxu1 }
 0x2e2   : > { %v1996_v34 = vadd.f32 %v1995_v56, %v15666_v40 }
 0x2e3   : > { %v4328_v28 = vadd.f32 %v4069_v1, %v3226_v38 }
 0x2e4   : > { %v5174_v44 = vpop.f32.mrf.mxu0  ;;  %11475 = vmatmul.msk.bf16.gmra.mxu1 %vm840_vm1, %v14428_v26  ;;  %v14429_v26 = vld [vmem:[%s15478_s30 + $0xf0] sm:$0xff] }
 0x2e5   : > { %11924 = vmatmul.msk.bf16.gmra.mxu2 %vm840_vm1, %v14556_v58  ;;  %v16242_v22 = vadd.f32 %v5171_v61, %v4328_v28  ;;  %v14557_v58 = vld [vmem:[%s15478_s30 + $0x530] sm:$0xff]  ;;  %v14685_v28 = vld [vmem:[%s15478_s30 + $0x320] sm:$0xff] }
 0x2e6   : > { %12245 = vmatmul.msk.bf16.gmra.mxu3 %vm840_vm1, %v14620_v4 }
 0x2e7   : > { %12694 = vmatmul.msk.bf16.gmra.mxu0 %vm840_vm1, %v14684_v16  ;;  %v14621_v16 = vld [vmem:[%s15478_s30 + $0x100] sm:$0xff] }
 0x2e8   : > { %v2970_v48 = vpop.f32.mrf.mxu2 }
 0x2e9   : > { %v3227_v8 = vadd.f32 %v2970_v48, %v1996_v34  ;;  %v4072_v32 = vpop.f32.mrf.mxu3  ;;  %v1997_v29 = vpop.f32.mrf.mxu1 }
 0x2ea   : > { %v1998_v61 = vadd.f32 %v1997_v29, %v15680_v54 }
 0x2eb   : > { %v4329_v46 = vadd.f32 %v4072_v32, %v3227_v8 }
 0x2ec   : > { %v5176_v9 = vpop.f32.mrf.mxu0 }
 0x2ed   : > { %v16247_v33 = vadd.f32 %v5174_v44, %v4329_v46 }
 0x2f0   : > { %v2972_v14 = vpop.f32.mrf.mxu2 }
 0x2f1   : > { %v3228_v38 = vadd.f32 %v2972_v14, %v1998_v61  ;;  %v4074_v1 = vpop.f32.mrf.mxu3  ;;  %v2000_v4 = vpop.f32.mrf.mxu1  ;;  %v17588_v14 = vld [vmem:[#allocation28_spill] sm:$0xff] }
 0x2f2   : > { %v2001_v54 = vadd.f32 %v2000_v4, %v15690_v5 }
 0x2f3   : > { %v4330_v40 = vadd.f32 %v4074_v1, %v3228_v38 }
 0x2f4   : > { %v5179_v56 = vpop.f32.mrf.mxu0  ;;  %11476 = vmatmul.msk.bf16.gmra.mxu1 %vm840_vm1, %v14429_v26 }
 0x2f5   : > { %11925 = vmatmul.msk.bf16.gmra.mxu2 %vm840_vm1, %v14557_v58  ;;  %v16256_v34 = vadd.f32 %v5176_v9, %v4330_v40  ;;  %v14430_v58 = vld [vmem:[%s15478_s30 + $0xf8] sm:$0xff]  ;;  %v14622_v40 = vld [vmem:[%s15478_s30 + $0x108] sm:$0xff] }
 0x2f6   : > { %12246 = vmatmul.msk.bf16.gmra.mxu3 %vm840_vm1, %v14621_v16  ;;  %v14558_v16 = vld [vmem:[%s15478_s30 + $0x538] sm:$0xff] }
 0x2f7   : > { %17586 = vst [vmem:[#allocation85_spill] sm:$0xff] %v16256_v34  ;;  %12695 = vmatmul.msk.bf16.gmra.mxu0 %vm840_vm1, %v14685_v28  ;;  %v14686_v34 = vld [vmem:[%s15478_s30 + $0x328] sm:$0xff] }
 0x2f8   : > { %v2975_v44 = vpop.f32.mrf.mxu2 }
 0x2f9   : > { %v3229_v48 = vadd.f32 %v2975_v44, %v2001_v54  ;;  %v4077_v8 = vpop.f32.mrf.mxu3  ;;  %v2002_v32 = vpop.f32.mrf.mxu1 }
 0x2fa   : > { %v2003_v9 = vadd.f32 %v2002_v32, %v17588_v14 }
 0x2fb   : > { %v4331_v29 = vadd.f32 %v4077_v8, %v3229_v48 }
 0x2fc   : > { %v5181_v46 = vpop.f32.mrf.mxu0 }
 0x2fd   : > { %v16261_v61 = vadd.f32 %v5179_v56, %v4331_v29  ;;  %v17590_v56 = vld [vmem:[#allocation31_spill] sm:$0xff] }
 0x2ff   : > { %17587 = vst [vmem:[#allocation86_spill] sm:$0xff] %v16261_v61  ;;  %v14687_v61 = vld [vmem:[%s15478_s30 + $0x330] sm:$0xff] }
 0x300   : > { %v2977_v38 = vpop.f32.mrf.mxu2 }
 0x301   : > { %v3230_v1 = vadd.f32 %v2977_v38, %v2003_v9  ;;  %v4079_v26 = vpop.f32.mrf.mxu3  ;;  %v2005_v28 = vpop.f32.mrf.mxu1 }
 0x302   : > { %v2006_v44 = vadd.f32 %v2005_v28, %v17590_v56 }
 0x303   : > { %v4332_v5 = vadd.f32 %v4079_v26, %v3230_v1  ;;  %v17592_v1 = vld [vmem:[#allocation34_spill] sm:$0xff] }
 0x304   : > { %v5184_v4 = vpop.f32.mrf.mxu0  ;;  %11477 = vmatmul.msk.bf16.gmra.mxu1 %vm840_vm1, %v14430_v58 }
 0x305   : > { %11926 = vmatmul.msk.bf16.gmra.mxu2 %vm840_vm1, %v14558_v16  ;;  %v16270_v54 = vadd.f32 %v5181_v46, %v4332_v5  ;;  %v14559_v5 = vld [vmem:[%s15478_s30 + $0x540] sm:$0xff] }
 0x306   : > { %12247 = vmatmul.msk.bf16.gmra.mxu3 %vm840_vm1, %v14622_v40  ;;  %v14431_v40 = vld [vmem:[%s15478_s30 + $0x100] sm:$0xff] }
 0x307   : > { %17589 = vst [vmem:[#allocation28_spill] sm:$0xff] %v16270_v54  ;;  %12696 = vmatmul.msk.bf16.gmra.mxu0 %vm840_vm1, %v14686_v34  ;;  %v14623_v54 = vld [vmem:[%s15478_s30 + $0x110] sm:$0xff] }
 0x308   : > { %v2980_v48 = vpop.f32.mrf.mxu2 }
 0x309   : > { %v3231_v8 = vadd.f32 %v2980_v48, %v2006_v44  ;;  %v4082_v32 = vpop.f32.mrf.mxu3  ;;  %v2007_v29 = vpop.f32.mrf.mxu1 }
 0x30a   : > { %v2008_v46 = vadd.f32 %v2007_v29, %v17592_v1 }
 0x30b   : > { %v4333_v14 = vadd.f32 %v4082_v32, %v3231_v8 }
 0x30c   : > { %v5186_v9 = vpop.f32.mrf.mxu0 }
 0x30d   : > { %v16275_v38 = vadd.f32 %v5184_v4, %v4333_v14  ;;  %v17594_v4 = vld [vmem:[#allocation37_spill] sm:$0xff] }
 0x30f   : > { %17591 = vst [vmem:[#allocation31_spill] sm:$0xff] %v16275_v38  ;;  %v14688_v38 = vld [vmem:[%s15478_s30 + $0x338] sm:$0xff] }
 0x310   : > { %v2982_v26 = vpop.f32.mrf.mxu2 }
 0x311   : > { %v3232_v58 = vadd.f32 %v2982_v26, %v2008_v46  ;;  %v4084_v16 = vpop.f32.mrf.mxu3  ;;  %v2010_v34 = vpop.f32.mrf.mxu1 }
 0x312   : > { %v2011_v48 = vadd.f32 %v2010_v34, %v17594_v4 }
 0x313   : > { %v4334_v28 = vadd.f32 %v4084_v16, %v3232_v58  ;;  %v17596_v58 = vld [vmem:[#allocation40_spill] sm:$0xff] }
 0x314   : > { %v5189_v56 = vpop.f32.mrf.mxu0  ;;  %11478 = vmatmul.msk.bf16.gmra.mxu1 %vm840_vm1, %v14431_v40 }
 0x315   : > { %11927 = vmatmul.msk.bf16.gmra.mxu2 %vm840_vm1, %v14559_v5  ;;  %v16284_v44 = vadd.f32 %v5186_v9, %v4334_v28  ;;  %v14560_v28 = vld [vmem:[%s15478_s30 + $0x548] sm:$0xff] }
 0x316   : > { %12248 = vmatmul.msk.bf16.gmra.mxu3 %vm840_vm1, %v14623_v54  ;;  %v14432_v54 = vld [vmem:[%s15478_s30 + $0x108] sm:$0xff] }
 0x317   : > { %17593 = vst [vmem:[#allocation34_spill] sm:$0xff] %v16284_v44  ;;  %12697 = vmatmul.msk.bf16.gmra.mxu0 %vm840_vm1, %v14687_v61  ;;  %v14624_v44 = vld [vmem:[%s15478_s30 + $0x118] sm:$0xff] }
 0x318   : > { %v2985_v8 = vpop.f32.mrf.mxu2 }
 0x319   : > { %v3233_v32 = vadd.f32 %v2985_v8, %v2011_v48  ;;  %v4087_v29 = vpop.f32.mrf.mxu3  ;;  %v2012_v14 = vpop.f32.mrf.mxu1 }
 0x31a   : > { %v2013_v9 = vadd.f32 %v2012_v14, %v17596_v58 }
 0x31b   : > { %v4335_v1 = vadd.f32 %v4087_v29, %v3233_v32 }
 0x31c   : > { %v5191_v46 = vpop.f32.mrf.mxu0 }
 0x31d   : > { %v16289_v26 = vadd.f32 %v5189_v56, %v4335_v1  ;;  %v17598_v56 = vld [vmem:[#allocation43_spill] sm:$0xff] }
 0x31f   : > { %17595 = vst [vmem:[#allocation37_spill] sm:$0xff] %v16289_v26  ;;  %v14689_v26 = vld [vmem:[%s15478_s30 + $0x340] sm:$0xff] }
 0x320   : > { %v2987_v16 = vpop.f32.mrf.mxu2 }
 0x321   : > { %v3234_v40 = vadd.f32 %v2987_v16, %v2013_v9  ;;  %v4089_v5 = vpop.f32.mrf.mxu3  ;;  %v2015_v61 = vpop.f32.mrf.mxu1 }
 0x322   : > { %v2016_v8 = vadd.f32 %v2015_v61, %v17598_v56 }
 0x323   : > { %v4336_v34 = vadd.f32 %v4089_v5, %v3234_v40  ;;  %v17600_v40 = vld [vmem:[#allocation46_spill] sm:$0xff] }
 0x324   : > { %v5194_v4 = vpop.f32.mrf.mxu0  ;;  %11479 = vmatmul.msk.bf16.gmra.mxu1 %vm840_vm1, %v14432_v54 }
 0x325   : > { %11928 = vmatmul.msk.bf16.gmra.mxu2 %vm840_vm1, %v14560_v28  ;;  %v16298_v48 = vadd.f32 %v5191_v46, %v4336_v34  ;;  %v14561_v34 = vld [vmem:[%s15478_s30 + $0x550] sm:$0xff] }
 0x326   : > { %12249 = vmatmul.msk.bf16.gmra.mxu3 %vm840_vm1, %v14624_v44  ;;  %v14433_v44 = vld [vmem:[%s15478_s30 + $0x110] sm:$0xff] }
 0x327   : > { %17597 = vst [vmem:[#allocation40_spill] sm:$0xff] %v16298_v48  ;;  %12698 = vmatmul.msk.bf16.gmra.mxu0 %vm840_vm1, %v14688_v38  ;;  %v14625_v48 = vld [vmem:[%s15478_s30 + $0x120] sm:$0xff] }
 0x328   : > { %v2990_v32 = vpop.f32.mrf.mxu2 }
 0x329   : > { %v3235_v29 = vadd.f32 %v2990_v32, %v2016_v8  ;;  %v4092_v14 = vpop.f32.mrf.mxu3  ;;  %v2017_v1 = vpop.f32.mrf.mxu1 }
 0x32a   : > { %v2018_v46 = vadd.f32 %v2017_v1, %v17600_v40 }
 0x32b   : > { %v4337_v58 = vadd.f32 %v4092_v14, %v3235_v29 }
 0x32c   : > { %v5196_v9 = vpop.f32.mrf.mxu0 }
 0x32d   : > { %v16303_v16 = vadd.f32 %v5194_v4, %v4337_v58  ;;  %v17602_v4 = vld [vmem:[#allocation49_spill] sm:$0xff] }
 0x32f   : > { %17599 = vst [vmem:[#allocation43_spill] sm:$0xff] %v16303_v16  ;;  %v14690_v16 = vld [vmem:[%s15478_s30 + $0x348] sm:$0xff] }
 0x330   : > { %v2992_v5 = vpop.f32.mrf.mxu2 }
 0x331   : > { %v3236_v54 = vadd.f32 %v2992_v5, %v2018_v46  ;;  %v4094_v28 = vpop.f32.mrf.mxu3  ;;  %v2020_v38 = vpop.f32.mrf.mxu1 }
 0x332   : > { %v2021_v32 = vadd.f32 %v2020_v38, %v17602_v4 }
 0x333   : > { %v4338_v61 = vadd.f32 %v4094_v28, %v3236_v54  ;;  %v17604_v54 = vld [vmem:[#allocation52_spill] sm:$0xff] }
 0x334   : > { %v5199_v56 = vpop.f32.mrf.mxu0  ;;  %11480 = vmatmul.msk.bf16.gmra.mxu1 %vm840_vm1, %v14433_v44 }
 0x335   : > { %11929 = vmatmul.msk.bf16.gmra.mxu2 %vm840_vm1, %v14561_v34  ;;  %v16312_v8 = vadd.f32 %v5196_v9, %v4338_v61  ;;  %v14562_v61 = vld [vmem:[%s15478_s30 + $0x558] sm:$0xff] }
 0x336   : > { %12250 = vmatmul.msk.bf16.gmra.mxu3 %vm840_vm1, %v14625_v48  ;;  %v14434_v48 = vld [vmem:[%s15478_s30 + $0x118] sm:$0xff] }
 0x337   : > { %17601 = vst [vmem:[#allocation46_spill] sm:$0xff] %v16312_v8  ;;  %12699 = vmatmul.msk.bf16.gmra.mxu0 %vm840_vm1, %v14689_v26  ;;  %v14626_v8 = vld [vmem:[%s15478_s30 + $0x128] sm:$0xff] }
 0x338   : > { %v2995_v29 = vpop.f32.mrf.mxu2 }
 0x339   : > { %v3237_v14 = vadd.f32 %v2995_v29, %v2021_v32  ;;  %v4097_v1 = vpop.f32.mrf.mxu3  ;;  %v2022_v58 = vpop.f32.mrf.mxu1 }
 0x33a   : > { %v2023_v9 = vadd.f32 %v2022_v58, %v17604_v54 }
 0x33b   : > { %v4339_v40 = vadd.f32 %v4097_v1, %v3237_v14 }
 0x33c   : > { %v5201_v46 = vpop.f32.mrf.mxu0 }
 0x33d   : > { %v16317_v5 = vadd.f32 %v5199_v56, %v4339_v40  ;;  %v17606_v56 = vld [vmem:[#allocation55_spill] sm:$0xff] }
 0x33f   : > { %17603 = vst [vmem:[#allocation49_spill] sm:$0xff] %v16317_v5  ;;  %v14691_v5 = vld [vmem:[%s15478_s30 + $0x350] sm:$0xff] }
 0x340   : > { %v2997_v28 = vpop.f32.mrf.mxu2 }
 0x341   : > { %v3238_v44 = vadd.f32 %v2997_v28, %v2023_v9  ;;  %v4099_v34 = vpop.f32.mrf.mxu3  ;;  %v2025_v26 = vpop.f32.mrf.mxu1 }
 0x342   : > { %v2026_v29 = vadd.f32 %v2025_v26, %v17606_v56 }
 0x343   : > { %v4340_v38 = vadd.f32 %v4099_v34, %v3238_v44  ;;  %v17608_v44 = vld [vmem:[#allocation58_spill] sm:$0xff] }
 0x344   : > { %v5204_v4 = vpop.f32.mrf.mxu0  ;;  %11481 = vmatmul.msk.bf16.gmra.mxu1 %vm840_vm1, %v14434_v48 }
 0x345   : > { %11930 = vmatmul.msk.bf16.gmra.mxu2 %vm840_vm1, %v14562_v61  ;;  %v16326_v32 = vadd.f32 %v5201_v46, %v4340_v38  ;;  %v14563_v38 = vld [vmem:[%s15478_s30 + $0x560] sm:$0xff] }
 0x346   : > { %12251 = vmatmul.msk.bf16.gmra.mxu3 %vm840_vm1, %v14626_v8  ;;  %v14435_v8 = vld [vmem:[%s15478_s30 + $0x120] sm:$0xff] }
 0x347   : > { %17605 = vst [vmem:[#allocation52_spill] sm:$0xff] %v16326_v32  ;;  %12700 = vmatmul.msk.bf16.gmra.mxu0 %vm840_vm1, %v14690_v16  ;;  %v14627_v32 = vld [vmem:[%s15478_s30 + $0x130] sm:$0xff] }
 0x348   : > { %v3000_v14 = vpop.f32.mrf.mxu2 }
 0x349   : > { %v3239_v1 = vadd.f32 %v3000_v14, %v2026_v29  ;;  %v4102_v58 = vpop.f32.mrf.mxu3  ;;  %v2027_v40 = vpop.f32.mrf.mxu1 }
 0x34a   : > { %v2028_v46 = vadd.f32 %v2027_v40, %v17608_v44 }
 0x34b   : > { %v4341_v54 = vadd.f32 %v4102_v58, %v3239_v1 }
 0x34c   : > { %v5206_v9 = vpop.f32.mrf.mxu0 }
 0x34d   : > { %v16331_v28 = vadd.f32 %v5204_v4, %v4341_v54  ;;  %v17610_v4 = vld [vmem:[#allocation61_spill] sm:$0xff] }
 0x34f   : > { %17607 = vst [vmem:[#allocation55_spill] sm:$0xff] %v16331_v28  ;;  %v14692_v28 = vld [vmem:[%s15478_s30 + $0x358] sm:$0xff] }
 0x350   : > { %v3002_v34 = vpop.f32.mrf.mxu2 }
 0x351   : > { %v3240_v48 = vadd.f32 %v3002_v34, %v2028_v46  ;;  %v4104_v61 = vpop.f32.mrf.mxu3  ;;  %v2030_v16 = vpop.f32.mrf.mxu1 }
 0x352   : > { %v2031_v14 = vadd.f32 %v2030_v16, %v17610_v4 }
 0x353   : > { %v4342_v26 = vadd.f32 %v4104_v61, %v3240_v48  ;;  %v17612_v48 = vld [vmem:[#allocation64_spill] sm:$0xff] }
 0x354   : > { %v5209_v56 = vpop.f32.mrf.mxu0  ;;  %11482 = vmatmul.msk.bf16.gmra.mxu1 %vm840_vm1, %v14435_v8 }
 0x355   : > { %11931 = vmatmul.msk.bf16.gmra.mxu2 %vm840_vm1, %v14563_v38  ;;  %v16340_v29 = vadd.f32 %v5206_v9, %v4342_v26  ;;  %v14564_v26 = vld [vmem:[%s15478_s30 + $0x568] sm:$0xff] }
 0x356   : > { %12252 = vmatmul.msk.bf16.gmra.mxu3 %vm840_vm1, %v14627_v32  ;;  %v14436_v32 = vld [vmem:[%s15478_s30 + $0x128] sm:$0xff] }
 0x357   : > { %17609 = vst [vmem:[#allocation58_spill] sm:$0xff] %v16340_v29  ;;  %12701 = vmatmul.msk.bf16.gmra.mxu0 %vm840_vm1, %v14691_v5  ;;  %v14628_v29 = vld [vmem:[%s15478_s30 + $0x138] sm:$0xff] }
 0x358   : > { %v3005_v1 = vpop.f32.mrf.mxu2 }
 0x359   : > { %v3241_v58 = vadd.f32 %v3005_v1, %v2031_v14  ;;  %v4107_v40 = vpop.f32.mrf.mxu3  ;;  %v2032_v54 = vpop.f32.mrf.mxu1 }
 0x35a   : > { %v2033_v9 = vadd.f32 %v2032_v54, %v17612_v48 }
 0x35b   : > { %v4343_v44 = vadd.f32 %v4107_v40, %v3241_v58 }
 0x35c   : > { %v5211_v46 = vpop.f32.mrf.mxu0 }
 0x35d   : > { %v16345_v34 = vadd.f32 %v5209_v56, %v4343_v44  ;;  %v17614_v56 = vld [vmem:[#allocation67_spill] sm:$0xff] }
 0x35f   : > { %17611 = vst [vmem:[#allocation61_spill] sm:$0xff] %v16345_v34  ;;  %v14693_v34 = vld [vmem:[%s15478_s30 + $0x360] sm:$0xff] }
 0x360   : > { %v3007_v61 = vpop.f32.mrf.mxu2 }
 0x361   : > { %v3242_v8 = vadd.f32 %v3007_v61, %v2033_v9  ;;  %v4109_v38 = vpop.f32.mrf.mxu3  ;;  %v2035_v5 = vpop.f32.mrf.mxu1 }
 0x362   : > { %v2036_v1 = vadd.f32 %v2035_v5, %v17614_v56 }
 0x363   : > { %v4344_v16 = vadd.f32 %v4109_v38, %v3242_v8  ;;  %v17616_v8 = vld [vmem:[#allocation70_spill] sm:$0xff] }
 0x364   : > { %v5214_v4 = vpop.f32.mrf.mxu0  ;;  %11483 = vmatmul.msk.bf16.gmra.mxu1 %vm840_vm1, %v14436_v32 }
 0x365   : > { %11932 = vmatmul.msk.bf16.gmra.mxu2 %vm840_vm1, %v14564_v26  ;;  %v16354_v14 = vadd.f32 %v5211_v46, %v4344_v16  ;;  %v14565_v16 = vld [vmem:[%s15478_s30 + $0x570] sm:$0xff] }
 0x366   : > { %12253 = vmatmul.msk.bf16.gmra.mxu3 %vm840_vm1, %v14628_v29  ;;  %v14437_v29 = vld [vmem:[%s15478_s30 + $0x130] sm:$0xff] }
 0x367   : > { %17613 = vst [vmem:[#allocation64_spill] sm:$0xff] %v16354_v14  ;;  %12702 = vmatmul.msk.bf16.gmra.mxu0 %vm840_vm1, %v14692_v28  ;;  %v14629_v14 = vld [vmem:[%s15478_s30 + $0x140] sm:$0xff] }
 0x368   : > { %v3010_v58 = vpop.f32.mrf.mxu2 }
 0x369   : > { %v3243_v40 = vadd.f32 %v3010_v58, %v2036_v1  ;;  %v4112_v54 = vpop.f32.mrf.mxu3  ;;  %v2037_v44 = vpop.f32.mrf.mxu1 }
 0x36a   : > { %v2038_v46 = vadd.f32 %v2037_v44, %v17616_v8 }
 0x36b   : > { %v4345_v48 = vadd.f32 %v4112_v54, %v3243_v40 }
 0x36c   : > { %v5216_v9 = vpop.f32.mrf.mxu0 }
 0x36d   : > { %v16359_v61 = vadd.f32 %v5214_v4, %v4345_v48  ;;  %v17618_v4 = vld [vmem:[#allocation73_spill] sm:$0xff] }
 0x36f   : > { %17615 = vst [vmem:[#allocation67_spill] sm:$0xff] %v16359_v61  ;;  %v14694_v61 = vld [vmem:[%s15478_s30 + $0x368] sm:$0xff] }
 0x370   : > { %v3012_v38 = vpop.f32.mrf.mxu2 }
 0x371   : > { %v3244_v32 = vadd.f32 %v3012_v38, %v2038_v46  ;;  %v4114_v26 = vpop.f32.mrf.mxu3  ;;  %v2040_v28 = vpop.f32.mrf.mxu1 }
 0x372   : > { %v2041_v58 = vadd.f32 %v2040_v28, %v17618_v4 }
 0x373   : > { %v4346_v5 = vadd.f32 %v4114_v26, %v3244_v32  ;;  %v17620_v32 = vld [vmem:[#allocation76_spill] sm:$0xff] }
 0x374   : > { %v5219_v56 = vpop.f32.mrf.mxu0  ;;  %11484 = vmatmul.msk.bf16.gmra.mxu1 %vm840_vm1, %v14437_v29 }
 0x375   : > { %11933 = vmatmul.msk.bf16.gmra.mxu2 %vm840_vm1, %v14565_v16  ;;  %v16368_v1 = vadd.f32 %v5216_v9, %v4346_v5  ;;  %v14566_v5 = vld [vmem:[%s15478_s30 + $0x578] sm:$0xff] }
 0x376   : > { %12254 = vmatmul.msk.bf16.gmra.mxu3 %vm840_vm1, %v14629_v14  ;;  %v14438_v14 = vld [vmem:[%s15478_s30 + $0x138] sm:$0xff] }
 0x377   : > { %17617 = vst [vmem:[#allocation70_spill] sm:$0xff] %v16368_v1  ;;  %12703 = vmatmul.msk.bf16.gmra.mxu0 %vm840_vm1, %v14693_v34  ;;  %v14630_v1 = vld [vmem:[%s15478_s30 + $0x148] sm:$0xff] }
 0x378   : > { %v3015_v40 = vpop.f32.mrf.mxu2 }
 0x379   : > { %v3245_v54 = vadd.f32 %v3015_v40, %v2041_v58  ;;  %v4117_v44 = vpop.f32.mrf.mxu3  ;;  %v2042_v48 = vpop.f32.mrf.mxu1 }
 0x37a   : > { %v2043_v9 = vadd.f32 %v2042_v48, %v17620_v32 }
 0x37b   : > { %v4347_v8 = vadd.f32 %v4117_v44, %v3245_v54 }
 0x37c   : > { %v5221_v46 = vpop.f32.mrf.mxu0 }
 0x37d   : > { %v16373_v38 = vadd.f32 %v5219_v56, %v4347_v8  ;;  %v17622_v56 = vld [vmem:[#allocation79_spill] sm:$0xff] }
 0x37f   : > { %17619 = vst [vmem:[#allocation73_spill] sm:$0xff] %v16373_v38  ;;  %v14695_v38 = vld [vmem:[%s15478_s30 + $0x370] sm:$0xff] }
 0x380   : > { %v3017_v26 = vpop.f32.mrf.mxu2 }
 0x381   : > { %v3246_v29 = vadd.f32 %v3017_v26, %v2043_v9  ;;  %v4119_v16 = vpop.f32.mrf.mxu3  ;;  %v2045_v34 = vpop.f32.mrf.mxu1 }
 0x382   : > { %v2046_v40 = vadd.f32 %v2045_v34, %v17622_v56 }
 0x383   : > { %v4348_v28 = vadd.f32 %v4119_v16, %v3246_v29  ;;  %v17624_v29 = vld [vmem:[#allocation82_spill] sm:$0xff] }
 0x384   : > { %v5224_v4 = vpop.f32.mrf.mxu0  ;;  %11485 = vmatmul.msk.bf16.gmra.mxu1 %vm840_vm1, %v14438_v14 }
 0x385   : > { %11934 = vmatmul.msk.bf16.gmra.mxu2 %vm840_vm1, %v14566_v5  ;;  %v16382_v58 = vadd.f32 %v5221_v46, %v4348_v28  ;;  %v14567_v28 = vld [vmem:[%s15478_s30 + $0x580] sm:$0xff] }
 0x386   : > { %12255 = vmatmul.msk.bf16.gmra.mxu3 %vm840_vm1, %v14630_v1  ;;  %v14439_v1 = vld [vmem:[%s15478_s30 + $0x140] sm:$0xff] }
 0x387   : > { %17621 = vst [vmem:[#allocation76_spill] sm:$0xff] %v16382_v58  ;;  %12704 = vmatmul.msk.bf16.gmra.mxu0 %vm840_vm1, %v14694_v61  ;;  %v14631_v58 = vld [vmem:[%s15478_s30 + $0x150] sm:$0xff] }
 0x388   : > { %v3020_v54 = vpop.f32.mrf.mxu2 }
 0x389   : > { %v3247_v44 = vadd.f32 %v3020_v54, %v2046_v40  ;;  %v4122_v48 = vpop.f32.mrf.mxu3  ;;  %v2047_v8 = vpop.f32.mrf.mxu1 }
 0x38a   : > { %v2048_v46 = vadd.f32 %v2047_v8, %v17624_v29 }
 0x38b   : > { %v4349_v32 = vadd.f32 %v4122_v48, %v3247_v44 }
 0x38c   : > { %v5226_v9 = vpop.f32.mrf.mxu0 }
 0x38d   : > { %v16387_v26 = vadd.f32 %v5224_v4, %v4349_v32  ;;  %v17626_v4 = vld [vmem:[#allocation2_spill] sm:$0xff] }
 0x38f   : > { %17623 = vst [vmem:[#allocation79_spill] sm:$0xff] %v16387_v26  ;;  %v14696_v26 = vld [vmem:[%s15478_s30 + $0x378] sm:$0xff] }
 0x390   : > { %v3022_v16 = vpop.f32.mrf.mxu2 }
 0x391   : > { %v3248_v14 = vadd.f32 %v3022_v16, %v2048_v46  ;;  %v4124_v5 = vpop.f32.mrf.mxu3  ;;  %v2050_v61 = vpop.f32.mrf.mxu1 }
 0x392   : > { %v2051_v54 = vadd.f32 %v2050_v61, %v17626_v4 }
 0x393   : > { %v4350_v34 = vadd.f32 %v4124_v5, %v3248_v14  ;;  %v17628_v14 = vld [vmem:[#allocation4_spill] sm:$0xff] }
 0x394   : > { %v5229_v56 = vpop.f32.mrf.mxu0  ;;  %11486 = vmatmul.msk.bf16.gmra.mxu1 %vm840_vm1, %v14439_v1 }
 0x395   : > { %11935 = vmatmul.msk.bf16.gmra.mxu2 %vm840_vm1, %v14567_v28  ;;  %v16396_v40 = vadd.f32 %v5226_v9, %v4350_v34  ;;  %v14568_v34 = vld [vmem:[%s15478_s30 + $0x588] sm:$0xff] }
 0x396   : > { %12256 = vmatmul.msk.bf16.gmra.mxu3 %vm840_vm1, %v14631_v58  ;;  %v14440_v58 = vld [vmem:[%s15478_s30 + $0x148] sm:$0xff] }
 0x397   : > { %17625 = vst [vmem:[#allocation82_spill] sm:$0xff] %v16396_v40  ;;  %12705 = vmatmul.msk.bf16.gmra.mxu0 %vm840_vm1, %v14695_v38  ;;  %v14632_v40 = vld [vmem:[%s15478_s30 + $0x158] sm:$0xff] }
 0x398   : > { %v3025_v44 = vpop.f32.mrf.mxu2 }
 0x399   : > { %v3249_v48 = vadd.f32 %v3025_v44, %v2051_v54  ;;  %v4127_v8 = vpop.f32.mrf.mxu3  ;;  %v2052_v32 = vpop.f32.mrf.mxu1 }
 0x39a   : > { %v2053_v9 = vadd.f32 %v2052_v32, %v17628_v14 }
 0x39b   : > { %v4351_v29 = vadd.f32 %v4127_v8, %v3249_v48 }
 0x39c   : > { %v5231_v46 = vpop.f32.mrf.mxu0 }
 0x39d   : > { %v16401_v16 = vadd.f32 %v5229_v56, %v4351_v29  ;;  %v17630_v56 = vld [vmem:[#allocation6_spill] sm:$0xff] }
 0x39f   : > { %17627 = vst [vmem:[#allocation2_spill] sm:$0xff] %v16401_v16  ;;  %v14697_v16 = vld [vmem:[%s15478_s30 + $0x380] sm:$0xff] }
 0x3a0   : > { %v3027_v5 = vpop.f32.mrf.mxu2 }
 0x3a1   : > { %v3250_v1 = vadd.f32 %v3027_v5, %v2053_v9  ;;  %v4129_v28 = vpop.f32.mrf.mxu3  ;;  %v2055_v38 = vpop.f32.mrf.mxu1 }
 0x3a2   : > { %v2056_v44 = vadd.f32 %v2055_v38, %v17630_v56 }
 0x3a3   : > { %v4352_v61 = vadd.f32 %v4129_v28, %v3250_v1  ;;  %v17632_v1 = vld [vmem:[#allocation8_spill] sm:$0xff] }
 0x3a4   : > { %v5234_v4 = vpop.f32.mrf.mxu0  ;;  %11487 = vmatmul.msk.bf16.gmra.mxu1 %vm840_vm1, %v14440_v58 }
 0x3a5   : > { %11936 = vmatmul.msk.bf16.gmra.mxu2 %vm840_vm1, %v14568_v34  ;;  %v16410_v54 = vadd.f32 %v5231_v46, %v4352_v61  ;;  %v14569_v61 = vld [vmem:[%s15478_s30 + $0x590] sm:$0xff] }
 0x3a6   : > { %12257 = vmatmul.msk.bf16.gmra.mxu3 %vm840_vm1, %v14632_v40  ;;  %v14441_v40 = vld [vmem:[%s15478_s30 + $0x150] sm:$0xff] }
 0x3a7   : > { %17629 = vst [vmem:[#allocation4_spill] sm:$0xff] %v16410_v54  ;;  %12706 = vmatmul.msk.bf16.gmra.mxu0 %vm840_vm1, %v14696_v26  ;;  %v14633_v54 = vld [vmem:[%s15478_s30 + $0x160] sm:$0xff] }
 0x3a8   : > { %v3030_v48 = vpop.f32.mrf.mxu2 }
 0x3a9   : > { %v3251_v8 = vadd.f32 %v3030_v48, %v2056_v44  ;;  %v4132_v32 = vpop.f32.mrf.mxu3  ;;  %v2057_v29 = vpop.f32.mrf.mxu1 }
 0x3aa   : > { %v2058_v46 = vadd.f32 %v2057_v29, %v17632_v1 }
 0x3ab   : > { %v4353_v14 = vadd.f32 %v4132_v32, %v3251_v8 }
 0x3ac   : > { %v5236_v9 = vpop.f32.mrf.mxu0 }
 0x3ad   : > { %v16415_v5 = vadd.f32 %v5234_v4, %v4353_v14  ;;  %v17634_v4 = vld [vmem:[#allocation10_spill] sm:$0xff] }
 0x3af   : > { %17631 = vst [vmem:[#allocation6_spill] sm:$0xff] %v16415_v5  ;;  %v14698_v5 = vld [vmem:[%s15478_s30 + $0x388] sm:$0xff] }
 0x3b0   : > { %v3032_v28 = vpop.f32.mrf.mxu2 }
 0x3b1   : > { %v3252_v58 = vadd.f32 %v3032_v28, %v2058_v46  ;;  %v4134_v34 = vpop.f32.mrf.mxu3  ;;  %v2060_v26 = vpop.f32.mrf.mxu1 }
 0x3b2   : > { %v2061_v48 = vadd.f32 %v2060_v26, %v17634_v4 }
 0x3b3   : > { %v4354_v38 = vadd.f32 %v4134_v34, %v3252_v58  ;;  %v17636_v58 = vld [vmem:[#allocation12_spill] sm:$0xff] }
 0x3b4   : > { %v5239_v56 = vpop.f32.mrf.mxu0  ;;  %11488 = vmatmul.msk.bf16.gmra.mxu1 %vm840_vm1, %v14441_v40 }
 0x3b5   : > { %11937 = vmatmul.msk.bf16.gmra.mxu2 %vm840_vm1, %v14569_v61  ;;  %v16424_v44 = vadd.f32 %v5236_v9, %v4354_v38  ;;  %v14570_v38 = vld [vmem:[%s15478_s30 + $0x598] sm:$0xff] }
 0x3b6   : > { %12258 = vmatmul.msk.bf16.gmra.mxu3 %vm840_vm1, %v14633_v54  ;;  %v14442_v54 = vld [vmem:[%s15478_s30 + $0x158] sm:$0xff] }
 0x3b7   : > { %17633 = vst [vmem:[#allocation8_spill] sm:$0xff] %v16424_v44  ;;  %12707 = vmatmul.msk.bf16.gmra.mxu0 %vm840_vm1, %v14697_v16  ;;  %v14634_v44 = vld [vmem:[%s15478_s30 + $0x168] sm:$0xff] }
 0x3b8   : > { %v3035_v8 = vpop.f32.mrf.mxu2 }
 0x3b9   : > { %v3253_v32 = vadd.f32 %v3035_v8, %v2061_v48  ;;  %v4137_v29 = vpop.f32.mrf.mxu3  ;;  %v2062_v14 = vpop.f32.mrf.mxu1 }
 0x3ba   : > { %v2063_v9 = vadd.f32 %v2062_v14, %v17636_v58 }
 0x3bb   : > { %v4355_v1 = vadd.f32 %v4137_v29, %v3253_v32 }
 0x3bc   : > { %v5241_v46 = vpop.f32.mrf.mxu0 }
 0x3bd   : > { %v16429_v28 = vadd.f32 %v5239_v56, %v4355_v1  ;;  %v17638_v56 = vld [vmem:[#allocation14_spill] sm:$0xff] }
 0x3bf   : > { %17635 = vst [vmem:[#allocation10_spill] sm:$0xff] %v16429_v28  ;;  %v14699_v28 = vld [vmem:[%s15478_s30 + $0x390] sm:$0xff] }
 0x3c0   : > { %v3037_v34 = vpop.f32.mrf.mxu2 }
 0x3c1   : > { %v3254_v40 = vadd.f32 %v3037_v34, %v2063_v9  ;;  %v4139_v61 = vpop.f32.mrf.mxu3  ;;  %v2065_v16 = vpop.f32.mrf.mxu1 }
 0x3c2   : > { %v2066_v8 = vadd.f32 %v2065_v16, %v17638_v56 }
 0x3c3   : > { %v4356_v26 = vadd.f32 %v4139_v61, %v3254_v40  ;;  %v17640_v40 = vld [vmem:[#allocation16_spill] sm:$0xff] }
 0x3c4   : > { %v5244_v4 = vpop.f32.mrf.mxu0  ;;  %11489 = vmatmul.msk.bf16.gmra.mxu1 %vm840_vm1, %v14442_v54 }
 0x3c5   : > { %11938 = vmatmul.msk.bf16.gmra.mxu2 %vm840_vm1, %v14570_v38  ;;  %v16438_v48 = vadd.f32 %v5241_v46, %v4356_v26  ;;  %v14571_v26 = vld [vmem:[%s15478_s30 + $0x5a0] sm:$0xff] }
 0x3c6   : > { %12259 = vmatmul.msk.bf16.gmra.mxu3 %vm840_vm1, %v14634_v44  ;;  %v14443_v44 = vld [vmem:[%s15478_s30 + $0x160] sm:$0xff] }
 0x3c7   : > { %17637 = vst [vmem:[#allocation12_spill] sm:$0xff] %v16438_v48  ;;  %12708 = vmatmul.msk.bf16.gmra.mxu0 %vm840_vm1, %v14698_v5  ;;  %v14635_v48 = vld [vmem:[%s15478_s30 + $0x170] sm:$0xff] }
 0x3c8   : > { %v3040_v32 = vpop.f32.mrf.mxu2 }
 0x3c9   : > { %v3255_v29 = vadd.f32 %v3040_v32, %v2066_v8  ;;  %v4142_v14 = vpop.f32.mrf.mxu3  ;;  %v2067_v1 = vpop.f32.mrf.mxu1 }
 0x3ca   : > { %v2068_v46 = vadd.f32 %v2067_v1, %v17640_v40 }
 0x3cb   : > { %v4357_v58 = vadd.f32 %v4142_v14, %v3255_v29 }
 0x3cc   : > { %v5246_v9 = vpop.f32.mrf.mxu0 }
 0x3cd   : > { %v16443_v34 = vadd.f32 %v5244_v4, %v4357_v58  ;;  %v17642_v4 = vld [vmem:[#allocation18_spill] sm:$0xff] }
 0x3cf   : > { %17639 = vst [vmem:[#allocation14_spill] sm:$0xff] %v16443_v34  ;;  %v14700_v34 = vld [vmem:[%s15478_s30 + $0x398] sm:$0xff] }
 0x3d0   : > { %v3042_v61 = vpop.f32.mrf.mxu2 }
 0x3d1   : > { %v3256_v54 = vadd.f32 %v3042_v61, %v2068_v46  ;;  %v4144_v38 = vpop.f32.mrf.mxu3  ;;  %v2070_v5 = vpop.f32.mrf.mxu1 }
 0x3d2   : > { %v2071_v32 = vadd.f32 %v2070_v5, %v17642_v4 }
 0x3d3   : > { %v4358_v16 = vadd.f32 %v4144_v38, %v3256_v54  ;;  %v17644_v54 = vld [vmem:[#allocation20_spill] sm:$0xff] }
 0x3d4   : > { %v5249_v56 = vpop.f32.mrf.mxu0  ;;  %11490 = vmatmul.msk.bf16.gmra.mxu1 %vm840_vm1, %v14443_v44 }
 0x3d5   : > { %11939 = vmatmul.msk.bf16.gmra.mxu2 %vm840_vm1, %v14571_v26  ;;  %v16452_v8 = vadd.f32 %v5246_v9, %v4358_v16  ;;  %v14572_v16 = vld [vmem:[%s15478_s30 + $0x5a8] sm:$0xff] }
 0x3d6   : > { %12260 = vmatmul.msk.bf16.gmra.mxu3 %vm840_vm1, %v14635_v48  ;;  %v14444_v48 = vld [vmem:[%s15478_s30 + $0x168] sm:$0xff] }
 0x3d7   : > { %17641 = vst [vmem:[#allocation16_spill] sm:$0xff] %v16452_v8  ;;  %12709 = vmatmul.msk.bf16.gmra.mxu0 %vm840_vm1, %v14699_v28  ;;  %v14636_v8 = vld [vmem:[%s15478_s30 + $0x178] sm:$0xff] }
 0x3d8   : > { %v3045_v29 = vpop.f32.mrf.mxu2 }
 0x3d9   : > { %v3257_v14 = vadd.f32 %v3045_v29, %v2071_v32  ;;  %v4147_v1 = vpop.f32.mrf.mxu3  ;;  %v2072_v58 = vpop.f32.mrf.mxu1 }
 0x3da   : > { %v2073_v9 = vadd.f32 %v2072_v58, %v17644_v54 }
 0x3db   : > { %v4359_v40 = vadd.f32 %v4147_v1, %v3257_v14 }
 0x3dc   : > { %v5251_v46 = vpop.f32.mrf.mxu0 }
 0x3dd   : > { %v16457_v61 = vadd.f32 %v5249_v56, %v4359_v40  ;;  %v17646_v56 = vld [vmem:[#allocation22_spill] sm:$0xff] }
 0x3df   : > { %17643 = vst [vmem:[#allocation18_spill] sm:$0xff] %v16457_v61  ;;  %v14701_v61 = vld [vmem:[%s15478_s30 + $0x3a0] sm:$0xff] }
 0x3e0   : > { %v3047_v38 = vpop.f32.mrf.mxu2 }
 0x3e1   : > { %v3258_v44 = vadd.f32 %v3047_v38, %v2073_v9  ;;  %v4149_v26 = vpop.f32.mrf.mxu3  ;;  %v2075_v28 = vpop.f32.mrf.mxu1 }
 0x3e2   : > { %v2076_v29 = vadd.f32 %v2075_v28, %v17646_v56 }
 0x3e3   : > { %v4360_v5 = vadd.f32 %v4149_v26, %v3258_v44  ;;  %v17648_v44 = vld [vmem:[#allocation24_spill] sm:$0xff] }
 0x3e4   : > { %v5254_v4 = vpop.f32.mrf.mxu0  ;;  %11491 = vmatmul.msk.bf16.gmra.mxu1 %vm840_vm1, %v14444_v48 }
 0x3e5   : > { %11940 = vmatmul.msk.bf16.gmra.mxu2 %vm840_vm1, %v14572_v16  ;;  %v16466_v32 = vadd.f32 %v5251_v46, %v4360_v5  ;;  %v14573_v5 = vld [vmem:[%s15478_s30 + $0x5b0] sm:$0xff] }
 0x3e6   : > { %12261 = vmatmul.msk.bf16.gmra.mxu3 %vm840_vm1, %v14636_v8  ;;  %v14445_v8 = vld [vmem:[%s15478_s30 + $0x170] sm:$0xff] }
 0x3e7   : > { %17645 = vst [vmem:[#allocation20_spill] sm:$0xff] %v16466_v32  ;;  %12710 = vmatmul.msk.bf16.gmra.mxu0 %vm840_vm1, %v14700_v34  ;;  %v14637_v32 = vld [vmem:[%s15478_s30 + $0x180] sm:$0xff] }
 0x3e8   : > { %v3050_v14 = vpop.f32.mrf.mxu2 }
 0x3e9   : > { %v3259_v1 = vadd.f32 %v3050_v14, %v2076_v29  ;;  %v4152_v58 = vpop.f32.mrf.mxu3  ;;  %v2077_v40 = vpop.f32.mrf.mxu1 }
 0x3ea   : > { %v2078_v46 = vadd.f32 %v2077_v40, %v17648_v44 }
 0x3eb   : > { %v4361_v54 = vadd.f32 %v4152_v58, %v3259_v1 }
 0x3ec   : > { %v5256_v9 = vpop.f32.mrf.mxu0 }
 0x3ed   : > { %v16471_v38 = vadd.f32 %v5254_v4, %v4361_v54  ;;  %v17650_v4 = vld [vmem:[#allocation26_spill] sm:$0xff] }
 0x3ef   : > { %17647 = vst [vmem:[#allocation22_spill] sm:$0xff] %v16471_v38  ;;  %v14702_v38 = vld [vmem:[%s15478_s30 + $0x3a8] sm:$0xff] }
 0x3f0   : > { %v3052_v26 = vpop.f32.mrf.mxu2 }
 0x3f1   : > { %v3260_v48 = vadd.f32 %v3052_v26, %v2078_v46  ;;  %v4154_v16 = vpop.f32.mrf.mxu3  ;;  %v2080_v34 = vpop.f32.mrf.mxu1 }
 0x3f2   : > { %v2081_v14 = vadd.f32 %v2080_v34, %v17650_v4 }
 0x3f3   : > { %v4362_v28 = vadd.f32 %v4154_v16, %v3260_v48  ;;  %v17652_v48 = vld [vmem:[#allocation29_spill] sm:$0xff] }
 0x3f4   : > { %v5259_v56 = vpop.f32.mrf.mxu0  ;;  %11492 = vmatmul.msk.bf16.gmra.mxu1 %vm840_vm1, %v14445_v8 }
 0x3f5   : > { %11941 = vmatmul.msk.bf16.gmra.mxu2 %vm840_vm1, %v14573_v5  ;;  %v16480_v29 = vadd.f32 %v5256_v9, %v4362_v28  ;;  %v14574_v28 = vld [vmem:[%s15478_s30 + $0x5b8] sm:$0xff] }
 0x3f6   : > { %12262 = vmatmul.msk.bf16.gmra.mxu3 %vm840_vm1, %v14637_v32  ;;  %v14446_v32 = vld [vmem:[%s15478_s30 + $0x178] sm:$0xff] }
 0x3f7   : > { %17649 = vst [vmem:[#allocation24_spill] sm:$0xff] %v16480_v29  ;;  %12711 = vmatmul.msk.bf16.gmra.mxu0 %vm840_vm1, %v14701_v61  ;;  %v14638_v29 = vld [vmem:[%s15478_s30 + $0x188] sm:$0xff] }
 0x3f8   : > { %v3055_v1 = vpop.f32.mrf.mxu2 }
 0x3f9   : > { %v3261_v58 = vadd.f32 %v3055_v1, %v2081_v14  ;;  %v4157_v40 = vpop.f32.mrf.mxu3  ;;  %v2082_v54 = vpop.f32.mrf.mxu1 }
 0x3fa   : > { %v2083_v9 = vadd.f32 %v2082_v54, %v17652_v48 }
 0x3fb   : > { %v4363_v44 = vadd.f32 %v4157_v40, %v3261_v58 }
 0x3fc   : > { %v5261_v46 = vpop.f32.mrf.mxu0 }
 0x3fd   : > { %v16485_v26 = vadd.f32 %v5259_v56, %v4363_v44  ;;  %v17654_v56 = vld [vmem:[#allocation32_spill] sm:$0xff] }
 0x3ff   : > { %17651 = vst [vmem:[#allocation26_spill] sm:$0xff] %v16485_v26  ;;  %v14703_v26 = vld [vmem:[%s15478_s30 + $0x3b0] sm:$0xff] }
 0x400   : > { %v3057_v16 = vpop.f32.mrf.mxu2 }
 0x401   : > { %v3262_v8 = vadd.f32 %v3057_v16, %v2083_v9  ;;  %v4159_v5 = vpop.f32.mrf.mxu3  ;;  %v2085_v61 = vpop.f32.mrf.mxu1 }
 0x402   : > { %v2086_v1 = vadd.f32 %v2085_v61, %v17654_v56 }
 0x403   : > { %v4364_v34 = vadd.f32 %v4159_v5, %v3262_v8  ;;  %v17656_v8 = vld [vmem:[#allocation35_spill] sm:$0xff] }
 0x404   : > { %v5264_v4 = vpop.f32.mrf.mxu0  ;;  %11493 = vmatmul.msk.bf16.gmra.mxu1 %vm840_vm1, %v14446_v32 }
 0x405   : > { %11942 = vmatmul.msk.bf16.gmra.mxu2 %vm840_vm1, %v14574_v28  ;;  %v16494_v14 = vadd.f32 %v5261_v46, %v4364_v34  ;;  %v14575_v34 = vld [vmem:[%s15478_s30 + $0x5c0] sm:$0xff] }
 0x406   : > { %12263 = vmatmul.msk.bf16.gmra.mxu3 %vm840_vm1, %v14638_v29  ;;  %v14447_v29 = vld [vmem:[%s15478_s30 + $0x180] sm:$0xff] }
 0x407   : > { %17653 = vst [vmem:[#allocation29_spill] sm:$0xff] %v16494_v14  ;;  %12712 = vmatmul.msk.bf16.gmra.mxu0 %vm840_vm1, %v14702_v38  ;;  %v14639_v14 = vld [vmem:[%s15478_s30 + $0x190] sm:$0xff] }
 0x408   : > { %v3060_v58 = vpop.f32.mrf.mxu2 }
 0x409   : > { %v3263_v40 = vadd.f32 %v3060_v58, %v2086_v1  ;;  %v4162_v54 = vpop.f32.mrf.mxu3  ;;  %v2087_v44 = vpop.f32.mrf.mxu1 }
 0x40a   : > { %v2088_v46 = vadd.f32 %v2087_v44, %v17656_v8 }
 0x40b   : > { %v4365_v48 = vadd.f32 %v4162_v54, %v3263_v40 }
 0x40c   : > { %v5266_v9 = vpop.f32.mrf.mxu0 }
 0x40d   : > { %v16499_v16 = vadd.f32 %v5264_v4, %v4365_v48  ;;  %v17658_v4 = vld [vmem:[#allocation38_spill] sm:$0xff] }
 0x40f   : > { %17655 = vst [vmem:[#allocation32_spill] sm:$0xff] %v16499_v16  ;;  %v14704_v16 = vld [vmem:[%s15478_s30 + $0x3b8] sm:$0xff] }
 0x410   : > { %v3062_v5 = vpop.f32.mrf.mxu2 }
 0x411   : > { %v3264_v32 = vadd.f32 %v3062_v5, %v2088_v46  ;;  %v4164_v28 = vpop.f32.mrf.mxu3  ;;  %v2090_v38 = vpop.f32.mrf.mxu1 }
 0x412   : > { %v2091_v58 = vadd.f32 %v2090_v38, %v17658_v4 }
 0x413   : > { %v4366_v61 = vadd.f32 %v4164_v28, %v3264_v32  ;;  %v17660_v32 = vld [vmem:[#allocation41_spill] sm:$0xff] }
 0x414   : > { %v5269_v56 = vpop.f32.mrf.mxu0  ;;  %11494 = vmatmul.msk.bf16.gmra.mxu1 %vm840_vm1, %v14447_v29 }
 0x415   : > { %11943 = vmatmul.msk.bf16.gmra.mxu2 %vm840_vm1, %v14575_v34  ;;  %v16508_v1 = vadd.f32 %v5266_v9, %v4366_v61  ;;  %v14576_v61 = vld [vmem:[%s15478_s30 + $0x5c8] sm:$0xff] }
 0x416   : > { %12264 = vmatmul.msk.bf16.gmra.mxu3 %vm840_vm1, %v14639_v14  ;;  %v14448_v14 = vld [vmem:[%s15478_s30 + $0x188] sm:$0xff] }
 0x417   : > { %17657 = vst [vmem:[#allocation35_spill] sm:$0xff] %v16508_v1  ;;  %12713 = vmatmul.msk.bf16.gmra.mxu0 %vm840_vm1, %v14703_v26  ;;  %v14640_v1 = vld [vmem:[%s15478_s30 + $0x198] sm:$0xff] }
 0x418   : > { %v3065_v40 = vpop.f32.mrf.mxu2 }
 0x419   : > { %v3265_v54 = vadd.f32 %v3065_v40, %v2091_v58  ;;  %v4167_v44 = vpop.f32.mrf.mxu3  ;;  %v2092_v48 = vpop.f32.mrf.mxu1 }
 0x41a   : > { %v2093_v9 = vadd.f32 %v2092_v48, %v17660_v32 }
 0x41b   : > { %v4367_v8 = vadd.f32 %v4167_v44, %v3265_v54 }
 0x41c   : > { %v5271_v46 = vpop.f32.mrf.mxu0 }
 0x41d   : > { %v16513_v5 = vadd.f32 %v5269_v56, %v4367_v8  ;;  %v17662_v56 = vld [vmem:[#allocation44_spill] sm:$0xff] }
 0x41f   : > { %17659 = vst [vmem:[#allocation38_spill] sm:$0xff] %v16513_v5  ;;  %v14705_v5 = vld [vmem:[%s15478_s30 + $0x3c0] sm:$0xff] }
 0x420   : > { %v3067_v28 = vpop.f32.mrf.mxu2 }
 0x421   : > { %v3266_v29 = vadd.f32 %v3067_v28, %v2093_v9  ;;  %v4169_v34 = vpop.f32.mrf.mxu3  ;;  %v2095_v26 = vpop.f32.mrf.mxu1 }
 0x422   : > { %v2096_v40 = vadd.f32 %v2095_v26, %v17662_v56 }
 0x423   : > { %v4368_v38 = vadd.f32 %v4169_v34, %v3266_v29  ;;  %v17664_v29 = vld [vmem:[#allocation47_spill] sm:$0xff] }
 0x424   : > { %v5274_v4 = vpop.f32.mrf.mxu0  ;;  %11495 = vmatmul.msk.bf16.gmra.mxu1 %vm840_vm1, %v14448_v14 }
 0x425   : > { %11944 = vmatmul.msk.bf16.gmra.mxu2 %vm840_vm1, %v14576_v61  ;;  %v16522_v58 = vadd.f32 %v5271_v46, %v4368_v38  ;;  %v14577_v38 = vld [vmem:[%s15478_s30 + $0x5d0] sm:$0xff] }
 0x426   : > { %12265 = vmatmul.msk.bf16.gmra.mxu3 %vm840_vm1, %v14640_v1  ;;  %v14449_v1 = vld [vmem:[%s15478_s30 + $0x190] sm:$0xff] }
 0x427   : > { %17661 = vst [vmem:[#allocation41_spill] sm:$0xff] %v16522_v58  ;;  %12714 = vmatmul.msk.bf16.gmra.mxu0 %vm840_vm1, %v14704_v16  ;;  %v14641_v58 = vld [vmem:[%s15478_s30 + $0x1a0] sm:$0xff] }
 0x428   : > { %v3070_v54 = vpop.f32.mrf.mxu2 }
 0x429   : > { %v3267_v44 = vadd.f32 %v3070_v54, %v2096_v40  ;;  %v4172_v48 = vpop.f32.mrf.mxu3  ;;  %v2097_v8 = vpop.f32.mrf.mxu1 }
 0x42a   : > { %v2098_v46 = vadd.f32 %v2097_v8, %v17664_v29 }
 0x42b   : > { %v4369_v32 = vadd.f32 %v4172_v48, %v3267_v44 }
 0x42c   : > { %v5276_v9 = vpop.f32.mrf.mxu0 }
 0x42d   : > { %v16527_v28 = vadd.f32 %v5274_v4, %v4369_v32  ;;  %v17666_v4 = vld [vmem:[#allocation50_spill] sm:$0xff] }
 0x42f   : > { %17663 = vst [vmem:[#allocation44_spill] sm:$0xff] %v16527_v28  ;;  %v14706_v28 = vld [vmem:[%s15478_s30 + $0x3c8] sm:$0xff] }
 0x430   : > { %v3072_v34 = vpop.f32.mrf.mxu2 }
 0x431   : > { %v3268_v14 = vadd.f32 %v3072_v34, %v2098_v46  ;;  %v4174_v61 = vpop.f32.mrf.mxu3  ;;  %v2100_v16 = vpop.f32.mrf.mxu1 }
 0x432   : > { %v2101_v54 = vadd.f32 %v2100_v16, %v17666_v4 }
 0x433   : > { %v4370_v26 = vadd.f32 %v4174_v61, %v3268_v14  ;;  %v17668_v14 = vld [vmem:[#allocation53_spill] sm:$0xff] }
 0x434   : > { %v5279_v56 = vpop.f32.mrf.mxu0  ;;  %11496 = vmatmul.msk.bf16.gmra.mxu1 %vm840_vm1, %v14449_v1 }
 0x435   : > { %11945 = vmatmul.msk.bf16.gmra.mxu2 %vm840_vm1, %v14577_v38  ;;  %v16536_v40 = vadd.f32 %v5276_v9, %v4370_v26  ;;  %v14578_v26 = vld [vmem:[%s15478_s30 + $0x5d8] sm:$0xff] }
 0x436   : > { %12266 = vmatmul.msk.bf16.gmra.mxu3 %vm840_vm1, %v14641_v58  ;;  %v14450_v58 = vld [vmem:[%s15478_s30 + $0x198] sm:$0xff] }
 0x437   : > { %17665 = vst [vmem:[#allocation47_spill] sm:$0xff] %v16536_v40  ;;  %12715 = vmatmul.msk.bf16.gmra.mxu0 %vm840_vm1, %v14705_v5  ;;  %v14642_v40 = vld [vmem:[%s15478_s30 + $0x1a8] sm:$0xff] }
 0x438   : > { %v3075_v44 = vpop.f32.mrf.mxu2 }
 0x439   : > { %v3269_v48 = vadd.f32 %v3075_v44, %v2101_v54  ;;  %v4177_v8 = vpop.f32.mrf.mxu3  ;;  %v2102_v32 = vpop.f32.mrf.mxu1 }
 0x43a   : > { %v2103_v9 = vadd.f32 %v2102_v32, %v17668_v14 }
 0x43b   : > { %v4371_v29 = vadd.f32 %v4177_v8, %v3269_v48 }
 0x43c   : > { %v5281_v46 = vpop.f32.mrf.mxu0 }
 0x43d   : > { %v16541_v34 = vadd.f32 %v5279_v56, %v4371_v29  ;;  %v17670_v56 = vld [vmem:[#allocation56_spill] sm:$0xff] }
 0x43f   : > { %17667 = vst [vmem:[#allocation50_spill] sm:$0xff] %v16541_v34  ;;  %v14707_v34 = vld [vmem:[%s15478_s30 + $0x3d0] sm:$0xff] }
 0x440   : > { %v3077_v61 = vpop.f32.mrf.mxu2 }
 0x441   : > { %v3270_v1 = vadd.f32 %v3077_v61, %v2103_v9  ;;  %v4179_v38 = vpop.f32.mrf.mxu3  ;;  %v2105_v5 = vpop.f32.mrf.mxu1 }
 0x442   : > { %v2106_v44 = vadd.f32 %v2105_v5, %v17670_v56 }
 0x443   : > { %v4372_v16 = vadd.f32 %v4179_v38, %v3270_v1  ;;  %v17672_v1 = vld [vmem:[#allocation59_spill] sm:$0xff] }
 0x444   : > { %v5284_v4 = vpop.f32.mrf.mxu0  ;;  %11497 = vmatmul.msk.bf16.gmra.mxu1 %vm840_vm1, %v14450_v58 }
 0x445   : > { %11946 = vmatmul.msk.bf16.gmra.mxu2 %vm840_vm1, %v14578_v26  ;;  %v16550_v54 = vadd.f32 %v5281_v46, %v4372_v16  ;;  %v14579_v16 = vld [vmem:[%s15478_s30 + $0x5e0] sm:$0xff] }
 0x446   : > { %12267 = vmatmul.msk.bf16.gmra.mxu3 %vm840_vm1, %v14642_v40  ;;  %v14451_v40 = vld [vmem:[%s15478_s30 + $0x1a0] sm:$0xff] }
 0x447   : > { %17669 = vst [vmem:[#allocation53_spill] sm:$0xff] %v16550_v54  ;;  %12716 = vmatmul.msk.bf16.gmra.mxu0 %vm840_vm1, %v14706_v28  ;;  %v14643_v54 = vld [vmem:[%s15478_s30 + $0x1b0] sm:$0xff] }
 0x448   : > { %v3080_v48 = vpop.f32.mrf.mxu2 }
 0x449   : > { %v3271_v8 = vadd.f32 %v3080_v48, %v2106_v44  ;;  %v4182_v32 = vpop.f32.mrf.mxu3  ;;  %v2107_v29 = vpop.f32.mrf.mxu1 }
 0x44a   : > { %v2108_v46 = vadd.f32 %v2107_v29, %v17672_v1 }
 0x44b   : > { %v4373_v14 = vadd.f32 %v4182_v32, %v3271_v8 }
 0x44c   : > { %v5286_v9 = vpop.f32.mrf.mxu0 }
 0x44d   : > { %v16555_v61 = vadd.f32 %v5284_v4, %v4373_v14  ;;  %v17674_v4 = vld [vmem:[#allocation62_spill] sm:$0xff] }
 0x44f   : > { %17671 = vst [vmem:[#allocation56_spill] sm:$0xff] %v16555_v61  ;;  %v14708_v61 = vld [vmem:[%s15478_s30 + $0x3d8] sm:$0xff] }
 0x450   : > { %v3082_v38 = vpop.f32.mrf.mxu2 }
 0x451   : > { %v3272_v58 = vadd.f32 %v3082_v38, %v2108_v46  ;;  %v4184_v26 = vpop.f32.mrf.mxu3  ;;  %v2110_v28 = vpop.f32.mrf.mxu1 }
 0x452   : > { %v2111_v48 = vadd.f32 %v2110_v28, %v17674_v4 }
 0x453   : > { %v4374_v5 = vadd.f32 %v4184_v26, %v3272_v58  ;;  %v17676_v58 = vld [vmem:[#allocation65_spill] sm:$0xff] }
 0x454   : > { %v5289_v56 = vpop.f32.mrf.mxu0  ;;  %11498 = vmatmul.msk.bf16.gmra.mxu1 %vm840_vm1, %v14451_v40 }
 0x455   : > { %11947 = vmatmul.msk.bf16.gmra.mxu2 %vm840_vm1, %v14579_v16  ;;  %v16564_v44 = vadd.f32 %v5286_v9, %v4374_v5  ;;  %v14580_v5 = vld [vmem:[%s15478_s30 + $0x5e8] sm:$0xff] }
 0x456   : > { %12268 = vmatmul.msk.bf16.gmra.mxu3 %vm840_vm1, %v14643_v54  ;;  %v14452_v54 = vld [vmem:[%s15478_s30 + $0x1a8] sm:$0xff] }
 0x457   : > { %17673 = vst [vmem:[#allocation59_spill] sm:$0xff] %v16564_v44  ;;  %12717 = vmatmul.msk.bf16.gmra.mxu0 %vm840_vm1, %v14707_v34  ;;  %v14644_v44 = vld [vmem:[%s15478_s30 + $0x1b8] sm:$0xff] }
 0x458   : > { %v3085_v8 = vpop.f32.mrf.mxu2 }
 0x459   : > { %v3273_v32 = vadd.f32 %v3085_v8, %v2111_v48  ;;  %v4187_v29 = vpop.f32.mrf.mxu3  ;;  %v2112_v14 = vpop.f32.mrf.mxu1 }
 0x45a   : > { %v2113_v9 = vadd.f32 %v2112_v14, %v17676_v58 }
 0x45b   : > { %v4375_v1 = vadd.f32 %v4187_v29, %v3273_v32 }
 0x45c   : > { %v5291_v46 = vpop.f32.mrf.mxu0 }
 0x45d   : > { %v16569_v38 = vadd.f32 %v5289_v56, %v4375_v1  ;;  %v17678_v56 = vld [vmem:[#allocation68_spill] sm:$0xff] }
 0x45f   : > { %17675 = vst [vmem:[#allocation62_spill] sm:$0xff] %v16569_v38  ;;  %v14709_v38 = vld [vmem:[%s15478_s30 + $0x3e0] sm:$0xff] }
 0x460   : > { %v3087_v26 = vpop.f32.mrf.mxu2 }
 0x461   : > { %v3274_v40 = vadd.f32 %v3087_v26, %v2113_v9  ;;  %v4189_v16 = vpop.f32.mrf.mxu3  ;;  %v2115_v34 = vpop.f32.mrf.mxu1 }
 0x462   : > { %v2116_v8 = vadd.f32 %v2115_v34, %v17678_v56 }
 0x463   : > { %v4376_v28 = vadd.f32 %v4189_v16, %v3274_v40  ;;  %v17680_v40 = vld [vmem:[#allocation71_spill] sm:$0xff] }
 0x464   : > { %v5294_v4 = vpop.f32.mrf.mxu0  ;;  %11499 = vmatmul.msk.bf16.gmra.mxu1 %vm840_vm1, %v14452_v54 }
 0x465   : > { %11948 = vmatmul.msk.bf16.gmra.mxu2 %vm840_vm1, %v14580_v5  ;;  %v16578_v48 = vadd.f32 %v5291_v46, %v4376_v28  ;;  %v14581_v28 = vld [vmem:[%s15478_s30 + $0x5f0] sm:$0xff] }
 0x466   : > { %12269 = vmatmul.msk.bf16.gmra.mxu3 %vm840_vm1, %v14644_v44  ;;  %v14453_v44 = vld [vmem:[%s15478_s30 + $0x1b0] sm:$0xff] }
 0x467   : > { %17677 = vst [vmem:[#allocation65_spill] sm:$0xff] %v16578_v48  ;;  %12718 = vmatmul.msk.bf16.gmra.mxu0 %vm840_vm1, %v14708_v61  ;;  %v14645_v48 = vld [vmem:[%s15478_s30 + $0x1c0] sm:$0xff] }
 0x468   : > { %v3090_v32 = vpop.f32.mrf.mxu2 }
 0x469   : > { %v3275_v29 = vadd.f32 %v3090_v32, %v2116_v8  ;;  %v4192_v14 = vpop.f32.mrf.mxu3  ;;  %v2117_v1 = vpop.f32.mrf.mxu1 }
 0x46a   : > { %v2118_v46 = vadd.f32 %v2117_v1, %v17680_v40 }
 0x46b   : > { %v4377_v58 = vadd.f32 %v4192_v14, %v3275_v29 }
 0x46c   : > { %v5296_v9 = vpop.f32.mrf.mxu0 }
 0x46d   : > { %v16583_v26 = vadd.f32 %v5294_v4, %v4377_v58  ;;  %v17682_v4 = vld [vmem:[#allocation74_spill] sm:$0xff] }
 0x46f   : > { %17679 = vst [vmem:[#allocation68_spill] sm:$0xff] %v16583_v26  ;;  %v14710_v26 = vld [vmem:[%s15478_s30 + $0x3e8] sm:$0xff] }
 0x470   : > { %v3092_v16 = vpop.f32.mrf.mxu2 }
 0x471   : > { %v3276_v54 = vadd.f32 %v3092_v16, %v2118_v46  ;;  %v4194_v5 = vpop.f32.mrf.mxu3  ;;  %v2120_v61 = vpop.f32.mrf.mxu1 }
 0x472   : > { %v2121_v32 = vadd.f32 %v2120_v61, %v17682_v4 }
 0x473   : > { %v4378_v34 = vadd.f32 %v4194_v5, %v3276_v54  ;;  %v17684_v54 = vld [vmem:[#allocation77_spill] sm:$0xff] }
 0x474   : > { %v5299_v56 = vpop.f32.mrf.mxu0  ;;  %11500 = vmatmul.msk.bf16.gmra.mxu1 %vm840_vm1, %v14453_v44 }
 0x475   : > { %11949 = vmatmul.msk.bf16.gmra.mxu2 %vm840_vm1, %v14581_v28  ;;  %v16592_v8 = vadd.f32 %v5296_v9, %v4378_v34  ;;  %v14582_v34 = vld [vmem:[%s15478_s30 + $0x5f8] sm:$0xff] }
 0x476   : > { %12270 = vmatmul.msk.bf16.gmra.mxu3 %vm840_vm1, %v14645_v48  ;;  %v14454_v48 = vld [vmem:[%s15478_s30 + $0x1b8] sm:$0xff] }
 0x477   : > { %17681 = vst [vmem:[#allocation71_spill] sm:$0xff] %v16592_v8  ;;  %12719 = vmatmul.msk.bf16.gmra.mxu0 %vm840_vm1, %v14709_v38  ;;  %v14646_v8 = vld [vmem:[%s15478_s30 + $0x1c8] sm:$0xff] }
 0x478   : > { %v3095_v29 = vpop.f32.mrf.mxu2 }
 0x479   : > { %v3277_v14 = vadd.f32 %v3095_v29, %v2121_v32  ;;  %v4197_v1 = vpop.f32.mrf.mxu3  ;;  %v2122_v58 = vpop.f32.mrf.mxu1 }
 0x47a   : > { %v2123_v9 = vadd.f32 %v2122_v58, %v17684_v54 }
 0x47b   : > { %v4379_v40 = vadd.f32 %v4197_v1, %v3277_v14 }
 0x47c   : > { %v5301_v46 = vpop.f32.mrf.mxu0 }
 0x47d   : > { %v16597_v16 = vadd.f32 %v5299_v56, %v4379_v40  ;;  %v17686_v56 = vld [vmem:[#allocation80_spill] sm:$0xff] }
 0x47f   : > { %17683 = vst [vmem:[#allocation74_spill] sm:$0xff] %v16597_v16  ;;  %v14711_v16 = vld [vmem:[%s15478_s30 + $0x3f0] sm:$0xff] }
 0x480   : > { %v3097_v5 = vpop.f32.mrf.mxu2 }
 0x481   : > { %v3278_v44 = vadd.f32 %v3097_v5, %v2123_v9  ;;  %v4199_v28 = vpop.f32.mrf.mxu3  ;;  %v2125_v38 = vpop.f32.mrf.mxu1 }
 0x482   : > { %v2126_v29 = vadd.f32 %v2125_v38, %v17686_v56 }
 0x483   : > { %v4380_v61 = vadd.f32 %v4199_v28, %v3278_v44  ;;  %v17688_v44 = vld [vmem:[#allocation83_spill] sm:$0xff] }
 0x484   : > { %v5304_v4 = vpop.f32.mrf.mxu0  ;;  %11501 = vmatmul.msk.bf16.gmra.mxu1 %vm840_vm1, %v14454_v48 }
 0x485   : > { %11950 = vmatmul.msk.bf16.gmra.mxu2 %vm840_vm1, %v14582_v34  ;;  %v16606_v32 = vadd.f32 %v5301_v46, %v4380_v61  ;;  %v14583_v61 = vld [vmem:[%s15478_s30 + $0x600] sm:$0xff] }
 0x486   : > { %12271 = vmatmul.msk.bf16.gmra.mxu3 %vm840_vm1, %v14646_v8  ;;  %v14455_v8 = vld [vmem:[%s15478_s30 + $0x1c0] sm:$0xff] }
 0x487   : > { %17685 = vst [vmem:[#allocation77_spill] sm:$0xff] %v16606_v32  ;;  %12720 = vmatmul.msk.bf16.gmra.mxu0 %vm840_vm1, %v14710_v26  ;;  %v14647_v32 = vld [vmem:[%s15478_s30 + $0x1d0] sm:$0xff] }
 0x488   : > { %v3100_v14 = vpop.f32.mrf.mxu2 }
 0x489   : > { %v3279_v1 = vadd.f32 %v3100_v14, %v2126_v29  ;;  %v4202_v58 = vpop.f32.mrf.mxu3  ;;  %v2127_v40 = vpop.f32.mrf.mxu1 }
 0x48a   : > { %v2128_v46 = vadd.f32 %v2127_v40, %v17688_v44 }
 0x48b   : > { %v4381_v54 = vadd.f32 %v4202_v58, %v3279_v1 }
 0x48c   : > { %v5306_v9 = vpop.f32.mrf.mxu0 }
 0x48d   : > { %v16611_v5 = vadd.f32 %v5304_v4, %v4381_v54  ;;  %v17690_v4 = vld [vmem:[#allocation3_spill] sm:$0xff] }
 0x48f   : > { %17687 = vst [vmem:[#allocation80_spill] sm:$0xff] %v16611_v5  ;;  %v14712_v5 = vld [vmem:[%s15478_s30 + $0x3f8] sm:$0xff] }
 0x490   : > { %v3102_v28 = vpop.f32.mrf.mxu2 }
 0x491   : > { %v3280_v48 = vadd.f32 %v3102_v28, %v2128_v46  ;;  %v4204_v34 = vpop.f32.mrf.mxu3  ;;  %v2130_v26 = vpop.f32.mrf.mxu1 }
 0x492   : > { %v2131_v14 = vadd.f32 %v2130_v26, %v17690_v4 }
 0x493   : > { %v4382_v38 = vadd.f32 %v4204_v34, %v3280_v48  ;;  %v17692_v48 = vld [vmem:[#allocation5_spill] sm:$0xff] }
 0x494   : > { %v5309_v56 = vpop.f32.mrf.mxu0  ;;  %11502 = vmatmul.msk.bf16.gmra.mxu1 %vm840_vm1, %v14455_v8 }
 0x495   : > { %11951 = vmatmul.msk.bf16.gmra.mxu2 %vm840_vm1, %v14583_v61  ;;  %v16620_v29 = vadd.f32 %v5306_v9, %v4382_v38  ;;  %v14584_v38 = vld [vmem:[%s15478_s30 + $0x608] sm:$0xff] }
 0x496   : > { %12272 = vmatmul.msk.bf16.gmra.mxu3 %vm840_vm1, %v14647_v32  ;;  %v14456_v32 = vld [vmem:[%s15478_s30 + $0x1c8] sm:$0xff] }
 0x497   : > { %17689 = vst [vmem:[#allocation83_spill] sm:$0xff] %v16620_v29  ;;  %12721 = vmatmul.msk.bf16.gmra.mxu0 %vm840_vm1, %v14711_v16  ;;  %v14648_v29 = vld [vmem:[%s15478_s30 + $0x1d8] sm:$0xff] }
 0x498   : > { %v3105_v1 = vpop.f32.mrf.mxu2 }
 0x499   : > { %v3281_v58 = vadd.f32 %v3105_v1, %v2131_v14  ;;  %v4207_v40 = vpop.f32.mrf.mxu3  ;;  %v2132_v54 = vpop.f32.mrf.mxu1 }
 0x49a   : > { %v2133_v9 = vadd.f32 %v2132_v54, %v17692_v48 }
 0x49b   : > { %v4383_v44 = vadd.f32 %v4207_v40, %v3281_v58 }
 0x49c   : > { %v5311_v46 = vpop.f32.mrf.mxu0 }
 0x49d   : > { %v16625_v28 = vadd.f32 %v5309_v56, %v4383_v44  ;;  %v17694_v56 = vld [vmem:[#allocation7_spill] sm:$0xff] }
 0x49f   : > { %17691 = vst [vmem:[#allocation3_spill] sm:$0xff] %v16625_v28  ;;  %v14713_v28 = vld [vmem:[%s15478_s30 + $0x400] sm:$0xff] }
 0x4a0   : > { %v3107_v34 = vpop.f32.mrf.mxu2 }
 0x4a1   : > { %v3282_v8 = vadd.f32 %v3107_v34, %v2133_v9  ;;  %v4209_v61 = vpop.f32.mrf.mxu3  ;;  %v2135_v16 = vpop.f32.mrf.mxu1 }
 0x4a2   : > { %v2136_v1 = vadd.f32 %v2135_v16, %v17694_v56 }
 0x4a3   : > { %v4384_v26 = vadd.f32 %v4209_v61, %v3282_v8  ;;  %v17696_v8 = vld [vmem:[#allocation9_spill] sm:$0xff] }
 0x4a4   : > { %v5314_v4 = vpop.f32.mrf.mxu0  ;;  %11503 = vmatmul.msk.bf16.gmra.mxu1 %vm840_vm1, %v14456_v32 }
 0x4a5   : > { %11952 = vmatmul.msk.bf16.gmra.mxu2 %vm840_vm1, %v14584_v38  ;;  %v16634_v14 = vadd.f32 %v5311_v46, %v4384_v26  ;;  %v14585_v26 = vld [vmem:[%s15478_s30 + $0x610] sm:$0xff] }
 0x4a6   : > { %12273 = vmatmul.msk.bf16.gmra.mxu3 %vm840_vm1, %v14648_v29  ;;  %v14457_v29 = vld [vmem:[%s15478_s30 + $0x1d0] sm:$0xff] }
 0x4a7   : > { %17693 = vst [vmem:[#allocation5_spill] sm:$0xff] %v16634_v14  ;;  %12722 = vmatmul.msk.bf16.gmra.mxu0 %vm840_vm1, %v14712_v5  ;;  %v14649_v14 = vld [vmem:[%s15478_s30 + $0x1e0] sm:$0xff] }
 0x4a8   : > { %v3110_v58 = vpop.f32.mrf.mxu2 }
 0x4a9   : > { %v3283_v40 = vadd.f32 %v3110_v58, %v2136_v1  ;;  %v4212_v54 = vpop.f32.mrf.mxu3  ;;  %v2137_v44 = vpop.f32.mrf.mxu1 }
 0x4aa   : > { %v2138_v46 = vadd.f32 %v2137_v44, %v17696_v8 }
 0x4ab   : > { %v4385_v48 = vadd.f32 %v4212_v54, %v3283_v40 }
 0x4ac   : > { %v5316_v9 = vpop.f32.mrf.mxu0 }
 0x4ad   : > { %v16639_v34 = vadd.f32 %v5314_v4, %v4385_v48  ;;  %v17698_v4 = vld [vmem:[#allocation11_spill] sm:$0xff] }
 0x4af   : > { %17695 = vst [vmem:[#allocation7_spill] sm:$0xff] %v16639_v34  ;;  %v14714_v34 = vld [vmem:[%s15478_s30 + $0x408] sm:$0xff] }
 0x4b0   : > { %v3112_v61 = vpop.f32.mrf.mxu2 }
 0x4b1   : > { %v3284_v32 = vadd.f32 %v3112_v61, %v2138_v46  ;;  %v4214_v38 = vpop.f32.mrf.mxu3  ;;  %v2140_v5 = vpop.f32.mrf.mxu1 }
 0x4b2   : > { %v2141_v58 = vadd.f32 %v2140_v5, %v17698_v4 }
 0x4b3   : > { %v4386_v16 = vadd.f32 %v4214_v38, %v3284_v32  ;;  %v17700_v32 = vld [vmem:[#allocation13_spill] sm:$0xff] }
 0x4b4   : > { %v5319_v56 = vpop.f32.mrf.mxu0  ;;  %11504 = vmatmul.msk.bf16.gmra.mxu1 %vm840_vm1, %v14457_v29 }
 0x4b5   : > { %11953 = vmatmul.msk.bf16.gmra.mxu2 %vm840_vm1, %v14585_v26  ;;  %v16648_v1 = vadd.f32 %v5316_v9, %v4386_v16  ;;  %v14586_v16 = vld [vmem:[%s15478_s30 + $0x618] sm:$0xff] }
 0x4b6   : > { %12274 = vmatmul.msk.bf16.gmra.mxu3 %vm840_vm1, %v14649_v14  ;;  %v14458_v14 = vld [vmem:[%s15478_s30 + $0x1d8] sm:$0xff] }
 0x4b7   : > { %17697 = vst [vmem:[#allocation9_spill] sm:$0xff] %v16648_v1  ;;  %12723 = vmatmul.msk.bf16.gmra.mxu0 %vm840_vm1, %v14713_v28  ;;  %v14650_v1 = vld [vmem:[%s15478_s30 + $0x1e8] sm:$0xff] }
 0x4b8   : > { %v3115_v40 = vpop.f32.mrf.mxu2 }
 0x4b9   : > { %v3285_v54 = vadd.f32 %v3115_v40, %v2141_v58  ;;  %v4217_v44 = vpop.f32.mrf.mxu3  ;;  %v2142_v48 = vpop.f32.mrf.mxu1 }
 0x4ba   : > { %v2143_v9 = vadd.f32 %v2142_v48, %v17700_v32 }
 0x4bb   : > { %v4387_v8 = vadd.f32 %v4217_v44, %v3285_v54 }
 0x4bc   : > { %v5321_v46 = vpop.f32.mrf.mxu0 }
 0x4bd   : > { %v16653_v61 = vadd.f32 %v5319_v56, %v4387_v8  ;;  %v17702_v56 = vld [vmem:[#allocation15_spill] sm:$0xff] }
 0x4bf   : > { %17699 = vst [vmem:[#allocation11_spill] sm:$0xff] %v16653_v61  ;;  %v14715_v61 = vld [vmem:[%s15478_s30 + $0x410] sm:$0xff] }
 0x4c0   : > { %v3117_v38 = vpop.f32.mrf.mxu2 }
 0x4c1   : > { %v3286_v29 = vadd.f32 %v3117_v38, %v2143_v9  ;;  %v4219_v26 = vpop.f32.mrf.mxu3  ;;  %v2145_v28 = vpop.f32.mrf.mxu1 }
 0x4c2   : > { %v2146_v40 = vadd.f32 %v2145_v28, %v17702_v56 }
 0x4c3   : > { %v4388_v5 = vadd.f32 %v4219_v26, %v3286_v29  ;;  %v17704_v29 = vld [vmem:[#allocation17_spill] sm:$0xff] }
 0x4c4   : > { %v5324_v4 = vpop.f32.mrf.mxu0  ;;  %11505 = vmatmul.msk.bf16.gmra.mxu1 %vm840_vm1, %v14458_v14 }
 0x4c5   : > { %11954 = vmatmul.msk.bf16.gmra.mxu2 %vm840_vm1, %v14586_v16  ;;  %v16662_v58 = vadd.f32 %v5321_v46, %v4388_v5  ;;  %v14587_v5 = vld [vmem:[%s15478_s30 + $0x620] sm:$0xff] }
 0x4c6   : > { %12275 = vmatmul.msk.bf16.gmra.mxu3 %vm840_vm1, %v14650_v1  ;;  %v14459_v1 = vld [vmem:[%s15478_s30 + $0x1e0] sm:$0xff] }
 0x4c7   : > { %17701 = vst [vmem:[#allocation13_spill] sm:$0xff] %v16662_v58  ;;  %12724 = vmatmul.msk.bf16.gmra.mxu0 %vm840_vm1, %v14714_v34  ;;  %v14651_v58 = vld [vmem:[%s15478_s30 + $0x1f0] sm:$0xff] }
 0x4c8   : > { %v3120_v54 = vpop.f32.mrf.mxu2 }
 0x4c9   : > { %v3287_v44 = vadd.f32 %v3120_v54, %v2146_v40  ;;  %v4222_v48 = vpop.f32.mrf.mxu3  ;;  %v2147_v8 = vpop.f32.mrf.mxu1 }
 0x4ca   : > { %v2148_v46 = vadd.f32 %v2147_v8, %v17704_v29 }
 0x4cb   : > { %v4389_v32 = vadd.f32 %v4222_v48, %v3287_v44 }
 0x4cc   : > { %v5326_v9 = vpop.f32.mrf.mxu0 }
 0x4cd   : > { %v16667_v38 = vadd.f32 %v5324_v4, %v4389_v32  ;;  %v17706_v4 = vld [vmem:[#allocation19_spill] sm:$0xff] }
 0x4cf   : > { %17703 = vst [vmem:[#allocation15_spill] sm:$0xff] %v16667_v38  ;;  %v14716_v38 = vld [vmem:[%s15478_s30 + $0x418] sm:$0xff] }
 0x4d0   : > { %v3122_v26 = vpop.f32.mrf.mxu2 }
 0x4d1   : > { %v3288_v14 = vadd.f32 %v3122_v26, %v2148_v46  ;;  %v4224_v16 = vpop.f32.mrf.mxu3  ;;  %v2150_v34 = vpop.f32.mrf.mxu1 }
 0x4d2   : > { %v2151_v54 = vadd.f32 %v2150_v34, %v17706_v4 }
 0x4d3   : > { %v4390_v28 = vadd.f32 %v4224_v16, %v3288_v14  ;;  %v17708_v14 = vld [vmem:[#allocation21_spill] sm:$0xff] }
 0x4d4   : > { %v5329_v56 = vpop.f32.mrf.mxu0  ;;  %11506 = vmatmul.msk.bf16.gmra.mxu1 %vm840_vm1, %v14459_v1 }
 0x4d5   : > { %11955 = vmatmul.msk.bf16.gmra.mxu2 %vm840_vm1, %v14587_v5  ;;  %v16676_v40 = vadd.f32 %v5326_v9, %v4390_v28  ;;  %v14588_v28 = vld [vmem:[%s15478_s30 + $0x628] sm:$0xff] }
 0x4d6   : > { %12276 = vmatmul.msk.bf16.gmra.mxu3 %vm840_vm1, %v14651_v58  ;;  %v14460_v58 = vld [vmem:[%s15478_s30 + $0x1e8] sm:$0xff] }
 0x4d7   : > { %17705 = vst [vmem:[#allocation17_spill] sm:$0xff] %v16676_v40  ;;  %12725 = vmatmul.msk.bf16.gmra.mxu0 %vm840_vm1, %v14715_v61  ;;  %v14652_v40 = vld [vmem:[%s15478_s30 + $0x1f8] sm:$0xff] }
 0x4d8   : > { %v3125_v44 = vpop.f32.mrf.mxu2 }
 0x4d9   : > { %v3289_v48 = vadd.f32 %v3125_v44, %v2151_v54  ;;  %v4227_v8 = vpop.f32.mrf.mxu3  ;;  %v2152_v32 = vpop.f32.mrf.mxu1 }
 0x4da   : > { %v2153_v9 = vadd.f32 %v2152_v32, %v17708_v14 }
 0x4db   : > { %v4391_v29 = vadd.f32 %v4227_v8, %v3289_v48 }
 0x4dc   : > { %v5331_v46 = vpop.f32.mrf.mxu0 }
 0x4dd   : > { %v16681_v26 = vadd.f32 %v5329_v56, %v4391_v29  ;;  %v17710_v56 = vld [vmem:[#allocation23_spill] sm:$0xff] }
 0x4df   : > { %17707 = vst [vmem:[#allocation19_spill] sm:$0xff] %v16681_v26  ;;  %v14717_v26 = vld [vmem:[%s15478_s30 + $0x420] sm:$0xff] }
 0x4e0   : > { %v3127_v16 = vpop.f32.mrf.mxu2 }
 0x4e1   : > { %v3290_v1 = vadd.f32 %v3127_v16, %v2153_v9  ;;  %v4229_v5 = vpop.f32.mrf.mxu3  ;;  %v2155_v61 = vpop.f32.mrf.mxu1 }
 0x4e2   : > { %v2156_v44 = vadd.f32 %v2155_v61, %v17710_v56 }
 0x4e3   : > { %v4392_v34 = vadd.f32 %v4229_v5, %v3290_v1  ;;  %v17712_v1 = vld [vmem:[#allocation25_spill] sm:$0xff] }
 0x4e4   : > { %v5334_v4 = vpop.f32.mrf.mxu0  ;;  %11507 = vmatmul.msk.bf16.gmra.mxu1 %vm840_vm1, %v14460_v58 }
 0x4e5   : > { %11956 = vmatmul.msk.bf16.gmra.mxu2 %vm840_vm1, %v14588_v28  ;;  %v16690_v54 = vadd.f32 %v5331_v46, %v4392_v34  ;;  %v14589_v34 = vld [vmem:[%s15478_s30 + $0x630] sm:$0xff] }
 0x4e6   : > { %12277 = vmatmul.msk.bf16.gmra.mxu3 %vm840_vm1, %v14652_v40  ;;  %v14461_v40 = vld [vmem:[%s15478_s30 + $0x1f0] sm:$0xff] }
 0x4e7   : > { %17709 = vst [vmem:[#allocation21_spill] sm:$0xff] %v16690_v54  ;;  %12726 = vmatmul.msk.bf16.gmra.mxu0 %vm840_vm1, %v14716_v38  ;;  %v14653_v54 = vld [vmem:[%s15478_s30 + $0x200] sm:$0xff] }
 0x4e8   : > { %v3130_v48 = vpop.f32.mrf.mxu2 }
 0x4e9   : > { %v3291_v8 = vadd.f32 %v3130_v48, %v2156_v44  ;;  %v4232_v32 = vpop.f32.mrf.mxu3  ;;  %v2157_v29 = vpop.f32.mrf.mxu1 }
 0x4ea   : > { %v2158_v46 = vadd.f32 %v2157_v29, %v17712_v1 }
 0x4eb   : > { %v4393_v14 = vadd.f32 %v4232_v32, %v3291_v8 }
 0x4ec   : > { %v5336_v9 = vpop.f32.mrf.mxu0 }
 0x4ed   : > { %v16695_v16 = vadd.f32 %v5334_v4, %v4393_v14  ;;  %v17714_v4 = vld [vmem:[#allocation27_spill] sm:$0xff] }
 0x4ef   : > { %17711 = vst [vmem:[#allocation23_spill] sm:$0xff] %v16695_v16  ;;  %v14718_v16 = vld [vmem:[%s15478_s30 + $0x428] sm:$0xff] }
 0x4f0   : > { %v3132_v5 = vpop.f32.mrf.mxu2 }
 0x4f1   : > { %v3292_v58 = vadd.f32 %v3132_v5, %v2158_v46  ;;  %v4234_v28 = vpop.f32.mrf.mxu3  ;;  %v2160_v38 = vpop.f32.mrf.mxu1 }
 0x4f2   : > { %v2161_v48 = vadd.f32 %v2160_v38, %v17714_v4 }
 0x4f3   : > { %v4394_v61 = vadd.f32 %v4234_v28, %v3292_v58  ;;  %v17716_v58 = vld [vmem:[#allocation30_spill] sm:$0xff] }
 0x4f4   : > { %v5339_v56 = vpop.f32.mrf.mxu0  ;;  %11508 = vmatmul.msk.bf16.gmra.mxu1 %vm840_vm1, %v14461_v40 }
 0x4f5   : > { %11957 = vmatmul.msk.bf16.gmra.mxu2 %vm840_vm1, %v14589_v34  ;;  %v16704_v44 = vadd.f32 %v5336_v9, %v4394_v61  ;;  %v14590_v61 = vld [vmem:[%s15478_s30 + $0x638] sm:$0xff] }
 0x4f6   : > { %12278 = vmatmul.msk.bf16.gmra.mxu3 %vm840_vm1, %v14653_v54  ;;  %v14462_v54 = vld [vmem:[%s15478_s30 + $0x1f8] sm:$0xff] }
 0x4f7   : > { %17713 = vst [vmem:[#allocation25_spill] sm:$0xff] %v16704_v44  ;;  %12727 = vmatmul.msk.bf16.gmra.mxu0 %vm840_vm1, %v14717_v26  ;;  %v14654_v44 = vld [vmem:[%s15478_s30 + $0x208] sm:$0xff] }
 0x4f8   : > { %v3135_v8 = vpop.f32.mrf.mxu2 }
 0x4f9   : > { %v3293_v32 = vadd.f32 %v3135_v8, %v2161_v48  ;;  %v4237_v29 = vpop.f32.mrf.mxu3  ;;  %v2162_v14 = vpop.f32.mrf.mxu1 }
 0x4fa   : > { %v2163_v9 = vadd.f32 %v2162_v14, %v17716_v58 }
 0x4fb   : > { %v4395_v1 = vadd.f32 %v4237_v29, %v3293_v32 }
 0x4fc   : > { %v5341_v46 = vpop.f32.mrf.mxu0 }
 0x4fd   : > { %v16709_v5 = vadd.f32 %v5339_v56, %v4395_v1  ;;  %v17718_v56 = vld [vmem:[#allocation33_spill] sm:$0xff] }
 0x4ff   : > { %17715 = vst [vmem:[#allocation27_spill] sm:$0xff] %v16709_v5  ;;  %v14911_v5 = vld [vmem:[%s15478_s30 + $0x460] sm:$0xff] }
 0x500   : > { %v3137_v28 = vpop.f32.mrf.mxu2 }
 0x501   : > { %v3294_v40 = vadd.f32 %v3137_v28, %v2163_v9  ;;  %v4239_v34 = vpop.f32.mrf.mxu3  ;;  %v2165_v26 = vpop.f32.mrf.mxu1 }
 0x502   : > { %v2166_v8 = vadd.f32 %v2165_v26, %v17718_v56 }
 0x503   : > { %v4396_v38 = vadd.f32 %v4239_v34, %v3294_v40  ;;  %v17720_v40 = vld [vmem:[#allocation36_spill] sm:$0xff] }
 0x504   : > { %v5344_v4 = vpop.f32.mrf.mxu0  ;;  %11509 = vmatmul.msk.bf16.gmra.mxu1 %vm840_vm1, %v14462_v54 }
 0x505   : > { %11958 = vmatmul.msk.bf16.gmra.mxu2 %vm840_vm1, %v14590_v61  ;;  %v16718_v48 = vadd.f32 %v5341_v46, %v4396_v38  ;;  %v14783_v38 = vld [vmem:[%s15478_s30 + $0x20] sm:$0xff] }
 0x506   : > { %12279 = vmatmul.msk.bf16.gmra.mxu3 %vm840_vm1, %v14654_v44  ;;  %v14719_v44 = vld [vmem:[%s15478_s30 + $0x450] sm:$0xff] }
 0x507   : > { %17717 = vst [vmem:[#allocation30_spill] sm:$0xff] %v16718_v48  ;;  %12728 = vmatmul.msk.bf16.gmra.mxu0 %vm840_vm1, %v14718_v16  ;;  %v14847_v48 = vld [vmem:[%s15478_s30 + $0x240] sm:$0xff] }
 0x508   : > { %v3140_v32 = vpop.f32.mrf.mxu2 }
 0x509   : > { %v3295_v29 = vadd.f32 %v3140_v32, %v2166_v8  ;;  %v4242_v14 = vpop.f32.mrf.mxu3  ;;  %v2167_v1 = vpop.f32.mrf.mxu1 }
 0x50a   : > { %v2168_v46 = vadd.f32 %v2167_v1, %v17720_v40 }
 0x50b   : > { %v4397_v58 = vadd.f32 %v4242_v14, %v3295_v29 }
 0x50c   : > { %v5346_v9 = vpop.f32.mrf.mxu0 }
 0x50d   : > { %v16723_v28 = vadd.f32 %v5344_v4, %v4397_v58  ;;  %v17722_v4 = vld [vmem:[#allocation39_spill] sm:$0xff] }
 0x50f   : > { %17719 = vst [vmem:[#allocation33_spill] sm:$0xff] %v16723_v28  ;;  %v14912_v28 = vld [vmem:[%s15478_s30 + $0x468] sm:$0xff] }
 0x510   : > { %v3142_v34 = vpop.f32.mrf.mxu2 }
 0x511   : > { %v3296_v54 = vadd.f32 %v3142_v34, %v2168_v46  ;;  %v4244_v61 = vpop.f32.mrf.mxu3  ;;  %v2170_v16 = vpop.f32.mrf.mxu1 }
 0x512   : > { %v2171_v32 = vadd.f32 %v2170_v16, %v17722_v4 }
 0x513   : > { %v4398_v26 = vadd.f32 %v4244_v61, %v3296_v54  ;;  %v17724_v54 = vld [vmem:[#allocation42_spill] sm:$0xff] }
 0x514   : > { %v5349_v56 = vpop.f32.mrf.mxu0  ;;  %13114 = vmatmul.msk.bf16.vlgmr.msra.gmra.mxu1 %vm840_vm1, %v14719_v44 }
 0x515   : > { %13435 = vmatmul.msk.bf16.vlgmr.msra.gmra.mxu2 %vm840_vm1, %v14783_v38  ;;  %v16732_v8 = vadd.f32 %v5346_v9, %v4398_v26  ;;  %v14784_v26 = vld [vmem:[%s15478_s30 + $0x28] sm:$0xff] }
 0x516   : > { %13884 = vmatmul.msk.bf16.vlgmr.msra.gmra.mxu3 %vm840_vm1, %v14847_v48  ;;  %v14720_v48 = vld [vmem:[%s15478_s30 + $0x458] sm:$0xff] }
 0x517   : > { %17721 = vst [vmem:[#allocation36_spill] sm:$0xff] %v16732_v8  ;;  %14333 = vmatmul.msk.bf16.vlgmr.msra.gmra.mxu0 %vm840_vm1, %v14911_v5  ;;  %v14848_v8 = vld [vmem:[%s15478_s30 + $0x248] sm:$0xff] }
 0x518   : > { %v3145_v29 = vpop.f32.mrf.mxu2 }
 0x519   : > { %v3297_v14 = vadd.f32 %v3145_v29, %v2171_v32  ;;  %v4247_v1 = vpop.f32.mrf.mxu3  ;;  %v2172_v58 = vpop.f32.mrf.mxu1 }
 0x51a   : > { %v2173_v9 = vadd.f32 %v2172_v58, %v17724_v54 }
 0x51b   : > { %v4399_v40 = vadd.f32 %v4247_v1, %v3297_v14 }
 0x51c   : > { %v5351_v46 = vpop.f32.mrf.mxu0 }
 0x51d   : > { %v16737_v34 = vadd.f32 %v5349_v56, %v4399_v40  ;;  %v17726_v56 = vld [vmem:[#allocation45_spill] sm:$0xff] }
 0x51f   : > { %17723 = vst [vmem:[#allocation39_spill] sm:$0xff] %v16737_v34  ;;  %v14913_v34 = vld [vmem:[%s15478_s30 + $0x470] sm:$0xff] }
 0x520   : > { %v3147_v61 = vpop.f32.mrf.mxu2 }
 0x521   : > { %v3298_v44 = vadd.f32 %v3147_v61, %v2173_v9  ;;  %v4249_v38 = vpop.f32.mrf.mxu3  ;;  %v2175_v5 = vpop.f32.mrf.mxu1 }
 0x522   : > { %v2176_v29 = vadd.f32 %v2175_v5, %v17726_v56 }
 0x523   : > { %v4400_v16 = vadd.f32 %v4249_v38, %v3298_v44  ;;  %v17728_v44 = vld [vmem:[#allocation48_spill] sm:$0xff] }
 0x524   : > { %v5354_v4 = vpop.f32.mrf.mxu0  ;;  %13115 = vmatmul.msk.bf16.gmra.mxu1 %vm840_vm1, %v14720_v48 }
 0x525   : > { %13436 = vmatmul.msk.bf16.gmra.mxu2 %vm840_vm1, %v14784_v26  ;;  %v16746_v32 = vadd.f32 %v5351_v46, %v4400_v16  ;;  %v14785_v16 = vld [vmem:[%s15478_s30 + $0x30] sm:$0xff] }
 0x526   : > { %13885 = vmatmul.msk.bf16.gmra.mxu3 %vm840_vm1, %v14848_v8  ;;  %v14721_v8 = vld [vmem:[%s15478_s30 + $0x460] sm:$0xff] }
 0x527   : > { %17725 = vst [vmem:[#allocation42_spill] sm:$0xff] %v16746_v32  ;;  %14334 = vmatmul.msk.bf16.gmra.mxu0 %vm840_vm1, %v14912_v28  ;;  %v14849_v32 = vld [vmem:[%s15478_s30 + $0x250] sm:$0xff] }
 0x528   : > { %v3150_v14 = vpop.f32.mrf.mxu2 }
 0x529   : > { %v3299_v1 = vadd.f32 %v3150_v14, %v2176_v29  ;;  %v4252_v58 = vpop.f32.mrf.mxu3  ;;  %v2177_v40 = vpop.f32.mrf.mxu1 }
 0x52a   : > { %v2178_v46 = vadd.f32 %v2177_v40, %v17728_v44 }
 0x52b   : > { %v4401_v54 = vadd.f32 %v4252_v58, %v3299_v1 }
 0x52c   : > { %v5356_v9 = vpop.f32.mrf.mxu0 }
 0x52d   : > { %v16751_v61 = vadd.f32 %v5354_v4, %v4401_v54  ;;  %v17730_v4 = vld [vmem:[#allocation51_spill] sm:$0xff] }
 0x52f   : > { %17727 = vst [vmem:[#allocation45_spill] sm:$0xff] %v16751_v61  ;;  %v14914_v61 = vld [vmem:[%s15478_s30 + $0x478] sm:$0xff] }
 0x530   : > { %v3152_v38 = vpop.f32.mrf.mxu2 }
 0x531   : > { %v3300_v48 = vadd.f32 %v3152_v38, %v2178_v46  ;;  %v4254_v26 = vpop.f32.mrf.mxu3  ;;  %v2180_v28 = vpop.f32.mrf.mxu1 }
 0x532   : > { %v2181_v14 = vadd.f32 %v2180_v28, %v17730_v4 }
 0x533   : > { %v4402_v5 = vadd.f32 %v4254_v26, %v3300_v48  ;;  %v17732_v48 = vld [vmem:[#allocation54_spill] sm:$0xff] }
 0x534   : > { %v5359_v56 = vpop.f32.mrf.mxu0  ;;  %13116 = vmatmul.msk.bf16.gmra.mxu1 %vm840_vm1, %v14721_v8 }
 0x535   : > { %13437 = vmatmul.msk.bf16.gmra.mxu2 %vm840_vm1, %v14785_v16  ;;  %v16760_v29 = vadd.f32 %v5356_v9, %v4402_v5  ;;  %v14786_v5 = vld [vmem:[%s15478_s30 + $0x38] sm:$0xff] }
 0x536   : > { %13886 = vmatmul.msk.bf16.gmra.mxu3 %vm840_vm1, %v14849_v32  ;;  %v14722_v32 = vld [vmem:[%s15478_s30 + $0x468] sm:$0xff] }
 0x537   : > { %17729 = vst [vmem:[#allocation48_spill] sm:$0xff] %v16760_v29  ;;  %14335 = vmatmul.msk.bf16.gmra.mxu0 %vm840_vm1, %v14913_v34  ;;  %v14850_v29 = vld [vmem:[%s15478_s30 + $0x258] sm:$0xff] }
 0x538   : > { %v3155_v1 = vpop.f32.mrf.mxu2 }
 0x539   : > { %v3301_v58 = vadd.f32 %v3155_v1, %v2181_v14  ;;  %v4257_v40 = vpop.f32.mrf.mxu3  ;;  %v2182_v54 = vpop.f32.mrf.mxu1 }
 0x53a   : > { %v2183_v9 = vadd.f32 %v2182_v54, %v17732_v48 }
 0x53b   : > { %v4403_v44 = vadd.f32 %v4257_v40, %v3301_v58 }
 0x53c   : > { %v5361_v46 = vpop.f32.mrf.mxu0 }
 0x53d   : > { %v16765_v38 = vadd.f32 %v5359_v56, %v4403_v44  ;;  %v17734_v56 = vld [vmem:[#allocation57_spill] sm:$0xff] }
 0x53f   : > { %17731 = vst [vmem:[#allocation51_spill] sm:$0xff] %v16765_v38  ;;  %v14915_v38 = vld [vmem:[%s15478_s30 + $0x480] sm:$0xff] }
 0x540   : > { %v3157_v26 = vpop.f32.mrf.mxu2 }
 0x541   : > { %v3302_v8 = vadd.f32 %v3157_v26, %v2183_v9  ;;  %v4259_v16 = vpop.f32.mrf.mxu3  ;;  %v2185_v34 = vpop.f32.mrf.mxu1 }
 0x542   : > { %v2186_v1 = vadd.f32 %v2185_v34, %v17734_v56 }
 0x543   : > { %v4404_v28 = vadd.f32 %v4259_v16, %v3302_v8  ;;  %v17736_v8 = vld [vmem:[#allocation60_spill] sm:$0xff] }
 0x544   : > { %v5364_v4 = vpop.f32.mrf.mxu0  ;;  %13117 = vmatmul.msk.bf16.gmra.mxu1 %vm840_vm1, %v14722_v32 }
 0x545   : > { %13438 = vmatmul.msk.bf16.gmra.mxu2 %vm840_vm1, %v14786_v5  ;;  %v16774_v14 = vadd.f32 %v5361_v46, %v4404_v28  ;;  %v14787_v28 = vld [vmem:[%s15478_s30 + $0x40] sm:$0xff] }
 0x546   : > { %13887 = vmatmul.msk.bf16.gmra.mxu3 %vm840_vm1, %v14850_v29  ;;  %v14723_v29 = vld [vmem:[%s15478_s30 + $0x470] sm:$0xff] }
 0x547   : > { %17733 = vst [vmem:[#allocation54_spill] sm:$0xff] %v16774_v14  ;;  %14336 = vmatmul.msk.bf16.gmra.mxu0 %vm840_vm1, %v14914_v61  ;;  %v14851_v14 = vld [vmem:[%s15478_s30 + $0x260] sm:$0xff] }
 0x548   : > { %v3160_v58 = vpop.f32.mrf.mxu2 }
 0x549   : > { %v3303_v40 = vadd.f32 %v3160_v58, %v2186_v1  ;;  %v4262_v54 = vpop.f32.mrf.mxu3  ;;  %v2187_v44 = vpop.f32.mrf.mxu1 }
 0x54a   : > { %v2188_v46 = vadd.f32 %v2187_v44, %v17736_v8 }
 0x54b   : > { %v4405_v48 = vadd.f32 %v4262_v54, %v3303_v40 }
 0x54c   : > { %v5366_v9 = vpop.f32.mrf.mxu0 }
 0x54d   : > { %v16779_v26 = vadd.f32 %v5364_v4, %v4405_v48  ;;  %v17738_v4 = vld [vmem:[#allocation63_spill] sm:$0xff] }
 0x54f   : > { %17735 = vst [vmem:[#allocation57_spill] sm:$0xff] %v16779_v26  ;;  %v14916_v26 = vld [vmem:[%s15478_s30 + $0x488] sm:$0xff] }
 0x550   : > { %v3162_v16 = vpop.f32.mrf.mxu2 }
 0x551   : > { %v3304_v32 = vadd.f32 %v3162_v16, %v2188_v46  ;;  %v4264_v5 = vpop.f32.mrf.mxu3  ;;  %v2190_v61 = vpop.f32.mrf.mxu1 }
 0x552   : > { %v2191_v58 = vadd.f32 %v2190_v61, %v17738_v4 }
 0x553   : > { %v4406_v34 = vadd.f32 %v4264_v5, %v3304_v32  ;;  %v17740_v32 = vld [vmem:[#allocation66_spill] sm:$0xff] }
 0x554   : > { %v5369_v56 = vpop.f32.mrf.mxu0  ;;  %13118 = vmatmul.msk.bf16.gmra.mxu1 %vm840_vm1, %v14723_v29 }
 0x555   : > { %13439 = vmatmul.msk.bf16.gmra.mxu2 %vm840_vm1, %v14787_v28  ;;  %v16788_v1 = vadd.f32 %v5366_v9, %v4406_v34  ;;  %v14788_v34 = vld [vmem:[%s15478_s30 + $0x48] sm:$0xff] }
 0x556   : > { %13888 = vmatmul.msk.bf16.gmra.mxu3 %vm840_vm1, %v14851_v14  ;;  %v14724_v14 = vld [vmem:[%s15478_s30 + $0x478] sm:$0xff] }
 0x557   : > { %17737 = vst [vmem:[#allocation60_spill] sm:$0xff] %v16788_v1  ;;  %14337 = vmatmul.msk.bf16.gmra.mxu0 %vm840_vm1, %v14915_v38  ;;  %v14852_v1 = vld [vmem:[%s15478_s30 + $0x268] sm:$0xff] }
 0x558   : > { %v3165_v40 = vpop.f32.mrf.mxu2 }
 0x559   : > { %v3305_v54 = vadd.f32 %v3165_v40, %v2191_v58  ;;  %v4267_v44 = vpop.f32.mrf.mxu3  ;;  %v2192_v48 = vpop.f32.mrf.mxu1 }
 0x55a   : > { %v2193_v9 = vadd.f32 %v2192_v48, %v17740_v32 }
 0x55b   : > { %v4407_v8 = vadd.f32 %v4267_v44, %v3305_v54 }
 0x55c   : > { %v5371_v46 = vpop.f32.mrf.mxu0 }
 0x55d   : > { %v16793_v16 = vadd.f32 %v5369_v56, %v4407_v8  ;;  %v17742_v56 = vld [vmem:[#allocation69_spill] sm:$0xff] }
 0x55f   : > { %17739 = vst [vmem:[#allocation63_spill] sm:$0xff] %v16793_v16  ;;  %v14917_v16 = vld [vmem:[%s15478_s30 + $0x490] sm:$0xff] }
 0x560   : > { %v3167_v5 = vpop.f32.mrf.mxu2 }
 0x561   : > { %v3306_v29 = vadd.f32 %v3167_v5, %v2193_v9  ;;  %v4269_v28 = vpop.f32.mrf.mxu3  ;;  %v2195_v38 = vpop.f32.mrf.mxu1 }
 0x562   : > { %v2196_v40 = vadd.f32 %v2195_v38, %v17742_v56 }
 0x563   : > { %v4408_v61 = vadd.f32 %v4269_v28, %v3306_v29  ;;  %v17744_v29 = vld [vmem:[#allocation72_spill] sm:$0xff] }
 0x564   : > { %v5374_v4 = vpop.f32.mrf.mxu0  ;;  %13119 = vmatmul.msk.bf16.gmra.mxu1 %vm840_vm1, %v14724_v14 }
 0x565   : > { %13440 = vmatmul.msk.bf16.gmra.mxu2 %vm840_vm1, %v14788_v34  ;;  %v16802_v58 = vadd.f32 %v5371_v46, %v4408_v61  ;;  %v14789_v61 = vld [vmem:[%s15478_s30 + $0x50] sm:$0xff] }
 0x566   : > { %13889 = vmatmul.msk.bf16.gmra.mxu3 %vm840_vm1, %v14852_v1  ;;  %v14725_v1 = vld [vmem:[%s15478_s30 + $0x480] sm:$0xff] }
 0x567   : > { %17741 = vst [vmem:[#allocation66_spill] sm:$0xff] %v16802_v58  ;;  %14338 = vmatmul.msk.bf16.gmra.mxu0 %vm840_vm1, %v14916_v26  ;;  %v14853_v58 = vld [vmem:[%s15478_s30 + $0x270] sm:$0xff] }
 0x568   : > { %v3170_v54 = vpop.f32.mrf.mxu2 }
 0x569   : > { %v3307_v44 = vadd.f32 %v3170_v54, %v2196_v40  ;;  %v4272_v48 = vpop.f32.mrf.mxu3  ;;  %v2197_v8 = vpop.f32.mrf.mxu1 }
 0x56a   : > { %v2198_v46 = vadd.f32 %v2197_v8, %v17744_v29 }
 0x56b   : > { %v4409_v32 = vadd.f32 %v4272_v48, %v3307_v44 }
 0x56c   : > { %v5376_v9 = vpop.f32.mrf.mxu0 }
 0x56d   : > { %v16807_v5 = vadd.f32 %v5374_v4, %v4409_v32  ;;  %v17746_v4 = vld [vmem:[#allocation75_spill] sm:$0xff] }
 0x56f   : > { %17743 = vst [vmem:[#allocation69_spill] sm:$0xff] %v16807_v5  ;;  %v14918_v5 = vld [vmem:[%s15478_s30 + $0x498] sm:$0xff] }
 0x570   : > { %v3172_v28 = vpop.f32.mrf.mxu2 }
 0x571   : > { %v3308_v14 = vadd.f32 %v3172_v28, %v2198_v46  ;;  %v4274_v34 = vpop.f32.mrf.mxu3  ;;  %v2200_v26 = vpop.f32.mrf.mxu1 }
 0x572   : > { %v2201_v54 = vadd.f32 %v2200_v26, %v17746_v4 }
 0x573   : > { %v4410_v38 = vadd.f32 %v4274_v34, %v3308_v14  ;;  %v17748_v14 = vld [vmem:[#allocation78_spill] sm:$0xff] }
 0x574   : > { %v5379_v56 = vpop.f32.mrf.mxu0  ;;  %13120 = vmatmul.msk.bf16.gmra.mxu1 %vm840_vm1, %v14725_v1 }
 0x575   : > { %13441 = vmatmul.msk.bf16.gmra.mxu2 %vm840_vm1, %v14789_v61  ;;  %v16816_v40 = vadd.f32 %v5376_v9, %v4410_v38  ;;  %v14790_v38 = vld [vmem:[%s15478_s30 + $0x58] sm:$0xff] }
 0x576   : > { %13890 = vmatmul.msk.bf16.gmra.mxu3 %vm840_vm1, %v14853_v58  ;;  %v14726_v58 = vld [vmem:[%s15478_s30 + $0x488] sm:$0xff] }
 0x577   : > { %17745 = vst [vmem:[#allocation72_spill] sm:$0xff] %v16816_v40  ;;  %14339 = vmatmul.msk.bf16.gmra.mxu0 %vm840_vm1, %v14917_v16  ;;  %v14854_v40 = vld [vmem:[%s15478_s30 + $0x278] sm:$0xff] }
 0x578   : > { %v3175_v44 = vpop.f32.mrf.mxu2 }
 0x579   : > { %v3309_v48 = vadd.f32 %v3175_v44, %v2201_v54  ;;  %v4277_v8 = vpop.f32.mrf.mxu3  ;;  %v2202_v32 = vpop.f32.mrf.mxu1 }
 0x57a   : > { %v2203_v9 = vadd.f32 %v2202_v32, %v17748_v14 }
 0x57b   : > { %v4411_v29 = vadd.f32 %v4277_v8, %v3309_v48 }
 0x57c   : > { %v5381_v46 = vpop.f32.mrf.mxu0 }
 0x57d   : > { %v16821_v28 = vadd.f32 %v5379_v56, %v4411_v29  ;;  %v17750_v56 = vld [vmem:[#allocation81_spill] sm:$0xff] }
 0x57f   : > { %17747 = vst [vmem:[#allocation75_spill] sm:$0xff] %v16821_v28 }
 0x580   : > { %v3177_v34 = vpop.f32.mrf.mxu2 }
 0x581   : > { %v3310_v1 = vadd.f32 %v3177_v34, %v2203_v9  ;;  %v4279_v61 = vpop.f32.mrf.mxu3  ;;  %v2205_v16 = vpop.f32.mrf.mxu1 }
 0x582   : > { %v2206_v44 = vadd.f32 %v2205_v16, %v17750_v56  ;;  %v14919_v16 = vld [vmem:[%s15478_s30 + $0x4a0] sm:$0xff] }
 0x583   : > { %v4412_v26 = vadd.f32 %v4279_v61, %v3310_v1  ;;  %v17752_v1 = vld [vmem:[#allocation84_spill] sm:$0xff] }
 0x584   : > { %v5384_v4 = vpop.f32.mrf.mxu0  ;;  %13121 = vmatmul.msk.bf16.gmra.mxu1 %vm840_vm1, %v14726_v58 }
 0x585   : > { %13442 = vmatmul.msk.bf16.gmra.mxu2 %vm840_vm1, %v14790_v38  ;;  %v16830_v54 = vadd.f32 %v5381_v46, %v4412_v26  ;;  %v14727_v38 = vld [vmem:[%s15478_s30 + $0x490] sm:$0xff] }
 0x586   : > { %13891 = vmatmul.msk.bf16.gmra.mxu3 %vm840_vm1, %v14854_v40 }
 0x587   : > { %17749 = vst [vmem:[#allocation78_spill] sm:$0xff] %v16830_v54  ;;  %14340 = vmatmul.msk.bf16.gmra.mxu0 %vm840_vm1, %v14918_v5  ;;  %v14791_v5 = vld [vmem:[%s15478_s30 + $0x60] sm:$0xff] }
 0x588   : > { %v3180_v48 = vpop.f32.mrf.mxu2  ;;  %v14855_v54 = vld [vmem:[%s15478_s30 + $0x280] sm:$0xff] }
 0x589   : > { %v3311_v8 = vadd.f32 %v3180_v48, %v2206_v44  ;;  %v4282_v32 = vpop.f32.mrf.mxu3  ;;  %v2207_v29 = vpop.f32.mrf.mxu1 }
 0x58a   : > { %v2208_v46 = vadd.f32 %v2207_v29, %v17752_v1 }
 0x58b   : > { %v4413_v14 = vadd.f32 %v4282_v32, %v3311_v8 }
 0x58c   : > { %v5386_v9 = vpop.f32.mrf.mxu0 }
 0x58d   : > { %v16835_v34 = vadd.f32 %v5384_v4, %v4413_v14 }
 0x58f   : > { %17751 = vst [vmem:[#allocation81_spill] sm:$0xff] %v16835_v34 }
 0x590   : > { %v3182_v61 = vpop.f32.mrf.mxu2 }
 0x591   : > { %v3312_v58 = vadd.f32 %v3182_v61, %v2208_v46  ;;  %v4284_v40 = vpop.f32.mrf.mxu3  ;;  %v6171_v26 = vpop.f32.mrf.mxu1 }
 0x592   : > { %v6491_v4 = vadd.f32 %v6171_v26, %v15953_v17  ;;  %v14920_v26 = vld [vmem:[%s15478_s30 + $0x4a8] sm:$0xff] }
 0x593   : > { %v4414_v56 = vadd.f32 %v4284_v40, %v3312_v58  ;;  %v14728_v58 = vld [vmem:[%s15478_s30 + $0x498] sm:$0xff]  ;;  %v14792_v40 = vld [vmem:[%s15478_s30 + $0x68] sm:$0xff] }
 0x594   : > { %v9477_v28 = vpop.f32.mrf.mxu0  ;;  %13122 = vmatmul.msk.bf16.gmra.mxu1 %vm840_vm1, %v14727_v38 }
 0x595   : > { %13443 = vmatmul.msk.bf16.gmra.mxu2 %vm840_vm1, %v14791_v5  ;;  %v16844_v44 = vadd.f32 %v5386_v9, %v4414_v56  ;;  %v14856_v5 = vld [vmem:[%s15478_s30 + $0x288] sm:$0xff] }
 0x596   : > { %13892 = vmatmul.msk.bf16.gmra.mxu3 %vm840_vm1, %v14855_v54 }
 0x597   : > { %17753 = vst [vmem:[#allocation84_spill] sm:$0xff] %v16844_v44  ;;  %14341 = vmatmul.msk.bf16.gmra.mxu0 %vm840_vm1, %v14919_v16 }
 0x598   : > { %v7273_v48 = vpop.f32.mrf.mxu2 }
 0x599   : > { %v8375_v8 = vpop.f32.mrf.mxu3  ;;  %v7593_v32 = vadd.f32 %v7273_v48, %v6491_v4  ;;  %v6173_v29 = vpop.f32.mrf.mxu1 }
 0x59a   : > { %v6492_v9 = vadd.f32 %v6173_v29, %v15962_v52 }
 0x59b   : > { %v8695_v1 = vadd.f32 %v8375_v8, %v7593_v32 }
 0x59c   : > { %v9479_v14 = vpop.f32.mrf.mxu0 }
 0x59d   : > { %v9797_v38 = vadd.f32 %v9477_v28, %v8695_v1 }
 0x59f   : > { %v10314_v48 = vmul.f32 %v9797_v38, %v9797_v38 }
 0x5a0   : > { %v7275_v54 = vpop.f32.mrf.mxu2 }
 0x5a1   : > { %v7594_v46 = vadd.f32 %v7275_v54, %v6492_v9  ;;  %v8377_v61 = vpop.f32.mrf.mxu3  ;;  %v6176_v17 = vpop.f32.mrf.mxu1 }
 0x5a2   : > { %v6493_v32 = vadd.f32 %v6176_v17, %v15967_v27 }
 0x5a3   : > { %v8696_v16 = vadd.f32 %v8377_v61, %v7594_v46 }
 0x5a4   : > { %v9482_v56 = vpop.f32.mrf.mxu0  ;;  %13123 = vmatmul.msk.bf16.gmra.mxu1 %vm840_vm1, %v14728_v58 }
 0x5a5   : > { %v9798_v4 = vadd.f32 %v9479_v14, %v8696_v16  ;;  %13444 = vmatmul.msk.bf16.gmra.mxu2 %vm840_vm1, %v14792_v40 }
 0x5a6   : > { %13893 = vmatmul.msk.bf16.gmra.mxu3 %vm840_vm1, %v14856_v5 }
 0x5a7   : > { %14342 = vmatmul.msk.bf16.gmra.mxu0 %vm840_vm1, %v14920_v26  ;;  %v14978_v52 = vpack.c.bf16 %v9798_v4, %v9797_v38  ;;  %v10181_v28 = vadd.f32 %v9798_v4, %v9797_v38  ;;  %v10315_v8 = vmul.f32 %v9798_v4, %v9798_v4  ;;  %v14729_v4 = vld [vmem:[%s15478_s30 + $0x4a0] sm:$0xff] }
 0x5a8   : > { %v7278_v29 = vpop.f32.mrf.mxu2 }
 0x5a9   : > { %14979 = vst [vmem:[%s16860_s19] sm:$0xff] %v14978_v52   ;;  %v10442_v14 = vadd.f32 %v10315_v8, %v10314_v48  ;;  %v7595_v1 = vadd.f32 %v7278_v29, %v6493_v32  ;;  %v8380_v9 = vpop.f32.mrf.mxu3  ;;  %v6178_v54 = vpop.f32.mrf.mxu1  ;;  %v14793_v52 = vld [vmem:[%s15478_s30 + $0x70] sm:$0xff] }
 0x5aa   : > { %v6494_v38 = vadd.f32 %v6178_v54, %v15976_v51  ;;  %v14857_v8 = vld [vmem:[%s15478_s30 + $0x290] sm:$0xff] }
 0x5ab   : > { %v8697_v46 = vadd.f32 %v8380_v9, %v7595_v1  ;;  %v14921_v32 = vld [vmem:[%s15478_s30 + $0x4b0] sm:$0xff] }
 0x5ac   : > { %v9484_v61 = vpop.f32.mrf.mxu0 }
 0x5ad   : > { %v9799_v58 = vadd.f32 %v9482_v56, %v8697_v46 }
 0x5af   : > { %v10182_v40 = vadd.f32 %v10181_v28, %v9799_v58  ;;  %v10316_v5 = vmul.f32 %v9799_v58, %v9799_v58 }
 0x5b0   : > { %v7280_v26 = vpop.f32.mrf.mxu2 }
 0x5b1   : > { %v10443_v16 = vadd.f32 %v10442_v14, %v10316_v5  ;;  %v7596_v27 = vadd.f32 %v7280_v26, %v6494_v38  ;;  %v8382_v17 = vpop.f32.mrf.mxu3  ;;  %v6181_v48 = vpop.f32.mrf.mxu1 }
 0x5b2   : > { %v6495_v14 = vadd.f32 %v6181_v48, %v15981_v53  ;;  %v14794_v48 = vld [vmem:[%s15478_s30 + $0x78] sm:$0xff] }
 0x5b3   : > { %v8698_v29 = vadd.f32 %v8382_v17, %v7596_v27 }
 0x5b4   : > { %v9487_v44 = vpop.f32.mrf.mxu0  ;;  %13124 = vmatmul.msk.bf16.gmra.mxu1 %vm840_vm1, %v14729_v4 }
 0x5b5   : > { %v9800_v34 = vadd.f32 %v9484_v61, %v8698_v29  ;;  %13445 = vmatmul.msk.bf16.gmra.mxu2 %vm840_vm1, %v14793_v52  ;;  %v14730_v52 = vld [vmem:[%s15478_s30 + $0x4a8] sm:$0xff] }
 0x5b6   : > { %13894 = vmatmul.msk.bf16.gmra.mxu3 %vm840_vm1, %v14857_v8  ;;  %v14858_v8 = vld [vmem:[%s15478_s30 + $0x298] sm:$0xff] }
 0x5b7   : > { %14343 = vmatmul.msk.bf16.gmra.mxu0 %vm840_vm1, %v14921_v32  ;;  %v14983_v51 = vpack.c.bf16 %v9800_v34, %v9799_v58  ;;  %v10183_v56 = vadd.f32 %v10182_v40, %v9800_v34  ;;  %v10317_v28 = vmul.f32 %v9800_v34, %v9800_v34  ;;  %v14922_v32 = vld [vmem:[%s15478_s30 + $0x4b8] sm:$0xff] }
 0x5b8   : > { %v7283_v1 = vpop.f32.mrf.mxu2 }
 0x5b9   : > { %15295 = vst [vmem:[%s16860_s19 + $0x8] sm:$0xff] %v14983_v51   ;;  %v10444_v9 = vadd.f32 %v10443_v16, %v10317_v28  ;;  %v7597_v54 = vadd.f32 %v7283_v1, %v6495_v14  ;;  %v8385_v46 = vpop.f32.mrf.mxu3  ;;  %v6183_v61 = vpop.f32.mrf.mxu1 }
 0x5ba   : > { %v6496_v58 = vadd.f32 %v6183_v61, %v15990_v63 }
 0x5bb   : > { %v8699_v5 = vadd.f32 %v8385_v46, %v7597_v54 }
 0x5bc   : > { %v9489_v38 = vpop.f32.mrf.mxu0 }
 0x5bd   : > { %v9801_v26 = vadd.f32 %v9487_v44, %v8699_v5 }
 0x5bf   : > { %v10184_v27 = vadd.f32 %v10183_v56, %v9801_v26  ;;  %v10318_v17 = vmul.f32 %v9801_v26, %v9801_v26 }
 0x5c0   : > { %v7285_v34 = vpop.f32.mrf.mxu2 }
 0x5c1   : > { %v10445_v40 = vadd.f32 %v10444_v9, %v10318_v17  ;;  %v7598_v53 = vadd.f32 %v7285_v34, %v6496_v58  ;;  %v8387_v4 = vpop.f32.mrf.mxu3  ;;  %v6186_v16 = vpop.f32.mrf.mxu1 }
 0x5c2   : > { %v6497_v14 = vadd.f32 %v6186_v16, %v15995_v18  ;;  %v14859_v16 = vld [vmem:[%s15478_s30 + $0x2a0] sm:$0xff] }
 0x5c3   : > { %v8700_v29 = vadd.f32 %v8387_v4, %v7598_v53 }
 0x5c4   : > { %v9492_v51 = vpop.f32.mrf.mxu0  ;;  %13125 = vmatmul.msk.bf16.gmra.mxu1 %vm840_vm1, %v14730_v52  ;;  %v14731_v52 = vld [vmem:[%s15478_s30 + $0x4b0] sm:$0xff] }
 0x5c5   : > { %v9802_v28 = vadd.f32 %v9489_v38, %v8700_v29  ;;  %13446 = vmatmul.msk.bf16.gmra.mxu2 %vm840_vm1, %v14794_v48  ;;  %v14795_v48 = vld [vmem:[%s15478_s30 + $0x80] sm:$0xff] }
 0x5c6   : > { %13895 = vmatmul.msk.bf16.gmra.mxu3 %vm840_vm1, %v14858_v8  ;;  %v14923_v8 = vld [vmem:[%s15478_s30 + $0x4c0] sm:$0xff] }
 0x5c7   : > { %14344 = vmatmul.msk.bf16.gmra.mxu0 %vm840_vm1, %v14922_v32  ;;  %v14988_v63 = vpack.c.bf16 %v9802_v28, %v9801_v26  ;;  %v10185_v44 = vadd.f32 %v10184_v27, %v9802_v28  ;;  %v10319_v56 = vmul.f32 %v9802_v28, %v9802_v28 }
 0x5c8   : > { %v7288_v1 = vpop.f32.mrf.mxu2 }
 0x5c9   : > { %15296 = vst [vmem:[%s16860_s19 + $0x10] sm:$0xff] %v14988_v63   ;;  %v10446_v9 = vadd.f32 %v10445_v40, %v10319_v56  ;;  %v7599_v54 = vadd.f32 %v7288_v1, %v6497_v14  ;;  %v8390_v46 = vpop.f32.mrf.mxu3  ;;  %v6188_v61 = vpop.f32.mrf.mxu1 }
 0x5ca   : > { %v6498_v26 = vadd.f32 %v6188_v61, %v16004_v11 }
 0x5cb   : > { %v8701_v5 = vadd.f32 %v8390_v46, %v7599_v54 }
 0x5cc   : > { %v9494_v38 = vpop.f32.mrf.mxu0 }
 0x5cd   : > { %v9803_v17 = vadd.f32 %v9492_v51, %v8701_v5 }
 0x5cf   : > { %v10186_v58 = vadd.f32 %v10185_v44, %v9803_v17  ;;  %v10320_v34 = vmul.f32 %v9803_v17, %v9803_v17 }
 0x5d0   : > { %v7290_v27 = vpop.f32.mrf.mxu2 }
 0x5d1   : > { %v10447_v53 = vadd.f32 %v10446_v9, %v10320_v34  ;;  %v7600_v18 = vadd.f32 %v7290_v27, %v6498_v26  ;;  %v8392_v4 = vpop.f32.mrf.mxu3  ;;  %v6191_v40 = vpop.f32.mrf.mxu1 }
 0x5d2   : > { %v6499_v44 = vadd.f32 %v6191_v40, %v16009_v3 }
 0x5d3   : > { %v8702_v32 = vadd.f32 %v8392_v4, %v7600_v18  ;;  %v14732_v18 = vld [vmem:[%s15478_s30 + $0x4b8] sm:$0xff]  ;;  %v14796_v4 = vld [vmem:[%s15478_s30 + $0x88] sm:$0xff] }
 0x5d4   : > { %v9497_v29 = vpop.f32.mrf.mxu0  ;;  %13126 = vmatmul.msk.bf16.gmra.mxu1 %vm840_vm1, %v14731_v52  ;;  %v14860_v52 = vld [vmem:[%s15478_s30 + $0x2a8] sm:$0xff] }
 0x5d5   : > { %v9804_v28 = vadd.f32 %v9494_v38, %v8702_v32  ;;  %13447 = vmatmul.msk.bf16.gmra.mxu2 %vm840_vm1, %v14795_v48  ;;  %v14924_v48 = vld [vmem:[%s15478_s30 + $0x4c8] sm:$0xff] }
 0x5d6   : > { %13896 = vmatmul.msk.bf16.gmra.mxu3 %vm840_vm1, %v14859_v16 }
 0x5d7   : > { %14345 = vmatmul.msk.bf16.gmra.mxu0 %vm840_vm1, %v14923_v8  ;;  %v14993_v11 = vpack.c.bf16 %v9804_v28, %v9803_v17  ;;  %v10187_v51 = vadd.f32 %v10186_v58, %v9804_v28  ;;  %v10321_v63 = vmul.f32 %v9804_v28, %v9804_v28 }
 0x5d8   : > { %v7293_v56 = vpop.f32.mrf.mxu2 }
 0x5d9   : > { %15297 = vst [vmem:[%s16860_s19 + $0x18] sm:$0xff] %v14993_v11   ;;  %v10448_v14 = vadd.f32 %v10447_v53, %v10321_v63  ;;  %v7601_v1 = vadd.f32 %v7293_v56, %v6499_v44  ;;  %v8395_v9 = vpop.f32.mrf.mxu3  ;;  %v6193_v54 = vpop.f32.mrf.mxu1 }
 0x5da   : > { %v6500_v17 = vadd.f32 %v6193_v54, %v16018_v23 }
 0x5db   : > { %v8703_v46 = vadd.f32 %v8395_v9, %v7601_v1 }
 0x5dc   : > { %v9499_v61 = vpop.f32.mrf.mxu0 }
 0x5dd   : > { %v9805_v5 = vadd.f32 %v9497_v29, %v8703_v46 }
 0x5df   : > { %v10188_v38 = vadd.f32 %v10187_v51, %v9805_v5  ;;  %v10322_v34 = vmul.f32 %v9805_v5, %v9805_v5 }
 0x5e0   : > { %v7295_v58 = vpop.f32.mrf.mxu2 }
 0x5e1   : > { %v10449_v26 = vadd.f32 %v10448_v14, %v10322_v34  ;;  %v7602_v3 = vadd.f32 %v7295_v58, %v6500_v17  ;;  %v8397_v27 = vpop.f32.mrf.mxu3  ;;  %v6196_v53 = vpop.f32.mrf.mxu1  ;;  %v14733_v17 = vld [vmem:[%s15478_s30 + $0x4c0] sm:$0xff]  ;;  %v14797_v58 = vld [vmem:[%s15478_s30 + $0x90] sm:$0xff] }
 0x5e2   : > { %v6501_v28 = vadd.f32 %v6196_v53, %v16023_v6 }
 0x5e3   : > { %v8704_v40 = vadd.f32 %v8397_v27, %v7602_v3  ;;  %v14861_v3 = vld [vmem:[%s15478_s30 + $0x2b0] sm:$0xff] }
 0x5e4   : > { %v9502_v16 = vpop.f32.mrf.mxu0  ;;  %13127 = vmatmul.msk.bf16.gmra.mxu1 %vm840_vm1, %v14732_v18  ;;  %v14925_v27 = vld [vmem:[%s15478_s30 + $0x4d0] sm:$0xff] }
 0x5e5   : > { %v9806_v8 = vadd.f32 %v9499_v61, %v8704_v40  ;;  %13448 = vmatmul.msk.bf16.gmra.mxu2 %vm840_vm1, %v14796_v4 }
 0x5e6   : > { %13897 = vmatmul.msk.bf16.gmra.mxu3 %vm840_vm1, %v14860_v52 }
 0x5e7   : > { %14346 = vmatmul.msk.bf16.gmra.mxu0 %vm840_vm1, %v14924_v48  ;;  %v14998_v23 = vpack.c.bf16 %v9806_v8, %v9805_v5  ;;  %v10189_v32 = vadd.f32 %v10188_v38, %v9806_v8  ;;  %v10323_v29 = vmul.f32 %v9806_v8, %v9806_v8 }
 0x5e8   : > { %v7298_v11 = vpop.f32.mrf.mxu2 }
 0x5e9   : > { %15298 = vst [vmem:[%s16860_s19 + $0x20] sm:$0xff] %v14998_v23   ;;  %v10450_v51 = vadd.f32 %v10449_v26, %v10323_v29  ;;  %v7603_v63 = vadd.f32 %v7298_v11, %v6501_v28  ;;  %v8400_v44 = vpop.f32.mrf.mxu3  ;;  %v6198_v56 = vpop.f32.mrf.mxu1 }
 0x5ea   : > { %v6502_v61 = vadd.f32 %v6198_v56, %v16032_v35 }
 0x5eb   : > { %v8705_v14 = vadd.f32 %v8400_v44, %v7603_v63 }
 0x5ec   : > { %v9504_v1 = vpop.f32.mrf.mxu0 }
 0x5ed   : > { %v9807_v9 = vadd.f32 %v9502_v16, %v8705_v14 }
 0x5ef   : > { %v10190_v54 = vadd.f32 %v10189_v32, %v9807_v9  ;;  %v10324_v46 = vmul.f32 %v9807_v9, %v9807_v9 }
 0x5f0   : > { %v7300_v5 = vpop.f32.mrf.mxu2 }
 0x5f1   : > { %v10451_v38 = vadd.f32 %v10450_v51, %v10324_v46  ;;  %v7604_v6 = vadd.f32 %v7300_v5, %v6502_v61  ;;  %v8402_v34 = vpop.f32.mrf.mxu3  ;;  %v6201_v26 = vpop.f32.mrf.mxu1  ;;  %v14798_v46 = vld [vmem:[%s15478_s30 + $0x98] sm:$0xff] }
 0x5f2   : > { %v6503_v40 = vadd.f32 %v6201_v26, %v16037_v25  ;;  %v14862_v5 = vld [vmem:[%s15478_s30 + $0x2b8] sm:$0xff] }
 0x5f3   : > { %v8706_v18 = vadd.f32 %v8402_v34, %v7604_v6 }
 0x5f4   : > { %v9507_v4 = vpop.f32.mrf.mxu0  ;;  %13128 = vmatmul.msk.bf16.gmra.mxu1 %vm840_vm1, %v14733_v17 }
 0x5f5   : > { %v9808_v53 = vadd.f32 %v9504_v1, %v8706_v18  ;;  %13449 = vmatmul.msk.bf16.gmra.mxu2 %vm840_vm1, %v14797_v58 }
 0x5f6   : > { %13898 = vmatmul.msk.bf16.gmra.mxu3 %vm840_vm1, %v14861_v3 }
 0x5f7   : > { %14347 = vmatmul.msk.bf16.gmra.mxu0 %vm840_vm1, %v14925_v27  ;;  %v15003_v35 = vpack.c.bf16 %v9808_v53, %v9807_v9  ;;  %v10191_v52 = vadd.f32 %v10190_v54, %v9808_v53  ;;  %v10325_v48 = vmul.f32 %v9808_v53, %v9808_v53  ;;  %v14734_v54 = vld [vmem:[%s15478_s30 + $0x4c8] sm:$0xff] }
 0x5f8   : > { %v7303_v16 = vpop.f32.mrf.mxu2 }
 0x5f9   : > { %15299 = vst [vmem:[%s16860_s19 + $0x28] sm:$0xff] %v15003_v35   ;;  %v10452_v8 = vadd.f32 %v10451_v38, %v10325_v48  ;;  %v7605_v23 = vadd.f32 %v7303_v16, %v6503_v40  ;;  %v8405_v32 = vpop.f32.mrf.mxu3  ;;  %v6203_v29 = vpop.f32.mrf.mxu1  ;;  %v14926_v38 = vld [vmem:[%s15478_s30 + $0x4d8] sm:$0xff] }
 0x5fa   : > { %v6504_v56 = vadd.f32 %v6203_v29, %v16046_v55 }
 0x5fb   : > { %v8707_v28 = vadd.f32 %v8405_v32, %v7605_v23 }
 0x5fc   : > { %v9509_v11 = vpop.f32.mrf.mxu0 }
 0x5fd   : > { %v9809_v51 = vadd.f32 %v9507_v4, %v8707_v28 }
 0x5ff   : > { %v10192_v63 = vadd.f32 %v10191_v52, %v9809_v51  ;;  %v10326_v44 = vmul.f32 %v9809_v51, %v9809_v51 }
 0x600   : > { %v7305_v14 = vpop.f32.mrf.mxu2 }
 0x601   : > { %v10453_v1 = vadd.f32 %v10452_v8, %v10326_v44  ;;  %v7606_v25 = vadd.f32 %v7305_v14, %v6504_v56  ;;  %v8407_v9 = vpop.f32.mrf.mxu3  ;;  %v6206_v61 = vpop.f32.mrf.mxu1  ;;  %v14863_v44 = vld [vmem:[%s15478_s30 + $0x2c0] sm:$0xff] }
 0x602   : > { %v6505_v3 = vadd.f32 %v6206_v61, %v16051_v36  ;;  %v14927_v56 = vld [vmem:[%s15478_s30 + $0x4e0] sm:$0xff] }
 0x603   : > { %v8708_v6 = vadd.f32 %v8407_v9, %v7606_v25 }
 0x604   : > { %v9512_v34 = vpop.f32.mrf.mxu0  ;;  %13129 = vmatmul.msk.bf16.gmra.mxu1 %vm840_vm1, %v14734_v54 }
 0x605   : > { %v9810_v17 = vadd.f32 %v9509_v11, %v8708_v6  ;;  %13450 = vmatmul.msk.bf16.gmra.mxu2 %vm840_vm1, %v14798_v46  ;;  %v14735_v11 = vld [vmem:[%s15478_s30 + $0x4d0] sm:$0xff] }
 0x606   : > { %13899 = vmatmul.msk.bf16.gmra.mxu3 %vm840_vm1, %v14862_v5 }
 0x607   : > { %14348 = vmatmul.msk.bf16.gmra.mxu0 %vm840_vm1, %v14926_v38  ;;  %v15008_v55 = vpack.c.bf16 %v9810_v17, %v9809_v51  ;;  %v10193_v58 = vadd.f32 %v10192_v63, %v9810_v17  ;;  %v10327_v26 = vmul.f32 %v9810_v17, %v9810_v17  ;;  %v14799_v51 = vld [vmem:[%s15478_s30 + $0xa0] sm:$0xff] }
 0x608   : > { %v7308_v27 = vpop.f32.mrf.mxu2 }
 0x609   : > { %15300 = vst [vmem:[%s16860_s19 + $0x30] sm:$0xff] %v15008_v55   ;;  %v10454_v18 = vadd.f32 %v10453_v1, %v10327_v26  ;;  %v7607_v4 = vadd.f32 %v7308_v27, %v6505_v3  ;;  %v8410_v53 = vpop.f32.mrf.mxu3  ;;  %v6208_v35 = vpop.f32.mrf.mxu1 }
 0x60a   : > { %v6506_v23 = vadd.f32 %v6208_v35, %v16060_v42  ;;  %v14736_v35 = vld [vmem:[%s15478_s30 + $0x4d8] sm:$0xff] }
 0x60b   : > { %v8709_v52 = vadd.f32 %v8410_v53, %v7607_v4 }
 0x60c   : > { %v9514_v48 = vpop.f32.mrf.mxu0 }
 0x60d   : > { %v9811_v40 = vadd.f32 %v9512_v34, %v8709_v52  ;;  %v14800_v52 = vld [vmem:[%s15478_s30 + $0xa8] sm:$0xff] }
 0x60f   : > { %v10194_v16 = vadd.f32 %v10193_v58, %v9811_v40  ;;  %v10328_v8 = vmul.f32 %v9811_v40, %v9811_v40 }
 0x610   : > { %v7310_v32 = vpop.f32.mrf.mxu2 }
 0x611   : > { %v10455_v29 = vadd.f32 %v10454_v18, %v10328_v8  ;;  %v7608_v36 = vadd.f32 %v7310_v32, %v6506_v23  ;;  %v8412_v28 = vpop.f32.mrf.mxu3  ;;  %v6211_v63 = vpop.f32.mrf.mxu1 }
 0x612   : > { %v6507_v46 = vadd.f32 %v6211_v63, %v16065_v12 }
 0x613   : > { %v8710_v14 = vadd.f32 %v8412_v28, %v7608_v36 }
 0x614   : > { %v9517_v1 = vpop.f32.mrf.mxu0  ;;  %13130 = vmatmul.msk.bf16.gmra.mxu1 %vm840_vm1, %v14735_v11 }
 0x615   : > { %v9812_v25 = vadd.f32 %v9514_v48, %v8710_v14  ;;  %13451 = vmatmul.msk.bf16.gmra.mxu2 %vm840_vm1, %v14799_v51 }
 0x616   : > { %13900 = vmatmul.msk.bf16.gmra.mxu3 %vm840_vm1, %v14863_v44 }
 0x617   : > { %14349 = vmatmul.msk.bf16.gmra.mxu0 %vm840_vm1, %v14927_v56  ;;  %v15013_v42 = vpack.c.bf16 %v9812_v25, %v9811_v40  ;;  %v10195_v9 = vadd.f32 %v10194_v16, %v9812_v25  ;;  %v10329_v54 = vmul.f32 %v9812_v25, %v9812_v25  ;;  %v14864_v40 = vld [vmem:[%s15478_s30 + $0x2c8] sm:$0xff] }
 0x618   : > { %v7313_v61 = vpop.f32.mrf.mxu2  ;;  %v14928_v16 = vld [vmem:[%s15478_s30 + $0x4e8] sm:$0xff] }
 0x619   : > { %15301 = vst [vmem:[%s16860_s19 + $0x38] sm:$0xff] %v15013_v42   ;;  %v10456_v5 = vadd.f32 %v10455_v29, %v10329_v54  ;;  %v7609_v38 = vadd.f32 %v7313_v61, %v6507_v46  ;;  %v8415_v6 = vpop.f32.mrf.mxu3  ;;  %v6213_v34 = vpop.f32.mrf.mxu1 }
 0x61a   : > { %v6508_v27 = vadd.f32 %v6213_v34, %v16074_v30 }
 0x61b   : > { %v8711_v17 = vadd.f32 %v8415_v6, %v7609_v38  ;;  %v14737_v38 = vld [vmem:[%s15478_s30 + $0x4e0] sm:$0xff]  ;;  %v14801_v6 = vld [vmem:[%s15478_s30 + $0xb0] sm:$0xff] }
 0x61c   : > { %v9519_v55 = vpop.f32.mrf.mxu0 }
 0x61d   : > { %v9813_v58 = vadd.f32 %v9517_v1, %v8711_v17  ;;  %v14865_v17 = vld [vmem:[%s15478_s30 + $0x2d0] sm:$0xff] }
 0x61f   : > { %v10196_v26 = vadd.f32 %v10195_v9, %v9813_v58  ;;  %v10330_v3 = vmul.f32 %v9813_v58, %v9813_v58 }
 0x620   : > { %v7315_v18 = vpop.f32.mrf.mxu2 }
 0x621   : > { %v10457_v4 = vadd.f32 %v10456_v5, %v10330_v3  ;;  %v7610_v12 = vadd.f32 %v7315_v18, %v6508_v27  ;;  %v8417_v53 = vpop.f32.mrf.mxu3  ;;  %v6216_v48 = vpop.f32.mrf.mxu1 }
 0x622   : > { %v6509_v28 = vadd.f32 %v6216_v48, %v16079_v13 }
 0x623   : > { %v8712_v8 = vadd.f32 %v8417_v53, %v7610_v12 }
 0x624   : > { %v9522_v23 = vpop.f32.mrf.mxu0  ;;  %13131 = vmatmul.msk.bf16.gmra.mxu1 %vm840_vm1, %v14736_v35 }
 0x625   : > { %v9814_v32 = vadd.f32 %v9519_v55, %v8712_v8  ;;  %13452 = vmatmul.msk.bf16.gmra.mxu2 %vm840_vm1, %v14800_v52  ;;  %v14929_v55 = vld [vmem:[%s15478_s30 + $0x4f0] sm:$0xff] }
 0x626   : > { %13901 = vmatmul.msk.bf16.gmra.mxu3 %vm840_vm1, %v14864_v40 }
 0x627   : > { %14350 = vmatmul.msk.bf16.gmra.mxu0 %vm840_vm1, %v14928_v16  ;;  %v15018_v30 = vpack.c.bf16 %v9814_v32, %v9813_v58  ;;  %v10197_v29 = vadd.f32 %v10196_v26, %v9814_v32  ;;  %v10331_v36 = vmul.f32 %v9814_v32, %v9814_v32 }
 0x628   : > { %v7318_v11 = vpop.f32.mrf.mxu2 }
 0x629   : > { %15302 = vst [vmem:[%s16860_s19 + $0x40] sm:$0xff] %v15018_v30   ;;  %v10458_v51 = vadd.f32 %v10457_v4, %v10331_v36  ;;  %v7611_v63 = vadd.f32 %v7318_v11, %v6509_v28  ;;  %v8420_v44 = vpop.f32.mrf.mxu3  ;;  %v6218_v56 = vpop.f32.mrf.mxu1  ;;  %v14738_v11 = vld [vmem:[%s15478_s30 + $0x4e8] sm:$0xff] }
 0x62a   : > { %v6510_v54 = vadd.f32 %v6218_v56, %v16088_v21  ;;  %v14930_v56 = vld [vmem:[%s15478_s30 + $0x4f8] sm:$0xff] }
 0x62b   : > { %v8713_v14 = vadd.f32 %v8420_v44, %v7611_v63  ;;  %v14866_v44 = vld [vmem:[%s15478_s30 + $0x2d8] sm:$0xff] }
 0x62c   : > { %v9524_v1 = vpop.f32.mrf.mxu0 }
 0x62d   : > { %v9815_v25 = vadd.f32 %v9522_v23, %v8713_v14 }
 0x62f   : > { %v10198_v42 = vadd.f32 %v10197_v29, %v9815_v25  ;;  %v10332_v9 = vmul.f32 %v9815_v25, %v9815_v25 }
 0x630   : > { %v7320_v46 = vpop.f32.mrf.mxu2 }
 0x631   : > { %v10459_v61 = vadd.f32 %v10458_v51, %v10332_v9  ;;  %v7612_v13 = vadd.f32 %v7320_v46, %v6510_v54  ;;  %v8422_v5 = vpop.f32.mrf.mxu3  ;;  %v6221_v34 = vpop.f32.mrf.mxu1  ;;  %v14802_v51 = vld [vmem:[%s15478_s30 + $0xb8] sm:$0xff] }
 0x632   : > { %v6511_v4 = vadd.f32 %v6221_v34, %v16093_v37 }
 0x633   : > { %v8714_v58 = vadd.f32 %v8422_v5, %v7612_v13 }
 0x634   : > { %v9527_v26 = vpop.f32.mrf.mxu0  ;;  %13132 = vmatmul.msk.bf16.gmra.mxu1 %vm840_vm1, %v14737_v38 }
 0x635   : > { %v9816_v3 = vadd.f32 %v9524_v1, %v8714_v58  ;;  %13453 = vmatmul.msk.bf16.gmra.mxu2 %vm840_vm1, %v14801_v6 }
 0x636   : > { %13902 = vmatmul.msk.bf16.gmra.mxu3 %vm840_vm1, %v14865_v17 }
 0x637   : > { %14351 = vmatmul.msk.bf16.gmra.mxu0 %vm840_vm1, %v14929_v55  ;;  %v15023_v21 = vpack.c.bf16 %v9816_v3, %v9815_v25  ;;  %v10199_v27 = vadd.f32 %v10198_v42, %v9816_v3  ;;  %v10333_v18 = vmul.f32 %v9816_v3, %v9816_v3 }
 0x638   : > { %v7323_v12 = vpop.f32.mrf.mxu2 }
 0x639   : > { %15303 = vst [vmem:[%s16860_s19 + $0x48] sm:$0xff] %v15023_v21   ;;  %v10460_v53 = vadd.f32 %v10459_v61, %v10333_v18  ;;  %v7613_v35 = vadd.f32 %v7323_v12, %v6511_v4  ;;  %v8425_v52 = vpop.f32.mrf.mxu3  ;;  %v6223_v48 = vpop.f32.mrf.mxu1  ;;  %v14739_v18 = vld [vmem:[%s15478_s30 + $0x4f0] sm:$0xff]  ;;  %v14803_v4 = vld [vmem:[%s15478_s30 + $0xc0] sm:$0xff] }
 0x63a   : > { %v6512_v30 = vadd.f32 %v6223_v48, %v16102_v49 }
 0x63b   : > { %v8715_v40 = vadd.f32 %v8425_v52, %v7613_v35  ;;  %v14931_v35 = vld [vmem:[%s15478_s30 + $0x500] sm:$0xff] }
 0x63c   : > { %v9529_v16 = vpop.f32.mrf.mxu0 }
 0x63d   : > { %v9817_v8 = vadd.f32 %v9527_v26, %v8715_v40 }
 0x63f   : > { %v10200_v23 = vadd.f32 %v10199_v27, %v9817_v8  ;;  %v10334_v32 = vmul.f32 %v9817_v8, %v9817_v8 }
 0x640   : > { %v7325_v29 = vpop.f32.mrf.mxu2 }
 0x641   : > { %v10461_v36 = vadd.f32 %v10460_v53, %v10334_v32  ;;  %v7614_v37 = vadd.f32 %v7325_v29, %v6512_v30  ;;  %v8427_v28 = vpop.f32.mrf.mxu3  ;;  %v6226_v63 = vpop.f32.mrf.mxu1  ;;  %v14867_v53 = vld [vmem:[%s15478_s30 + $0x2e0] sm:$0xff] }
 0x642   : > { %v6513_v54 = vadd.f32 %v6226_v63, %v16107_v39 }
 0x643   : > { %v8716_v14 = vadd.f32 %v8427_v28, %v7614_v37 }
 0x644   : > { %v9532_v1 = vpop.f32.mrf.mxu0  ;;  %13133 = vmatmul.msk.bf16.gmra.mxu1 %vm840_vm1, %v14738_v11 }
 0x645   : > { %v9818_v25 = vadd.f32 %v9529_v16, %v8716_v14  ;;  %13454 = vmatmul.msk.bf16.gmra.mxu2 %vm840_vm1, %v14802_v51 }
 0x646   : > { %13903 = vmatmul.msk.bf16.gmra.mxu3 %vm840_vm1, %v14866_v44 }
 0x647   : > { %14352 = vmatmul.msk.bf16.gmra.mxu0 %vm840_vm1, %v14930_v56  ;;  %v15028_v49 = vpack.c.bf16 %v9818_v25, %v9817_v8  ;;  %v10201_v42 = vadd.f32 %v10200_v23, %v9818_v25  ;;  %v10335_v9 = vmul.f32 %v9818_v25, %v9818_v25 }
 0x648   : > { %v7328_v46 = vpop.f32.mrf.mxu2 }
 0x649   : > { %15304 = vst [vmem:[%s16860_s19 + $0x50] sm:$0xff] %v15028_v49   ;;  %v10462_v61 = vadd.f32 %v10461_v36, %v10335_v9  ;;  %v7615_v13 = vadd.f32 %v7328_v46, %v6513_v54  ;;  %v8430_v5 = vpop.f32.mrf.mxu3  ;;  %v6228_v38 = vpop.f32.mrf.mxu1  ;;  %v14740_v49 = vld [vmem:[%s15478_s30 + $0x4f8] sm:$0xff]  ;;  %v14868_v54 = vld [vmem:[%s15478_s30 + $0x2e8] sm:$0xff] }
 0x64a   : > { %v6514_v26 = vadd.f32 %v6228_v38, %v16116_v2  ;;  %v14932_v46 = vld [vmem:[%s15478_s30 + $0x508] sm:$0xff] }
 0x64b   : > { %v8717_v6 = vadd.f32 %v8430_v5, %v7615_v13 }
 0x64c   : > { %v9534_v34 = vpop.f32.mrf.mxu0 }
 0x64d   : > { %v9819_v17 = vadd.f32 %v9532_v1, %v8717_v6 }
 0x64f   : > { %v10202_v55 = vadd.f32 %v10201_v42, %v9819_v17  ;;  %v10336_v58 = vmul.f32 %v9819_v17, %v9819_v17  ;;  %v14804_v42 = vld [vmem:[%s15478_s30 + $0xc8] sm:$0xff] }
 0x650   : > { %v7330_v3 = vpop.f32.mrf.mxu2 }
 0x651   : > { %v10463_v21 = vadd.f32 %v10462_v61, %v10336_v58  ;;  %v7616_v39 = vadd.f32 %v7330_v3, %v6514_v26  ;;  %v8432_v27 = vpop.f32.mrf.mxu3  ;;  %v6231_v12 = vpop.f32.mrf.mxu1 }
 0x652   : > { %v6515_v23 = vadd.f32 %v6231_v12, %v16121_v57 }
 0x653   : > { %v8718_v52 = vadd.f32 %v8432_v27, %v7616_v39 }
 0x654   : > { %v9537_v48 = vpop.f32.mrf.mxu0  ;;  %13134 = vmatmul.msk.bf16.gmra.mxu1 %vm840_vm1, %v14739_v18 }
 0x655   : > { %v9820_v40 = vadd.f32 %v9534_v34, %v8718_v52  ;;  %13455 = vmatmul.msk.bf16.gmra.mxu2 %vm840_vm1, %v14803_v4 }
 0x656   : > { %13904 = vmatmul.msk.bf16.gmra.mxu3 %vm840_vm1, %v14867_v53 }
 0x657   : > { %14353 = vmatmul.msk.bf16.gmra.mxu0 %vm840_vm1, %v14931_v35  ;;  %v15033_v2 = vpack.c.bf16 %v9820_v40, %v9819_v17  ;;  %v10203_v16 = vadd.f32 %v10202_v55, %v9820_v40  ;;  %v10337_v8 = vmul.f32 %v9820_v40, %v9820_v40  ;;  %v14805_v40 = vld [vmem:[%s15478_s30 + $0xd0] sm:$0xff] }
 0x658   : > { %v7333_v32 = vpop.f32.mrf.mxu2 }
 0x659   : > { %15305 = vst [vmem:[%s16860_s19 + $0x58] sm:$0xff] %v15033_v2   ;;  %v10464_v30 = vadd.f32 %v10463_v21, %v10337_v8  ;;  %v7617_v29 = vadd.f32 %v7333_v32, %v6515_v23  ;;  %v8435_v36 = vpop.f32.mrf.mxu3  ;;  %v6233_v37 = vpop.f32.mrf.mxu1  ;;  %v14933_v8 = vld [vmem:[%s15478_s30 + $0x510] sm:$0xff] }
 0x65a   : > { %v6516_v56 = vadd.f32 %v6233_v37, %v16130_v45 }
 0x65b   : > { %v8719_v28 = vadd.f32 %v8435_v36, %v7617_v29 }
 0x65c   : > { %v9539_v11 = vpop.f32.mrf.mxu0 }
 0x65d   : > { %v9821_v51 = vadd.f32 %v9537_v48, %v8719_v28  ;;  %v14741_v48 = vld [vmem:[%s15478_s30 + $0x500] sm:$0xff] }
 0x65f   : > { %v10204_v63 = vadd.f32 %v10203_v16, %v9821_v51  ;;  %v10338_v44 = vmul.f32 %v9821_v51, %v9821_v51  ;;  %v14869_v16 = vld [vmem:[%s15478_s30 + $0x2f0] sm:$0xff] }
 0x660   : > { %v7335_v14 = vpop.f32.mrf.mxu2 }
 0x661   : > { %v10465_v1 = vadd.f32 %v10464_v30, %v10338_v44  ;;  %v7618_v57 = vadd.f32 %v7335_v14, %v6516_v56  ;;  %v8437_v25 = vpop.f32.mrf.mxu3  ;;  %v6236_v9 = vpop.f32.mrf.mxu1 }
 0x662   : > { %v6517_v34 = vadd.f32 %v6236_v9, %v16135_v47 }
 0x663   : > { %v8720_v61 = vadd.f32 %v8437_v25, %v7618_v57 }
 0x664   : > { %v9542_v13 = vpop.f32.mrf.mxu0  ;;  %13135 = vmatmul.msk.bf16.gmra.mxu1 %vm840_vm1, %v14740_v49 }
 0x665   : > { %v9822_v5 = vadd.f32 %v9539_v11, %v8720_v61  ;;  %13456 = vmatmul.msk.bf16.gmra.mxu2 %vm840_vm1, %v14804_v42  ;;  %v14806_v61 = vld [vmem:[%s15478_s30 + $0xd8] sm:$0xff] }
 0x666   : > { %13905 = vmatmul.msk.bf16.gmra.mxu3 %vm840_vm1, %v14868_v54 }
 0x667   : > { %14354 = vmatmul.msk.bf16.gmra.mxu0 %vm840_vm1, %v14932_v46  ;;  %v15038_v45 = vpack.c.bf16 %v9822_v5, %v9821_v51  ;;  %v10205_v38 = vadd.f32 %v10204_v63, %v9822_v5  ;;  %v10339_v6 = vmul.f32 %v9822_v5, %v9822_v5  ;;  %v14742_v46 = vld [vmem:[%s15478_s30 + $0x508] sm:$0xff]  ;;  %v14870_v5 = vld [vmem:[%s15478_s30 + $0x2f8] sm:$0xff] }
 0x668   : > { %v7338_v17 = vpop.f32.mrf.mxu2 }
 0x669   : > { %15306 = vst [vmem:[%s16860_s19 + $0x60] sm:$0xff] %v15038_v45   ;;  %v10466_v55 = vadd.f32 %v10465_v1, %v10339_v6  ;;  %v7619_v58 = vadd.f32 %v7338_v17, %v6517_v34  ;;  %v8440_v26 = vpop.f32.mrf.mxu3  ;;  %v6238_v3 = vpop.f32.mrf.mxu1  ;;  %v14934_v45 = vld [vmem:[%s15478_s30 + $0x518] sm:$0xff] }
 0x66a   : > { %v6518_v12 = vadd.f32 %v6238_v3, %v16144_v20 }
 0x66b   : > { %v8721_v21 = vadd.f32 %v8440_v26, %v7619_v58 }
 0x66c   : > { %v9544_v39 = vpop.f32.mrf.mxu0 }
 0x66d   : > { %v9823_v27 = vadd.f32 %v9542_v13, %v8721_v21 }
 0x66f   : > { %v10206_v18 = vadd.f32 %v10205_v38, %v9823_v27  ;;  %v10340_v4 = vmul.f32 %v9823_v27, %v9823_v27 }
 0x670   : > { %v7340_v53 = vpop.f32.mrf.mxu2 }
 0x671   : > { %v10467_v35 = vadd.f32 %v10466_v55, %v10340_v4  ;;  %v7620_v47 = vadd.f32 %v7340_v53, %v6518_v12  ;;  %v8442_v52 = vpop.f32.mrf.mxu3  ;;  %v6241_v2 = vpop.f32.mrf.mxu1 }
 0x672   : > { %v6519_v37 = vadd.f32 %v6241_v2, %v16149_v59  ;;  %v14743_v2 = vld [vmem:[%s15478_s30 + $0x510] sm:$0xff] }
 0x673   : > { %v8722_v23 = vadd.f32 %v8442_v52, %v7620_v47 }
 0x674   : > { %v9547_v32 = vpop.f32.mrf.mxu0  ;;  %13136 = vmatmul.msk.bf16.gmra.mxu1 %vm840_vm1, %v14741_v48 }
 0x675   : > { %v9824_v30 = vadd.f32 %v9544_v39, %v8722_v23  ;;  %13457 = vmatmul.msk.bf16.gmra.mxu2 %vm840_vm1, %v14805_v40  ;;  %v14871_v23 = vld [vmem:[%s15478_s30 + $0x300] sm:$0xff] }
 0x676   : > { %13906 = vmatmul.msk.bf16.gmra.mxu3 %vm840_vm1, %v14869_v16  ;;  %v14807_v16 = vld [vmem:[%s15478_s30 + $0xe0] sm:$0xff] }
 0x677   : > { %14355 = vmatmul.msk.bf16.gmra.mxu0 %vm840_vm1, %v14933_v8  ;;  %v15043_v20 = vpack.c.bf16 %v9824_v30, %v9823_v27  ;;  %v10207_v29 = vadd.f32 %v10206_v18, %v9824_v30  ;;  %v10341_v36 = vmul.f32 %v9824_v30, %v9824_v30 }
 0x678   : > { %v7343_v28 = vpop.f32.mrf.mxu2 }
 0x679   : > { %15307 = vst [vmem:[%s16860_s19 + $0x68] sm:$0xff] %v15043_v20   ;;  %v10468_v11 = vadd.f32 %v10467_v35, %v10341_v36  ;;  %v7621_v51 = vadd.f32 %v7343_v28, %v6519_v37  ;;  %v8445_v63 = vpop.f32.mrf.mxu3  ;;  %v6243_v44 = vpop.f32.mrf.mxu1 }
 0x67a   : > { %v6520_v49 = vadd.f32 %v6243_v44, %v16158_v60 }
 0x67b   : > { %v8723_v56 = vadd.f32 %v8445_v63, %v7621_v51 }
 0x67c   : > { %v9549_v14 = vpop.f32.mrf.mxu0 }
 0x67d   : > { %v9825_v1 = vadd.f32 %v9547_v32, %v8723_v56  ;;  %v14935_v32 = vld [vmem:[%s15478_s30 + $0x520] sm:$0xff] }
 0x67f   : > { %v10208_v57 = vadd.f32 %v10207_v29, %v9825_v1  ;;  %v10342_v25 = vmul.f32 %v9825_v1, %v9825_v1 }
 0x680   : > { %v7345_v42 = vpop.f32.mrf.mxu2 }
 0x681   : > { %v10469_v9 = vadd.f32 %v10468_v11, %v10342_v25  ;;  %v7622_v59 = vadd.f32 %v7345_v42, %v6520_v49  ;;  %v8447_v54 = vpop.f32.mrf.mxu3  ;;  %v6246_v13 = vpop.f32.mrf.mxu1 }
 0x682   : > { %v6521_v58 = vadd.f32 %v6246_v13, %v16163_v7 }
 0x683   : > { %v8724_v38 = vadd.f32 %v8447_v54, %v7622_v59 }
 0x684   : > { %v9552_v6 = vpop.f32.mrf.mxu0  ;;  %13137 = vmatmul.msk.bf16.gmra.mxu1 %vm840_vm1, %v14742_v46  ;;  %v14744_v46 = vld [vmem:[%s15478_s30 + $0x518] sm:$0xff] }
 0x685   : > { %v9826_v34 = vadd.f32 %v9549_v14, %v8724_v38  ;;  %13458 = vmatmul.msk.bf16.gmra.mxu2 %vm840_vm1, %v14806_v61  ;;  %v14808_v61 = vld [vmem:[%s15478_s30 + $0xe8] sm:$0xff] }
 0x686   : > { %13907 = vmatmul.msk.bf16.gmra.mxu3 %vm840_vm1, %v14870_v5  ;;  %v14872_v5 = vld [vmem:[%s15478_s30 + $0x308] sm:$0xff] }
 0x687   : > { %14356 = vmatmul.msk.bf16.gmra.mxu0 %vm840_vm1, %v14934_v45  ;;  %v15048_v60 = vpack.c.bf16 %v9826_v34, %v9825_v1  ;;  %v10209_v17 = vadd.f32 %v10208_v57, %v9826_v34  ;;  %v10343_v55 = vmul.f32 %v9826_v34, %v9826_v34  ;;  %v14936_v45 = vld [vmem:[%s15478_s30 + $0x528] sm:$0xff] }
 0x688   : > { %v7348_v26 = vpop.f32.mrf.mxu2 }
 0x689   : > { %15308 = vst [vmem:[%s16860_s19 + $0x70] sm:$0xff] %v15048_v60   ;;  %v10470_v3 = vadd.f32 %v10469_v9, %v10343_v55  ;;  %v7623_v21 = vadd.f32 %v7348_v26, %v6521_v58  ;;  %v8450_v39 = vpop.f32.mrf.mxu3  ;;  %v6248_v27 = vpop.f32.mrf.mxu1 }
 0x68a   : > { %v6522_v47 = vadd.f32 %v6248_v27, %v16172_v24 }
 0x68b   : > { %v8725_v18 = vadd.f32 %v8450_v39, %v7623_v21 }
 0x68c   : > { %v9554_v4 = vpop.f32.mrf.mxu0 }
 0x68d   : > { %v9827_v12 = vadd.f32 %v9552_v6, %v8725_v18 }
 0x68f   : > { %v10210_v53 = vadd.f32 %v10209_v17, %v9827_v12  ;;  %v10344_v35 = vmul.f32 %v9827_v12, %v9827_v12 }
 0x690   : > { %v7350_v52 = vpop.f32.mrf.mxu2 }
 0x691   : > { %v10471_v48 = vadd.f32 %v10470_v3, %v10344_v35  ;;  %v7624_v7 = vadd.f32 %v7350_v52, %v6522_v47  ;;  %v8452_v40 = vpop.f32.mrf.mxu3  ;;  %v6251_v8 = vpop.f32.mrf.mxu1 }
 0x692   : > { %v6523_v28 = vadd.f32 %v6251_v8, %v16177_v19  ;;  %v14937_v8 = vld [vmem:[%s15478_s30 + $0x530] sm:$0xff] }
 0x693   : > { %v8726_v30 = vadd.f32 %v8452_v40, %v7624_v7  ;;  %v14745_v7 = vld [vmem:[%s15478_s30 + $0x520] sm:$0xff]  ;;  %v14809_v40 = vld [vmem:[%s15478_s30 + $0xf0] sm:$0xff] }
 0x694   : > { %v9557_v20 = vpop.f32.mrf.mxu0  ;;  %13138 = vmatmul.msk.bf16.gmra.mxu1 %vm840_vm1, %v14743_v2 }
 0x695   : > { %v9828_v29 = vadd.f32 %v9554_v4, %v8726_v30  ;;  %13459 = vmatmul.msk.bf16.gmra.mxu2 %vm840_vm1, %v14807_v16  ;;  %v14873_v16 = vld [vmem:[%s15478_s30 + $0x310] sm:$0xff] }
 0x696   : > { %13908 = vmatmul.msk.bf16.gmra.mxu3 %vm840_vm1, %v14871_v23 }
 0x697   : > { %14357 = vmatmul.msk.bf16.gmra.mxu0 %vm840_vm1, %v14935_v32  ;;  %v15053_v24 = vpack.c.bf16 %v9828_v29, %v9827_v12  ;;  %v10211_v36 = vadd.f32 %v10210_v53, %v9828_v29  ;;  %v10345_v37 = vmul.f32 %v9828_v29, %v9828_v29 }
 0x698   : > { %v7353_v11 = vpop.f32.mrf.mxu2 }
 0x699   : > { %15309 = vst [vmem:[%s16860_s19 + $0x78] sm:$0xff] %v15053_v24   ;;  %v10472_v51 = vadd.f32 %v10471_v48, %v10345_v37  ;;  %v7625_v63 = vadd.f32 %v7353_v11, %v6523_v28  ;;  %v8455_v44 = vpop.f32.mrf.mxu3  ;;  %v6253_v56 = vpop.f32.mrf.mxu1 }
 0x69a   : > { %v6524_v42 = vadd.f32 %v6253_v56, %v16186_v0 }
 0x69b   : > { %v8727_v14 = vadd.f32 %v8455_v44, %v7625_v63 }
 0x69c   : > { %v9559_v1 = vpop.f32.mrf.mxu0 }
 0x69d   : > { %v9829_v57 = vadd.f32 %v9557_v20, %v8727_v14 }
 0x69f   : > { %v10212_v25 = vadd.f32 %v10211_v36, %v9829_v57  ;;  %v10346_v49 = vmul.f32 %v9829_v57, %v9829_v57 }
 0x6a0   : > { %v7355_v9 = vpop.f32.mrf.mxu2 }
 0x6a1   : > { %v10473_v59 = vadd.f32 %v10472_v51, %v10346_v49  ;;  %v7626_v19 = vadd.f32 %v7355_v9, %v6524_v42  ;;  %v8457_v54 = vpop.f32.mrf.mxu3  ;;  %v6256_v13 = vpop.f32.mrf.mxu1  ;;  %v14746_v9 = vld [vmem:[%s15478_s30 + $0x528] sm:$0xff] }
 0x6a2   : > { %v6525_v55 = vadd.f32 %v6256_v13, %v16191_v31 }
 0x6a3   : > { %v8728_v38 = vadd.f32 %v8457_v54, %v7626_v19  ;;  %v14874_v54 = vld [vmem:[%s15478_s30 + $0x318] sm:$0xff] }
 0x6a4   : > { %v9562_v6 = vpop.f32.mrf.mxu0  ;;  %13139 = vmatmul.msk.bf16.gmra.mxu1 %vm840_vm1, %v14744_v46  ;;  %v14938_v46 = vld [vmem:[%s15478_s30 + $0x538] sm:$0xff] }
 0x6a5   : > { %v9830_v34 = vadd.f32 %v9559_v1, %v8728_v38  ;;  %13460 = vmatmul.msk.bf16.gmra.mxu2 %vm840_vm1, %v14808_v61 }
 0x6a6   : > { %13909 = vmatmul.msk.bf16.gmra.mxu3 %vm840_vm1, %v14872_v5 }
 0x6a7   : > { %14358 = vmatmul.msk.bf16.gmra.mxu0 %vm840_vm1, %v14936_v45  ;;  %v15058_v0 = vpack.c.bf16 %v9830_v34, %v9829_v57  ;;  %v10213_v60 = vadd.f32 %v10212_v25, %v9830_v34  ;;  %v10347_v17 = vmul.f32 %v9830_v34, %v9830_v34 }
 0x6a8   : > { %v7358_v58 = vpop.f32.mrf.mxu2 }
 0x6a9   : > { %15310 = vst [vmem:[%s16860_s19 + $0x80] sm:$0xff] %v15058_v0   ;;  %v10474_v26 = vadd.f32 %v10473_v59, %v10347_v17  ;;  %v7627_v3 = vadd.f32 %v7358_v58, %v6525_v55  ;;  %v8460_v21 = vpop.f32.mrf.mxu3  ;;  %v6258_v39 = vpop.f32.mrf.mxu1  ;;  %v14810_v59 = vld [vmem:[%s15478_s30 + $0xf8] sm:$0xff] }
 0x6aa   : > { %v6526_v35 = vadd.f32 %v6258_v39, %v16200_v50 }
 0x6ab   : > { %v8729_v27 = vadd.f32 %v8460_v21, %v7627_v3 }
 0x6ac   : > { %v9564_v18 = vpop.f32.mrf.mxu0 }
 0x6ad   : > { %v9831_v4 = vadd.f32 %v9562_v6, %v8729_v27 }
 0x6af   : > { %v10214_v12 = vadd.f32 %v10213_v60, %v9831_v4  ;;  %v10348_v53 = vmul.f32 %v9831_v4, %v9831_v4 }
 0x6b0   : > { %v7360_v47 = vpop.f32.mrf.mxu2 }
 0x6b1   : > { %v10475_v52 = vadd.f32 %v10474_v26, %v10348_v53  ;;  %v7628_v31 = vadd.f32 %v7360_v47, %v6526_v35  ;;  %v8462_v48 = vpop.f32.mrf.mxu3  ;;  %v6261_v2 = vpop.f32.mrf.mxu1  ;;  %v14747_v53 = vld [vmem:[%s15478_s30 + $0x530] sm:$0xff]  ;;  %v14811_v35 = vld [vmem:[%s15478_s30 + $0x100] sm:$0xff] }
 0x6b2   : > { %v6527_v24 = vadd.f32 %v6261_v2, %v16205_v43 }
 0x6b3   : > { %v8730_v23 = vadd.f32 %v8462_v48, %v7628_v31  ;;  %v14939_v31 = vld [vmem:[%s15478_s30 + $0x540] sm:$0xff] }
 0x6b4   : > { %v9567_v32 = vpop.f32.mrf.mxu0  ;;  %13140 = vmatmul.msk.bf16.gmra.mxu1 %vm840_vm1, %v14745_v7 }
 0x6b5   : > { %v9832_v30 = vadd.f32 %v9564_v18, %v8730_v23  ;;  %13461 = vmatmul.msk.bf16.gmra.mxu2 %vm840_vm1, %v14809_v40 }
 0x6b6   : > { %13910 = vmatmul.msk.bf16.gmra.mxu3 %vm840_vm1, %v14873_v16 }
 0x6b7   : > { %14359 = vmatmul.msk.bf16.gmra.mxu0 %vm840_vm1, %v14937_v8  ;;  %v15063_v50 = vpack.c.bf16 %v9832_v30, %v9831_v4  ;;  %v10215_v20 = vadd.f32 %v10214_v12, %v9832_v30  ;;  %v10349_v29 = vmul.f32 %v9832_v30, %v9832_v30 }
 0x6b8   : > { %v7363_v36 = vpop.f32.mrf.mxu2 }
 0x6b9   : > { %15311 = vst [vmem:[%s16860_s19 + $0x88] sm:$0xff] %v15063_v50   ;;  %v10476_v37 = vadd.f32 %v10475_v52, %v10349_v29  ;;  %v7629_v28 = vadd.f32 %v7363_v36, %v6527_v24  ;;  %v8465_v11 = vpop.f32.mrf.mxu3  ;;  %v6263_v51 = vpop.f32.mrf.mxu1  ;;  %v14875_v52 = vld [vmem:[%s15478_s30 + $0x320] sm:$0xff] }
 0x6ba   : > { %v6528_v57 = vadd.f32 %v6263_v51, %v16214_v62 }
 0x6bb   : > { %v8731_v63 = vadd.f32 %v8465_v11, %v7629_v28 }
 0x6bc   : > { %v9569_v44 = vpop.f32.mrf.mxu0 }
 0x6bd   : > { %v9833_v56 = vadd.f32 %v9567_v32, %v8731_v63 }
 0x6bf   : > { %v10216_v14 = vadd.f32 %v10215_v20, %v9833_v56  ;;  %v10350_v1 = vmul.f32 %v9833_v56, %v9833_v56 }
 0x6c0   : > { %v7365_v25 = vpop.f32.mrf.mxu2 }
 0x6c1   : > { %v10477_v49 = vadd.f32 %v10476_v37, %v10350_v1  ;;  %v7630_v43 = vadd.f32 %v7365_v25, %v6528_v57  ;;  %v8467_v42 = vpop.f32.mrf.mxu3  ;;  %v6266_v19 = vpop.f32.mrf.mxu1  ;;  %v14876_v57 = vld [vmem:[%s15478_s30 + $0x328] sm:$0xff] }
 0x6c2   : > { %v6529_v6 = vadd.f32 %v6266_v19, %v16219_v15  ;;  %v14940_v25 = vld [vmem:[%s15478_s30 + $0x548] sm:$0xff] }
 0x6c3   : > { %v8732_v61 = vadd.f32 %v8467_v42, %v7630_v43 }
 0x6c4   : > { %v9572_v13 = vpop.f32.mrf.mxu0  ;;  %13141 = vmatmul.msk.bf16.gmra.mxu1 %vm840_vm1, %v14746_v9 }
 0x6c5   : > { %v9834_v5 = vadd.f32 %v9569_v44, %v8732_v61  ;;  %13462 = vmatmul.msk.bf16.gmra.mxu2 %vm840_vm1, %v14810_v59 }
 0x6c6   : > { %13911 = vmatmul.msk.bf16.gmra.mxu3 %vm840_vm1, %v14874_v54 }
 0x6c7   : > { %14360 = vmatmul.msk.bf16.gmra.mxu0 %vm840_vm1, %v14938_v46  ;;  %v15068_v62 = vpack.c.bf16 %v9834_v5, %v9833_v56  ;;  %v10217_v45 = vadd.f32 %v10216_v14, %v9834_v5  ;;  %v10351_v38 = vmul.f32 %v9834_v5, %v9834_v5  ;;  %v14748_v56 = vld [vmem:[%s15478_s30 + $0x538] sm:$0xff]  ;;  %v14812_v14 = vld [vmem:[%s15478_s30 + $0x108] sm:$0xff] }
 0x6c8   : > { %v7368_v34 = vpop.f32.mrf.mxu2 }
 0x6c9   : > { %15312 = vst [vmem:[%s16860_s19 + $0x90] sm:$0xff] %v15068_v62   ;;  %v10478_v0 = vadd.f32 %v10477_v49, %v10351_v38  ;;  %v7631_v60 = vadd.f32 %v7368_v34, %v6529_v6  ;;  %v8470_v17 = vpop.f32.mrf.mxu3  ;;  %v6268_v55 = vpop.f32.mrf.mxu1 }
 0x6ca   : > { %v6530_v27 = vadd.f32 %v6268_v55, %v16228_v10 }
 0x6cb   : > { %v8733_v58 = vadd.f32 %v8470_v17, %v7631_v60 }
 0x6cc   : > { %v9574_v26 = vpop.f32.mrf.mxu0 }
 0x6cd   : > { %v9835_v3 = vadd.f32 %v9572_v13, %v8733_v58 }
 0x6cf   : > { %v10218_v21 = vadd.f32 %v10217_v45, %v9835_v3  ;;  %v10352_v39 = vmul.f32 %v9835_v3, %v9835_v3 }
 0x6d0   : > { %v7370_v18 = vpop.f32.mrf.mxu2 }
 0x6d1   : > { %v10479_v4 = vadd.f32 %v10478_v0, %v10352_v39  ;;  %v7632_v15 = vadd.f32 %v7370_v18, %v6530_v27  ;;  %v8472_v12 = vpop.f32.mrf.mxu3  ;;  %v6271_v47 = vpop.f32.mrf.mxu1  ;;  %v17754_v0 = vld [vmem:[#allocation85_spill] sm:$0xff]  ;;  %v14877_v39 = vld [vmem:[%s15478_s30 + $0x330] sm:$0xff] }
 0x6d2   : > { %v6531_v8 = vadd.f32 %v6271_v47, %v16233_v41  ;;  %v14941_v27 = vld [vmem:[%s15478_s30 + $0x550] sm:$0xff]  ;;  %v17755_v47 = vld [vmem:[#allocation86_spill] sm:$0xff] }
 0x6d3   : > { %v8734_v48 = vadd.f32 %v8472_v12, %v7632_v15 }
 0x6d4   : > { %v9577_v7 = vpop.f32.mrf.mxu0  ;;  %13142 = vmatmul.msk.bf16.gmra.mxu1 %vm840_vm1, %v14747_v53 }
 0x6d5   : > { %v9836_v40 = vadd.f32 %v9574_v26, %v8734_v48  ;;  %13463 = vmatmul.msk.bf16.gmra.mxu2 %vm840_vm1, %v14811_v35  ;;  %v14749_v26 = vld [vmem:[%s15478_s30 + $0x540] sm:$0xff] }
 0x6d6   : > { %13912 = vmatmul.msk.bf16.gmra.mxu3 %vm840_vm1, %v14875_v52 }
 0x6d7   : > { %14361 = vmatmul.msk.bf16.gmra.mxu0 %vm840_vm1, %v14939_v31  ;;  %v15073_v10 = vpack.c.bf16 %v9836_v40, %v9835_v3  ;;  %v10219_v2 = vadd.f32 %v10218_v21, %v9836_v40  ;;  %v10353_v16 = vmul.f32 %v9836_v40, %v9836_v40  ;;  %v14813_v3 = vld [vmem:[%s15478_s30 + $0x110] sm:$0xff] }
 0x6d8   : > { %v7373_v23 = vpop.f32.mrf.mxu2 }
 0x6d9   : > { %15313 = vst [vmem:[%s16860_s19 + $0x98] sm:$0xff] %v15073_v10   ;;  %v10480_v32 = vadd.f32 %v10479_v4, %v10353_v16  ;;  %v7633_v30 = vadd.f32 %v7373_v23, %v6531_v8  ;;  %v8475_v50 = vpop.f32.mrf.mxu3  ;;  %v6273_v20 = vpop.f32.mrf.mxu1 }
 0x6da   : > { %v6532_v11 = vadd.f32 %v6273_v20, %v16242_v22 }
 0x6db   : > { %v8735_v29 = vadd.f32 %v8475_v50, %v7633_v30  ;;  %v17756_v30 = vld [vmem:[#allocation28_spill] sm:$0xff] }
 0x6dc   : > { %v9579_v24 = vpop.f32.mrf.mxu0 }
 0x6dd   : > { %v9837_v36 = vadd.f32 %v9577_v7, %v8735_v29 }
 0x6df   : > { %v10220_v37 = vadd.f32 %v10219_v2, %v9837_v36  ;;  %v10354_v28 = vmul.f32 %v9837_v36, %v9837_v36 }
 0x6e0   : > { %v7375_v51 = vpop.f32.mrf.mxu2 }
 0x6e1   : > { %v10481_v63 = vadd.f32 %v10480_v32, %v10354_v28  ;;  %v7634_v41 = vadd.f32 %v7375_v51, %v6532_v11  ;;  %v8477_v44 = vpop.f32.mrf.mxu3  ;;  %v6276_v1 = vpop.f32.mrf.mxu1  ;;  %v14814_v28 = vld [vmem:[%s15478_s30 + $0x118] sm:$0xff] }
 0x6e2   : > { %v6533_v19 = vadd.f32 %v6276_v1, %v16247_v33  ;;  %v14878_v51 = vld [vmem:[%s15478_s30 + $0x338] sm:$0xff] }
 0x6e3   : > { %v8736_v49 = vadd.f32 %v8477_v44, %v7634_v41 }
 0x6e4   : > { %v9582_v43 = vpop.f32.mrf.mxu0  ;;  %13143 = vmatmul.msk.bf16.gmra.mxu1 %vm840_vm1, %v14748_v56 }
 0x6e5   : > { %v9838_v42 = vadd.f32 %v9579_v24, %v8736_v49  ;;  %13464 = vmatmul.msk.bf16.gmra.mxu2 %vm840_vm1, %v14812_v14 }
 0x6e6   : > { %13913 = vmatmul.msk.bf16.gmra.mxu3 %vm840_vm1, %v14876_v57 }
 0x6e7   : > { %14362 = vmatmul.msk.bf16.gmra.mxu0 %vm840_vm1, %v14940_v25  ;;  %v15078_v22 = vpack.c.bf16 %v9838_v42, %v9837_v36  ;;  %v10221_v9 = vadd.f32 %v10220_v37, %v9838_v42  ;;  %v10355_v59 = vmul.f32 %v9838_v42, %v9838_v42  ;;  %v14750_v37 = vld [vmem:[%s15478_s30 + $0x548] sm:$0xff] }
 0x6e8   : > { %v7378_v54 = vpop.f32.mrf.mxu2  ;;  %v17757_v25 = vld [vmem:[#allocation31_spill] sm:$0xff] }
 0x6e9   : > { %15314 = vst [vmem:[%s16860_s19 + $0xa0] sm:$0xff] %v15078_v22   ;;  %v10482_v46 = vadd.f32 %v10481_v63, %v10355_v59  ;;  %v7635_v61 = vadd.f32 %v7378_v54, %v6533_v19  ;;  %v8480_v13 = vpop.f32.mrf.mxu3  ;;  %v6278_v5 = vpop.f32.mrf.mxu1  ;;  %v14942_v63 = vld [vmem:[%s15478_s30 + $0x558] sm:$0xff] }
 0x6ea   : > { %v6534_v60 = vadd.f32 %v6278_v5, %v17754_v0  ;;  %v17758_v5 = vld [vmem:[#allocation34_spill] sm:$0xff]  ;;  %v14751_v0 = vld [vmem:[%s15478_s30 + $0x550] sm:$0xff] }
 0x6eb   : > { %v8737_v62 = vadd.f32 %v8480_v13, %v7635_v61 }
 0x6ec   : > { %v9584_v45 = vpop.f32.mrf.mxu0 }
 0x6ed   : > { %v9839_v38 = vadd.f32 %v9582_v43, %v8737_v62 }
 0x6ef   : > { %v10222_v6 = vadd.f32 %v10221_v9, %v9839_v38  ;;  %v10356_v34 = vmul.f32 %v9839_v38, %v9839_v38 }
 0x6f0   : > { %v7380_v17 = vpop.f32.mrf.mxu2 }
 0x6f1   : > { %v10483_v55 = vadd.f32 %v10482_v46, %v10356_v34  ;;  %v7636_v33 = vadd.f32 %v7380_v17, %v6534_v60  ;;  %v8482_v58 = vpop.f32.mrf.mxu3  ;;  %v6281_v21 = vpop.f32.mrf.mxu1  ;;  %v14815_v60 = vld [vmem:[%s15478_s30 + $0x120] sm:$0xff] }
 0x6f2   : > { %v6535_v52 = vadd.f32 %v6281_v21, %v17755_v47 }
 0x6f3   : > { %v8738_v18 = vadd.f32 %v8482_v58, %v7636_v33  ;;  %v14943_v33 = vld [vmem:[%s15478_s30 + $0x560] sm:$0xff] }
 0x6f4   : > { %v9587_v4 = vpop.f32.mrf.mxu0  ;;  %13144 = vmatmul.msk.bf16.gmra.mxu1 %vm840_vm1, %v14749_v26 }
 0x6f5   : > { %v9840_v15 = vadd.f32 %v9584_v45, %v8738_v18  ;;  %13465 = vmatmul.msk.bf16.gmra.mxu2 %vm840_vm1, %v14813_v3  ;;  %v17759_v18 = vld [vmem:[#allocation37_spill] sm:$0xff] }
 0x6f6   : > { %13914 = vmatmul.msk.bf16.gmra.mxu3 %vm840_vm1, %v14877_v39 }
 0x6f7   : > { %14363 = vmatmul.msk.bf16.gmra.mxu0 %vm840_vm1, %v14941_v27  ;;  %v15083_v12 = vpack.c.bf16 %v9840_v15, %v9839_v38  ;;  %v10223_v53 = vadd.f32 %v10222_v6, %v9840_v15  ;;  %v10357_v35 = vmul.f32 %v9840_v15, %v9840_v15 }
 0x6f8   : > { %v7383_v31 = vpop.f32.mrf.mxu2 }
 0x6f9   : > { %15315 = vst [vmem:[%s16860_s19 + $0xa8] sm:$0xff] %v15083_v12   ;;  %v10484_v48 = vadd.f32 %v10483_v55, %v10357_v35  ;;  %v7637_v7 = vadd.f32 %v7383_v31, %v6535_v52  ;;  %v8485_v40 = vpop.f32.mrf.mxu3  ;;  %v6283_v10 = vpop.f32.mrf.mxu1  ;;  %v14879_v55 = vld [vmem:[%s15478_s30 + $0x340] sm:$0xff] }
 0x6fa   : > { %v6536_v50 = vadd.f32 %v6283_v10, %v17756_v30  ;;  %v17760_v10 = vld [vmem:[#allocation40_spill] sm:$0xff]  ;;  %v14752_v30 = vld [vmem:[%s15478_s30 + $0x558] sm:$0xff] }
 0x6fb   : > { %v8739_v2 = vadd.f32 %v8485_v40, %v7637_v7 }
 0x6fc   : > { %v9589_v16 = vpop.f32.mrf.mxu0 }
 0x6fd   : > { %v9841_v8 = vadd.f32 %v9587_v4, %v8739_v2 }
 0x6ff   : > { %v10224_v23 = vadd.f32 %v10223_v53, %v9841_v8  ;;  %v10358_v32 = vmul.f32 %v9841_v8, %v9841_v8 }
 0x700   : > { %v7385_v20 = vpop.f32.mrf.mxu2 }
 0x701   : > { %v10485_v29 = vadd.f32 %v10484_v48, %v10358_v32  ;;  %v7638_v24 = vadd.f32 %v7385_v20, %v6536_v50  ;;  %v8487_v36 = vpop.f32.mrf.mxu3  ;;  %v6286_v11 = vpop.f32.mrf.mxu1  ;;  %v14816_v50 = vld [vmem:[%s15478_s30 + $0x128] sm:$0xff] }
 0x702   : > { %v6537_v49 = vadd.f32 %v6286_v11, %v17757_v25 }
 0x703   : > { %v8740_v41 = vadd.f32 %v8487_v36, %v7638_v24  ;;  %v14944_v24 = vld [vmem:[%s15478_s30 + $0x568] sm:$0xff] }
 0x704   : > { %v9592_v44 = vpop.f32.mrf.mxu0  ;;  %13145 = vmatmul.msk.bf16.gmra.mxu1 %vm840_vm1, %v14750_v37 }
 0x705   : > { %v9842_v56 = vadd.f32 %v9589_v16, %v8740_v41  ;;  %13466 = vmatmul.msk.bf16.gmra.mxu2 %vm840_vm1, %v14814_v28  ;;  %v17761_v41 = vld [vmem:[#allocation43_spill] sm:$0xff] }
 0x706   : > { %13915 = vmatmul.msk.bf16.gmra.mxu3 %vm840_vm1, %v14878_v51 }
 0x707   : > { %14364 = vmatmul.msk.bf16.gmra.mxu0 %vm840_vm1, %v14942_v63  ;;  %v15088_v14 = vpack.c.bf16 %v9842_v56, %v9841_v8  ;;  %v10225_v1 = vadd.f32 %v10224_v23, %v9842_v56  ;;  %v10359_v57 = vmul.f32 %v9842_v56, %v9842_v56 }
 0x708   : > { %v7388_v43 = vpop.f32.mrf.mxu2 }
 0x709   : > { %15316 = vst [vmem:[%s16860_s19 + $0xb0] sm:$0xff] %v15088_v14   ;;  %v10486_v42 = vadd.f32 %v10485_v29, %v10359_v57  ;;  %v7639_v22 = vadd.f32 %v7388_v43, %v6537_v49  ;;  %v8490_v9 = vpop.f32.mrf.mxu3  ;;  %v6288_v59 = vpop.f32.mrf.mxu1  ;;  %v14880_v29 = vld [vmem:[%s15478_s30 + $0x348] sm:$0xff] }
 0x70a   : > { %v6538_v62 = vadd.f32 %v6288_v59, %v17758_v5  ;;  %v17762_v59 = vld [vmem:[#allocation46_spill] sm:$0xff] }
 0x70b   : > { %v8741_v19 = vadd.f32 %v8490_v9, %v7639_v22  ;;  %v14753_v5 = vld [vmem:[%s15478_s30 + $0x560] sm:$0xff] }
 0x70c   : > { %v9594_v54 = vpop.f32.mrf.mxu0 }
 0x70d   : > { %v9843_v46 = vadd.f32 %v9592_v44, %v8741_v19 }
 0x70f   : > { %v10226_v61 = vadd.f32 %v10225_v1, %v9843_v46  ;;  %v10360_v13 = vmul.f32 %v9843_v46, %v9843_v46 }
 0x710   : > { %v7390_v45 = vpop.f32.mrf.mxu2 }
 0x711   : > { %v10487_v38 = vadd.f32 %v10486_v42, %v10360_v13  ;;  %v7640_v6 = vadd.f32 %v7390_v45, %v6538_v62  ;;  %v8492_v34 = vpop.f32.mrf.mxu3  ;;  %v6291_v17 = vpop.f32.mrf.mxu1  ;;  %v14817_v62 = vld [vmem:[%s15478_s30 + $0x130] sm:$0xff] }
 0x712   : > { %v6539_v4 = vadd.f32 %v6291_v17, %v17759_v18 }
 0x713   : > { %v8742_v58 = vadd.f32 %v8492_v34, %v7640_v6  ;;  %v14945_v6 = vld [vmem:[%s15478_s30 + $0x570] sm:$0xff] }
 0x714   : > { %v9597_v26 = vpop.f32.mrf.mxu0  ;;  %13146 = vmatmul.msk.bf16.gmra.mxu1 %vm840_vm1, %v14751_v0 }
 0x715   : > { %v9844_v3 = vadd.f32 %v9594_v54, %v8742_v58  ;;  %13467 = vmatmul.msk.bf16.gmra.mxu2 %vm840_vm1, %v14815_v60  ;;  %v17763_v58 = vld [vmem:[#allocation49_spill] sm:$0xff] }
 0x716   : > { %13916 = vmatmul.msk.bf16.gmra.mxu3 %vm840_vm1, %v14879_v55 }
 0x717   : > { %14365 = vmatmul.msk.bf16.gmra.mxu0 %vm840_vm1, %v14943_v33  ;;  %v15093_v21 = vpack.c.bf16 %v9844_v3, %v9843_v46  ;;  %v10227_v39 = vadd.f32 %v10226_v61, %v9844_v3  ;;  %v10361_v27 = vmul.f32 %v9844_v3, %v9844_v3 }
 0x718   : > { %v7393_v15 = vpop.f32.mrf.mxu2 }
 0x719   : > { %15317 = vst [vmem:[%s16860_s19 + $0xb8] sm:$0xff] %v15093_v21   ;;  %v10488_v12 = vadd.f32 %v10487_v38, %v10361_v27  ;;  %v7641_v53 = vadd.f32 %v7393_v15, %v6539_v4  ;;  %v8495_v35 = vpop.f32.mrf.mxu3  ;;  %v6293_v47 = vpop.f32.mrf.mxu1  ;;  %v14881_v38 = vld [vmem:[%s15478_s30 + $0x350] sm:$0xff] }
 0x71a   : > { %v6540_v2 = vadd.f32 %v6293_v47, %v17760_v10  ;;  %v17764_v47 = vld [vmem:[#allocation52_spill] sm:$0xff]  ;;  %v14754_v10 = vld [vmem:[%s15478_s30 + $0x568] sm:$0xff] }
 0x71b   : > { %v8743_v52 = vadd.f32 %v8495_v35, %v7641_v53 }
 0x71c   : > { %v9599_v31 = vpop.f32.mrf.mxu0 }
 0x71d   : > { %v9845_v48 = vadd.f32 %v9597_v26, %v8743_v52 }
 0x71f   : > { %v10228_v7 = vadd.f32 %v10227_v39, %v9845_v48  ;;  %v10362_v40 = vmul.f32 %v9845_v48, %v9845_v48 }
 0x720   : > { %v7395_v16 = vpop.f32.mrf.mxu2 }
 0x721   : > { %v10489_v8 = vadd.f32 %v10488_v12, %v10362_v40  ;;  %v7642_v23 = vadd.f32 %v7395_v16, %v6540_v2  ;;  %v8497_v32 = vpop.f32.mrf.mxu3  ;;  %v6296_v20 = vpop.f32.mrf.mxu1  ;;  %v14818_v2 = vld [vmem:[%s15478_s30 + $0x138] sm:$0xff] }
 0x722   : > { %v6541_v44 = vadd.f32 %v6296_v20, %v17761_v41 }
 0x723   : > { %v8744_v36 = vadd.f32 %v8497_v32, %v7642_v23  ;;  %v14946_v23 = vld [vmem:[%s15478_s30 + $0x578] sm:$0xff] }
 0x724   : > { %v9602_v37 = vpop.f32.mrf.mxu0  ;;  %13147 = vmatmul.msk.bf16.gmra.mxu1 %vm840_vm1, %v14752_v30 }
 0x725   : > { %v9846_v28 = vadd.f32 %v9599_v31, %v8744_v36  ;;  %13468 = vmatmul.msk.bf16.gmra.mxu2 %vm840_vm1, %v14816_v50  ;;  %v17765_v36 = vld [vmem:[#allocation55_spill] sm:$0xff] }
 0x726   : > { %13917 = vmatmul.msk.bf16.gmra.mxu3 %vm840_vm1, %v14880_v29 }
 0x727   : > { %14366 = vmatmul.msk.bf16.gmra.mxu0 %vm840_vm1, %v14944_v24  ;;  %v15098_v11 = vpack.c.bf16 %v9846_v28, %v9845_v48  ;;  %v10229_v51 = vadd.f32 %v10228_v7, %v9846_v28  ;;  %v10363_v63 = vmul.f32 %v9846_v28, %v9846_v28 }
 0x728   : > { %v7398_v56 = vpop.f32.mrf.mxu2 }
 0x729   : > { %15318 = vst [vmem:[%s16860_s19 + $0xc0] sm:$0xff] %v15098_v11   ;;  %v10490_v14 = vadd.f32 %v10489_v8, %v10363_v63  ;;  %v7643_v1 = vadd.f32 %v7398_v56, %v6541_v44  ;;  %v8500_v57 = vpop.f32.mrf.mxu3  ;;  %v6298_v25 = vpop.f32.mrf.mxu1  ;;  %v14882_v8 = vld [vmem:[%s15478_s30 + $0x358] sm:$0xff] }
 0x72a   : > { %v6542_v19 = vadd.f32 %v6298_v25, %v17762_v59  ;;  %v17766_v25 = vld [vmem:[#allocation58_spill] sm:$0xff]  ;;  %v14755_v59 = vld [vmem:[%s15478_s30 + $0x570] sm:$0xff] }
 0x72b   : > { %v8745_v49 = vadd.f32 %v8500_v57, %v7643_v1 }
 0x72c   : > { %v9604_v43 = vpop.f32.mrf.mxu0 }
 0x72d   : > { %v9847_v42 = vadd.f32 %v9602_v37, %v8745_v49 }
 0x72f   : > { %v10230_v22 = vadd.f32 %v10229_v51, %v9847_v42  ;;  %v10364_v9 = vmul.f32 %v9847_v42, %v9847_v42 }
 0x730   : > { %v7400_v54 = vpop.f32.mrf.mxu2 }
 0x731   : > { %v10491_v46 = vadd.f32 %v10490_v14, %v10364_v9  ;;  %v7644_v61 = vadd.f32 %v7400_v54, %v6542_v19  ;;  %v8502_v13 = vpop.f32.mrf.mxu3  ;;  %v6301_v45 = vpop.f32.mrf.mxu1  ;;  %v14819_v19 = vld [vmem:[%s15478_s30 + $0x140] sm:$0xff] }
 0x732   : > { %v6543_v26 = vadd.f32 %v6301_v45, %v17763_v58 }
 0x733   : > { %v8746_v34 = vadd.f32 %v8502_v13, %v7644_v61  ;;  %v14947_v61 = vld [vmem:[%s15478_s30 + $0x580] sm:$0xff] }
 0x734   : > { %v9607_v0 = vpop.f32.mrf.mxu0  ;;  %13148 = vmatmul.msk.bf16.gmra.mxu1 %vm840_vm1, %v14753_v5 }
 0x735   : > { %v9848_v60 = vadd.f32 %v9604_v43, %v8746_v34  ;;  %13469 = vmatmul.msk.bf16.gmra.mxu2 %vm840_vm1, %v14817_v62  ;;  %v17767_v34 = vld [vmem:[#allocation61_spill] sm:$0xff] }
 0x736   : > { %13918 = vmatmul.msk.bf16.gmra.mxu3 %vm840_vm1, %v14881_v38 }
 0x737   : > { %14367 = vmatmul.msk.bf16.gmra.mxu0 %vm840_vm1, %v14945_v6  ;;  %v15103_v17 = vpack.c.bf16 %v9848_v60, %v9847_v42  ;;  %v10231_v55 = vadd.f32 %v10230_v22, %v9848_v60  ;;  %v10365_v33 = vmul.f32 %v9848_v60, %v9848_v60 }
 0x738   : > { %v7403_v3 = vpop.f32.mrf.mxu2 }
 0x739   : > { %15319 = vst [vmem:[%s16860_s19 + $0xc8] sm:$0xff] %v15103_v17   ;;  %v10492_v21 = vadd.f32 %v10491_v46, %v10365_v33  ;;  %v7645_v39 = vadd.f32 %v7403_v3, %v6543_v26  ;;  %v8505_v27 = vpop.f32.mrf.mxu3  ;;  %v6303_v18 = vpop.f32.mrf.mxu1  ;;  %v14883_v46 = vld [vmem:[%s15478_s30 + $0x360] sm:$0xff] }
 0x73a   : > { %v6544_v52 = vadd.f32 %v6303_v18, %v17764_v47  ;;  %v17768_v18 = vld [vmem:[#allocation64_spill] sm:$0xff]  ;;  %v14756_v47 = vld [vmem:[%s15478_s30 + $0x578] sm:$0xff] }
 0x73b   : > { %v8747_v4 = vadd.f32 %v8505_v27, %v7645_v39 }
 0x73c   : > { %v9609_v15 = vpop.f32.mrf.mxu0 }
 0x73d   : > { %v9849_v12 = vadd.f32 %v9607_v0, %v8747_v4 }
 0x73f   : > { %v10232_v53 = vadd.f32 %v10231_v55, %v9849_v12  ;;  %v10366_v35 = vmul.f32 %v9849_v12, %v9849_v12 }
 0x740   : > { %v7405_v31 = vpop.f32.mrf.mxu2 }
 0x741   : > { %v10493_v48 = vadd.f32 %v10492_v21, %v10366_v35  ;;  %v7646_v7 = vadd.f32 %v7405_v31, %v6544_v52  ;;  %v8507_v40 = vpop.f32.mrf.mxu3  ;;  %v6306_v16 = vpop.f32.mrf.mxu1  ;;  %v14820_v52 = vld [vmem:[%s15478_s30 + $0x148] sm:$0xff] }
 0x742   : > { %v6545_v37 = vadd.f32 %v6306_v16, %v17765_v36 }
 0x743   : > { %v8748_v32 = vadd.f32 %v8507_v40, %v7646_v7  ;;  %v14948_v7 = vld [vmem:[%s15478_s30 + $0x588] sm:$0xff] }
 0x744   : > { %v9612_v30 = vpop.f32.mrf.mxu0  ;;  %13149 = vmatmul.msk.bf16.gmra.mxu1 %vm840_vm1, %v14754_v10 }
 0x745   : > { %v9850_v50 = vadd.f32 %v9609_v15, %v8748_v32  ;;  %13470 = vmatmul.msk.bf16.gmra.mxu2 %vm840_vm1, %v14818_v2  ;;  %v17769_v32 = vld [vmem:[#allocation67_spill] sm:$0xff] }
 0x746   : > { %13919 = vmatmul.msk.bf16.gmra.mxu3 %vm840_vm1, %v14882_v8 }
 0x747   : > { %14368 = vmatmul.msk.bf16.gmra.mxu0 %vm840_vm1, %v14946_v23  ;;  %v15108_v20 = vpack.c.bf16 %v9850_v50, %v9849_v12  ;;  %v10233_v29 = vadd.f32 %v10232_v53, %v9850_v50  ;;  %v10367_v24 = vmul.f32 %v9850_v50, %v9850_v50 }
 0x748   : > { %v7408_v28 = vpop.f32.mrf.mxu2 }
 0x749   : > { %15320 = vst [vmem:[%s16860_s19 + $0xd0] sm:$0xff] %v15108_v20   ;;  %v10494_v11 = vadd.f32 %v10493_v48, %v10367_v24  ;;  %v7647_v51 = vadd.f32 %v7408_v28, %v6545_v37  ;;  %v8510_v63 = vpop.f32.mrf.mxu3  ;;  %v6308_v41 = vpop.f32.mrf.mxu1  ;;  %v14884_v48 = vld [vmem:[%s15478_s30 + $0x368] sm:$0xff] }
 0x74a   : > { %v6546_v49 = vadd.f32 %v6308_v41, %v17766_v25  ;;  %v17770_v41 = vld [vmem:[#allocation70_spill] sm:$0xff] }
 0x74b   : > { %v8749_v44 = vadd.f32 %v8510_v63, %v7647_v51  ;;  %v14757_v25 = vld [vmem:[%s15478_s30 + $0x580] sm:$0xff] }
 0x74c   : > { %v9614_v56 = vpop.f32.mrf.mxu0 }
 0x74d   : > { %v9851_v14 = vadd.f32 %v9612_v30, %v8749_v44 }
 0x74f   : > { %v10234_v1 = vadd.f32 %v10233_v29, %v9851_v14  ;;  %v10368_v57 = vmul.f32 %v9851_v14, %v9851_v14 }
 0x750   : > { %v7410_v43 = vpop.f32.mrf.mxu2 }
 0x751   : > { %v10495_v42 = vadd.f32 %v10494_v11, %v10368_v57  ;;  %v7648_v22 = vadd.f32 %v7410_v43, %v6546_v49  ;;  %v8512_v9 = vpop.f32.mrf.mxu3  ;;  %v6311_v54 = vpop.f32.mrf.mxu1  ;;  %v14821_v49 = vld [vmem:[%s15478_s30 + $0x150] sm:$0xff] }
 0x752   : > { %v6547_v0 = vadd.f32 %v6311_v54, %v17767_v34 }
 0x753   : > { %v8750_v13 = vadd.f32 %v8512_v9, %v7648_v22  ;;  %v14949_v22 = vld [vmem:[%s15478_s30 + $0x590] sm:$0xff] }
 0x754   : > { %v9617_v5 = vpop.f32.mrf.mxu0  ;;  %13150 = vmatmul.msk.bf16.gmra.mxu1 %vm840_vm1, %v14755_v59 }
 0x755   : > { %v9852_v62 = vadd.f32 %v9614_v56, %v8750_v13  ;;  %13471 = vmatmul.msk.bf16.gmra.mxu2 %vm840_vm1, %v14819_v19  ;;  %v17771_v13 = vld [vmem:[#allocation73_spill] sm:$0xff] }
 0x756   : > { %13920 = vmatmul.msk.bf16.gmra.mxu3 %vm840_vm1, %v14883_v46 }
 0x757   : > { %14369 = vmatmul.msk.bf16.gmra.mxu0 %vm840_vm1, %v14947_v61  ;;  %v15113_v45 = vpack.c.bf16 %v9852_v62, %v9851_v14  ;;  %v10235_v38 = vadd.f32 %v10234_v1, %v9852_v62  ;;  %v10369_v6 = vmul.f32 %v9852_v62, %v9852_v62 }
 0x758   : > { %v7413_v60 = vpop.f32.mrf.mxu2 }
 0x759   : > { %15321 = vst [vmem:[%s16860_s19 + $0xd8] sm:$0xff] %v15113_v45   ;;  %v10496_v17 = vadd.f32 %v10495_v42, %v10369_v6  ;;  %v7649_v55 = vadd.f32 %v7413_v60, %v6547_v0  ;;  %v8515_v33 = vpop.f32.mrf.mxu3  ;;  %v6313_v58 = vpop.f32.mrf.mxu1  ;;  %v14885_v42 = vld [vmem:[%s15478_s30 + $0x370] sm:$0xff] }
 0x75a   : > { %v6548_v4 = vadd.f32 %v6313_v58, %v17768_v18  ;;  %v17772_v58 = vld [vmem:[#allocation76_spill] sm:$0xff]  ;;  %v14758_v18 = vld [vmem:[%s15478_s30 + $0x588] sm:$0xff] }
 0x75b   : > { %v8751_v26 = vadd.f32 %v8515_v33, %v7649_v55 }
 0x75c   : > { %v9619_v3 = vpop.f32.mrf.mxu0 }
 0x75d   : > { %v9853_v21 = vadd.f32 %v9617_v5, %v8751_v26 }
 0x75f   : > { %v10236_v39 = vadd.f32 %v10235_v38, %v9853_v21  ;;  %v10370_v27 = vmul.f32 %v9853_v21, %v9853_v21 }
 0x760   : > { %v7415_v15 = vpop.f32.mrf.mxu2 }
 0x761   : > { %v10497_v12 = vadd.f32 %v10496_v17, %v10370_v27  ;;  %v7650_v53 = vadd.f32 %v7415_v15, %v6548_v4  ;;  %v8517_v35 = vpop.f32.mrf.mxu3  ;;  %v6316_v31 = vpop.f32.mrf.mxu1  ;;  %v14822_v4 = vld [vmem:[%s15478_s30 + $0x158] sm:$0xff] }
 0x762   : > { %v6549_v30 = vadd.f32 %v6316_v31, %v17769_v32 }
 0x763   : > { %v8752_v40 = vadd.f32 %v8517_v35, %v7650_v53  ;;  %v14950_v53 = vld [vmem:[%s15478_s30 + $0x598] sm:$0xff] }
 0x764   : > { %v9622_v10 = vpop.f32.mrf.mxu0  ;;  %13151 = vmatmul.msk.bf16.gmra.mxu1 %vm840_vm1, %v14756_v47 }
 0x765   : > { %v9854_v2 = vadd.f32 %v9619_v3, %v8752_v40  ;;  %13472 = vmatmul.msk.bf16.gmra.mxu2 %vm840_vm1, %v14820_v52  ;;  %v17773_v40 = vld [vmem:[#allocation79_spill] sm:$0xff] }
 0x766   : > { %13921 = vmatmul.msk.bf16.gmra.mxu3 %vm840_vm1, %v14884_v48 }
 0x767   : > { %14370 = vmatmul.msk.bf16.gmra.mxu0 %vm840_vm1, %v14948_v7  ;;  %v15118_v16 = vpack.c.bf16 %v9854_v2, %v9853_v21  ;;  %v10237_v8 = vadd.f32 %v10236_v39, %v9854_v2  ;;  %v10371_v23 = vmul.f32 %v9854_v2, %v9854_v2 }
 0x768   : > { %v7418_v50 = vpop.f32.mrf.mxu2 }
 0x769   : > { %15322 = vst [vmem:[%s16860_s19 + $0xe0] sm:$0xff] %v15118_v16   ;;  %v10498_v20 = vadd.f32 %v10497_v12, %v10371_v23  ;;  %v7651_v29 = vadd.f32 %v7418_v50, %v6549_v30  ;;  %v8520_v24 = vpop.f32.mrf.mxu3  ;;  %v6318_v36 = vpop.f32.mrf.mxu1  ;;  %v14886_v12 = vld [vmem:[%s15478_s30 + $0x378] sm:$0xff] }
 0x76a   : > { %v6550_v44 = vadd.f32 %v6318_v36, %v17770_v41  ;;  %v17774_v36 = vld [vmem:[#allocation82_spill] sm:$0xff]  ;;  %v14759_v41 = vld [vmem:[%s15478_s30 + $0x590] sm:$0xff] }
 0x76b   : > { %v8753_v37 = vadd.f32 %v8520_v24, %v7651_v29 }
 0x76c   : > { %v9624_v28 = vpop.f32.mrf.mxu0 }
 0x76d   : > { %v9855_v11 = vadd.f32 %v9622_v10, %v8753_v37 }
 0x76f   : > { %v10238_v51 = vadd.f32 %v10237_v8, %v9855_v11  ;;  %v10372_v63 = vmul.f32 %v9855_v11, %v9855_v11 }
 0x770   : > { %v7420_v56 = vpop.f32.mrf.mxu2 }
 0x771   : > { %v10499_v14 = vadd.f32 %v10498_v20, %v10372_v63  ;;  %v7652_v1 = vadd.f32 %v7420_v56, %v6550_v44  ;;  %v8522_v57 = vpop.f32.mrf.mxu3  ;;  %v6321_v43 = vpop.f32.mrf.mxu1  ;;  %v14823_v44 = vld [vmem:[%s15478_s30 + $0x160] sm:$0xff] }
 0x772   : > { %v6551_v5 = vadd.f32 %v6321_v43, %v17771_v13 }
 0x773   : > { %v8754_v9 = vadd.f32 %v8522_v57, %v7652_v1  ;;  %v14951_v1 = vld [vmem:[%s15478_s30 + $0x5a0] sm:$0xff] }
 0x774   : > { %v9627_v59 = vpop.f32.mrf.mxu0  ;;  %13152 = vmatmul.msk.bf16.gmra.mxu1 %vm840_vm1, %v14757_v25 }
 0x775   : > { %v9856_v19 = vadd.f32 %v9624_v28, %v8754_v9  ;;  %13473 = vmatmul.msk.bf16.gmra.mxu2 %vm840_vm1, %v14821_v49  ;;  %v17775_v9 = vld [vmem:[#allocation2_spill] sm:$0xff] }
 0x776   : > { %13922 = vmatmul.msk.bf16.gmra.mxu3 %vm840_vm1, %v14885_v42 }
 0x777   : > { %14371 = vmatmul.msk.bf16.gmra.mxu0 %vm840_vm1, %v14949_v22  ;;  %v15123_v54 = vpack.c.bf16 %v9856_v19, %v9855_v11  ;;  %v10239_v46 = vadd.f32 %v10238_v51, %v9856_v19  ;;  %v10373_v61 = vmul.f32 %v9856_v19, %v9856_v19 }
 0x778   : > { %v7423_v62 = vpop.f32.mrf.mxu2 }
 0x779   : > { %15323 = vst [vmem:[%s16860_s19 + $0xe8] sm:$0xff] %v15123_v54   ;;  %v10500_v45 = vadd.f32 %v10499_v14, %v10373_v61  ;;  %v7653_v38 = vadd.f32 %v7423_v62, %v6551_v5  ;;  %v8525_v6 = vpop.f32.mrf.mxu3  ;;  %v6323_v34 = vpop.f32.mrf.mxu1  ;;  %v14887_v14 = vld [vmem:[%s15478_s30 + $0x380] sm:$0xff] }
 0x77a   : > { %v6552_v26 = vadd.f32 %v6323_v34, %v17772_v58  ;;  %v17776_v34 = vld [vmem:[#allocation4_spill] sm:$0xff]  ;;  %v14760_v58 = vld [vmem:[%s15478_s30 + $0x598] sm:$0xff] }
 0x77b   : > { %v8755_v0 = vadd.f32 %v8525_v6, %v7653_v38 }
 0x77c   : > { %v9629_v60 = vpop.f32.mrf.mxu0 }
 0x77d   : > { %v9857_v17 = vadd.f32 %v9627_v59, %v8755_v0 }
 0x77f   : > { %v10240_v55 = vadd.f32 %v10239_v46, %v9857_v17  ;;  %v10374_v33 = vmul.f32 %v9857_v17, %v9857_v17 }
 0x780   : > { %v7425_v3 = vpop.f32.mrf.mxu2 }
 0x781   : > { %v10501_v21 = vadd.f32 %v10500_v45, %v10374_v33  ;;  %v7654_v39 = vadd.f32 %v7425_v3, %v6552_v26  ;;  %v8527_v27 = vpop.f32.mrf.mxu3  ;;  %v6326_v15 = vpop.f32.mrf.mxu1  ;;  %v14824_v26 = vld [vmem:[%s15478_s30 + $0x168] sm:$0xff] }
 0x782   : > { %v6553_v10 = vadd.f32 %v6326_v15, %v17773_v40 }
 0x783   : > { %v8756_v35 = vadd.f32 %v8527_v27, %v7654_v39  ;;  %v14952_v39 = vld [vmem:[%s15478_s30 + $0x5a8] sm:$0xff] }
 0x784   : > { %v9632_v47 = vpop.f32.mrf.mxu0  ;;  %13153 = vmatmul.msk.bf16.gmra.mxu1 %vm840_vm1, %v14758_v18 }
 0x785   : > { %v9858_v52 = vadd.f32 %v9629_v60, %v8756_v35  ;;  %13474 = vmatmul.msk.bf16.gmra.mxu2 %vm840_vm1, %v14822_v4  ;;  %v17777_v35 = vld [vmem:[#allocation6_spill] sm:$0xff] }
 0x786   : > { %13923 = vmatmul.msk.bf16.gmra.mxu3 %vm840_vm1, %v14886_v12 }
 0x787   : > { %14372 = vmatmul.msk.bf16.gmra.mxu0 %vm840_vm1, %v14950_v53  ;;  %v15128_v31 = vpack.c.bf16 %v9858_v52, %v9857_v17  ;;  %v10241_v48 = vadd.f32 %v10240_v55, %v9858_v52  ;;  %v10375_v7 = vmul.f32 %v9858_v52, %v9858_v52 }
 0x788   : > { %v7428_v2 = vpop.f32.mrf.mxu2 }
 0x789   : > { %15324 = vst [vmem:[%s16860_s19 + $0xf0] sm:$0xff] %v15128_v31   ;;  %v10502_v16 = vadd.f32 %v10501_v21, %v10375_v7  ;;  %v7655_v8 = vadd.f32 %v7428_v2, %v6553_v10  ;;  %v8530_v23 = vpop.f32.mrf.mxu3  ;;  %v6328_v32 = vpop.f32.mrf.mxu1  ;;  %v14888_v21 = vld [vmem:[%s15478_s30 + $0x388] sm:$0xff] }
 0x78a   : > { %v6554_v37 = vadd.f32 %v6328_v32, %v17774_v36  ;;  %v17778_v32 = vld [vmem:[#allocation8_spill] sm:$0xff]  ;;  %v14761_v36 = vld [vmem:[%s15478_s30 + $0x5a0] sm:$0xff] }
 0x78b   : > { %v8757_v30 = vadd.f32 %v8530_v23, %v7655_v8 }
 0x78c   : > { %v9634_v50 = vpop.f32.mrf.mxu0 }
 0x78d   : > { %v9859_v20 = vadd.f32 %v9632_v47, %v8757_v30 }
 0x78f   : > { %v10242_v29 = vadd.f32 %v10241_v48, %v9859_v20  ;;  %v10376_v24 = vmul.f32 %v9859_v20, %v9859_v20 }
 0x790   : > { %v7430_v28 = vpop.f32.mrf.mxu2 }
 0x791   : > { %v10503_v11 = vadd.f32 %v10502_v16, %v10376_v24  ;;  %v7656_v51 = vadd.f32 %v7430_v28, %v6554_v37  ;;  %v8532_v63 = vpop.f32.mrf.mxu3  ;;  %v6331_v56 = vpop.f32.mrf.mxu1  ;;  %v14825_v37 = vld [vmem:[%s15478_s30 + $0x170] sm:$0xff] }
 0x792   : > { %v6555_v59 = vadd.f32 %v6331_v56, %v17775_v9 }
 0x793   : > { %v8758_v57 = vadd.f32 %v8532_v63, %v7656_v51  ;;  %v14953_v51 = vld [vmem:[%s15478_s30 + $0x5b0] sm:$0xff] }
 0x794   : > { %v9637_v25 = vpop.f32.mrf.mxu0  ;;  %13154 = vmatmul.msk.bf16.gmra.mxu1 %vm840_vm1, %v14759_v41 }
 0x795   : > { %v9860_v49 = vadd.f32 %v9634_v50, %v8758_v57  ;;  %13475 = vmatmul.msk.bf16.gmra.mxu2 %vm840_vm1, %v14823_v44  ;;  %v17779_v57 = vld [vmem:[#allocation10_spill] sm:$0xff] }
 0x796   : > { %13924 = vmatmul.msk.bf16.gmra.mxu3 %vm840_vm1, %v14887_v14 }
 0x797   : > { %14373 = vmatmul.msk.bf16.gmra.mxu0 %vm840_vm1, %v14951_v1  ;;  %v15133_v43 = vpack.c.bf16 %v9860_v49, %v9859_v20  ;;  %v10243_v42 = vadd.f32 %v10242_v29, %v9860_v49  ;;  %v10377_v22 = vmul.f32 %v9860_v49, %v9860_v49 }
 0x798   : > { %v7433_v19 = vpop.f32.mrf.mxu2 }
 0x799   : > { %15325 = vst [vmem:[%s16860_s19 + $0xf8] sm:$0xff] %v15133_v43   ;;  %v10504_v54 = vadd.f32 %v10503_v11, %v10377_v22  ;;  %v7657_v46 = vadd.f32 %v7433_v19, %v6555_v59  ;;  %v8535_v61 = vpop.f32.mrf.mxu3  ;;  %v6333_v13 = vpop.f32.mrf.mxu1  ;;  %v14889_v11 = vld [vmem:[%s15478_s30 + $0x390] sm:$0xff] }
 0x79a   : > { %v6556_v0 = vadd.f32 %v6333_v13, %v17776_v34  ;;  %v17780_v13 = vld [vmem:[#allocation12_spill] sm:$0xff]  ;;  %v14762_v34 = vld [vmem:[%s15478_s30 + $0x5a8] sm:$0xff] }
 0x79b   : > { %v8759_v5 = vadd.f32 %v8535_v61, %v7657_v46 }
 0x79c   : > { %v9639_v62 = vpop.f32.mrf.mxu0 }
 0x79d   : > { %v9861_v45 = vadd.f32 %v9637_v25, %v8759_v5 }
 0x79f   : > { %v10244_v38 = vadd.f32 %v10243_v42, %v9861_v45  ;;  %v10378_v6 = vmul.f32 %v9861_v45, %v9861_v45 }
 0x7a0   : > { %v7435_v60 = vpop.f32.mrf.mxu2 }
 0x7a1   : > { %v10505_v17 = vadd.f32 %v10504_v54, %v10378_v6  ;;  %v7658_v55 = vadd.f32 %v7435_v60, %v6556_v0  ;;  %v8537_v33 = vpop.f32.mrf.mxu3  ;;  %v6336_v3 = vpop.f32.mrf.mxu1  ;;  %v14826_v0 = vld [vmem:[%s15478_s30 + $0x178] sm:$0xff] }
 0x7a2   : > { %v6557_v47 = vadd.f32 %v6336_v3, %v17777_v35 }
 0x7a3   : > { %v8760_v27 = vadd.f32 %v8537_v33, %v7658_v55  ;;  %v14954_v55 = vld [vmem:[%s15478_s30 + $0x5b8] sm:$0xff] }
 0x7a4   : > { %v9642_v18 = vpop.f32.mrf.mxu0  ;;  %13155 = vmatmul.msk.bf16.gmra.mxu1 %vm840_vm1, %v14760_v58 }
 0x7a5   : > { %v9862_v4 = vadd.f32 %v9639_v62, %v8760_v27  ;;  %13476 = vmatmul.msk.bf16.gmra.mxu2 %vm840_vm1, %v14824_v26  ;;  %v17781_v27 = vld [vmem:[#allocation14_spill] sm:$0xff] }
 0x7a6   : > { %13925 = vmatmul.msk.bf16.gmra.mxu3 %vm840_vm1, %v14888_v21 }
 0x7a7   : > { %14374 = vmatmul.msk.bf16.gmra.mxu0 %vm840_vm1, %v14952_v39  ;;  %v15138_v15 = vpack.c.bf16 %v9862_v4, %v9861_v45  ;;  %v10245_v12 = vadd.f32 %v10244_v38, %v9862_v4  ;;  %v10379_v53 = vmul.f32 %v9862_v4, %v9862_v4 }
 0x7a8   : > { %v7438_v52 = vpop.f32.mrf.mxu2 }
 0x7a9   : > { %15326 = vst [vmem:[%s16860_s19 + $0x100] sm:$0xff] %v15138_v15   ;;  %v10506_v31 = vadd.f32 %v10505_v17, %v10379_v53  ;;  %v7659_v48 = vadd.f32 %v7438_v52, %v6557_v47  ;;  %v8540_v7 = vpop.f32.mrf.mxu3  ;;  %v6338_v40 = vpop.f32.mrf.mxu1  ;;  %v14890_v17 = vld [vmem:[%s15478_s30 + $0x398] sm:$0xff] }
 0x7aa   : > { %v6558_v30 = vadd.f32 %v6338_v40, %v17778_v32  ;;  %v17782_v40 = vld [vmem:[#allocation16_spill] sm:$0xff] }
 0x7ab   : > { %v8761_v10 = vadd.f32 %v8540_v7, %v7659_v48  ;;  %v14763_v32 = vld [vmem:[%s15478_s30 + $0x5b0] sm:$0xff] }
 0x7ac   : > { %v9644_v2 = vpop.f32.mrf.mxu0 }
 0x7ad   : > { %v9863_v16 = vadd.f32 %v9642_v18, %v8761_v10 }
 0x7af   : > { %v10246_v8 = vadd.f32 %v10245_v12, %v9863_v16  ;;  %v10380_v23 = vmul.f32 %v9863_v16, %v9863_v16 }
 0x7b0   : > { %v7440_v50 = vpop.f32.mrf.mxu2 }
 0x7b1   : > { %v10507_v20 = vadd.f32 %v10506_v31, %v10380_v23  ;;  %v7660_v29 = vadd.f32 %v7440_v50, %v6558_v30  ;;  %v8542_v24 = vpop.f32.mrf.mxu3  ;;  %v6341_v28 = vpop.f32.mrf.mxu1  ;;  %v14827_v30 = vld [vmem:[%s15478_s30 + $0x180] sm:$0xff] }
 0x7b2   : > { %v6559_v25 = vadd.f32 %v6341_v28, %v17779_v57 }
 0x7b3   : > { %v8762_v63 = vadd.f32 %v8542_v24, %v7660_v29  ;;  %v14955_v29 = vld [vmem:[%s15478_s30 + $0x5c0] sm:$0xff] }
 0x7b4   : > { %v9647_v41 = vpop.f32.mrf.mxu0  ;;  %13156 = vmatmul.msk.bf16.gmra.mxu1 %vm840_vm1, %v14761_v36 }
 0x7b5   : > { %v9864_v44 = vadd.f32 %v9644_v2, %v8762_v63  ;;  %13477 = vmatmul.msk.bf16.gmra.mxu2 %vm840_vm1, %v14825_v37  ;;  %v17783_v63 = vld [vmem:[#allocation18_spill] sm:$0xff] }
 0x7b6   : > { %13926 = vmatmul.msk.bf16.gmra.mxu3 %vm840_vm1, %v14889_v11 }
 0x7b7   : > { %14375 = vmatmul.msk.bf16.gmra.mxu0 %vm840_vm1, %v14953_v51  ;;  %v15143_v56 = vpack.c.bf16 %v9864_v44, %v9863_v16  ;;  %v10247_v14 = vadd.f32 %v10246_v8, %v9864_v44  ;;  %v10381_v1 = vmul.f32 %v9864_v44, %v9864_v44 }
 0x7b8   : > { %v7443_v49 = vpop.f32.mrf.mxu2 }
 0x7b9   : > { %15327 = vst [vmem:[%s16860_s19 + $0x108] sm:$0xff] %v15143_v56   ;;  %v10508_v43 = vadd.f32 %v10507_v20, %v10381_v1  ;;  %v7661_v42 = vadd.f32 %v7443_v49, %v6559_v25  ;;  %v8545_v22 = vpop.f32.mrf.mxu3  ;;  %v6343_v9 = vpop.f32.mrf.mxu1  ;;  %v14891_v20 = vld [vmem:[%s15478_s30 + $0x3a0] sm:$0xff] }
 0x7ba   : > { %v6560_v5 = vadd.f32 %v6343_v9, %v17780_v13  ;;  %v17784_v9 = vld [vmem:[#allocation20_spill] sm:$0xff]  ;;  %v14764_v13 = vld [vmem:[%s15478_s30 + $0x5b8] sm:$0xff] }
 0x7bb   : > { %v8763_v59 = vadd.f32 %v8545_v22, %v7661_v42 }
 0x7bc   : > { %v9649_v19 = vpop.f32.mrf.mxu0 }
 0x7bd   : > { %v9865_v54 = vadd.f32 %v9647_v41, %v8763_v59 }
 0x7bf   : > { %v10248_v46 = vadd.f32 %v10247_v14, %v9865_v54  ;;  %v10382_v61 = vmul.f32 %v9865_v54, %v9865_v54 }
 0x7c0   : > { %v7445_v62 = vpop.f32.mrf.mxu2 }
 0x7c1   : > { %v10509_v45 = vadd.f32 %v10508_v43, %v10382_v61  ;;  %v7662_v38 = vadd.f32 %v7445_v62, %v6560_v5  ;;  %v8547_v6 = vpop.f32.mrf.mxu3  ;;  %v6346_v60 = vpop.f32.mrf.mxu1  ;;  %v14828_v5 = vld [vmem:[%s15478_s30 + $0x188] sm:$0xff] }
 0x7c2   : > { %v6561_v18 = vadd.f32 %v6346_v60, %v17781_v27 }
 0x7c3   : > { %v8764_v33 = vadd.f32 %v8547_v6, %v7662_v38  ;;  %v14956_v38 = vld [vmem:[%s15478_s30 + $0x5c8] sm:$0xff] }
 0x7c4   : > { %v9652_v58 = vpop.f32.mrf.mxu0  ;;  %13157 = vmatmul.msk.bf16.gmra.mxu1 %vm840_vm1, %v14762_v34 }
 0x7c5   : > { %v9866_v26 = vadd.f32 %v9649_v19, %v8764_v33  ;;  %13478 = vmatmul.msk.bf16.gmra.mxu2 %vm840_vm1, %v14826_v0  ;;  %v17785_v33 = vld [vmem:[#allocation22_spill] sm:$0xff] }
 0x7c6   : > { %13927 = vmatmul.msk.bf16.gmra.mxu3 %vm840_vm1, %v14890_v17 }
 0x7c7   : > { %14376 = vmatmul.msk.bf16.gmra.mxu0 %vm840_vm1, %v14954_v55  ;;  %v15148_v3 = vpack.c.bf16 %v9866_v26, %v9865_v54  ;;  %v10249_v21 = vadd.f32 %v10248_v46, %v9866_v26  ;;  %v10383_v39 = vmul.f32 %v9866_v26, %v9866_v26 }
 0x7c8   : > { %v7448_v4 = vpop.f32.mrf.mxu2 }
 0x7c9   : > { %15328 = vst [vmem:[%s16860_s19 + $0x110] sm:$0xff] %v15148_v3   ;;  %v10510_v15 = vadd.f32 %v10509_v45, %v10383_v39  ;;  %v7663_v12 = vadd.f32 %v7448_v4, %v6561_v18  ;;  %v8550_v53 = vpop.f32.mrf.mxu3  ;;  %v6348_v35 = vpop.f32.mrf.mxu1  ;;  %v14892_v45 = vld [vmem:[%s15478_s30 + $0x3a8] sm:$0xff] }
 0x7ca   : > { %v6562_v10 = vadd.f32 %v6348_v35, %v17782_v40  ;;  %v17786_v35 = vld [vmem:[#allocation24_spill] sm:$0xff]  ;;  %v14765_v40 = vld [vmem:[%s15478_s30 + $0x5c0] sm:$0xff] }
 0x7cb   : > { %v8765_v47 = vadd.f32 %v8550_v53, %v7663_v12 }
 0x7cc   : > { %v9654_v52 = vpop.f32.mrf.mxu0 }
 0x7cd   : > { %v9867_v31 = vadd.f32 %v9652_v58, %v8765_v47 }
 0x7cf   : > { %v10250_v48 = vadd.f32 %v10249_v21, %v9867_v31  ;;  %v10384_v7 = vmul.f32 %v9867_v31, %v9867_v31 }
 0x7d0   : > { %v7450_v2 = vpop.f32.mrf.mxu2 }
 0x7d1   : > { %v10511_v16 = vadd.f32 %v10510_v15, %v10384_v7  ;;  %v7664_v8 = vadd.f32 %v7450_v2, %v6562_v10  ;;  %v8552_v23 = vpop.f32.mrf.mxu3  ;;  %v6351_v50 = vpop.f32.mrf.mxu1  ;;  %v14829_v10 = vld [vmem:[%s15478_s30 + $0x190] sm:$0xff] }
 0x7d2   : > { %v6563_v41 = vadd.f32 %v6351_v50, %v17783_v63 }
 0x7d3   : > { %v8766_v24 = vadd.f32 %v8552_v23, %v7664_v8  ;;  %v14957_v8 = vld [vmem:[%s15478_s30 + $0x5d0] sm:$0xff] }
 0x7d4   : > { %v9657_v36 = vpop.f32.mrf.mxu0  ;;  %13158 = vmatmul.msk.bf16.gmra.mxu1 %vm840_vm1, %v14763_v32 }
 0x7d5   : > { %v9868_v37 = vadd.f32 %v9654_v52, %v8766_v24  ;;  %13479 = vmatmul.msk.bf16.gmra.mxu2 %vm840_vm1, %v14827_v30  ;;  %v17787_v24 = vld [vmem:[#allocation26_spill] sm:$0xff] }
 0x7d6   : > { %13928 = vmatmul.msk.bf16.gmra.mxu3 %vm840_vm1, %v14891_v20 }
 0x7d7   : > { %14377 = vmatmul.msk.bf16.gmra.mxu0 %vm840_vm1, %v14955_v29  ;;  %v15153_v28 = vpack.c.bf16 %v9868_v37, %v9867_v31  ;;  %v10251_v11 = vadd.f32 %v10250_v48, %v9868_v37  ;;  %v10385_v51 = vmul.f32 %v9868_v37, %v9868_v37 }
 0x7d8   : > { %v7453_v44 = vpop.f32.mrf.mxu2 }
 0x7d9   : > { %15329 = vst [vmem:[%s16860_s19 + $0x118] sm:$0xff] %v15153_v28   ;;  %v10512_v56 = vadd.f32 %v10511_v16, %v10385_v51  ;;  %v7665_v14 = vadd.f32 %v7453_v44, %v6563_v41  ;;  %v8555_v1 = vpop.f32.mrf.mxu3  ;;  %v6353_v57 = vpop.f32.mrf.mxu1  ;;  %v14893_v16 = vld [vmem:[%s15478_s30 + $0x3b0] sm:$0xff] }
 0x7da   : > { %v6564_v59 = vadd.f32 %v6353_v57, %v17784_v9  ;;  %v17788_v57 = vld [vmem:[#allocation29_spill] sm:$0xff]  ;;  %v14766_v9 = vld [vmem:[%s15478_s30 + $0x5c8] sm:$0xff] }
 0x7db   : > { %v8767_v25 = vadd.f32 %v8555_v1, %v7665_v14 }
 0x7dc   : > { %v9659_v49 = vpop.f32.mrf.mxu0 }
 0x7dd   : > { %v9869_v43 = vadd.f32 %v9657_v36, %v8767_v25 }
 0x7df   : > { %v10252_v42 = vadd.f32 %v10251_v11, %v9869_v43  ;;  %v10386_v22 = vmul.f32 %v9869_v43, %v9869_v43 }
 0x7e0   : > { %v7455_v19 = vpop.f32.mrf.mxu2 }
 0x7e1   : > { %v10513_v54 = vadd.f32 %v10512_v56, %v10386_v22  ;;  %v7666_v46 = vadd.f32 %v7455_v19, %v6564_v59  ;;  %v8557_v61 = vpop.f32.mrf.mxu3  ;;  %v6356_v62 = vpop.f32.mrf.mxu1  ;;  %v14830_v59 = vld [vmem:[%s15478_s30 + $0x198] sm:$0xff] }
 0x7e2   : > { %v6565_v58 = vadd.f32 %v6356_v62, %v17785_v33 }
 0x7e3   : > { %v8768_v6 = vadd.f32 %v8557_v61, %v7666_v46  ;;  %v14958_v46 = vld [vmem:[%s15478_s30 + $0x5d8] sm:$0xff] }
 0x7e4   : > { %v9662_v34 = vpop.f32.mrf.mxu0  ;;  %13159 = vmatmul.msk.bf16.gmra.mxu1 %vm840_vm1, %v14764_v13 }
 0x7e5   : > { %v9870_v0 = vadd.f32 %v9659_v49, %v8768_v6  ;;  %13480 = vmatmul.msk.bf16.gmra.mxu2 %vm840_vm1, %v14828_v5  ;;  %v17789_v6 = vld [vmem:[#allocation32_spill] sm:$0xff] }
 0x7e6   : > { %13929 = vmatmul.msk.bf16.gmra.mxu3 %vm840_vm1, %v14892_v45 }
 0x7e7   : > { %14378 = vmatmul.msk.bf16.gmra.mxu0 %vm840_vm1, %v14956_v38  ;;  %v15158_v60 = vpack.c.bf16 %v9870_v0, %v9869_v43  ;;  %v10253_v17 = vadd.f32 %v10252_v42, %v9870_v0  ;;  %v10387_v55 = vmul.f32 %v9870_v0, %v9870_v0 }
 0x7e8   : > { %v7458_v26 = vpop.f32.mrf.mxu2 }
 0x7e9   : > { %15330 = vst [vmem:[%s16860_s19 + $0x120] sm:$0xff] %v15158_v60   ;;  %v10514_v3 = vadd.f32 %v10513_v54, %v10387_v55  ;;  %v7667_v21 = vadd.f32 %v7458_v26, %v6565_v58  ;;  %v8560_v39 = vpop.f32.mrf.mxu3  ;;  %v6358_v27 = vpop.f32.mrf.mxu1  ;;  %v14894_v54 = vld [vmem:[%s15478_s30 + $0x3b8] sm:$0xff] }
 0x7ea   : > { %v6566_v47 = vadd.f32 %v6358_v27, %v17786_v35  ;;  %v17790_v27 = vld [vmem:[#allocation35_spill] sm:$0xff]  ;;  %v14767_v35 = vld [vmem:[%s15478_s30 + $0x5d0] sm:$0xff] }
 0x7eb   : > { %v8769_v18 = vadd.f32 %v8560_v39, %v7667_v21 }
 0x7ec   : > { %v9664_v4 = vpop.f32.mrf.mxu0 }
 0x7ed   : > { %v9871_v15 = vadd.f32 %v9662_v34, %v8769_v18 }
 0x7ef   : > { %v10254_v12 = vadd.f32 %v10253_v17, %v9871_v15  ;;  %v10388_v53 = vmul.f32 %v9871_v15, %v9871_v15 }
 0x7f0   : > { %v7460_v52 = vpop.f32.mrf.mxu2 }
 0x7f1   : > { %v10515_v31 = vadd.f32 %v10514_v3, %v10388_v53  ;;  %v7668_v48 = vadd.f32 %v7460_v52, %v6566_v47  ;;  %v8562_v7 = vpop.f32.mrf.mxu3  ;;  %v6361_v2 = vpop.f32.mrf.mxu1  ;;  %v14831_v47 = vld [vmem:[%s15478_s30 + $0x1a0] sm:$0xff] }
 0x7f2   : > { %v6567_v36 = vadd.f32 %v6361_v2, %v17787_v24 }
 0x7f3   : > { %v8770_v23 = vadd.f32 %v8562_v7, %v7668_v48  ;;  %v14959_v48 = vld [vmem:[%s15478_s30 + $0x5e0] sm:$0xff] }
 0x7f4   : > { %v9667_v32 = vpop.f32.mrf.mxu0  ;;  %13160 = vmatmul.msk.bf16.gmra.mxu1 %vm840_vm1, %v14765_v40 }
 0x7f5   : > { %v9872_v30 = vadd.f32 %v9664_v4, %v8770_v23  ;;  %13481 = vmatmul.msk.bf16.gmra.mxu2 %vm840_vm1, %v14829_v10  ;;  %v17791_v23 = vld [vmem:[#allocation38_spill] sm:$0xff] }
 0x7f6   : > { %13930 = vmatmul.msk.bf16.gmra.mxu3 %vm840_vm1, %v14893_v16 }
 0x7f7   : > { %14379 = vmatmul.msk.bf16.gmra.mxu0 %vm840_vm1, %v14957_v8  ;;  %v15163_v50 = vpack.c.bf16 %v9872_v30, %v9871_v15  ;;  %v10255_v20 = vadd.f32 %v10254_v12, %v9872_v30  ;;  %v10389_v29 = vmul.f32 %v9872_v30, %v9872_v30 }
 0x7f8   : > { %v7463_v37 = vpop.f32.mrf.mxu2 }
 0x7f9   : > { %15331 = vst [vmem:[%s16860_s19 + $0x128] sm:$0xff] %v15163_v50   ;;  %v10516_v28 = vadd.f32 %v10515_v31, %v10389_v29  ;;  %v7669_v11 = vadd.f32 %v7463_v37, %v6567_v36  ;;  %v8565_v51 = vpop.f32.mrf.mxu3  ;;  %v6363_v63 = vpop.f32.mrf.mxu1  ;;  %v14895_v31 = vld [vmem:[%s15478_s30 + $0x3c0] sm:$0xff] }
 0x7fa   : > { %v6568_v25 = vadd.f32 %v6363_v63, %v17788_v57  ;;  %v17792_v63 = vld [vmem:[#allocation41_spill] sm:$0xff] }
 0x7fb   : > { %v8771_v41 = vadd.f32 %v8565_v51, %v7669_v11  ;;  %v14768_v57 = vld [vmem:[%s15478_s30 + $0x5d8] sm:$0xff] }
 0x7fc   : > { %v9669_v44 = vpop.f32.mrf.mxu0 }
 0x7fd   : > { %v9873_v56 = vadd.f32 %v9667_v32, %v8771_v41 }
 0x7ff   : > { %v10256_v14 = vadd.f32 %v10255_v20, %v9873_v56  ;;  %v10390_v1 = vmul.f32 %v9873_v56, %v9873_v56 }
 0x800   : > { %v7465_v49 = vpop.f32.mrf.mxu2 }
 0x801   : > { %v10517_v43 = vadd.f32 %v10516_v28, %v10390_v1  ;;  %v7670_v42 = vadd.f32 %v7465_v49, %v6568_v25  ;;  %v8567_v22 = vpop.f32.mrf.mxu3  ;;  %v6366_v19 = vpop.f32.mrf.mxu1  ;;  %v14832_v25 = vld [vmem:[%s15478_s30 + $0x1a8] sm:$0xff] }
 0x802   : > { %v6569_v34 = vadd.f32 %v6366_v19, %v17789_v6 }
 0x803   : > { %v8772_v61 = vadd.f32 %v8567_v22, %v7670_v42  ;;  %v14960_v42 = vld [vmem:[%s15478_s30 + $0x5e8] sm:$0xff] }
 0x804   : > { %v9672_v13 = vpop.f32.mrf.mxu0  ;;  %13161 = vmatmul.msk.bf16.gmra.mxu1 %vm840_vm1, %v14766_v9 }
 0x805   : > { %v9874_v5 = vadd.f32 %v9669_v44, %v8772_v61  ;;  %13482 = vmatmul.msk.bf16.gmra.mxu2 %vm840_vm1, %v14830_v59  ;;  %v17793_v61 = vld [vmem:[#allocation44_spill] sm:$0xff] }
 0x806   : > { %13931 = vmatmul.msk.bf16.gmra.mxu3 %vm840_vm1, %v14894_v54 }
 0x807   : > { %14380 = vmatmul.msk.bf16.gmra.mxu0 %vm840_vm1, %v14958_v46  ;;  %v15168_v62 = vpack.c.bf16 %v9874_v5, %v9873_v56  ;;  %v10257_v45 = vadd.f32 %v10256_v14, %v9874_v5  ;;  %v10391_v38 = vmul.f32 %v9874_v5, %v9874_v5 }
 0x808   : > { %v7468_v0 = vpop.f32.mrf.mxu2 }
 0x809   : > { %15332 = vst [vmem:[%s16860_s19 + $0x130] sm:$0xff] %v15168_v62   ;;  %v10518_v60 = vadd.f32 %v10517_v43, %v10391_v38  ;;  %v7671_v17 = vadd.f32 %v7468_v0, %v6569_v34  ;;  %v8570_v55 = vpop.f32.mrf.mxu3  ;;  %v6368_v33 = vpop.f32.mrf.mxu1  ;;  %v14896_v43 = vld [vmem:[%s15478_s30 + $0x3c8] sm:$0xff] }
 0x80a   : > { %v6570_v18 = vadd.f32 %v6368_v33, %v17790_v27  ;;  %v17794_v33 = vld [vmem:[#allocation47_spill] sm:$0xff]  ;;  %v14769_v27 = vld [vmem:[%s15478_s30 + $0x5e0] sm:$0xff] }
 0x80b   : > { %v8773_v58 = vadd.f32 %v8570_v55, %v7671_v17 }
 0x80c   : > { %v9674_v26 = vpop.f32.mrf.mxu0 }
 0x80d   : > { %v9875_v3 = vadd.f32 %v9672_v13, %v8773_v58 }
 0x80f   : > { %v10258_v21 = vadd.f32 %v10257_v45, %v9875_v3  ;;  %v10392_v39 = vmul.f32 %v9875_v3, %v9875_v3 }
 0x810   : > { %v7470_v4 = vpop.f32.mrf.mxu2 }
 0x811   : > { %v10519_v15 = vadd.f32 %v10518_v60, %v10392_v39  ;;  %v7672_v12 = vadd.f32 %v7470_v4, %v6570_v18  ;;  %v8572_v53 = vpop.f32.mrf.mxu3  ;;  %v6371_v52 = vpop.f32.mrf.mxu1  ;;  %v14833_v18 = vld [vmem:[%s15478_s30 + $0x1b0] sm:$0xff] }
 0x812   : > { %v6571_v32 = vadd.f32 %v6371_v52, %v17791_v23 }
 0x813   : > { %v8774_v7 = vadd.f32 %v8572_v53, %v7672_v12  ;;  %v14961_v12 = vld [vmem:[%s15478_s30 + $0x5f0] sm:$0xff] }
 0x814   : > { %v9677_v40 = vpop.f32.mrf.mxu0  ;;  %13162 = vmatmul.msk.bf16.gmra.mxu1 %vm840_vm1, %v14767_v35 }
 0x815   : > { %v9876_v10 = vadd.f32 %v9674_v26, %v8774_v7  ;;  %13483 = vmatmul.msk.bf16.gmra.mxu2 %vm840_vm1, %v14831_v47  ;;  %v17795_v7 = vld [vmem:[#allocation50_spill] sm:$0xff] }
 0x816   : > { %13932 = vmatmul.msk.bf16.gmra.mxu3 %vm840_vm1, %v14895_v31 }
 0x817   : > { %14381 = vmatmul.msk.bf16.gmra.mxu0 %vm840_vm1, %v14959_v48  ;;  %v15173_v2 = vpack.c.bf16 %v9876_v10, %v9875_v3  ;;  %v10259_v16 = vadd.f32 %v10258_v21, %v9876_v10  ;;  %v10393_v8 = vmul.f32 %v9876_v10, %v9876_v10 }
 0x818   : > { %v7473_v30 = vpop.f32.mrf.mxu2 }
 0x819   : > { %15333 = vst [vmem:[%s16860_s19 + $0x138] sm:$0xff] %v15173_v2   ;;  %v10520_v50 = vadd.f32 %v10519_v15, %v10393_v8  ;;  %v7673_v20 = vadd.f32 %v7473_v30, %v6571_v32  ;;  %v8575_v29 = vpop.f32.mrf.mxu3  ;;  %v6373_v24 = vpop.f32.mrf.mxu1  ;;  %v14897_v15 = vld [vmem:[%s15478_s30 + $0x3d0] sm:$0xff] }
 0x81a   : > { %v6572_v41 = vadd.f32 %v6373_v24, %v17792_v63  ;;  %v17796_v24 = vld [vmem:[#allocation53_spill] sm:$0xff]  ;;  %v14770_v63 = vld [vmem:[%s15478_s30 + $0x5e8] sm:$0xff] }
 0x81b   : > { %v8775_v36 = vadd.f32 %v8575_v29, %v7673_v20 }
 0x81c   : > { %v9679_v37 = vpop.f32.mrf.mxu0 }
 0x81d   : > { %v9877_v28 = vadd.f32 %v9677_v40, %v8775_v36 }
 0x81f   : > { %v10260_v11 = vadd.f32 %v10259_v16, %v9877_v28  ;;  %v10394_v51 = vmul.f32 %v9877_v28, %v9877_v28 }
 0x820   : > { %v7475_v44 = vpop.f32.mrf.mxu2 }
 0x821   : > { %v10521_v56 = vadd.f32 %v10520_v50, %v10394_v51  ;;  %v7674_v14 = vadd.f32 %v7475_v44, %v6572_v41  ;;  %v8577_v1 = vpop.f32.mrf.mxu3  ;;  %v6376_v49 = vpop.f32.mrf.mxu1  ;;  %v14834_v41 = vld [vmem:[%s15478_s30 + $0x1b8] sm:$0xff] }
 0x822   : > { %v6573_v13 = vadd.f32 %v6376_v49, %v17793_v61 }
 0x823   : > { %v8776_v22 = vadd.f32 %v8577_v1, %v7674_v14  ;;  %v14962_v14 = vld [vmem:[%s15478_s30 + $0x5f8] sm:$0xff] }
 0x824   : > { %v9682_v9 = vpop.f32.mrf.mxu0  ;;  %13163 = vmatmul.msk.bf16.gmra.mxu1 %vm840_vm1, %v14768_v57 }
 0x825   : > { %v9878_v59 = vadd.f32 %v9679_v37, %v8776_v22  ;;  %13484 = vmatmul.msk.bf16.gmra.mxu2 %vm840_vm1, %v14832_v25  ;;  %v17797_v22 = vld [vmem:[#allocation56_spill] sm:$0xff] }
 0x826   : > { %13933 = vmatmul.msk.bf16.gmra.mxu3 %vm840_vm1, %v14896_v43 }
 0x827   : > { %14382 = vmatmul.msk.bf16.gmra.mxu0 %vm840_vm1, %v14960_v42  ;;  %v15178_v19 = vpack.c.bf16 %v9878_v59, %v9877_v28  ;;  %v10261_v54 = vadd.f32 %v10260_v11, %v9878_v59  ;;  %v10395_v46 = vmul.f32 %v9878_v59, %v9878_v59 }
 0x828   : > { %v7478_v5 = vpop.f32.mrf.mxu2 }
 0x829   : > { %15334 = vst [vmem:[%s16860_s19 + $0x140] sm:$0xff] %v15178_v19   ;;  %v10522_v62 = vadd.f32 %v10521_v56, %v10395_v46  ;;  %v7675_v45 = vadd.f32 %v7478_v5, %v6573_v13  ;;  %v8580_v38 = vpop.f32.mrf.mxu3  ;;  %v6378_v6 = vpop.f32.mrf.mxu1  ;;  %v14898_v56 = vld [vmem:[%s15478_s30 + $0x3d8] sm:$0xff] }
 0x82a   : > { %v6574_v58 = vadd.f32 %v6378_v6, %v17794_v33  ;;  %v17798_v6 = vld [vmem:[#allocation59_spill] sm:$0xff]  ;;  %v14771_v33 = vld [vmem:[%s15478_s30 + $0x5f0] sm:$0xff] }
 0x82b   : > { %v8777_v34 = vadd.f32 %v8580_v38, %v7675_v45 }
 0x82c   : > { %v9684_v0 = vpop.f32.mrf.mxu0 }
 0x82d   : > { %v9879_v60 = vadd.f32 %v9682_v9, %v8777_v34 }
 0x82f   : > { %v10262_v17 = vadd.f32 %v10261_v54, %v9879_v60  ;;  %v10396_v55 = vmul.f32 %v9879_v60, %v9879_v60 }
 0x830   : > { %v7480_v26 = vpop.f32.mrf.mxu2 }
 0x831   : > { %v10523_v3 = vadd.f32 %v10522_v62, %v10396_v55  ;;  %v7676_v21 = vadd.f32 %v7480_v26, %v6574_v58  ;;  %v8582_v39 = vpop.f32.mrf.mxu3  ;;  %v6381_v4 = vpop.f32.mrf.mxu1  ;;  %v14835_v58 = vld [vmem:[%s15478_s30 + $0x1c0] sm:$0xff] }
 0x832   : > { %v6575_v40 = vadd.f32 %v6381_v4, %v17795_v7 }
 0x833   : > { %v8778_v53 = vadd.f32 %v8582_v39, %v7676_v21  ;;  %v14963_v21 = vld [vmem:[%s15478_s30 + $0x600] sm:$0xff] }
 0x834   : > { %v9687_v35 = vpop.f32.mrf.mxu0  ;;  %13164 = vmatmul.msk.bf16.gmra.mxu1 %vm840_vm1, %v14769_v27 }
 0x835   : > { %v9880_v47 = vadd.f32 %v9684_v0, %v8778_v53  ;;  %13485 = vmatmul.msk.bf16.gmra.mxu2 %vm840_vm1, %v14833_v18  ;;  %v17799_v53 = vld [vmem:[#allocation62_spill] sm:$0xff] }
 0x836   : > { %13934 = vmatmul.msk.bf16.gmra.mxu3 %vm840_vm1, %v14897_v15 }
 0x837   : > { %14383 = vmatmul.msk.bf16.gmra.mxu0 %vm840_vm1, %v14961_v12  ;;  %v15183_v52 = vpack.c.bf16 %v9880_v47, %v9879_v60  ;;  %v10263_v31 = vadd.f32 %v10262_v17, %v9880_v47  ;;  %v10397_v48 = vmul.f32 %v9880_v47, %v9880_v47 }
 0x838   : > { %v7483_v10 = vpop.f32.mrf.mxu2 }
 0x839   : > { %15335 = vst [vmem:[%s16860_s19 + $0x148] sm:$0xff] %v15183_v52   ;;  %v10524_v2 = vadd.f32 %v10523_v3, %v10397_v48  ;;  %v7677_v16 = vadd.f32 %v7483_v10, %v6575_v40  ;;  %v8585_v8 = vpop.f32.mrf.mxu3  ;;  %v6383_v23 = vpop.f32.mrf.mxu1  ;;  %v14899_v3 = vld [vmem:[%s15478_s30 + $0x3e0] sm:$0xff] }
 0x83a   : > { %v6576_v36 = vadd.f32 %v6383_v23, %v17796_v24  ;;  %v17800_v23 = vld [vmem:[#allocation65_spill] sm:$0xff] }
 0x83b   : > { %v8779_v32 = vadd.f32 %v8585_v8, %v7677_v16  ;;  %v14772_v24 = vld [vmem:[%s15478_s30 + $0x5f8] sm:$0xff] }
 0x83c   : > { %v9689_v30 = vpop.f32.mrf.mxu0 }
 0x83d   : > { %v9881_v50 = vadd.f32 %v9687_v35, %v8779_v32 }
 0x83f   : > { %v10264_v20 = vadd.f32 %v10263_v31, %v9881_v50  ;;  %v10398_v29 = vmul.f32 %v9881_v50, %v9881_v50 }
 0x840   : > { %v7485_v37 = vpop.f32.mrf.mxu2 }
 0x841   : > { %v10525_v28 = vadd.f32 %v10524_v2, %v10398_v29  ;;  %v7678_v11 = vadd.f32 %v7485_v37, %v6576_v36  ;;  %v8587_v51 = vpop.f32.mrf.mxu3  ;;  %v6386_v44 = vpop.f32.mrf.mxu1  ;;  %v14836_v36 = vld [vmem:[%s15478_s30 + $0x1c8] sm:$0xff] }
 0x842   : > { %v6577_v9 = vadd.f32 %v6386_v44, %v17797_v22 }
 0x843   : > { %v8780_v1 = vadd.f32 %v8587_v51, %v7678_v11  ;;  %v14964_v11 = vld [vmem:[%s15478_s30 + $0x608] sm:$0xff] }
 0x844   : > { %v9692_v57 = vpop.f32.mrf.mxu0  ;;  %13165 = vmatmul.msk.bf16.gmra.mxu1 %vm840_vm1, %v14770_v63 }
 0x845   : > { %v9882_v25 = vadd.f32 %v9689_v30, %v8780_v1  ;;  %13486 = vmatmul.msk.bf16.gmra.mxu2 %vm840_vm1, %v14834_v41  ;;  %v17801_v1 = vld [vmem:[#allocation68_spill] sm:$0xff] }
 0x846   : > { %13935 = vmatmul.msk.bf16.gmra.mxu3 %vm840_vm1, %v14898_v56 }
 0x847   : > { %14384 = vmatmul.msk.bf16.gmra.mxu0 %vm840_vm1, %v14962_v14  ;;  %v15188_v49 = vpack.c.bf16 %v9882_v25, %v9881_v50  ;;  %v10265_v43 = vadd.f32 %v10264_v20, %v9882_v25  ;;  %v10399_v42 = vmul.f32 %v9882_v25, %v9882_v25 }
 0x848   : > { %v7488_v59 = vpop.f32.mrf.mxu2 }
 0x849   : > { %15336 = vst [vmem:[%s16860_s19 + $0x150] sm:$0xff] %v15188_v49   ;;  %v10526_v19 = vadd.f32 %v10525_v28, %v10399_v42  ;;  %v7679_v54 = vadd.f32 %v7488_v59, %v6577_v9  ;;  %v8590_v46 = vpop.f32.mrf.mxu3  ;;  %v6388_v61 = vpop.f32.mrf.mxu1  ;;  %v14900_v28 = vld [vmem:[%s15478_s30 + $0x3e8] sm:$0xff] }
 0x84a   : > { %v6578_v34 = vadd.f32 %v6388_v61, %v17798_v6  ;;  %v17802_v61 = vld [vmem:[#allocation71_spill] sm:$0xff]  ;;  %v14773_v6 = vld [vmem:[%s15478_s30 + $0x600] sm:$0xff] }
 0x84b   : > { %v8781_v13 = vadd.f32 %v8590_v46, %v7679_v54 }
 0x84c   : > { %v9694_v5 = vpop.f32.mrf.mxu0 }
 0x84d   : > { %v9883_v62 = vadd.f32 %v9692_v57, %v8781_v13 }
 0x84f   : > { %v10266_v45 = vadd.f32 %v10265_v43, %v9883_v62  ;;  %v10400_v38 = vmul.f32 %v9883_v62, %v9883_v62 }
 0x850   : > { %v7490_v0 = vpop.f32.mrf.mxu2 }
 0x851   : > { %v10527_v60 = vadd.f32 %v10526_v19, %v10400_v38  ;;  %v7680_v17 = vadd.f32 %v7490_v0, %v6578_v34  ;;  %v8592_v55 = vpop.f32.mrf.mxu3  ;;  %v6391_v26 = vpop.f32.mrf.mxu1  ;;  %v14837_v34 = vld [vmem:[%s15478_s30 + $0x1d0] sm:$0xff] }
 0x852   : > { %v6579_v35 = vadd.f32 %v6391_v26, %v17799_v53 }
 0x853   : > { %v8782_v39 = vadd.f32 %v8592_v55, %v7680_v17  ;;  %v14965_v17 = vld [vmem:[%s15478_s30 + $0x610] sm:$0xff] }
 0x854   : > { %v9697_v27 = vpop.f32.mrf.mxu0  ;;  %13166 = vmatmul.msk.bf16.gmra.mxu1 %vm840_vm1, %v14771_v33 }
 0x855   : > { %v9884_v18 = vadd.f32 %v9694_v5, %v8782_v39  ;;  %13487 = vmatmul.msk.bf16.gmra.mxu2 %vm840_vm1, %v14835_v58  ;;  %v17803_v39 = vld [vmem:[#allocation74_spill] sm:$0xff] }
 0x856   : > { %13936 = vmatmul.msk.bf16.gmra.mxu3 %vm840_vm1, %v14899_v3 }
 0x857   : > { %14385 = vmatmul.msk.bf16.gmra.mxu0 %vm840_vm1, %v14963_v21  ;;  %v15193_v4 = vpack.c.bf16 %v9884_v18, %v9883_v62  ;;  %v10267_v15 = vadd.f32 %v10266_v45, %v9884_v18  ;;  %v10401_v12 = vmul.f32 %v9884_v18, %v9884_v18 }
 0x858   : > { %v7493_v47 = vpop.f32.mrf.mxu2 }
 0x859   : > { %15337 = vst [vmem:[%s16860_s19 + $0x158] sm:$0xff] %v15193_v4   ;;  %v10528_v52 = vadd.f32 %v10527_v60, %v10401_v12  ;;  %v7681_v31 = vadd.f32 %v7493_v47, %v6579_v35  ;;  %v8595_v48 = vpop.f32.mrf.mxu3  ;;  %v6393_v7 = vpop.f32.mrf.mxu1  ;;  %v14901_v60 = vld [vmem:[%s15478_s30 + $0x3f0] sm:$0xff] }
 0x85a   : > { %v6580_v32 = vadd.f32 %v6393_v7, %v17800_v23  ;;  %v17804_v7 = vld [vmem:[#allocation77_spill] sm:$0xff]  ;;  %v14774_v23 = vld [vmem:[%s15478_s30 + $0x608] sm:$0xff] }
 0x85b   : > { %v8783_v40 = vadd.f32 %v8595_v48, %v7681_v31 }
 0x85c   : > { %v9699_v10 = vpop.f32.mrf.mxu0 }
 0x85d   : > { %v9885_v2 = vadd.f32 %v9697_v27, %v8783_v40 }
 0x85f   : > { %v10268_v16 = vadd.f32 %v10267_v15, %v9885_v2  ;;  %v10402_v8 = vmul.f32 %v9885_v2, %v9885_v2 }
 0x860   : > { %v7495_v30 = vpop.f32.mrf.mxu2 }
 0x861   : > { %v10529_v50 = vadd.f32 %v10528_v52, %v10402_v8  ;;  %v7682_v20 = vadd.f32 %v7495_v30, %v6580_v32  ;;  %v8597_v29 = vpop.f32.mrf.mxu3  ;;  %v6396_v37 = vpop.f32.mrf.mxu1  ;;  %v14838_v32 = vld [vmem:[%s15478_s30 + $0x1d8] sm:$0xff] }
 0x862   : > { %v6581_v57 = vadd.f32 %v6396_v37, %v17801_v1 }
 0x863   : > { %v8784_v51 = vadd.f32 %v8597_v29, %v7682_v20  ;;  %v14966_v20 = vld [vmem:[%s15478_s30 + $0x618] sm:$0xff] }
 0x864   : > { %v9702_v63 = vpop.f32.mrf.mxu0  ;;  %13167 = vmatmul.msk.bf16.gmra.mxu1 %vm840_vm1, %v14772_v24 }
 0x865   : > { %v9886_v41 = vadd.f32 %v9699_v10, %v8784_v51  ;;  %13488 = vmatmul.msk.bf16.gmra.mxu2 %vm840_vm1, %v14836_v36  ;;  %v17805_v51 = vld [vmem:[#allocation80_spill] sm:$0xff] }
 0x866   : > { %13937 = vmatmul.msk.bf16.gmra.mxu3 %vm840_vm1, %v14900_v28 }
 0x867   : > { %14386 = vmatmul.msk.bf16.gmra.mxu0 %vm840_vm1, %v14964_v11  ;;  %v15198_v44 = vpack.c.bf16 %v9886_v41, %v9885_v2  ;;  %v10269_v56 = vadd.f32 %v10268_v16, %v9886_v41  ;;  %v10403_v14 = vmul.f32 %v9886_v41, %v9886_v41 }
 0x868   : > { %v7498_v25 = vpop.f32.mrf.mxu2 }
 0x869   : > { %15338 = vst [vmem:[%s16860_s19 + $0x160] sm:$0xff] %v15198_v44   ;;  %v10530_v49 = vadd.f32 %v10529_v50, %v10403_v14  ;;  %v7683_v43 = vadd.f32 %v7498_v25, %v6581_v57  ;;  %v8600_v42 = vpop.f32.mrf.mxu3  ;;  %v6398_v22 = vpop.f32.mrf.mxu1  ;;  %v14902_v50 = vld [vmem:[%s15478_s30 + $0x3f8] sm:$0xff] }
 0x86a   : > { %v6582_v13 = vadd.f32 %v6398_v22, %v17802_v61  ;;  %v17806_v22 = vld [vmem:[#allocation83_spill] sm:$0xff]  ;;  %v14775_v61 = vld [vmem:[%s15478_s30 + $0x610] sm:$0xff] }
 0x86b   : > { %v8785_v9 = vadd.f32 %v8600_v42, %v7683_v43 }
 0x86c   : > { %v9704_v59 = vpop.f32.mrf.mxu0 }
 0x86d   : > { %v9887_v19 = vadd.f32 %v9702_v63, %v8785_v9 }
 0x86f   : > { %v10270_v54 = vadd.f32 %v10269_v56, %v9887_v19  ;;  %v10404_v46 = vmul.f32 %v9887_v19, %v9887_v19 }
 0x870   : > { %v7500_v5 = vpop.f32.mrf.mxu2 }
 0x871   : > { %v10531_v62 = vadd.f32 %v10530_v49, %v10404_v46  ;;  %v7684_v45 = vadd.f32 %v7500_v5, %v6582_v13  ;;  %v8602_v38 = vpop.f32.mrf.mxu3  ;;  %v6401_v0 = vpop.f32.mrf.mxu1  ;;  %v14839_v13 = vld [vmem:[%s15478_s30 + $0x1e0] sm:$0xff] }
 0x872   : > { %v6583_v27 = vadd.f32 %v6401_v0, %v17803_v39 }
 0x873   : > { %v8786_v55 = vadd.f32 %v8602_v38, %v7684_v45  ;;  %v14967_v45 = vld [vmem:[%s15478_s30 + $0x620] sm:$0xff] }
 0x874   : > { %v9707_v33 = vpop.f32.mrf.mxu0  ;;  %13168 = vmatmul.msk.bf16.gmra.mxu1 %vm840_vm1, %v14773_v6 }
 0x875   : > { %v9888_v58 = vadd.f32 %v9704_v59, %v8786_v55  ;;  %13489 = vmatmul.msk.bf16.gmra.mxu2 %vm840_vm1, %v14837_v34  ;;  %v17807_v55 = vld [vmem:[#allocation3_spill] sm:$0xff] }
 0x876   : > { %13938 = vmatmul.msk.bf16.gmra.mxu3 %vm840_vm1, %v14901_v60 }
 0x877   : > { %14387 = vmatmul.msk.bf16.gmra.mxu0 %vm840_vm1, %v14965_v17  ;;  %v15203_v26 = vpack.c.bf16 %v9888_v58, %v9887_v19  ;;  %v10271_v3 = vadd.f32 %v10270_v54, %v9888_v58  ;;  %v10405_v21 = vmul.f32 %v9888_v58, %v9888_v58 }
 0x878   : > { %v7503_v18 = vpop.f32.mrf.mxu2 }
 0x879   : > { %15339 = vst [vmem:[%s16860_s19 + $0x168] sm:$0xff] %v15203_v26   ;;  %v10532_v4 = vadd.f32 %v10531_v62, %v10405_v21  ;;  %v7685_v15 = vadd.f32 %v7503_v18, %v6583_v27  ;;  %v8605_v12 = vpop.f32.mrf.mxu3  ;;  %v6403_v53 = vpop.f32.mrf.mxu1  ;;  %v14903_v62 = vld [vmem:[%s15478_s30 + $0x400] sm:$0xff] }
 0x87a   : > { %v6584_v40 = vadd.f32 %v6403_v53, %v17804_v7  ;;  %v17808_v53 = vld [vmem:[#allocation5_spill] sm:$0xff] }
 0x87b   : > { %v8787_v35 = vadd.f32 %v8605_v12, %v7685_v15  ;;  %v14776_v7 = vld [vmem:[%s15478_s30 + $0x618] sm:$0xff] }
 0x87c   : > { %v9709_v47 = vpop.f32.mrf.mxu0 }
 0x87d   : > { %v9889_v52 = vadd.f32 %v9707_v33, %v8787_v35 }
 0x87f   : > { %v10272_v31 = vadd.f32 %v10271_v3, %v9889_v52  ;;  %v10406_v48 = vmul.f32 %v9889_v52, %v9889_v52 }
 0x880   : > { %v7505_v10 = vpop.f32.mrf.mxu2 }
 0x881   : > { %v10533_v2 = vadd.f32 %v10532_v4, %v10406_v48  ;;  %v7686_v16 = vadd.f32 %v7505_v10, %v6584_v40  ;;  %v8607_v8 = vpop.f32.mrf.mxu3  ;;  %v6406_v30 = vpop.f32.mrf.mxu1  ;;  %v14840_v40 = vld [vmem:[%s15478_s30 + $0x1e8] sm:$0xff] }
 0x882   : > { %v6585_v63 = vadd.f32 %v6406_v30, %v17805_v51 }
 0x883   : > { %v8788_v29 = vadd.f32 %v8607_v8, %v7686_v16  ;;  %v14968_v16 = vld [vmem:[%s15478_s30 + $0x628] sm:$0xff] }
 0x884   : > { %v9712_v24 = vpop.f32.mrf.mxu0  ;;  %13169 = vmatmul.msk.bf16.gmra.mxu1 %vm840_vm1, %v14774_v23 }
 0x885   : > { %v9890_v36 = vadd.f32 %v9709_v47, %v8788_v29  ;;  %13490 = vmatmul.msk.bf16.gmra.mxu2 %vm840_vm1, %v14838_v32  ;;  %v17809_v29 = vld [vmem:[#allocation7_spill] sm:$0xff] }
 0x886   : > { %13939 = vmatmul.msk.bf16.gmra.mxu3 %vm840_vm1, %v14902_v50 }
 0x887   : > { %14388 = vmatmul.msk.bf16.gmra.mxu0 %vm840_vm1, %v14966_v20  ;;  %v15208_v37 = vpack.c.bf16 %v9890_v36, %v9889_v52  ;;  %v10273_v28 = vadd.f32 %v10272_v31, %v9890_v36  ;;  %v10407_v11 = vmul.f32 %v9890_v36, %v9890_v36 }
 0x888   : > { %v7508_v41 = vpop.f32.mrf.mxu2 }
 0x889   : > { %15340 = vst [vmem:[%s16860_s19 + $0x170] sm:$0xff] %v15208_v37   ;;  %v10534_v44 = vadd.f32 %v10533_v2, %v10407_v11  ;;  %v7687_v56 = vadd.f32 %v7508_v41, %v6585_v63  ;;  %v8610_v14 = vpop.f32.mrf.mxu3  ;;  %v6408_v1 = vpop.f32.mrf.mxu1  ;;  %v14904_v2 = vld [vmem:[%s15478_s30 + $0x408] sm:$0xff] }
 0x88a   : > { %v6586_v9 = vadd.f32 %v6408_v1, %v17806_v22  ;;  %v17810_v1 = vld [vmem:[#allocation9_spill] sm:$0xff]  ;;  %v14777_v22 = vld [vmem:[%s15478_s30 + $0x620] sm:$0xff] }
 0x88b   : > { %v8789_v57 = vadd.f32 %v8610_v14, %v7687_v56 }
 0x88c   : > { %v9714_v25 = vpop.f32.mrf.mxu0 }
 0x88d   : > { %v9891_v49 = vadd.f32 %v9712_v24, %v8789_v57 }
 0x88f   : > { %v10274_v43 = vadd.f32 %v10273_v28, %v9891_v49  ;;  %v10408_v42 = vmul.f32 %v9891_v49, %v9891_v49 }
 0x890   : > { %v7510_v59 = vpop.f32.mrf.mxu2 }
 0x891   : > { %v10535_v19 = vadd.f32 %v10534_v44, %v10408_v42  ;;  %v7688_v54 = vadd.f32 %v7510_v59, %v6586_v9  ;;  %v8612_v46 = vpop.f32.mrf.mxu3  ;;  %v6411_v5 = vpop.f32.mrf.mxu1  ;;  %v14841_v9 = vld [vmem:[%s15478_s30 + $0x1f0] sm:$0xff] }
 0x892   : > { %v6587_v33 = vadd.f32 %v6411_v5, %v17807_v55 }
 0x893   : > { %v8790_v38 = vadd.f32 %v8612_v46, %v7688_v54  ;;  %v14969_v54 = vld [vmem:[%s15478_s30 + $0x630] sm:$0xff] }
 0x894   : > { %v9717_v6 = vpop.f32.mrf.mxu0  ;;  %13170 = vmatmul.msk.bf16.gmra.mxu1 %vm840_vm1, %v14775_v61 }
 0x895   : > { %v9892_v34 = vadd.f32 %v9714_v25, %v8790_v38  ;;  %13491 = vmatmul.msk.bf16.gmra.mxu2 %vm840_vm1, %v14839_v13  ;;  %v17811_v38 = vld [vmem:[#allocation11_spill] sm:$0xff] }
 0x896   : > { %13940 = vmatmul.msk.bf16.gmra.mxu3 %vm840_vm1, %v14903_v62 }
 0x897   : > { %14389 = vmatmul.msk.bf16.gmra.mxu0 %vm840_vm1, %v14967_v45  ;;  %v15213_v0 = vpack.c.bf16 %v9892_v34, %v9891_v49  ;;  %v10275_v60 = vadd.f32 %v10274_v43, %v9892_v34  ;;  %v10409_v17 = vmul.f32 %v9892_v34, %v9892_v34 }
 0x898   : > { %v7513_v58 = vpop.f32.mrf.mxu2 }
 0x899   : > { %15341 = vst [vmem:[%s16860_s19 + $0x178] sm:$0xff] %v15213_v0   ;;  %v10536_v26 = vadd.f32 %v10535_v19, %v10409_v17  ;;  %v7689_v3 = vadd.f32 %v7513_v58, %v6587_v33  ;;  %v8615_v21 = vpop.f32.mrf.mxu3  ;;  %v6413_v39 = vpop.f32.mrf.mxu1  ;;  %v14905_v19 = vld [vmem:[%s15478_s30 + $0x410] sm:$0xff] }
 0x89a   : > { %v6588_v35 = vadd.f32 %v6413_v39, %v17808_v53  ;;  %v17812_v39 = vld [vmem:[#allocation13_spill] sm:$0xff]  ;;  %v14778_v53 = vld [vmem:[%s15478_s30 + $0x628] sm:$0xff] }
 0x89b   : > { %v8791_v27 = vadd.f32 %v8615_v21, %v7689_v3 }
 0x89c   : > { %v9719_v18 = vpop.f32.mrf.mxu0 }
 0x89d   : > { %v9893_v4 = vadd.f32 %v9717_v6, %v8791_v27 }
 0x89f   : > { %v10276_v15 = vadd.f32 %v10275_v60, %v9893_v4  ;;  %v10410_v12 = vmul.f32 %v9893_v4, %v9893_v4 }
 0x8a0   : > { %v7515_v47 = vpop.f32.mrf.mxu2 }
 0x8a1   : > { %v10537_v52 = vadd.f32 %v10536_v26, %v10410_v12  ;;  %v7690_v31 = vadd.f32 %v7515_v47, %v6588_v35  ;;  %v8617_v48 = vpop.f32.mrf.mxu3  ;;  %v6416_v10 = vpop.f32.mrf.mxu1  ;;  %v14842_v35 = vld [vmem:[%s15478_s30 + $0x1f8] sm:$0xff] }
 0x8a2   : > { %v6589_v24 = vadd.f32 %v6416_v10, %v17809_v29 }
 0x8a3   : > { %v8792_v8 = vadd.f32 %v8617_v48, %v7690_v31  ;;  %v14970_v31 = vld [vmem:[%s15478_s30 + $0x638] sm:$0xff] }
 0x8a4   : > { %v9722_v23 = vpop.f32.mrf.mxu0  ;;  %13171 = vmatmul.msk.bf16.gmra.mxu1 %vm840_vm1, %v14776_v7 }
 0x8a5   : > { %v9894_v32 = vadd.f32 %v9719_v18, %v8792_v8  ;;  %13492 = vmatmul.msk.bf16.gmra.mxu2 %vm840_vm1, %v14840_v40  ;;  %v17813_v8 = vld [vmem:[#allocation15_spill] sm:$0xff] }
 0x8a6   : > { %13941 = vmatmul.msk.bf16.gmra.mxu3 %vm840_vm1, %v14904_v2 }
 0x8a7   : > { %14390 = vmatmul.msk.bf16.gmra.mxu0 %vm840_vm1, %v14968_v16  ;;  %v15218_v30 = vpack.c.bf16 %v9894_v32, %v9893_v4  ;;  %v10277_v50 = vadd.f32 %v10276_v15, %v9894_v32  ;;  %v10411_v20 = vmul.f32 %v9894_v32, %v9894_v32 }
 0x8a8   : > { %v7518_v36 = vpop.f32.mrf.mxu2 }
 0x8a9   : > { %15342 = vst [vmem:[%s16860_s19 + $0x180] sm:$0xff] %v15218_v30   ;;  %v10538_v37 = vadd.f32 %v10537_v52, %v10411_v20  ;;  %v7691_v28 = vadd.f32 %v7518_v36, %v6589_v24  ;;  %v8620_v11 = vpop.f32.mrf.mxu3  ;;  %v6418_v51 = vpop.f32.mrf.mxu1  ;;  %v14906_v52 = vld [vmem:[%s15478_s30 + $0x418] sm:$0xff] }
 0x8aa   : > { %v6590_v57 = vadd.f32 %v6418_v51, %v17810_v1  ;;  %v17814_v51 = vld [vmem:[#allocation17_spill] sm:$0xff]  ;;  %v14779_v1 = vld [vmem:[%s15478_s30 + $0x630] sm:$0xff] }
 0x8ab   : > { %v8793_v63 = vadd.f32 %v8620_v11, %v7691_v28 }
 0x8ac   : > { %v9724_v41 = vpop.f32.mrf.mxu0 }
 0x8ad   : > { %v9895_v44 = vadd.f32 %v9722_v23, %v8793_v63 }
 0x8af   : > { %v10278_v56 = vadd.f32 %v10277_v50, %v9895_v44  ;;  %v10412_v14 = vmul.f32 %v9895_v44, %v9895_v44 }
 0x8b0   : > { %v7520_v25 = vpop.f32.mrf.mxu2 }
 0x8b1   : > { %v10539_v49 = vadd.f32 %v10538_v37, %v10412_v14  ;;  %v7692_v43 = vadd.f32 %v7520_v25, %v6590_v57  ;;  %v8622_v42 = vpop.f32.mrf.mxu3  ;;  %v6421_v59 = vpop.f32.mrf.mxu1  ;;  %v14843_v57 = vld [vmem:[%s15478_s30 + $0x200] sm:$0xff] }
 0x8b2   : > { %v6591_v6 = vadd.f32 %v6421_v59, %v17811_v38 }
 0x8b3   : > { %v8794_v46 = vadd.f32 %v8622_v42, %v7692_v43  ;;  %v14971_v43 = vld [vmem:[%s15478_s30 + $0x640] sm:$0xff] }
 0x8b4   : > { %v9727_v61 = vpop.f32.mrf.mxu0  ;;  %13172 = vmatmul.msk.bf16.gmra.mxu1 %vm840_vm1, %v14777_v22 }
 0x8b5   : > { %v9896_v13 = vadd.f32 %v9724_v41, %v8794_v46  ;;  %13493 = vmatmul.msk.bf16.gmra.mxu2 %vm840_vm1, %v14841_v9  ;;  %v17815_v46 = vld [vmem:[#allocation19_spill] sm:$0xff] }
 0x8b6   : > { %13942 = vmatmul.msk.bf16.gmra.mxu3 %vm840_vm1, %v14905_v19 }
 0x8b7   : > { %14391 = vmatmul.msk.bf16.gmra.mxu0 %vm840_vm1, %v14969_v54  ;;  %v15223_v5 = vpack.c.bf16 %v9896_v13, %v9895_v44  ;;  %v10279_v62 = vadd.f32 %v10278_v56, %v9896_v13  ;;  %v10413_v45 = vmul.f32 %v9896_v13, %v9896_v13 }
 0x8b8   : > { %v7523_v34 = vpop.f32.mrf.mxu2 }
 0x8b9   : > { %15343 = vst [vmem:[%s16860_s19 + $0x188] sm:$0xff] %v15223_v5   ;;  %v10540_v0 = vadd.f32 %v10539_v49, %v10413_v45  ;;  %v7693_v60 = vadd.f32 %v7523_v34, %v6591_v6  ;;  %v8625_v17 = vpop.f32.mrf.mxu3  ;;  %v6423_v55 = vpop.f32.mrf.mxu1  ;;  %v14907_v49 = vld [vmem:[%s15478_s30 + $0x420] sm:$0xff] }
 0x8ba   : > { %v6592_v27 = vadd.f32 %v6423_v55, %v17812_v39  ;;  %v17816_v55 = vld [vmem:[#allocation21_spill] sm:$0xff] }
 0x8bb   : > { %v8795_v33 = vadd.f32 %v8625_v17, %v7693_v60  ;;  %v14780_v39 = vld [vmem:[%s15478_s30 + $0x638] sm:$0xff] }
 0x8bc   : > { %v9729_v58 = vpop.f32.mrf.mxu0 }
 0x8bd   : > { %v9897_v26 = vadd.f32 %v9727_v61, %v8795_v33 }
 0x8bf   : > { %v10280_v3 = vadd.f32 %v10279_v62, %v9897_v26  ;;  %v10414_v21 = vmul.f32 %v9897_v26, %v9897_v26 }
 0x8c0   : > { %v7525_v18 = vpop.f32.mrf.mxu2 }
 0x8c1   : > { %v10541_v4 = vadd.f32 %v10540_v0, %v10414_v21  ;;  %v7694_v15 = vadd.f32 %v7525_v18, %v6592_v27  ;;  %v8627_v12 = vpop.f32.mrf.mxu3  ;;  %v6426_v47 = vpop.f32.mrf.mxu1  ;;  %v14844_v27 = vld [vmem:[%s15478_s30 + $0x208] sm:$0xff] }
 0x8c2   : > { %v6593_v23 = vadd.f32 %v6426_v47, %v17813_v8 }
 0x8c3   : > { %v8796_v48 = vadd.f32 %v8627_v12, %v7694_v15  ;;  %v14972_v15 = vld [vmem:[%s15478_s30 + $0x648] sm:$0xff] }
 0x8c4   : > { %v9732_v7 = vpop.f32.mrf.mxu0  ;;  %13173 = vmatmul.msk.bf16.gmra.mxu1 %vm840_vm1, %v14778_v53 }
 0x8c5   : > { %v9898_v40 = vadd.f32 %v9729_v58, %v8796_v48  ;;  %13494 = vmatmul.msk.bf16.gmra.mxu2 %vm840_vm1, %v14842_v35  ;;  %v17817_v48 = vld [vmem:[#allocation23_spill] sm:$0xff] }
 0x8c6   : > { %13943 = vmatmul.msk.bf16.gmra.mxu3 %vm840_vm1, %v14906_v52 }
 0x8c7   : > { %14392 = vmatmul.msk.bf16.gmra.mxu0 %vm840_vm1, %v14970_v31  ;;  %v15228_v10 = vpack.c.bf16 %v9898_v40, %v9897_v26  ;;  %v10281_v2 = vadd.f32 %v10280_v3, %v9898_v40  ;;  %v10415_v16 = vmul.f32 %v9898_v40, %v9898_v40 }
 0x8c8   : > { %v7528_v32 = vpop.f32.mrf.mxu2 }
 0x8c9   : > { %15344 = vst [vmem:[%s16860_s19 + $0x190] sm:$0xff] %v15228_v10   ;;  %v10542_v30 = vadd.f32 %v10541_v4, %v10415_v16  ;;  %v7695_v50 = vadd.f32 %v7528_v32, %v6593_v23  ;;  %v8630_v20 = vpop.f32.mrf.mxu3  ;;  %v6428_v29 = vpop.f32.mrf.mxu1  ;;  %v14908_v4 = vld [vmem:[%s15478_s30 + $0x428] sm:$0xff] }
 0x8ca   : > { %v6594_v63 = vadd.f32 %v6428_v29, %v17814_v51  ;;  %v17818_v29 = vld [vmem:[#allocation25_spill] sm:$0xff]  ;;  %v14781_v51 = vld [vmem:[%s15478_s30 + $0x640] sm:$0xff] }
 0x8cb   : > { %v8797_v24 = vadd.f32 %v8630_v20, %v7695_v50 }
 0x8cc   : > { %v9734_v36 = vpop.f32.mrf.mxu0 }
 0x8cd   : > { %v9899_v37 = vadd.f32 %v9732_v7, %v8797_v24 }
 0x8cf   : > { %v10282_v28 = vadd.f32 %v10281_v2, %v9899_v37  ;;  %v10416_v11 = vmul.f32 %v9899_v37, %v9899_v37 }
 0x8d0   : > { %v7530_v41 = vpop.f32.mrf.mxu2 }
 0x8d1   : > { %v10543_v44 = vadd.f32 %v10542_v30, %v10416_v11  ;;  %v7696_v56 = vadd.f32 %v7530_v41, %v6594_v63  ;;  %v8632_v14 = vpop.f32.mrf.mxu3  ;;  %v6431_v25 = vpop.f32.mrf.mxu1  ;;  %v14845_v63 = vld [vmem:[%s15478_s30 + $0x210] sm:$0xff] }
 0x8d2   : > { %v6595_v61 = vadd.f32 %v6431_v25, %v17815_v46 }
 0x8d3   : > { %v8798_v42 = vadd.f32 %v8632_v14, %v7696_v56  ;;  %v14973_v56 = vld [vmem:[%s15478_s30 + $0x650] sm:$0xff] }
 0x8d4   : > { %v9737_v22 = vpop.f32.mrf.mxu0  ;;  %13174 = vmatmul.msk.bf16.gmra.mxu1 %vm840_vm1, %v14779_v1 }
 0x8d5   : > { %v9900_v9 = vadd.f32 %v9734_v36, %v8798_v42  ;;  %13495 = vmatmul.msk.bf16.gmra.mxu2 %vm840_vm1, %v14843_v57  ;;  %v17819_v42 = vld [vmem:[#allocation27_spill] sm:$0xff] }
 0x8d6   : > { %13944 = vmatmul.msk.bf16.gmra.mxu3 %vm840_vm1, %v14907_v49 }
 0x8d7   : > { %14393 = vmatmul.msk.bf16.gmra.mxu0 %vm840_vm1, %v14971_v43  ;;  %v15233_v59 = vpack.c.bf16 %v9900_v9, %v9899_v37  ;;  %v10283_v19 = vadd.f32 %v10282_v28, %v9900_v9  ;;  %v10417_v54 = vmul.f32 %v9900_v9, %v9900_v9 }
 0x8d8   : > { %v7533_v13 = vpop.f32.mrf.mxu2 }
 0x8d9   : > { %15345 = vst [vmem:[%s16860_s19 + $0x198] sm:$0xff] %v15233_v59   ;;  %v10544_v5 = vadd.f32 %v10543_v44, %v10417_v54  ;;  %v7697_v62 = vadd.f32 %v7533_v13, %v6595_v61  ;;  %v8635_v45 = vpop.f32.mrf.mxu3  ;;  %v6433_v38 = vpop.f32.mrf.mxu1  ;;  %v14909_v44 = vld [vmem:[%s15478_s30 + $0x430] sm:$0xff] }
 0x8da   : > { %v6596_v33 = vadd.f32 %v6433_v38, %v17816_v55  ;;  %v17820_v38 = vld [vmem:[#allocation30_spill] sm:$0xff]  ;;  %v14782_v55 = vld [vmem:[%s15478_s30 + $0x648] sm:$0xff] }
 0x8db   : > { %v8799_v6 = vadd.f32 %v8635_v45, %v7697_v62 }
 0x8dc   : > { %v9739_v34 = vpop.f32.mrf.mxu0 }
 0x8dd   : > { %v9901_v0 = vadd.f32 %v9737_v22, %v8799_v6 }
 0x8df   : > { %v10284_v60 = vadd.f32 %v10283_v19, %v9901_v0  ;;  %v10418_v17 = vmul.f32 %v9901_v0, %v9901_v0 }
 0x8e0   : > { %v7535_v58 = vpop.f32.mrf.mxu2 }
 0x8e1   : > { %v10545_v26 = vadd.f32 %v10544_v5, %v10418_v17  ;;  %v7698_v3 = vadd.f32 %v7535_v58, %v6596_v33  ;;  %v8637_v21 = vpop.f32.mrf.mxu3  ;;  %v6436_v18 = vpop.f32.mrf.mxu1  ;;  %v14846_v33 = vld [vmem:[%s15478_s30 + $0x218] sm:$0xff] }
 0x8e2   : > { %v6597_v7 = vadd.f32 %v6436_v18, %v17817_v48 }
 0x8e3   : > { %v8800_v12 = vadd.f32 %v8637_v21, %v7698_v3  ;;  %v14974_v3 = vld [vmem:[%s15478_s30 + $0x658] sm:$0xff] }
 0x8e4   : > { %v9742_v53 = vpop.f32.mrf.mxu0  ;;  %13175 = vmatmul.msk.bf16.gmra.mxu1 %vm840_vm1, %v14780_v39 }
 0x8e5   : > { %v9902_v35 = vadd.f32 %v9739_v34, %v8800_v12  ;;  %13496 = vmatmul.msk.bf16.gmra.mxu2 %vm840_vm1, %v14844_v27  ;;  %v17821_v12 = vld [vmem:[#allocation33_spill] sm:$0xff] }
 0x8e6   : > { %13945 = vmatmul.msk.bf16.gmra.mxu3 %vm840_vm1, %v14908_v4 }
 0x8e7   : > { %14394 = vmatmul.msk.bf16.gmra.mxu0 %vm840_vm1, %v14972_v15  ;;  %v15238_v47 = vpack.c.bf16 %v9902_v35, %v9901_v0  ;;  %v10285_v52 = vadd.f32 %v10284_v60, %v9902_v35  ;;  %v10419_v31 = vmul.f32 %v9902_v35, %v9902_v35 }
 0x8e8   : > { %v7538_v40 = vpop.f32.mrf.mxu2 }
 0x8e9   : > { %15346 = vst [vmem:[%s16860_s19 + $0x1a0] sm:$0xff] %v15238_v47   ;;  %v10546_v10 = vadd.f32 %v10545_v26, %v10419_v31  ;;  %v7699_v2 = vadd.f32 %v7538_v40, %v6597_v7  ;;  %v8640_v16 = vpop.f32.mrf.mxu3  ;;  %v6438_v8 = vpop.f32.mrf.mxu1  ;;  %v14910_v26 = vld [vmem:[%s15478_s30 + $0x438] sm:$0xff] }
 0x8ea   : > { %v6598_v24 = vadd.f32 %v6438_v8, %v17818_v29  ;;  %v17822_v8 = vld [vmem:[#allocation36_spill] sm:$0xff] }
 0x8eb   : > { %v8801_v23 = vadd.f32 %v8640_v16, %v7699_v2 }
 0x8ec   : > { %v9744_v32 = vpop.f32.mrf.mxu0 }
 0x8ed   : > { %v9903_v30 = vadd.f32 %v9742_v53, %v8801_v23 }
 0x8ef   : > { %v10286_v50 = vadd.f32 %v10285_v52, %v9903_v30  ;;  %v10420_v20 = vmul.f32 %v9903_v30, %v9903_v30 }
 0x8f0   : > { %v7540_v36 = vpop.f32.mrf.mxu2 }
 0x8f1   : > { %v10547_v37 = vadd.f32 %v10546_v10, %v10420_v20  ;;  %v7700_v28 = vadd.f32 %v7540_v36, %v6598_v24  ;;  %v8642_v11 = vpop.f32.mrf.mxu3  ;;  %v6441_v41 = vpop.f32.mrf.mxu1 }
 0x8f2   : > { %v6599_v22 = vadd.f32 %v6441_v41, %v17819_v42 }
 0x8f3   : > { %v8802_v14 = vadd.f32 %v8642_v11, %v7700_v28 }
 0x8f4   : > { %v9747_v1 = vpop.f32.mrf.mxu0  ;;  %13176 = vmatmul.msk.bf16.gmra.mxu1 %vm840_vm1, %v14781_v51 }
 0x8f5   : > { %v9904_v57 = vadd.f32 %v9744_v32, %v8802_v14  ;;  %13497 = vmatmul.msk.bf16.gmra.mxu2 %vm840_vm1, %v14845_v63  ;;  %v17823_v63 = vld [vmem:[#allocation39_spill] sm:$0xff] }
 0x8f6   : > { %13946 = vmatmul.msk.bf16.gmra.mxu3 %vm840_vm1, %v14909_v44 }
 0x8f7   : > { %14395 = vmatmul.msk.bf16.gmra.mxu0 %vm840_vm1, %v14973_v56  ;;  %v15243_v25 = vpack.c.bf16 %v9904_v57, %v9903_v30  ;;  %v10287_v49 = vadd.f32 %v10286_v50, %v9904_v57  ;;  %v10421_v43 = vmul.f32 %v9904_v57, %v9904_v57 }
 0x8f8   : > { %v7543_v9 = vpop.f32.mrf.mxu2 }
 0x8f9   : > { %15347 = vst [vmem:[%s16860_s19 + $0x1a8] sm:$0xff] %v15243_v25   ;;  %v10548_v59 = vadd.f32 %v10547_v37, %v10421_v43  ;;  %v7701_v19 = vadd.f32 %v7543_v9, %v6599_v22  ;;  %v8645_v54 = vpop.f32.mrf.mxu3  ;;  %v6443_v46 = vpop.f32.mrf.mxu1  ;;  %v17824_v9 = vld [vmem:[#allocation42_spill] sm:$0xff] }
 0x8fa   : > { %v6600_v6 = vadd.f32 %v6443_v46, %v17820_v38 }
 0x8fb   : > { %v8803_v61 = vadd.f32 %v8645_v54, %v7701_v19 }
 0x8fc   : > { %v9749_v13 = vpop.f32.mrf.mxu0 }
 0x8fd   : > { %v9905_v5 = vadd.f32 %v9747_v1, %v8803_v61 }
 0x8ff   : > { %v10288_v62 = vadd.f32 %v10287_v49, %v9905_v5  ;;  %v10422_v45 = vmul.f32 %v9905_v5, %v9905_v5 }
 0x900   : > { %v7545_v34 = vpop.f32.mrf.mxu2 }
 0x901   : > { %v10549_v0 = vadd.f32 %v10548_v59, %v10422_v45  ;;  %v7702_v60 = vadd.f32 %v7545_v34, %v6600_v6  ;;  %v8647_v17 = vpop.f32.mrf.mxu3  ;;  %v6446_v58 = vpop.f32.mrf.mxu1 }
 0x902   : > { %v6601_v53 = vadd.f32 %v6446_v58, %v17821_v12 }
 0x903   : > { %v8804_v21 = vadd.f32 %v8647_v17, %v7702_v60 }
 0x904   : > { %v9752_v39 = vpop.f32.mrf.mxu0  ;;  %13177 = vmatmul.msk.bf16.gmra.mxu1 %vm840_vm1, %v14782_v55 }
 0x905   : > { %v9906_v27 = vadd.f32 %v9749_v13, %v8804_v21  ;;  %13498 = vmatmul.msk.bf16.gmra.mxu2 %vm840_vm1, %v14846_v33 }
 0x906   : > { %13947 = vmatmul.msk.bf16.gmra.mxu3 %vm840_vm1, %v14910_v26 }
 0x907   : > { %14396 = vmatmul.msk.bf16.gmra.mxu0 %vm840_vm1, %v14974_v3  ;;  %v15248_v18 = vpack.c.bf16 %v9906_v27, %v9905_v5  ;;  %v10289_v4 = vadd.f32 %v10288_v62, %v9906_v27  ;;  %v10423_v15 = vmul.f32 %v9906_v27, %v9906_v27 }
 0x908   : > { %v7548_v35 = vpop.f32.mrf.mxu2 }
 0x909   : > { %15348 = vst [vmem:[%s16860_s19 + $0x1b0] sm:$0xff] %v15248_v18   ;;  %v10550_v47 = vadd.f32 %v10549_v0, %v10423_v15  ;;  %v7703_v52 = vadd.f32 %v7548_v35, %v6601_v53  ;;  %v8650_v31 = vpop.f32.mrf.mxu3  ;;  %v6448_v48 = vpop.f32.mrf.mxu1  ;;  %v17825_v0 = vld [vmem:[#allocation45_spill] sm:$0xff] }
 0x90a   : > { %v6602_v23 = vadd.f32 %v6448_v48, %v17822_v8 }
 0x90b   : > { %v8805_v7 = vadd.f32 %v8650_v31, %v7703_v52 }
 0x90c   : > { %v9754_v40 = vpop.f32.mrf.mxu0 }
 0x90d   : > { %v9907_v10 = vadd.f32 %v9752_v39, %v8805_v7 }
 0x90f   : > { %v10290_v2 = vadd.f32 %v10289_v4, %v9907_v10  ;;  %v10424_v16 = vmul.f32 %v9907_v10, %v9907_v10  ;;  %v17826_v4 = vld [vmem:[#allocation48_spill] sm:$0xff] }
 0x910   : > { %v7550_v32 = vpop.f32.mrf.mxu2 }
 0x911   : > { %v10551_v30 = vadd.f32 %v10550_v47, %v10424_v16  ;;  %v7704_v50 = vadd.f32 %v7550_v32, %v6602_v23  ;;  %v8652_v20 = vpop.f32.mrf.mxu3  ;;  %v6451_v29 = vpop.f32.mrf.mxu1  ;;  %v17827_v16 = vld [vmem:[#allocation51_spill] sm:$0xff] }
 0x912   : > { %v6603_v41 = vadd.f32 %v6451_v29, %v17823_v63 }
 0x913   : > { %v8806_v24 = vadd.f32 %v8652_v20, %v7704_v50 }
 0x914   : > { %v9757_v36 = vpop.f32.mrf.mxu0 }
 0x915   : > { %v9908_v37 = vadd.f32 %v9754_v40, %v8806_v24 }
 0x917   : > { %v15253_v28 = vpack.c.bf16 %v9908_v37, %v9907_v10  ;;  %v10291_v11 = vadd.f32 %v10290_v2, %v9908_v37  ;;  %v10425_v51 = vmul.f32 %v9908_v37, %v9908_v37 }
 0x918   : > { %v7553_v44 = vpop.f32.mrf.mxu2 }
 0x919   : > { %15349 = vst [vmem:[%s16860_s19 + $0x1b8] sm:$0xff] %v15253_v28   ;;  %v10552_v56 = vadd.f32 %v10551_v30, %v10425_v51  ;;  %v7705_v14 = vadd.f32 %v7553_v44, %v6603_v41  ;;  %v8655_v1 = vpop.f32.mrf.mxu3  ;;  %v6453_v57 = vpop.f32.mrf.mxu1 }
 0x91a   : > { %v6604_v59 = vadd.f32 %v6453_v57, %v17824_v9 }
 0x91b   : > { %v8807_v25 = vadd.f32 %v8655_v1, %v7705_v14 }
 0x91c   : > { %v9759_v49 = vpop.f32.mrf.mxu0 }
 0x91d   : > { %v9909_v43 = vadd.f32 %v9757_v36, %v8807_v25 }
 0x91f   : > { %v10292_v42 = vadd.f32 %v10291_v11, %v9909_v43  ;;  %v10426_v22 = vmul.f32 %v9909_v43, %v9909_v43  ;;  %v17828_v11 = vld [vmem:[#allocation54_spill] sm:$0xff] }
 0x920   : > { %v7555_v19 = vpop.f32.mrf.mxu2 }
 0x921   : > { %v10553_v54 = vadd.f32 %v10552_v56, %v10426_v22  ;;  %v7706_v46 = vadd.f32 %v7555_v19, %v6604_v59  ;;  %v8657_v61 = vpop.f32.mrf.mxu3  ;;  %v6456_v13 = vpop.f32.mrf.mxu1  ;;  %v17829_v22 = vld [vmem:[#allocation57_spill] sm:$0xff] }
 0x922   : > { %v6605_v60 = vadd.f32 %v6456_v13, %v17825_v0 }
 0x923   : > { %v8808_v5 = vadd.f32 %v8657_v61, %v7706_v46 }
 0x924   : > { %v9762_v62 = vpop.f32.mrf.mxu0 }
 0x925   : > { %v9910_v45 = vadd.f32 %v9759_v49, %v8808_v5 }
 0x927   : > { %v15258_v38 = vpack.c.bf16 %v9910_v45, %v9909_v43  ;;  %v10293_v6 = vadd.f32 %v10292_v42, %v9910_v45  ;;  %v10427_v34 = vmul.f32 %v9910_v45, %v9910_v45 }
 0x928   : > { %v7558_v17 = vpop.f32.mrf.mxu2 }
 0x929   : > { %15350 = vst [vmem:[%s16860_s19 + $0x1c0] sm:$0xff] %v15258_v38   ;;  %v10554_v55 = vadd.f32 %v10553_v54, %v10427_v34  ;;  %v7707_v33 = vadd.f32 %v7558_v17, %v6605_v60  ;;  %v8660_v58 = vpop.f32.mrf.mxu3  ;;  %v6458_v26 = vpop.f32.mrf.mxu1 }
 0x92a   : > { %v6606_v15 = vadd.f32 %v6458_v26, %v17826_v4 }
 0x92b   : > { %v8809_v3 = vadd.f32 %v8660_v58, %v7707_v33 }
 0x92c   : > { %v9764_v21 = vpop.f32.mrf.mxu0 }
 0x92d   : > { %v9911_v39 = vadd.f32 %v9762_v62, %v8809_v3 }
 0x92f   : > { %v10294_v27 = vadd.f32 %v10293_v6, %v9911_v39  ;;  %v10428_v18 = vmul.f32 %v9911_v39, %v9911_v39  ;;  %v17830_v6 = vld [vmem:[#allocation60_spill] sm:$0xff] }
 0x930   : > { %v7560_v12 = vpop.f32.mrf.mxu2 }
 0x931   : > { %v10555_v53 = vadd.f32 %v10554_v55, %v10428_v18  ;;  %v7708_v35 = vadd.f32 %v7560_v12, %v6606_v15  ;;  %v8662_v47 = vpop.f32.mrf.mxu3  ;;  %v6461_v52 = vpop.f32.mrf.mxu1  ;;  %v17831_v18 = vld [vmem:[#allocation63_spill] sm:$0xff] }
 0x932   : > { %v6607_v8 = vadd.f32 %v6461_v52, %v17827_v16 }
 0x933   : > { %v8810_v31 = vadd.f32 %v8662_v47, %v7708_v35 }
 0x934   : > { %v9767_v48 = vpop.f32.mrf.mxu0 }
 0x935   : > { %v9912_v7 = vadd.f32 %v9764_v21, %v8810_v31 }
 0x937   : > { %v15263_v40 = vpack.c.bf16 %v9912_v7, %v9911_v39  ;;  %v10295_v10 = vadd.f32 %v10294_v27, %v9912_v7  ;;  %v10429_v2 = vmul.f32 %v9912_v7, %v9912_v7 }
 0x938   : > { %v7563_v23 = vpop.f32.mrf.mxu2 }
 0x939   : > { %15351 = vst [vmem:[%s16860_s19 + $0x1c8] sm:$0xff] %v15263_v40   ;;  %v10556_v32 = vadd.f32 %v10555_v53, %v10429_v2  ;;  %v7709_v30 = vadd.f32 %v7563_v23, %v6607_v8  ;;  %v8665_v50 = vpop.f32.mrf.mxu3  ;;  %v6463_v20 = vpop.f32.mrf.mxu1 }
 0x93a   : > { %v6608_v51 = vadd.f32 %v6463_v20, %v17828_v11 }
 0x93b   : > { %v8811_v29 = vadd.f32 %v8665_v50, %v7709_v30 }
 0x93c   : > { %v9769_v24 = vpop.f32.mrf.mxu0 }
 0x93d   : > { %v9913_v36 = vadd.f32 %v9767_v48, %v8811_v29 }
 0x93f   : > { %v10296_v37 = vadd.f32 %v10295_v10, %v9913_v36  ;;  %v10430_v28 = vmul.f32 %v9913_v36, %v9913_v36  ;;  %v17832_v10 = vld [vmem:[#allocation66_spill] sm:$0xff] }
 0x940   : > { %v7565_v63 = vpop.f32.mrf.mxu2 }
 0x941   : > { %v10557_v41 = vadd.f32 %v10556_v32, %v10430_v28  ;;  %v7710_v44 = vadd.f32 %v7565_v63, %v6608_v51  ;;  %v8667_v56 = vpop.f32.mrf.mxu3  ;;  %v6466_v14 = vpop.f32.mrf.mxu1  ;;  %v17833_v28 = vld [vmem:[#allocation69_spill] sm:$0xff] }
 0x942   : > { %v6609_v9 = vadd.f32 %v6466_v14, %v17829_v22 }
 0x943   : > { %v8812_v1 = vadd.f32 %v8667_v56, %v7710_v44 }
 0x944   : > { %v9772_v57 = vpop.f32.mrf.mxu0 }
 0x945   : > { %v9914_v25 = vadd.f32 %v9769_v24, %v8812_v1 }
 0x947   : > { %v15268_v49 = vpack.c.bf16 %v9914_v25, %v9913_v36  ;;  %v10297_v43 = vadd.f32 %v10296_v37, %v9914_v25  ;;  %v10431_v42 = vmul.f32 %v9914_v25, %v9914_v25 }
 0x948   : > { %v7568_v59 = vpop.f32.mrf.mxu2 }
 0x949   : > { %15352 = vst [vmem:[%s16860_s19 + $0x1d0] sm:$0xff] %v15268_v49   ;;  %v10558_v19 = vadd.f32 %v10557_v41, %v10431_v42  ;;  %v7711_v54 = vadd.f32 %v7568_v59, %v6609_v9  ;;  %v8670_v46 = vpop.f32.mrf.mxu3  ;;  %v6468_v61 = vpop.f32.mrf.mxu1 }
 0x94a   : > { %v6610_v34 = vadd.f32 %v6468_v61, %v17830_v6 }
 0x94b   : > { %v8813_v13 = vadd.f32 %v8670_v46, %v7711_v54 }
 0x94c   : > { %v9774_v5 = vpop.f32.mrf.mxu0 }
 0x94d   : > { %v9915_v62 = vadd.f32 %v9772_v57, %v8813_v13 }
 0x94f   : > { %v10298_v45 = vadd.f32 %v10297_v43, %v9915_v62  ;;  %v10432_v38 = vmul.f32 %v9915_v62, %v9915_v62  ;;  %v17834_v43 = vld [vmem:[#allocation72_spill] sm:$0xff] }
 0x950   : > { %v7570_v0 = vpop.f32.mrf.mxu2 }
 0x951   : > { %v10559_v60 = vadd.f32 %v10558_v19, %v10432_v38  ;;  %v7712_v17 = vadd.f32 %v7570_v0, %v6610_v34  ;;  %v8672_v55 = vpop.f32.mrf.mxu3  ;;  %v6471_v33 = vpop.f32.mrf.mxu1  ;;  %v17835_v38 = vld [vmem:[#allocation75_spill] sm:$0xff] }
 0x952   : > { %v6611_v4 = vadd.f32 %v6471_v33, %v17831_v18 }
 0x953   : > { %v8814_v58 = vadd.f32 %v8672_v55, %v7712_v17 }
 0x954   : > { %v9777_v26 = vpop.f32.mrf.mxu0 }
 0x955   : > { %v9916_v3 = vadd.f32 %v9774_v5, %v8814_v58 }
 0x957   : > { %v15273_v21 = vpack.c.bf16 %v9916_v3, %v9915_v62  ;;  %v10299_v39 = vadd.f32 %v10298_v45, %v9916_v3  ;;  %v10433_v27 = vmul.f32 %v9916_v3, %v9916_v3 }
 0x958   : > { %v7573_v15 = vpop.f32.mrf.mxu2 }
 0x959   : > { %15353 = vst [vmem:[%s16860_s19 + $0x1d8] sm:$0xff] %v15273_v21   ;;  %v10560_v12 = vadd.f32 %v10559_v60, %v10433_v27  ;;  %v7713_v53 = vadd.f32 %v7573_v15, %v6611_v4  ;;  %v8675_v35 = vpop.f32.mrf.mxu3  ;;  %v6473_v47 = vpop.f32.mrf.mxu1  ;;  %v17836_v21 = vld [vmem:[#allocation78_spill] sm:$0xff] }
 0x95a   : > { %v6612_v2 = vadd.f32 %v6473_v47, %v17832_v10 }
 0x95b   : > { %v8815_v52 = vadd.f32 %v8675_v35, %v7713_v53 }
 0x95c   : > { %v9779_v31 = vpop.f32.mrf.mxu0 }
 0x95d   : > { %v9917_v48 = vadd.f32 %v9777_v26, %v8815_v52 }
 0x95f   : > { %v10300_v7 = vadd.f32 %v10299_v39, %v9917_v48  ;;  %v10434_v40 = vmul.f32 %v9917_v48, %v9917_v48 }
 0x960   : > { %v7575_v16 = vpop.f32.mrf.mxu2 }
 0x961   : > { %v10561_v8 = vadd.f32 %v10560_v12, %v10434_v40  ;;  %v7714_v23 = vadd.f32 %v7575_v16, %v6612_v2  ;;  %v8677_v32 = vpop.f32.mrf.mxu3  ;;  %v6476_v30 = vpop.f32.mrf.mxu1 }
 0x962   : > { %v6613_v11 = vadd.f32 %v6476_v30, %v17833_v28 }
 0x963   : > { %v8816_v50 = vadd.f32 %v8677_v32, %v7714_v23 }
 0x964   : > { %v9782_v20 = vpop.f32.mrf.mxu0 }
 0x965   : > { %v9918_v29 = vadd.f32 %v9779_v31, %v8816_v50 }
 0x967   : > { %v15278_v24 = vpack.c.bf16 %v9918_v29, %v9917_v48  ;;  %v10301_v36 = vadd.f32 %v10300_v7, %v9918_v29  ;;  %v10435_v37 = vmul.f32 %v9918_v29, %v9918_v29  ;;  %v17837_v7 = vld [vmem:[#allocation81_spill] sm:$0xff] }
 0x968   : > { %v7578_v51 = vpop.f32.mrf.mxu2 }
 0x969   : > { %15354 = vst [vmem:[%s16860_s19 + $0x1e0] sm:$0xff] %v15278_v24   ;;  %v10562_v63 = vadd.f32 %v10561_v8, %v10435_v37  ;;  %v7715_v41 = vadd.f32 %v7578_v51, %v6613_v11  ;;  %v8680_v44 = vpop.f32.mrf.mxu3  ;;  %v6478_v56 = vpop.f32.mrf.mxu1  ;;  %v17838_v24 = vld [vmem:[#allocation84_spill] sm:$0xff] }
 0x96a   : > { %v6614_v42 = vadd.f32 %v6478_v56, %v17834_v43 }
 0x96b   : > { %v8817_v14 = vadd.f32 %v8680_v44, %v7715_v41 }
 0x96c   : > { %v9784_v1 = vpop.f32.mrf.mxu0 }
 0x96d   : > { %v9919_v57 = vadd.f32 %v9782_v20, %v8817_v14 }
 0x96f   : > { %v10302_v25 = vadd.f32 %v10301_v36, %v9919_v57  ;;  %v10436_v49 = vmul.f32 %v9919_v57, %v9919_v57 }
 0x970   : > { %v7580_v22 = vpop.f32.mrf.mxu2 }
 0x971   : > { %v10563_v9 = vadd.f32 %v10562_v63, %v10436_v49  ;;  %v7716_v59 = vadd.f32 %v7580_v22, %v6614_v42  ;;  %v8682_v19 = vpop.f32.mrf.mxu3  ;;  %v6481_v54 = vpop.f32.mrf.mxu1  ;;  %v10575_v42 = vlaneseq }
 0x972   : > { %v6615_v6 = vadd.f32 %v6481_v54, %v17835_v38 }
 0x973   : > { %v8818_v46 = vadd.f32 %v8682_v19, %v7716_v59  ;;  %v10576_v54 = vshrl.u32 %v10575_v42, 7 }
 0x974   : > { %v9787_v13 = vpop.f32.mrf.mxu0 }
 0x975   : > { %v9920_v61 = vadd.f32 %v9784_v1, %v8818_v46  ;;  %vm10578_vm2 = vcmp.eq.s32.totalorder %v10576_v54, 1  ;;  %vm10577_vm3 = vcmp.eq.s32.totalorder %v10576_v54, 0 }
 0x977   : > { %v15283_v5 = vpack.c.bf16 %v9920_v61, %v9919_v57  ;;  %v10303_v62 = vadd.f32 %v10302_v25, %v9920_v61  ;;  %v10437_v45 = vmul.f32 %v9920_v61, %v9920_v61 }
 0x978   : > { %v7583_v34 = vpop.f32.mrf.mxu2 }
 0x979   : > { %15355 = vst [vmem:[%s16860_s19 + $0x1e8] sm:$0xff] %v15283_v5   ;;  %v10564_v0 = vadd.f32 %v10563_v9, %v10437_v45  ;;  %v7717_v60 = vadd.f32 %v7583_v34, %v6615_v6  ;;  %v8685_v17 = vpop.f32.mrf.mxu3  ;;  %v6483_v55 = vpop.f32.mrf.mxu1 }
 0x97a   : > { %v6616_v39 = vadd.f32 %v6483_v55, %v17836_v21 }
 0x97b   : > { %v8819_v33 = vadd.f32 %v8685_v17, %v7717_v60 }
 0x97c   : > { %v9789_v27 = vpop.f32.mrf.mxu0 }
 0x97d   : > { %v9921_v58 = vadd.f32 %v9787_v13, %v8819_v33 }
 0x97f   : > { %v10304_v26 = vadd.f32 %v10303_v62, %v9921_v58  ;;  %v10438_v3 = vmul.f32 %v9921_v58, %v9921_v58 }
 0x980   : > { %v7585_v18 = vpop.f32.mrf.mxu2 }
 0x981   : > { %v10565_v4 = vadd.f32 %v10564_v0, %v10438_v3  ;;  %v7718_v15 = vadd.f32 %v7585_v18, %v6616_v39  ;;  %v8687_v12 = vpop.f32.mrf.mxu3  ;;  %v6486_v53 = vpop.f32.mrf.mxu1 }
 0x982   : > { %v6617_v40 = vadd.f32 %v6486_v53, %v17837_v7 }
 0x983   : > { %v8820_v35 = vadd.f32 %v8687_v12, %v7718_v15 }
 0x984   : > { %v9792_v23 = vpop.f32.mrf.mxu0 }
 0x985   : > { %v9922_v47 = vadd.f32 %v9789_v27, %v8820_v35 }
 0x987   : > { %v15288_v52 = vpack.c.bf16 %v9922_v47, %v9921_v58  ;;  %v10305_v31 = vadd.f32 %v10304_v26, %v9922_v47  ;;  %v10439_v48 = vmul.f32 %v9922_v47, %v9922_v47 }
 0x988   : > { %v7588_v10 = vpop.f32.mrf.mxu2 }
 0x989   : > { %15356 = vst [vmem:[%s16860_s19 + $0x1f0] sm:$0xff] %v15288_v52   ;;  %v10566_v2 = vadd.f32 %v10565_v4, %v10439_v48  ;;  %v7719_v16 = vadd.f32 %v7588_v10, %v6617_v40  ;;  %v8690_v8 = vpop.f32.mrf.mxu3  ;;  %v6488_v30 = vpop.f32.mrf.mxu1 }
 0x98a   : > { %v6618_v36 = vadd.f32 %v6488_v30, %v17838_v24 }
 0x98b   : > { %v8821_v32 = vadd.f32 %v8690_v8, %v7719_v16 }
 0x98c   : > { %v9794_v41 = vpop.f32.mrf.mxu0 }
 0x98d   : > { %v9923_v50 = vadd.f32 %v9792_v23, %v8821_v32 }
 0x98f   : > { %v10306_v20 = vadd.f32 %v10305_v31, %v9923_v50  ;;  %v10440_v29 = vmul.f32 %v9923_v50, %v9923_v50 }
 0x990   : > { %v7590_v37 = vpop.f32.mrf.mxu2 }
 0x991   : > { %v10567_v28 = vadd.f32 %v10566_v2, %v10440_v29  ;;  %v7720_v11 = vadd.f32 %v7590_v37, %v6618_v36  ;;  %v8692_v51 = vpop.f32.mrf.mxu3 }
 0x993   : > { %v8822_v63 = vadd.f32 %v8692_v51, %v7720_v11 }
 0x995   : > { %v9924_v44 = vadd.f32 %v9794_v41, %v8822_v63 }
 0x997   : > { %v15293_v56 = vpack.c.bf16 %v9924_v44, %v9923_v50  ;;  %v10307_v14 = vadd.f32 %v10306_v20, %v9924_v44  ;;  %v10441_v1 = vmul.f32 %v9924_v44, %v9924_v44 }
 0x999   : > { %15357 = vst [vmem:[%s16860_s19 + $0x1f8] sm:$0xff] %v15293_v56   ;;  %v10308_v57 = vrot.slane %v10307_v14, 4  ;;  %v10568_v25 = vadd.f32 %v10567_v28, %v10441_v1 }
 0x99b   : > { %v10309_v49 = vadd.f32 %v10308_v57, %v10307_v14  ;;  %v10569_v43 = vrot.slane %v10568_v25, 4 }
 0x99d   : > { %v10310_v22 = vrot.slane %v10309_v49, 2  ;;  %v10570_v9 = vadd.f32 %v10569_v43, %v10568_v25 }
 0x99f   : > { %v10311_v59 = vadd.f32 %v10310_v22, %v10309_v49  ;;  %v10571_v19 = vrot.slane %v10570_v9, 2 }
 0x9a1   : > { %v10572_v46 = vadd.f32 %v10571_v19, %v10570_v9  ;;  %v10312_v61 = vrot.slane %v10311_v59, 1 }
 0x9a3   : > { %v10573_v13 = vrot.slane %v10572_v46, 1  ;;  %v10313_v62 = vadd.f32 %v10312_v61, %v10311_v59 }
 0x9a5   : > { %v10574_v5 = vadd.f32 %v10573_v13, %v10572_v46 }
 0x9a7   : > { %v10579_v45 = vsel %vm10578_vm2, %v10574_v5, 0.0 }
 0x9a8   : > { %v10580_v38 = vsel %vm10577_vm3, %v10313_v62, %v10579_v45 }
 0x9a9   : > { %10581 = vst [vmem:[%s257_s24] sm:$0xff] %v10580_v38 }
 0x9aa PF: > { %s14_s14 = sadd.s32 1, %s15408_s14   ;;  %s17839_s12 = smov %s15404_s13 }
 0x9ab   : > { %p11_p6 = scmp.ge.s32.totalorder %s14_s14, 4   ;;  %s17840_s13 = smov %s17842_s15 }
 0x9ad   :  { %13 = sbr.rel (!%p11_p6) target bundleno = 2 (0x2), region = 83 }

</bundles_post_ra>
